<compile_context>
chip_gen: v5e
topology: v5e:2x2
jax: 0.10.0
libtpu: 0.0.40
codegen_flags: <defaults>
</compile_context>

<pallas_src>
import jax
import jax.numpy as jnp
from jax.experimental import pallas as pl
from jax.experimental.pallas import tpu as pltpu


# ----------------------------- Pallas kernel --------------------------------
def nlu_classify_kernel(tok_ref,                         # (T*B, 1) int32, time-major
                        p0_ref,                          # (VOCAB, 4Hp)  emb@wih0 + b0
                        whh0_ref,                        # (Hp, 4Hp)     gates [i|f|o|g]
                        wih1_ref, whh1_ref, b1_ref,      # (Hp,4Hp), (Hp,4Hp), (1,4Hp)
                        fcw_ref, fcb_ref,                # (Hp, C), (1, C)
                        h00_ref, c00_ref,                # (B, Hp) layer-0 init (padded)
                        h10_ref, c10_ref,                # (B, Hp) layer-1 init (padded)
                        out_ref,                         # (B, C) softmax probs
                        x0_ref):                         # scratch (T*B, 4Hp)
    TB = tok_ref.shape[0]
    VOCAB = p0_ref.shape[0]
    Hp = whh0_ref.shape[0]
    B = h00_ref.shape[0]
    T = TB // B
    f32 = jnp.float32

    # Fused embedding lookup + layer-0 input projection + bias, as a single
    # one-hot matmul against the prepared table P0[v] = emb[v] @ wih0 + b0.
    onehot = (tok_ref[...] ==
              jax.lax.broadcasted_iota(jnp.int32, (TB, VOCAB), 1)).astype(f32)
    x0_ref[...] = jnp.dot(onehot, p0_ref[...], preferred_element_type=f32)   # (TB, 4Hp)

    # Hoist the layer-1 bias broadcast out of the loop (JAX does not CSE it).
    b1 = jnp.broadcast_to(b1_ref[...], (B, 4 * Hp))

    def gates_to_hc(gates, c):
        # gate order (i, f, o, g); Hp == 128, so every slice is vreg-aligned
        # and the cell math needs no XLU lane shuffles.
        sig = jax.nn.sigmoid(gates[:, :3 * Hp])
        g_g = jnp.tanh(gates[:, 3 * Hp:])
        i_g = sig[:, :Hp]
        f_g = sig[:, Hp:2 * Hp]
        o_g = sig[:, 2 * Hp:3 * Hp]
        c_new = f_g * c + i_g * g_g
        h_new = o_g * jnp.tanh(c_new)
        return h_new, c_new

    h0 = h00_ref[...]
    c0 = c00_ref[...]
    h1 = h10_ref[...]
    c1 = c10_ref[...]

    # Fully unrolled time loop (T is static and small); weight refs are read
    # at point of use so no large weight live ranges span the loop.
    for t in range(T):
        # layer-1 recurrent half only depends on h1_{t-1}: overlaps with layer 0.
        rec1 = jnp.dot(h1, whh1_ref[...], preferred_element_type=f32) + b1

        # layer 0: only the recurrent matmul remains on the serial chain.
        gates0 = (x0_ref[pl.ds(t * B, B), :]
                  + jnp.dot(h0, whh0_ref[...], preferred_element_type=f32))
        h0, c0 = gates_to_hc(gates0, c0)

        # layer 1: only the h0_t-dependent half is on the critical path.
        gates1 = jnp.dot(h0, wih1_ref[...], preferred_element_type=f32) + rec1
        h1, c1 = gates_to_hc(gates1, c1)

    # fc on the last time step only (== fc over all steps then x[:, -1, :]).
    logits = (jnp.dot(h1, fcw_ref[...], preferred_element_type=f32)
              + fcb_ref[...])                                                 # (B, C)

    # softmax(dim=1).  Exact divide kept (epilogue is off the critical path;
    # approx reciprocal would only perturb the last f32 bits for no latency win).
    m = jnp.max(logits, axis=1, keepdims=True)
    e = jnp.exp(logits - m)
    out_ref[...] = e / jnp.sum(e, axis=1, keepdims=True)
    # NOTE: C=8 -> single masked vst; pad the output last dim to 128 only if
    # class_num grows (not on the critical path at this size).


# --------------------------- parameter preparation ---------------------------
def prepare_params(params, hp=128):
    """One-time kernel-side layout: gate permutation (i,f,g,o)->(i,f,o,g),
    zero-padding of the hidden dim H -> hp, and fusion of the embedding with
    the layer-0 input projection + bias into a single table P0."""
    H = params["whh0"].shape[0]
    pad_h = hp - H
    assert pad_h >= 0

    def permute(w):  # PyTorch gate order (i,f,g,o) -> (i,f,o,g)
        i, f, g, o = jnp.split(w, 4, axis=-1)
        return jnp.concatenate([i, f, o, g], axis=-1)

    def pad_gate_cols(w):  # (..., 4H) -> (..., 4*hp), zero pad inside each gate block
        parts = jnp.split(w, 4, axis=-1)
        cfg = [(0, 0)] * (w.ndim - 1) + [(0, pad_h)]
        return jnp.concatenate([jnp.pad(p, cfg) for p in parts], axis=-1)

    def pad_rows(w):  # (H, ...) -> (hp, ...), zero rows
        return jnp.pad(w, [(0, pad_h)] + [(0, 0)] * (w.ndim - 1))

    wih0 = pad_gate_cols(permute(params["wih0"]))               # (E, 4hp)
    b0 = pad_gate_cols(permute(params["b0"]))                   # (1, 4hp)
    whh0 = pad_rows(pad_gate_cols(permute(params["whh0"])))     # (hp, 4hp)
    wih1 = pad_rows(pad_gate_cols(permute(params["wih1"])))     # (hp, 4hp)
    whh1 = pad_rows(pad_gate_cols(permute(params["whh1"])))     # (hp, 4hp)
    b1 = pad_gate_cols(permute(params["b1"]))                   # (1, 4hp)
    fc_w = pad_rows(params["fc_w"])                             # (hp, C)

    # Fused lookup table: P0[v] = emb[v] @ wih0 + b0 (exact under one-hot matmul).
    p0 = jnp.dot(params["emb"], wih0,
                 precision=jax.lax.Precision.HIGHEST) + b0      # (VOCAB, 4hp)

    return {"p0": p0, "whh0": whh0, "wih1": wih1, "whh1": whh1,
            "b1": b1, "fc_w": fc_w, "fc_b": params["fc_b"]}


# ------------------------------ wrapper --------------------------------------
def nlu_classify_forward(tokens, kparams, h0, c0):
    """tokens: (B, T) int32.  kparams from prepare_params().  h0/c0: (2, B, H).
    Returns (B, class_num) softmax probabilities."""
    B, T = tokens.shape
    Hp = kparams["whh0"].shape[0]
    H = h0.shape[2]
    C = kparams["fc_w"].shape[1]
    pad_h = Hp - H

    # time-major flattened tokens: row t*B + b <-> token (t, b)
    tok_tm = jnp.transpose(tokens, (1, 0)).reshape(T * B, 1).astype(jnp.int32)

    def pad_state(s):  # (B, H) -> (B, Hp); padded lanes must be exactly zero
        return jnp.pad(s, ((0, 0), (0, pad_h)))

    inputs = (
        tok_tm, kparams["p0"],
        kparams["whh0"],
        kparams["wih1"], kparams["whh1"], kparams["b1"],
        kparams["fc_w"], kparams["fc_b"],
        pad_state(h0[0]), pad_state(c0[0]), pad_state(h0[1]), pad_state(c0[1]),
    )

    vmem = pl.BlockSpec(memory_space=pltpu.MemorySpace.VMEM)
    return pl.pallas_call(
        nlu_classify_kernel,
        out_shape=jax.ShapeDtypeStruct((B, C), jnp.float32),
        in_specs=[vmem] * len(inputs),
        out_specs=vmem,
        scratch_shapes=[pltpu.VMEM((T * B, 4 * Hp), jnp.float32)],
    )(*inputs)


# --------------------------- pure-JAX reference -------------------------------
def nlu_classify_ref(tokens, params, h0, c0):
    H = params["whh0"].shape[0]
    x = params["emb"][tokens]                            # (B, T, E)

    def cell(x_t, h, c, wih, whh, b):
        g = x_t @ wih + h @ whh + b
        i = jax.nn.sigmoid(g[:, :H]); f = jax.nn.sigmoid(g[:, H:2 * H])
        gg = jnp.tanh(g[:, 2 * H:3 * H]); o = jax.nn.sigmoid(g[:, 3 * H:])
        c = f * c + i * gg
        return o * jnp.tanh(c), c

    def scan_step(carry, x_t):
        h0_, c0_, h1_, c1_ = carry
        h0_, c0_ = cell(x_t, h0_, c0_, params["wih0"], params["whh0"], params["b0"])
        h1_, c1_ = cell(h0_, h1_, c1_, params["wih1"], params["whh1"], params["b1"])
        return (h0_, c0_, h1_, c1_), h1_

    carry = (h0[0], c0[0], h0[1], c0[1])
    (_, _, h1, _), _ = jax.lax.scan(scan_step, carry, jnp.transpose(x, (1, 0, 2)))
    logits = h1 @ params["fc_w"] + params["fc_b"]
    return jax.nn.softmax(logits, axis=1)


# ------------------------------- main -----------------------------------------
if __name__ == "__main__":
    # Small shapes consistent with the module:
    #   emb dim E=128, lstm_hid H=64 (fc in-features), num_layers L=2,
    #   batch B=8, seq T=8, vocab=32, class_num=8.
    B, T, E, H, L, C, VOCAB = 8, 8, 128, 64, 2, 8, 32

    key = jax.random.PRNGKey(0)
    ks = jax.random.split(key, 16)
    bound = 1.0 / jnp.sqrt(H)

    def unif(k, shape):
        return jax.random.uniform(k, shape, jnp.float32, -bound, bound)

    params = {
        "emb":  jax.random.normal(ks[0], (VOCAB, E), jnp.float32),
        # layer 0: input E, layer 1: input H.  Stored transposed: (in, 4H).
        "wih0": unif(ks[1], (E, 4 * H)),
        "whh0": unif(ks[2], (H, 4 * H)),
        "b0":   unif(ks[3], (1, 4 * H)) + unif(ks[4], (1, 4 * H)),  # b_ih + b_hh
        "wih1": unif(ks[5], (H, 4 * H)),
        "whh1": unif(ks[6], (H, 4 * H)),
        "b1":   unif(ks[7], (1, 4 * H)) + unif(ks[8], (1, 4 * H)),
        "fc_w": unif(ks[9], (H, C)),
        "fc_b": unif(ks[10], (1, C)),
    }

    # forward() draws random (h0, c0) each call -> deterministic normal here.
    h0 = jax.random.normal(ks[11], (L, B, H), jnp.float32)
    c0 = jax.random.normal(ks[12], (L, B, H), jnp.float32)

    tokens = jax.random.randint(ks[13], (B, T), 0, VOCAB, dtype=jnp.int32)

    kparams = prepare_params(params)          # one-time kernel-side layout
    out = nlu_classify_forward(tokens, kparams, h0, c0)
    out = jax.block_until_ready(out)

    ref = nlu_classify_ref(tokens, params, h0, c0)
    assert out.shape == (B, C)
    assert jnp.allclose(jnp.sum(out, axis=1), 1.0, atol=1e-5)
    assert jnp.allclose(out, ref, atol=1e-5, rtol=1e-5)

    print("KERNEL_OK")
</pallas_src>

<mosaic_0001>
module attributes {stable_mosaic.version = 11 : i64} {
  func.func @nlu_classify_kernel(%arg0: memref<64x1xi32, #tpu.memory_space<vmem>>, %arg1: memref<32x512xf32, #tpu.memory_space<vmem>>, %arg2: memref<128x512xf32, #tpu.memory_space<vmem>>, %arg3: memref<128x512xf32, #tpu.memory_space<vmem>>, %arg4: memref<128x512xf32, #tpu.memory_space<vmem>>, %arg5: memref<1x512xf32, #tpu.memory_space<vmem>>, %arg6: memref<128x8xf32, #tpu.memory_space<vmem>>, %arg7: memref<1x8xf32, #tpu.memory_space<vmem>>, %arg8: memref<8x128xf32, #tpu.memory_space<vmem>>, %arg9: memref<8x128xf32, #tpu.memory_space<vmem>>, %arg10: memref<8x128xf32, #tpu.memory_space<vmem>>, %arg11: memref<8x128xf32, #tpu.memory_space<vmem>>, %arg12: memref<8x8xf32, #tpu.memory_space<vmem>>, %arg13: memref<64x512xf32, #tpu.memory_space<vmem>>) attributes {dimension_semantics = [], scalar_prefetch = 0 : i64, scratch_operands = 1 : i64, tpu.core_type = #tpu.core_type<tc>} {
    %c0 = arith.constant 0 : index
    %c0_0 = arith.constant 0 : index
    %0 = vector.load %arg0[%c0, %c0_0] : memref<64x1xi32, #tpu.memory_space<vmem>>, vector<64x1xi32>
    %1 = tpu.iota {dimensions = array<i32: 1>} : vector<64x32xi32>
    %2 = vector.broadcast %0 : vector<64x1xi32> to vector<64x32xi32>
    %3 = arith.cmpi eq, %2, %1 : vector<64x32xi32>
    %4 = arith.extui %3 : vector<64x32xi1> to vector<64x32xi32>
    %5 = arith.sitofp %4 : vector<64x32xi32> to vector<64x32xf32>
    %c0_1 = arith.constant 0 : index
    %c0_2 = arith.constant 0 : index
    %6 = vector.load %arg1[%c0_1, %c0_2] : memref<32x512xf32, #tpu.memory_space<vmem>>, vector<32x512xf32>
    %cst = arith.constant dense<0.000000e+00> : vector<64x512xf32>
    %7 = tpu.matmul %5, %6, %cst {dimension_numbers = #tpu.dot_dimension_numbers<[1], [0], [0], [1], [0, 0, 1, 1], [], []>} : vector<64x32xf32>, vector<32x512xf32>, vector<64x512xf32> -> vector<64x512xf32>
    %c0_3 = arith.constant 0 : index
    %c0_4 = arith.constant 0 : index
    %8 = vector.load %arg13[%c0_3, %c0_4] : memref<64x512xf32, #tpu.memory_space<vmem>>, vector<64x512xf32>
    tpu.vector_store %arg13[%c0_3, %c0_4], %7 {strides = array<i32>} : memref<64x512xf32, #tpu.memory_space<vmem>>, vector<64x512xf32>,
    %c0_5 = arith.constant 0 : index
    %c0_6 = arith.constant 0 : index
    %9 = vector.load %arg5[%c0_5, %c0_6] : memref<1x512xf32, #tpu.memory_space<vmem>>, vector<1x512xf32>
    %10 = vector.shape_cast %9 : vector<1x512xf32> to vector<1x512xf32>
    %11 = vector.broadcast %10 : vector<1x512xf32> to vector<8x512xf32>
    %c0_7 = arith.constant 0 : index
    %c0_8 = arith.constant 0 : index
    %12 = vector.load %arg8[%c0_7, %c0_8] : memref<8x128xf32, #tpu.memory_space<vmem>>, vector<8x128xf32>
    %c0_9 = arith.constant 0 : index
    %c0_10 = arith.constant 0 : index
    %13 = vector.load %arg9[%c0_9, %c0_10] : memref<8x128xf32, #tpu.memory_space<vmem>>, vector<8x128xf32>
    %c0_11 = arith.constant 0 : index
    %c0_12 = arith.constant 0 : index
    %14 = vector.load %arg10[%c0_11, %c0_12] : memref<8x128xf32, #tpu.memory_space<vmem>>, vector<8x128xf32>
    %c0_13 = arith.constant 0 : index
    %c0_14 = arith.constant 0 : index
    %15 = vector.load %arg11[%c0_13, %c0_14] : memref<8x128xf32, #tpu.memory_space<vmem>>, vector<8x128xf32>
    %c0_15 = arith.constant 0 : index
    %c0_16 = arith.constant 0 : index
    %16 = vector.load %arg4[%c0_15, %c0_16] : memref<128x512xf32, #tpu.memory_space<vmem>>, vector<128x512xf32>
    %cst_17 = arith.constant dense<0.000000e+00> : vector<8x512xf32>
    %17 = tpu.matmul %14, %16, %cst_17 {dimension_numbers = #tpu.dot_dimension_numbers<[1], [0], [0], [1], [0, 0, 1, 1], [], []>} : vector<8x128xf32>, vector<128x512xf32>, vector<8x512xf32> -> vector<8x512xf32>
    %18 = arith.addf %17, %11 : vector<8x512xf32>
    %c0_18 = arith.constant 0 : index
    %c0_19 = arith.constant 0 : index
    %19 = vector.load %arg13[%c0_18, %c0_19] : memref<64x512xf32, #tpu.memory_space<vmem>>, vector<8x512xf32>
    %c0_20 = arith.constant 0 : index
    %c0_21 = arith.constant 0 : index
    %20 = vector.load %arg2[%c0_20, %c0_21] : memref<128x512xf32, #tpu.memory_space<vmem>>, vector<128x512xf32>
    %cst_22 = arith.constant dense<0.000000e+00> : vector<8x512xf32>
    %21 = tpu.matmul %12, %20, %cst_22 {dimension_numbers = #tpu.dot_dimension_numbers<[1], [0], [0], [1], [0, 0, 1, 1], [], []>} : vector<8x128xf32>, vector<128x512xf32>, vector<8x512xf32> -> vector<8x512xf32>
    %22 = arith.addf %19, %21 : vector<8x512xf32>
    %23 = vector.extract_strided_slice %22 {offsets = [0, 0], sizes = [8, 384], strides = [1, 1]} : vector<8x512xf32> to vector<8x384xf32>
    %24 = arith.negf %23 : vector<8x384xf32>
    %25 = math.exp %24 : vector<8x384xf32>
    %cst_23 = arith.constant 1.000000e+00 : f32
    %26 = vector.broadcast %cst_23 : f32 to vector<8x384xf32>
    %27 = arith.addf %26, %25 : vector<8x384xf32>
    %28 = arith.divf %26, %27 : vector<8x384xf32>
    %29 = vector.extract_strided_slice %22 {offsets = [0, 384], sizes = [8, 128], strides = [1, 1]} : vector<8x512xf32> to vector<8x128xf32>
    %30 = math.tanh %29 : vector<8x128xf32>
    %31 = vector.extract_strided_slice %28 {offsets = [0, 0], sizes = [8, 128], strides = [1, 1]} : vector<8x384xf32> to vector<8x128xf32>
    %32 = vector.extract_strided_slice %28 {offsets = [0, 128], sizes = [8, 128], strides = [1, 1]} : vector<8x384xf32> to vector<8x128xf32>
    %33 = vector.extract_strided_slice %28 {offsets = [0, 256], sizes = [8, 128], strides = [1, 1]} : vector<8x384xf32> to vector<8x128xf32>
    %34 = arith.mulf %32, %13 : vector<8x128xf32>
    %35 = arith.mulf %31, %30 : vector<8x128xf32>
    %36 = arith.addf %34, %35 : vector<8x128xf32>
    %37 = math.tanh %36 : vector<8x128xf32>
    %38 = arith.mulf %33, %37 : vector<8x128xf32>
    %c0_24 = arith.constant 0 : index
    %c0_25 = arith.constant 0 : index
    %39 = vector.load %arg3[%c0_24, %c0_25] : memref<128x512xf32, #tpu.memory_space<vmem>>, vector<128x512xf32>
    %cst_26 = arith.constant dense<0.000000e+00> : vector<8x512xf32>
    %40 = tpu.matmul %38, %39, %cst_26 {dimension_numbers = #tpu.dot_dimension_numbers<[1], [0], [0], [1], [0, 0, 1, 1], [], []>} : vector<8x128xf32>, vector<128x512xf32>, vector<8x512xf32> -> vector<8x512xf32>
    %41 = arith.addf %40, %18 : vector<8x512xf32>
    %42 = vector.extract_strided_slice %41 {offsets = [0, 0], sizes = [8, 384], strides = [1, 1]} : vector<8x512xf32> to vector<8x384xf32>
    %43 = arith.negf %42 : vector<8x384xf32>
    %44 = math.exp %43 : vector<8x384xf32>
    %cst_27 = arith.constant 1.000000e+00 : f32
    %45 = vector.broadcast %cst_27 : f32 to vector<8x384xf32>
    %46 = arith.addf %45, %44 : vector<8x384xf32>
    %47 = arith.divf %45, %46 : vector<8x384xf32>
    %48 = vector.extract_strided_slice %41 {offsets = [0, 384], sizes = [8, 128], strides = [1, 1]} : vector<8x512xf32> to vector<8x128xf32>
    %49 = math.tanh %48 : vector<8x128xf32>
    %50 = vector.extract_strided_slice %47 {offsets = [0, 0], sizes = [8, 128], strides = [1, 1]} : vector<8x384xf32> to vector<8x128xf32>
    %51 = vector.extract_strided_slice %47 {offsets = [0, 128], sizes = [8, 128], strides = [1, 1]} : vector<8x384xf32> to vector<8x128xf32>
    %52 = vector.extract_strided_slice %47 {offsets = [0, 256], sizes = [8, 128], strides = [1, 1]} : vector<8x384xf32> to vector<8x128xf32>
    %53 = arith.mulf %51, %15 : vector<8x128xf32>
    %54 = arith.mulf %50, %49 : vector<8x128xf32>
    %55 = arith.addf %53, %54 : vector<8x128xf32>
    %56 = math.tanh %55 : vector<8x128xf32>
    %57 = arith.mulf %52, %56 : vector<8x128xf32>
    %c0_28 = arith.constant 0 : index
    %c0_29 = arith.constant 0 : index
    %58 = vector.load %arg4[%c0_28, %c0_29] : memref<128x512xf32, #tpu.memory_space<vmem>>, vector<128x512xf32>
    %cst_30 = arith.constant dense<0.000000e+00> : vector<8x512xf32>
    %59 = tpu.matmul %57, %58, %cst_30 {dimension_numbers = #tpu.dot_dimension_numbers<[1], [0], [0], [1], [0, 0, 1, 1], [], []>} : vector<8x128xf32>, vector<128x512xf32>, vector<8x512xf32> -> vector<8x512xf32>
    %60 = arith.addf %59, %11 : vector<8x512xf32>
    %c8 = arith.constant 8 : index
    %c0_31 = arith.constant 0 : index
    %61 = vector.load %arg13[%c8, %c0_31] : memref<64x512xf32, #tpu.memory_space<vmem>>, vector<8x512xf32>
    %c0_32 = arith.constant 0 : index
    %c0_33 = arith.constant 0 : index
    %62 = vector.load %arg2[%c0_32, %c0_33] : memref<128x512xf32, #tpu.memory_space<vmem>>, vector<128x512xf32>
    %cst_34 = arith.constant dense<0.000000e+00> : vector<8x512xf32>
    %63 = tpu.matmul %38, %62, %cst_34 {dimension_numbers = #tpu.dot_dimension_numbers<[1], [0], [0], [1], [0, 0, 1, 1], [], []>} : vector<8x128xf32>, vector<128x512xf32>, vector<8x512xf32> -> vector<8x512xf32>
    %64 = arith.addf %61, %63 : vector<8x512xf32>
    %65 = vector.extract_strided_slice %64 {offsets = [0, 0], sizes = [8, 384], strides = [1, 1]} : vector<8x512xf32> to vector<8x384xf32>
    %66 = arith.negf %65 : vector<8x384xf32>
    %67 = math.exp %66 : vector<8x384xf32>
    %cst_35 = arith.constant 1.000000e+00 : f32
    %68 = vector.broadcast %cst_35 : f32 to vector<8x384xf32>
    %69 = arith.addf %68, %67 : vector<8x384xf32>
    %70 = arith.divf %68, %69 : vector<8x384xf32>
    %71 = vector.extract_strided_slice %64 {offsets = [0, 384], sizes = [8, 128], strides = [1, 1]} : vector<8x512xf32> to vector<8x128xf32>
    %72 = math.tanh %71 : vector<8x128xf32>
    %73 = vector.extract_strided_slice %70 {offsets = [0, 0], sizes = [8, 128], strides = [1, 1]} : vector<8x384xf32> to vector<8x128xf32>
    %74 = vector.extract_strided_slice %70 {offsets = [0, 128], sizes = [8, 128], strides = [1, 1]} : vector<8x384xf32> to vector<8x128xf32>
    %75 = vector.extract_strided_slice %70 {offsets = [0, 256], sizes = [8, 128], strides = [1, 1]} : vector<8x384xf32> to vector<8x128xf32>
    %76 = arith.mulf %74, %36 : vector<8x128xf32>
    %77 = arith.mulf %73, %72 : vector<8x128xf32>
    %78 = arith.addf %76, %77 : vector<8x128xf32>
    %79 = math.tanh %78 : vector<8x128xf32>
    %80 = arith.mulf %75, %79 : vector<8x128xf32>
    %c0_36 = arith.constant 0 : index
    %c0_37 = arith.constant 0 : index
    %81 = vector.load %arg3[%c0_36, %c0_37] : memref<128x512xf32, #tpu.memory_space<vmem>>, vector<128x512xf32>
    %cst_38 = arith.constant dense<0.000000e+00> : vector<8x512xf32>
    %82 = tpu.matmul %80, %81, %cst_38 {dimension_numbers = #tpu.dot_dimension_numbers<[1], [0], [0], [1], [0, 0, 1, 1], [], []>} : vector<8x128xf32>, vector<128x512xf32>, vector<8x512xf32> -> vector<8x512xf32>
    %83 = arith.addf %82, %60 : vector<8x512xf32>
    %84 = vector.extract_strided_slice %83 {offsets = [0, 0], sizes = [8, 384], strides = [1, 1]} : vector<8x512xf32> to vector<8x384xf32>
    %85 = arith.negf %84 : vector<8x384xf32>
    %86 = math.exp %85 : vector<8x384xf32>
    %cst_39 = arith.constant 1.000000e+00 : f32
    %87 = vector.broadcast %cst_39 : f32 to vector<8x384xf32>
    %88 = arith.addf %87, %86 : vector<8x384xf32>
    %89 = arith.divf %87, %88 : vector<8x384xf32>
    %90 = vector.extract_strided_slice %83 {offsets = [0, 384], sizes = [8, 128], strides = [1, 1]} : vector<8x512xf32> to vector<8x128xf32>
    %91 = math.tanh %90 : vector<8x128xf32>
    %92 = vector.extract_strided_slice %89 {offsets = [0, 0], sizes = [8, 128], strides = [1, 1]} : vector<8x384xf32> to vector<8x128xf32>
    %93 = vector.extract_strided_slice %89 {offsets = [0, 128], sizes = [8, 128], strides = [1, 1]} : vector<8x384xf32> to vector<8x128xf32>
    %94 = vector.extract_strided_slice %89 {offsets = [0, 256], sizes = [8, 128], strides = [1, 1]} : vector<8x384xf32> to vector<8x128xf32>
    %95 = arith.mulf %93, %55 : vector<8x128xf32>
    %96 = arith.mulf %92, %91 : vector<8x128xf32>
    %97 = arith.addf %95, %96 : vector<8x128xf32>
    %98 = math.tanh %97 : vector<8x128xf32>
    %99 = arith.mulf %94, %98 : vector<8x128xf32>
    %c0_40 = arith.constant 0 : index
    %c0_41 = arith.constant 0 : index
    %100 = vector.load %arg4[%c0_40, %c0_41] : memref<128x512xf32, #tpu.memory_space<vmem>>, vector<128x512xf32>
    %cst_42 = arith.constant dense<0.000000e+00> : vector<8x512xf32>
    %101 = tpu.matmul %99, %100, %cst_42 {dimension_numbers = #tpu.dot_dimension_numbers<[1], [0], [0], [1], [0, 0, 1, 1], [], []>} : vector<8x128xf32>, vector<128x512xf32>, vector<8x512xf32> -> vector<8x512xf32>
    %102 = arith.addf %101, %11 : vector<8x512xf32>
    %c16 = arith.constant 16 : index
    %c0_43 = arith.constant 0 : index
    %103 = vector.load %arg13[%c16, %c0_43] : memref<64x512xf32, #tpu.memory_space<vmem>>, vector<8x512xf32>
    %c0_44 = arith.constant 0 : index
    %c0_45 = arith.constant 0 : index
    %104 = vector.load %arg2[%c0_44, %c0_45] : memref<128x512xf32, #tpu.memory_space<vmem>>, vector<128x512xf32>
    %cst_46 = arith.constant dense<0.000000e+00> : vector<8x512xf32>
    %105 = tpu.matmul %80, %104, %cst_46 {dimension_numbers = #tpu.dot_dimension_numbers<[1], [0], [0], [1], [0, 0, 1, 1], [], []>} : vector<8x128xf32>, vector<128x512xf32>, vector<8x512xf32> -> vector<8x512xf32>
    %106 = arith.addf %103, %105 : vector<8x512xf32>
    %107 = vector.extract_strided_slice %106 {offsets = [0, 0], sizes = [8, 384], strides = [1, 1]} : vector<8x512xf32> to vector<8x384xf32>
    %108 = arith.negf %107 : vector<8x384xf32>
    %109 = math.exp %108 : vector<8x384xf32>
    %cst_47 = arith.constant 1.000000e+00 : f32
    %110 = vector.broadcast %cst_47 : f32 to vector<8x384xf32>
    %111 = arith.addf %110, %109 : vector<8x384xf32>
    %112 = arith.divf %110, %111 : vector<8x384xf32>
    %113 = vector.extract_strided_slice %106 {offsets = [0, 384], sizes = [8, 128], strides = [1, 1]} : vector<8x512xf32> to vector<8x128xf32>
    %114 = math.tanh %113 : vector<8x128xf32>
    %115 = vector.extract_strided_slice %112 {offsets = [0, 0], sizes = [8, 128], strides = [1, 1]} : vector<8x384xf32> to vector<8x128xf32>
    %116 = vector.extract_strided_slice %112 {offsets = [0, 128], sizes = [8, 128], strides = [1, 1]} : vector<8x384xf32> to vector<8x128xf32>
    %117 = vector.extract_strided_slice %112 {offsets = [0, 256], sizes = [8, 128], strides = [1, 1]} : vector<8x384xf32> to vector<8x128xf32>
    %118 = arith.mulf %116, %78 : vector<8x128xf32>
    %119 = arith.mulf %115, %114 : vector<8x128xf32>
    %120 = arith.addf %118, %119 : vector<8x128xf32>
    %121 = math.tanh %120 : vector<8x128xf32>
    %122 = arith.mulf %117, %121 : vector<8x128xf32>
    %c0_48 = arith.constant 0 : index
    %c0_49 = arith.constant 0 : index
    %123 = vector.load %arg3[%c0_48, %c0_49] : memref<128x512xf32, #tpu.memory_space<vmem>>, vector<128x512xf32>
    %cst_50 = arith.constant dense<0.000000e+00> : vector<8x512xf32>
    %124 = tpu.matmul %122, %123, %cst_50 {dimension_numbers = #tpu.dot_dimension_numbers<[1], [0], [0], [1], [0, 0, 1, 1], [], []>} : vector<8x128xf32>, vector<128x512xf32>, vector<8x512xf32> -> vector<8x512xf32>
    %125 = arith.addf %124, %102 : vector<8x512xf32>
    %126 = vector.extract_strided_slice %125 {offsets = [0, 0], sizes = [8, 384], strides = [1, 1]} : vector<8x512xf32> to vector<8x384xf32>
    %127 = arith.negf %126 : vector<8x384xf32>
    %128 = math.exp %127 : vector<8x384xf32>
    %cst_51 = arith.constant 1.000000e+00 : f32
    %129 = vector.broadcast %cst_51 : f32 to vector<8x384xf32>
    %130 = arith.addf %129, %128 : vector<8x384xf32>
    %131 = arith.divf %129, %130 : vector<8x384xf32>
    %132 = vector.extract_strided_slice %125 {offsets = [0, 384], sizes = [8, 128], strides = [1, 1]} : vector<8x512xf32> to vector<8x128xf32>
    %133 = math.tanh %132 : vector<8x128xf32>
    %134 = vector.extract_strided_slice %131 {offsets = [0, 0], sizes = [8, 128], strides = [1, 1]} : vector<8x384xf32> to vector<8x128xf32>
    %135 = vector.extract_strided_slice %131 {offsets = [0, 128], sizes = [8, 128], strides = [1, 1]} : vector<8x384xf32> to vector<8x128xf32>
    %136 = vector.extract_strided_slice %131 {offsets = [0, 256], sizes = [8, 128], strides = [1, 1]} : vector<8x384xf32> to vector<8x128xf32>
    %137 = arith.mulf %135, %97 : vector<8x128xf32>
    %138 = arith.mulf %134, %133 : vector<8x128xf32>
    %139 = arith.addf %137, %138 : vector<8x128xf32>
    %140 = math.tanh %139 : vector<8x128xf32>
    %141 = arith.mulf %136, %140 : vector<8x128xf32>
    %c0_52 = arith.constant 0 : index
    %c0_53 = arith.constant 0 : index
    %142 = vector.load %arg4[%c0_52, %c0_53] : memref<128x512xf32, #tpu.memory_space<vmem>>, vector<128x512xf32>
    %cst_54 = arith.constant dense<0.000000e+00> : vector<8x512xf32>
    %143 = tpu.matmul %141, %142, %cst_54 {dimension_numbers = #tpu.dot_dimension_numbers<[1], [0], [0], [1], [0, 0, 1, 1], [], []>} : vector<8x128xf32>, vector<128x512xf32>, vector<8x512xf32> -> vector<8x512xf32>
    %144 = arith.addf %143, %11 : vector<8x512xf32>
    %c24 = arith.constant 24 : index
    %c0_55 = arith.constant 0 : index
    %145 = vector.load %arg13[%c24, %c0_55] : memref<64x512xf32, #tpu.memory_space<vmem>>, vector<8x512xf32>
    %c0_56 = arith.constant 0 : index
    %c0_57 = arith.constant 0 : index
    %146 = vector.load %arg2[%c0_56, %c0_57] : memref<128x512xf32, #tpu.memory_space<vmem>>, vector<128x512xf32>
    %cst_58 = arith.constant dense<0.000000e+00> : vector<8x512xf32>
    %147 = tpu.matmul %122, %146, %cst_58 {dimension_numbers = #tpu.dot_dimension_numbers<[1], [0], [0], [1], [0, 0, 1, 1], [], []>} : vector<8x128xf32>, vector<128x512xf32>, vector<8x512xf32> -> vector<8x512xf32>
    %148 = arith.addf %145, %147 : vector<8x512xf32>
    %149 = vector.extract_strided_slice %148 {offsets = [0, 0], sizes = [8, 384], strides = [1, 1]} : vector<8x512xf32> to vector<8x384xf32>
    %150 = arith.negf %149 : vector<8x384xf32>
    %151 = math.exp %150 : vector<8x384xf32>
    %cst_59 = arith.constant 1.000000e+00 : f32
    %152 = vector.broadcast %cst_59 : f32 to vector<8x384xf32>
    %153 = arith.addf %152, %151 : vector<8x384xf32>
    %154 = arith.divf %152, %153 : vector<8x384xf32>
    %155 = vector.extract_strided_slice %148 {offsets = [0, 384], sizes = [8, 128], strides = [1, 1]} : vector<8x512xf32> to vector<8x128xf32>
    %156 = math.tanh %155 : vector<8x128xf32>
    %157 = vector.extract_strided_slice %154 {offsets = [0, 0], sizes = [8, 128], strides = [1, 1]} : vector<8x384xf32> to vector<8x128xf32>
    %158 = vector.extract_strided_slice %154 {offsets = [0, 128], sizes = [8, 128], strides = [1, 1]} : vector<8x384xf32> to vector<8x128xf32>
    %159 = vector.extract_strided_slice %154 {offsets = [0, 256], sizes = [8, 128], strides = [1, 1]} : vector<8x384xf32> to vector<8x128xf32>
    %160 = arith.mulf %158, %120 : vector<8x128xf32>
    %161 = arith.mulf %157, %156 : vector<8x128xf32>
    %162 = arith.addf %160, %161 : vector<8x128xf32>
    %163 = math.tanh %162 : vector<8x128xf32>
    %164 = arith.mulf %159, %163 : vector<8x128xf32>
    %c0_60 = arith.constant 0 : index
    %c0_61 = arith.constant 0 : index
    %165 = vector.load %arg3[%c0_60, %c0_61] : memref<128x512xf32, #tpu.memory_space<vmem>>, vector<128x512xf32>
    %cst_62 = arith.constant dense<0.000000e+00> : vector<8x512xf32>
    %166 = tpu.matmul %164, %165, %cst_62 {dimension_numbers = #tpu.dot_dimension_numbers<[1], [0], [0], [1], [0, 0, 1, 1], [], []>} : vector<8x128xf32>, vector<128x512xf32>, vector<8x512xf32> -> vector<8x512xf32>
    %167 = arith.addf %166, %144 : vector<8x512xf32>
    %168 = vector.extract_strided_slice %167 {offsets = [0, 0], sizes = [8, 384], strides = [1, 1]} : vector<8x512xf32> to vector<8x384xf32>
    %169 = arith.negf %168 : vector<8x384xf32>
    %170 = math.exp %169 : vector<8x384xf32>
    %cst_63 = arith.constant 1.000000e+00 : f32
    %171 = vector.broadcast %cst_63 : f32 to vector<8x384xf32>
    %172 = arith.addf %171, %170 : vector<8x384xf32>
    %173 = arith.divf %171, %172 : vector<8x384xf32>
    %174 = vector.extract_strided_slice %167 {offsets = [0, 384], sizes = [8, 128], strides = [1, 1]} : vector<8x512xf32> to vector<8x128xf32>
    %175 = math.tanh %174 : vector<8x128xf32>
    %176 = vector.extract_strided_slice %173 {offsets = [0, 0], sizes = [8, 128], strides = [1, 1]} : vector<8x384xf32> to vector<8x128xf32>
    %177 = vector.extract_strided_slice %173 {offsets = [0, 128], sizes = [8, 128], strides = [1, 1]} : vector<8x384xf32> to vector<8x128xf32>
    %178 = vector.extract_strided_slice %173 {offsets = [0, 256], sizes = [8, 128], strides = [1, 1]} : vector<8x384xf32> to vector<8x128xf32>
    %179 = arith.mulf %177, %139 : vector<8x128xf32>
    %180 = arith.mulf %176, %175 : vector<8x128xf32>
    %181 = arith.addf %179, %180 : vector<8x128xf32>
    %182 = math.tanh %181 : vector<8x128xf32>
    %183 = arith.mulf %178, %182 : vector<8x128xf32>
    %c0_64 = arith.constant 0 : index
    %c0_65 = arith.constant 0 : index
    %184 = vector.load %arg4[%c0_64, %c0_65] : memref<128x512xf32, #tpu.memory_space<vmem>>, vector<128x512xf32>
    %cst_66 = arith.constant dense<0.000000e+00> : vector<8x512xf32>
    %185 = tpu.matmul %183, %184, %cst_66 {dimension_numbers = #tpu.dot_dimension_numbers<[1], [0], [0], [1], [0, 0, 1, 1], [], []>} : vector<8x128xf32>, vector<128x512xf32>, vector<8x512xf32> -> vector<8x512xf32>
    %186 = arith.addf %185, %11 : vector<8x512xf32>
    %c32 = arith.constant 32 : index
    %c0_67 = arith.constant 0 : index
    %187 = vector.load %arg13[%c32, %c0_67] : memref<64x512xf32, #tpu.memory_space<vmem>>, vector<8x512xf32>
    %c0_68 = arith.constant 0 : index
    %c0_69 = arith.constant 0 : index
    %188 = vector.load %arg2[%c0_68, %c0_69] : memref<128x512xf32, #tpu.memory_space<vmem>>, vector<128x512xf32>
    %cst_70 = arith.constant dense<0.000000e+00> : vector<8x512xf32>
    %189 = tpu.matmul %164, %188, %cst_70 {dimension_numbers = #tpu.dot_dimension_numbers<[1], [0], [0], [1], [0, 0, 1, 1], [], []>} : vector<8x128xf32>, vector<128x512xf32>, vector<8x512xf32> -> vector<8x512xf32>
    %190 = arith.addf %187, %189 : vector<8x512xf32>
    %191 = vector.extract_strided_slice %190 {offsets = [0, 0], sizes = [8, 384], strides = [1, 1]} : vector<8x512xf32> to vector<8x384xf32>
    %192 = arith.negf %191 : vector<8x384xf32>
    %193 = math.exp %192 : vector<8x384xf32>
    %cst_71 = arith.constant 1.000000e+00 : f32
    %194 = vector.broadcast %cst_71 : f32 to vector<8x384xf32>
    %195 = arith.addf %194, %193 : vector<8x384xf32>
    %196 = arith.divf %194, %195 : vector<8x384xf32>
    %197 = vector.extract_strided_slice %190 {offsets = [0, 384], sizes = [8, 128], strides = [1, 1]} : vector<8x512xf32> to vector<8x128xf32>
    %198 = math.tanh %197 : vector<8x128xf32>
    %199 = vector.extract_strided_slice %196 {offsets = [0, 0], sizes = [8, 128], strides = [1, 1]} : vector<8x384xf32> to vector<8x128xf32>
    %200 = vector.extract_strided_slice %196 {offsets = [0, 128], sizes = [8, 128], strides = [1, 1]} : vector<8x384xf32> to vector<8x128xf32>
    %201 = vector.extract_strided_slice %196 {offsets = [0, 256], sizes = [8, 128], strides = [1, 1]} : vector<8x384xf32> to vector<8x128xf32>
    %202 = arith.mulf %200, %162 : vector<8x128xf32>
    %203 = arith.mulf %199, %198 : vector<8x128xf32>
    %204 = arith.addf %202, %203 : vector<8x128xf32>
    %205 = math.tanh %204 : vector<8x128xf32>
    %206 = arith.mulf %201, %205 : vector<8x128xf32>
    %c0_72 = arith.constant 0 : index
    %c0_73 = arith.constant 0 : index
    %207 = vector.load %arg3[%c0_72, %c0_73] : memref<128x512xf32, #tpu.memory_space<vmem>>, vector<128x512xf32>
    %cst_74 = arith.constant dense<0.000000e+00> : vector<8x512xf32>
    %208 = tpu.matmul %206, %207, %cst_74 {dimension_numbers = #tpu.dot_dimension_numbers<[1], [0], [0], [1], [0, 0, 1, 1], [], []>} : vector<8x128xf32>, vector<128x512xf32>, vector<8x512xf32> -> vector<8x512xf32>
    %209 = arith.addf %208, %186 : vector<8x512xf32>
    %210 = vector.extract_strided_slice %209 {offsets = [0, 0], sizes = [8, 384], strides = [1, 1]} : vector<8x512xf32> to vector<8x384xf32>
    %211 = arith.negf %210 : vector<8x384xf32>
    %212 = math.exp %211 : vector<8x384xf32>
    %cst_75 = arith.constant 1.000000e+00 : f32
    %213 = vector.broadcast %cst_75 : f32 to vector<8x384xf32>
    %214 = arith.addf %213, %212 : vector<8x384xf32>
    %215 = arith.divf %213, %214 : vector<8x384xf32>
    %216 = vector.extract_strided_slice %209 {offsets = [0, 384], sizes = [8, 128], strides = [1, 1]} : vector<8x512xf32> to vector<8x128xf32>
    %217 = math.tanh %216 : vector<8x128xf32>
    %218 = vector.extract_strided_slice %215 {offsets = [0, 0], sizes = [8, 128], strides = [1, 1]} : vector<8x384xf32> to vector<8x128xf32>
    %219 = vector.extract_strided_slice %215 {offsets = [0, 128], sizes = [8, 128], strides = [1, 1]} : vector<8x384xf32> to vector<8x128xf32>
    %220 = vector.extract_strided_slice %215 {offsets = [0, 256], sizes = [8, 128], strides = [1, 1]} : vector<8x384xf32> to vector<8x128xf32>
    %221 = arith.mulf %219, %181 : vector<8x128xf32>
    %222 = arith.mulf %218, %217 : vector<8x128xf32>
    %223 = arith.addf %221, %222 : vector<8x128xf32>
    %224 = math.tanh %223 : vector<8x128xf32>
    %225 = arith.mulf %220, %224 : vector<8x128xf32>
    %c0_76 = arith.constant 0 : index
    %c0_77 = arith.constant 0 : index
    %226 = vector.load %arg4[%c0_76, %c0_77] : memref<128x512xf32, #tpu.memory_space<vmem>>, vector<128x512xf32>
    %cst_78 = arith.constant dense<0.000000e+00> : vector<8x512xf32>
    %227 = tpu.matmul %225, %226, %cst_78 {dimension_numbers = #tpu.dot_dimension_numbers<[1], [0], [0], [1], [0, 0, 1, 1], [], []>} : vector<8x128xf32>, vector<128x512xf32>, vector<8x512xf32> -> vector<8x512xf32>
    %228 = arith.addf %227, %11 : vector<8x512xf32>
    %c40 = arith.constant 40 : index
    %c0_79 = arith.constant 0 : index
    %229 = vector.load %arg13[%c40, %c0_79] : memref<64x512xf32, #tpu.memory_space<vmem>>, vector<8x512xf32>
    %c0_80 = arith.constant 0 : index
    %c0_81 = arith.constant 0 : index
    %230 = vector.load %arg2[%c0_80, %c0_81] : memref<128x512xf32, #tpu.memory_space<vmem>>, vector<128x512xf32>
    %cst_82 = arith.constant dense<0.000000e+00> : vector<8x512xf32>
    %231 = tpu.matmul %206, %230, %cst_82 {dimension_numbers = #tpu.dot_dimension_numbers<[1], [0], [0], [1], [0, 0, 1, 1], [], []>} : vector<8x128xf32>, vector<128x512xf32>, vector<8x512xf32> -> vector<8x512xf32>
    %232 = arith.addf %229, %231 : vector<8x512xf32>
    %233 = vector.extract_strided_slice %232 {offsets = [0, 0], sizes = [8, 384], strides = [1, 1]} : vector<8x512xf32> to vector<8x384xf32>
    %234 = arith.negf %233 : vector<8x384xf32>
    %235 = math.exp %234 : vector<8x384xf32>
    %cst_83 = arith.constant 1.000000e+00 : f32
    %236 = vector.broadcast %cst_83 : f32 to vector<8x384xf32>
    %237 = arith.addf %236, %235 : vector<8x384xf32>
    %238 = arith.divf %236, %237 : vector<8x384xf32>
    %239 = vector.extract_strided_slice %232 {offsets = [0, 384], sizes = [8, 128], strides = [1, 1]} : vector<8x512xf32> to vector<8x128xf32>
    %240 = math.tanh %239 : vector<8x128xf32>
    %241 = vector.extract_strided_slice %238 {offsets = [0, 0], sizes = [8, 128], strides = [1, 1]} : vector<8x384xf32> to vector<8x128xf32>
    %242 = vector.extract_strided_slice %238 {offsets = [0, 128], sizes = [8, 128], strides = [1, 1]} : vector<8x384xf32> to vector<8x128xf32>
    %243 = vector.extract_strided_slice %238 {offsets = [0, 256], sizes = [8, 128], strides = [1, 1]} : vector<8x384xf32> to vector<8x128xf32>
    %244 = arith.mulf %242, %204 : vector<8x128xf32>
    %245 = arith.mulf %241, %240 : vector<8x128xf32>
    %246 = arith.addf %244, %245 : vector<8x128xf32>
    %247 = math.tanh %246 : vector<8x128xf32>
    %248 = arith.mulf %243, %247 : vector<8x128xf32>
    %c0_84 = arith.constant 0 : index
    %c0_85 = arith.constant 0 : index
    %249 = vector.load %arg3[%c0_84, %c0_85] : memref<128x512xf32, #tpu.memory_space<vmem>>, vector<128x512xf32>
    %cst_86 = arith.constant dense<0.000000e+00> : vector<8x512xf32>
    %250 = tpu.matmul %248, %249, %cst_86 {dimension_numbers = #tpu.dot_dimension_numbers<[1], [0], [0], [1], [0, 0, 1, 1], [], []>} : vector<8x128xf32>, vector<128x512xf32>, vector<8x512xf32> -> vector<8x512xf32>
    %251 = arith.addf %250, %228 : vector<8x512xf32>
    %252 = vector.extract_strided_slice %251 {offsets = [0, 0], sizes = [8, 384], strides = [1, 1]} : vector<8x512xf32> to vector<8x384xf32>
    %253 = arith.negf %252 : vector<8x384xf32>
    %254 = math.exp %253 : vector<8x384xf32>
    %cst_87 = arith.constant 1.000000e+00 : f32
    %255 = vector.broadcast %cst_87 : f32 to vector<8x384xf32>
    %256 = arith.addf %255, %254 : vector<8x384xf32>
    %257 = arith.divf %255, %256 : vector<8x384xf32>
    %258 = vector.extract_strided_slice %251 {offsets = [0, 384], sizes = [8, 128], strides = [1, 1]} : vector<8x512xf32> to vector<8x128xf32>
    %259 = math.tanh %258 : vector<8x128xf32>
    %260 = vector.extract_strided_slice %257 {offsets = [0, 0], sizes = [8, 128], strides = [1, 1]} : vector<8x384xf32> to vector<8x128xf32>
    %261 = vector.extract_strided_slice %257 {offsets = [0, 128], sizes = [8, 128], strides = [1, 1]} : vector<8x384xf32> to vector<8x128xf32>
    %262 = vector.extract_strided_slice %257 {offsets = [0, 256], sizes = [8, 128], strides = [1, 1]} : vector<8x384xf32> to vector<8x128xf32>
    %263 = arith.mulf %261, %223 : vector<8x128xf32>
    %264 = arith.mulf %260, %259 : vector<8x128xf32>
    %265 = arith.addf %263, %264 : vector<8x128xf32>
    %266 = math.tanh %265 : vector<8x128xf32>
    %267 = arith.mulf %262, %266 : vector<8x128xf32>
    %c0_88 = arith.constant 0 : index
    %c0_89 = arith.constant 0 : index
    %268 = vector.load %arg4[%c0_88, %c0_89] : memref<128x512xf32, #tpu.memory_space<vmem>>, vector<128x512xf32>
    %cst_90 = arith.constant dense<0.000000e+00> : vector<8x512xf32>
    %269 = tpu.matmul %267, %268, %cst_90 {dimension_numbers = #tpu.dot_dimension_numbers<[1], [0], [0], [1], [0, 0, 1, 1], [], []>} : vector<8x128xf32>, vector<128x512xf32>, vector<8x512xf32> -> vector<8x512xf32>
    %270 = arith.addf %269, %11 : vector<8x512xf32>
    %c48 = arith.constant 48 : index
    %c0_91 = arith.constant 0 : index
    %271 = vector.load %arg13[%c48, %c0_91] : memref<64x512xf32, #tpu.memory_space<vmem>>, vector<8x512xf32>
    %c0_92 = arith.constant 0 : index
    %c0_93 = arith.constant 0 : index
    %272 = vector.load %arg2[%c0_92, %c0_93] : memref<128x512xf32, #tpu.memory_space<vmem>>, vector<128x512xf32>
    %cst_94 = arith.constant dense<0.000000e+00> : vector<8x512xf32>
    %273 = tpu.matmul %248, %272, %cst_94 {dimension_numbers = #tpu.dot_dimension_numbers<[1], [0], [0], [1], [0, 0, 1, 1], [], []>} : vector<8x128xf32>, vector<128x512xf32>, vector<8x512xf32> -> vector<8x512xf32>
    %274 = arith.addf %271, %273 : vector<8x512xf32>
    %275 = vector.extract_strided_slice %274 {offsets = [0, 0], sizes = [8, 384], strides = [1, 1]} : vector<8x512xf32> to vector<8x384xf32>
    %276 = arith.negf %275 : vector<8x384xf32>
    %277 = math.exp %276 : vector<8x384xf32>
    %cst_95 = arith.constant 1.000000e+00 : f32
    %278 = vector.broadcast %cst_95 : f32 to vector<8x384xf32>
    %279 = arith.addf %278, %277 : vector<8x384xf32>
    %280 = arith.divf %278, %279 : vector<8x384xf32>
    %281 = vector.extract_strided_slice %274 {offsets = [0, 384], sizes = [8, 128], strides = [1, 1]} : vector<8x512xf32> to vector<8x128xf32>
    %282 = math.tanh %281 : vector<8x128xf32>
    %283 = vector.extract_strided_slice %280 {offsets = [0, 0], sizes = [8, 128], strides = [1, 1]} : vector<8x384xf32> to vector<8x128xf32>
    %284 = vector.extract_strided_slice %280 {offsets = [0, 128], sizes = [8, 128], strides = [1, 1]} : vector<8x384xf32> to vector<8x128xf32>
    %285 = vector.extract_strided_slice %280 {offsets = [0, 256], sizes = [8, 128], strides = [1, 1]} : vector<8x384xf32> to vector<8x128xf32>
    %286 = arith.mulf %284, %246 : vector<8x128xf32>
    %287 = arith.mulf %283, %282 : vector<8x128xf32>
    %288 = arith.addf %286, %287 : vector<8x128xf32>
    %289 = math.tanh %288 : vector<8x128xf32>
    %290 = arith.mulf %285, %289 : vector<8x128xf32>
    %c0_96 = arith.constant 0 : index
    %c0_97 = arith.constant 0 : index
    %291 = vector.load %arg3[%c0_96, %c0_97] : memref<128x512xf32, #tpu.memory_space<vmem>>, vector<128x512xf32>
    %cst_98 = arith.constant dense<0.000000e+00> : vector<8x512xf32>
    %292 = tpu.matmul %290, %291, %cst_98 {dimension_numbers = #tpu.dot_dimension_numbers<[1], [0], [0], [1], [0, 0, 1, 1], [], []>} : vector<8x128xf32>, vector<128x512xf32>, vector<8x512xf32> -> vector<8x512xf32>
    %293 = arith.addf %292, %270 : vector<8x512xf32>
    %294 = vector.extract_strided_slice %293 {offsets = [0, 0], sizes = [8, 384], strides = [1, 1]} : vector<8x512xf32> to vector<8x384xf32>
    %295 = arith.negf %294 : vector<8x384xf32>
    %296 = math.exp %295 : vector<8x384xf32>
    %cst_99 = arith.constant 1.000000e+00 : f32
    %297 = vector.broadcast %cst_99 : f32 to vector<8x384xf32>
    %298 = arith.addf %297, %296 : vector<8x384xf32>
    %299 = arith.divf %297, %298 : vector<8x384xf32>
    %300 = vector.extract_strided_slice %293 {offsets = [0, 384], sizes = [8, 128], strides = [1, 1]} : vector<8x512xf32> to vector<8x128xf32>
    %301 = math.tanh %300 : vector<8x128xf32>
    %302 = vector.extract_strided_slice %299 {offsets = [0, 0], sizes = [8, 128], strides = [1, 1]} : vector<8x384xf32> to vector<8x128xf32>
    %303 = vector.extract_strided_slice %299 {offsets = [0, 128], sizes = [8, 128], strides = [1, 1]} : vector<8x384xf32> to vector<8x128xf32>
    %304 = vector.extract_strided_slice %299 {offsets = [0, 256], sizes = [8, 128], strides = [1, 1]} : vector<8x384xf32> to vector<8x128xf32>
    %305 = arith.mulf %303, %265 : vector<8x128xf32>
    %306 = arith.mulf %302, %301 : vector<8x128xf32>
    %307 = arith.addf %305, %306 : vector<8x128xf32>
    %308 = math.tanh %307 : vector<8x128xf32>
    %309 = arith.mulf %304, %308 : vector<8x128xf32>
    %c0_100 = arith.constant 0 : index
    %c0_101 = arith.constant 0 : index
    %310 = vector.load %arg4[%c0_100, %c0_101] : memref<128x512xf32, #tpu.memory_space<vmem>>, vector<128x512xf32>
    %cst_102 = arith.constant dense<0.000000e+00> : vector<8x512xf32>
    %311 = tpu.matmul %309, %310, %cst_102 {dimension_numbers = #tpu.dot_dimension_numbers<[1], [0], [0], [1], [0, 0, 1, 1], [], []>} : vector<8x128xf32>, vector<128x512xf32>, vector<8x512xf32> -> vector<8x512xf32>
    %312 = arith.addf %311, %11 : vector<8x512xf32>
    %c56 = arith.constant 56 : index
    %c0_103 = arith.constant 0 : index
    %313 = vector.load %arg13[%c56, %c0_103] : memref<64x512xf32, #tpu.memory_space<vmem>>, vector<8x512xf32>
    %c0_104 = arith.constant 0 : index
    %c0_105 = arith.constant 0 : index
    %314 = vector.load %arg2[%c0_104, %c0_105] : memref<128x512xf32, #tpu.memory_space<vmem>>, vector<128x512xf32>
    %cst_106 = arith.constant dense<0.000000e+00> : vector<8x512xf32>
    %315 = tpu.matmul %290, %314, %cst_106 {dimension_numbers = #tpu.dot_dimension_numbers<[1], [0], [0], [1], [0, 0, 1, 1], [], []>} : vector<8x128xf32>, vector<128x512xf32>, vector<8x512xf32> -> vector<8x512xf32>
    %316 = arith.addf %313, %315 : vector<8x512xf32>
    %317 = vector.extract_strided_slice %316 {offsets = [0, 0], sizes = [8, 384], strides = [1, 1]} : vector<8x512xf32> to vector<8x384xf32>
    %318 = arith.negf %317 : vector<8x384xf32>
    %319 = math.exp %318 : vector<8x384xf32>
    %cst_107 = arith.constant 1.000000e+00 : f32
    %320 = vector.broadcast %cst_107 : f32 to vector<8x384xf32>
    %321 = arith.addf %320, %319 : vector<8x384xf32>
    %322 = arith.divf %320, %321 : vector<8x384xf32>
    %323 = vector.extract_strided_slice %316 {offsets = [0, 384], sizes = [8, 128], strides = [1, 1]} : vector<8x512xf32> to vector<8x128xf32>
    %324 = math.tanh %323 : vector<8x128xf32>
    %325 = vector.extract_strided_slice %322 {offsets = [0, 0], sizes = [8, 128], strides = [1, 1]} : vector<8x384xf32> to vector<8x128xf32>
    %326 = vector.extract_strided_slice %322 {offsets = [0, 128], sizes = [8, 128], strides = [1, 1]} : vector<8x384xf32> to vector<8x128xf32>
    %327 = vector.extract_strided_slice %322 {offsets = [0, 256], sizes = [8, 128], strides = [1, 1]} : vector<8x384xf32> to vector<8x128xf32>
    %328 = arith.mulf %326, %288 : vector<8x128xf32>
    %329 = arith.mulf %325, %324 : vector<8x128xf32>
    %330 = arith.addf %328, %329 : vector<8x128xf32>
    %331 = math.tanh %330 : vector<8x128xf32>
    %332 = arith.mulf %327, %331 : vector<8x128xf32>
    %c0_108 = arith.constant 0 : index
    %c0_109 = arith.constant 0 : index
    %333 = vector.load %arg3[%c0_108, %c0_109] : memref<128x512xf32, #tpu.memory_space<vmem>>, vector<128x512xf32>
    %cst_110 = arith.constant dense<0.000000e+00> : vector<8x512xf32>
    %334 = tpu.matmul %332, %333, %cst_110 {dimension_numbers = #tpu.dot_dimension_numbers<[1], [0], [0], [1], [0, 0, 1, 1], [], []>} : vector<8x128xf32>, vector<128x512xf32>, vector<8x512xf32> -> vector<8x512xf32>
    %335 = arith.addf %334, %312 : vector<8x512xf32>
    %336 = vector.extract_strided_slice %335 {offsets = [0, 0], sizes = [8, 384], strides = [1, 1]} : vector<8x512xf32> to vector<8x384xf32>
    %337 = arith.negf %336 : vector<8x384xf32>
    %338 = math.exp %337 : vector<8x384xf32>
    %cst_111 = arith.constant 1.000000e+00 : f32
    %339 = vector.broadcast %cst_111 : f32 to vector<8x384xf32>
    %340 = arith.addf %339, %338 : vector<8x384xf32>
    %341 = arith.divf %339, %340 : vector<8x384xf32>
    %342 = vector.extract_strided_slice %335 {offsets = [0, 384], sizes = [8, 128], strides = [1, 1]} : vector<8x512xf32> to vector<8x128xf32>
    %343 = math.tanh %342 : vector<8x128xf32>
    %344 = vector.extract_strided_slice %341 {offsets = [0, 0], sizes = [8, 128], strides = [1, 1]} : vector<8x384xf32> to vector<8x128xf32>
    %345 = vector.extract_strided_slice %341 {offsets = [0, 128], sizes = [8, 128], strides = [1, 1]} : vector<8x384xf32> to vector<8x128xf32>
    %346 = vector.extract_strided_slice %341 {offsets = [0, 256], sizes = [8, 128], strides = [1, 1]} : vector<8x384xf32> to vector<8x128xf32>
    %347 = arith.mulf %345, %307 : vector<8x128xf32>
    %348 = arith.mulf %344, %343 : vector<8x128xf32>
    %349 = arith.addf %347, %348 : vector<8x128xf32>
    %350 = math.tanh %349 : vector<8x128xf32>
    %351 = arith.mulf %346, %350 : vector<8x128xf32>
    %c0_112 = arith.constant 0 : index
    %c0_113 = arith.constant 0 : index
    %352 = vector.load %arg6[%c0_112, %c0_113] : memref<128x8xf32, #tpu.memory_space<vmem>>, vector<128x8xf32>
    %cst_114 = arith.constant dense<0.000000e+00> : vector<8x8xf32>
    %353 = tpu.matmul %351, %352, %cst_114 {dimension_numbers = #tpu.dot_dimension_numbers<[1], [0], [0], [1], [0, 0, 1, 1], [], []>} : vector<8x128xf32>, vector<128x8xf32>, vector<8x8xf32> -> vector<8x8xf32>
    %c0_115 = arith.constant 0 : index
    %c0_116 = arith.constant 0 : index
    %354 = vector.load %arg7[%c0_115, %c0_116] : memref<1x8xf32, #tpu.memory_space<vmem>>, vector<1x8xf32>
    %355 = vector.broadcast %354 : vector<1x8xf32> to vector<8x8xf32>
    %356 = arith.addf %353, %355 : vector<8x8xf32>
    %cst_117 = arith.constant dense<0xFF800000> : vector<8xf32>
    %357 = vector.multi_reduction <maximumf>, %356, %cst_117 [1] : vector<8x8xf32> to vector<8xf32>
    %358 = vector.shape_cast %357 : vector<8xf32> to vector<8x1xf32>
    %359 = vector.broadcast %358 : vector<8x1xf32> to vector<8x8xf32>
    %360 = arith.subf %356, %359 : vector<8x8xf32>
    %361 = math.exp %360 : vector<8x8xf32>
    %cst_118 = arith.constant dense<0.000000e+00> : vector<8xf32>
    %362 = vector.multi_reduction <add>, %361, %cst_118 [1] : vector<8x8xf32> to vector<8xf32>
    %363 = vector.shape_cast %362 : vector<8xf32> to vector<8x1xf32>
    %364 = vector.broadcast %363 : vector<8x1xf32> to vector<8x8xf32>
    %365 = arith.divf %361, %364 : vector<8x8xf32>
    %c0_119 = arith.constant 0 : index
    %c0_120 = arith.constant 0 : index
    %366 = vector.load %arg12[%c0_119, %c0_120] : memref<8x8xf32, #tpu.memory_space<vmem>>, vector<8x8xf32>
    tpu.vector_store %arg12[%c0_119, %c0_120], %365 {strides = array<i32>} : memref<8x8xf32, #tpu.memory_space<vmem>>, vector<8x8xf32>,
    return
  }
}

</mosaic_0001>

<bundles_post_ra>
// kernel: tpu_custom_call.1
= control target key start
LH: loop header
LB: loop body
LE: loop exit
PB: predicated region body
PF: predicated region fallthrough
CT: control target
= control target key end

     0   :  { %17 = vsyncpa [#allocation4], 0  ;;  %s8420_s0 = inlined_call_operand.vmem [shape: s32[64,1], index: 0, kind: input, shape index: {}]   ;;  %s8421_s1 = inlined_call_operand.vmem [shape: f32[32,512], index: 1, kind: input, shape index: {}]   ;;  %s8422_s2 = inlined_call_operand.hbm [shape: f32[128,512], index: 2, kind: input, shape index: {}]   ;;  %s8423_s3 = inlined_call_operand.hbm [shape: f32[128,512], index: 3, kind: input, shape index: {}]   ;;  %s8424_s4 = inlined_call_operand.hbm [shape: f32[128,512], index: 4, kind: input, shape index: {}]   ;;  %s8425_s5 = inlined_call_operand.vmem [shape: f32[1,512], index: 5, kind: input, shape index: {}]   ;;  %s8426_s6 = inlined_call_operand.vmem [shape: f32[128,8], index: 6, kind: input, shape index: {}]   ;;  %s8427_s7 = inlined_call_operand.vmem [shape: f32[1,8], index: 7, kind: input, shape index: {}]   ;;  %s8428_s8 = inlined_call_operand.vmem [shape: f32[8,128], index: 8, kind: input, shape index: {}]   ;;  %s8429_s9 = inlined_call_operand.vmem [shape: f32[8,128], index: 9, kind: input, shape index: {}]   ;;  %s8430_s10 = inlined_call_operand.vmem [shape: f32[8,128], index: 10, kind: input, shape index: {}]   ;;  %s8431_s11 = inlined_call_operand.vmem [shape: f32[8,128], index: 11, kind: input, shape index: {}]   ;;  %s8432_s12 = inlined_call_operand.hbm [shape: f32[8,8], index: 12, kind: output, shape index: {}]  }
   0x1   :  { %18 = vsyncpa [#allocation7], 0 }
   0x2   :  { %19 = vsyncpa [#allocation5], 0  ;;  %s41_s23 = sshll.u32 %s8423_s3, 4  ;;  %s4748_s24 = smov [#allocation6]   ;;  %s42_s23 = int_to_ptr.hbm [resolvable:$true] %s41_s23 }
   0x3   :  { %s43_s25 = sshll.u32 %s4748_s24, 4  ;;  %s28_s28 = sshll.u32 %s8422_s2, 4  ;;  %s44_s25 = int_to_ptr.vmem [resolvable:$true] %s43_s25  ;;  %s29_s28 = int_to_ptr.hbm [resolvable:$true] %s28_s28 }
   0x4   :  { %s4749_s29 = smov 512   ;;  %s4750_s30 = smov 32  }
   0x5   :  { %49 = dma.hbm_to_vmem [thread:$0]  %s42_s23, 8192, %s44_s25, [#allocation7], %s4749_s29, %s4749_s29, %s4750_s30  }
   0x6   :  { %s4751_s13 = smov [#allocation3]   ;;  %s54_s17 = sshll.u32 %s8424_s4, 4  ;;  %s55_s17 = int_to_ptr.hbm [resolvable:$true] %s54_s17 }
   0x7   :  { %s30_s14 = sshll.u32 %s4751_s13, 4  ;;  %s4752_s3 = smov [#allocation8]   ;;  %s31_s14 = int_to_ptr.vmem [resolvable:$true] %s30_s14 }
   0x8   :  { %36 = dma.hbm_to_vmem [thread:$0]  %s29_s28, 8192, %s31_s14, [#allocation4], %s4749_s29, %s4749_s29, %s4750_s30  }
   0x9   :  { %s56_s18 = sshll.u32 %s4752_s3, 4  ;;  %s57_s18 = int_to_ptr.vmem [resolvable:$true] %s56_s18 }
   0xa   :  { %62 = dma.hbm_to_vmem [thread:$0]  %s55_s17, 8192, %s57_s18, [#allocation7], %s4749_s29, %s4749_s29, %s4750_s30  }
   0xb   :  { %4742 = dma.done.wait [#allocation4], 8192  }
   0xc   :  { %4743 = vsyncadd [#allocation4], 4294959104 }
   0xd   :  { %4744 = dma.done.wait [#allocation7], 16384  }
   0xe   :  { %4745 = vsyncadd [#allocation7], 4294950912  ;;  %v4753_v0 = vmov 0   ;;  %v94_v1 = vld [vmem:[%s8420_s0 + $0x28] sm:$0xff]  ;;  %v89_v2 = vld [vmem:[%s8420_s0] sm:$0xff]  ;;  %v97_v41 = vlaneseq  ;;  %vm163_vm0 = vcmask 261120  }
   0xf   :  { %3775 = vset.pattern.permute.xlu1 %v4753_v0  ;;  %3774 = vset.pattern.permute.xlu0 %v4753_v0  ;;  %v90_v3 = vld [vmem:[%s8420_s0 + $0x8] sm:$0xff]  ;;  %v159_v4 = vld [vmem:[%s8421_s1 + $0x60] sm:$0xff]  ;;  %v95_v7 = vld [vmem:[%s8420_s0 + $0x30] sm:$0xff]  ;;  %v4754_v48 = vmov 0.0   ;;  %s3655_s15 = sshll.u32 %s8432_s12, 4  ;;  %s3656_s15 = int_to_ptr.hbm [resolvable:$true] %s3655_s15 }
  0x10   :  { %3776 = vset.pattern.permute.xlu2 %v4753_v0  ;;  %115 = vperm.xlu0 %3774, %v94_v1   ;;  %v155_v5 = vld [vmem:[%s8421_s1 + $0x40] sm:$0xff]  ;;  %v96_v8 = vld [vmem:[%s8420_s0 + $0x38] sm:$0xff]  ;;  %v91_v10 = vld [vmem:[%s8420_s0 + $0x10] sm:$0xff]  ;;  %v4902_v42 = vand.u32 127, %v97_v41 }
  0x11   :  { %100 = vperm.xlu1 %3775, %v89_v2   ;;  %103 = vperm.xlu2 %3776, %v90_v3   ;;  %v151_v6 = vld [vmem:[%s8421_s1 + $0x20] sm:$0xff]  ;;  %v92_v14 = vld [vmem:[%s8420_s0 + $0x18] sm:$0xff]  ;;  %v160_v21 = vld [vmem:[%s8421_s1 + $0x68] sm:$0xff] }
  0x12   :  { %200 = vmatpush.msra.mxu0 %v159_v4  ;;  %3754 = vmatpush.msra.mxu1 %v159_v4  ;;  %v147_v9 = vld [vmem:[%s8421_s1] sm:$0xff]  ;;  %v156_v23 = vld [vmem:[%s8421_s1 + $0x48] sm:$0xff]  ;;  %v161_v29 = vld [vmem:[%s8421_s1 + $0x70] sm:$0xff] }
  0x13   :  { %3755 = vmatpush.msra.mxu2 %v159_v4  ;;  %3756 = vmatpush.msra.mxu3 %v159_v4  ;;  %v458_v11 = vld [vmem:[#allocation8 + $0x1e0] sm:$0xff]  ;;  %v152_v25 = vld [vmem:[%s8421_s1 + $0x28] sm:$0xff]  ;;  %v162_v30 = vld [vmem:[%s8421_s1 + $0x78] sm:$0xff] }
  0x14   :  { %201 = vmatpush.msra.mxu0 %v155_v5  ;;  %3757 = vmatpush.msra.mxu1 %v155_v5  ;;  %v454_v12 = vld [vmem:[#allocation8 + $0x1c0] sm:$0xff]  ;;  %v148_v27 = vld [vmem:[%s8421_s1 + $0x8] sm:$0xff]  ;;  %v157_v31 = vld [vmem:[%s8421_s1 + $0x50] sm:$0xff] }
  0x15   :  { %3758 = vmatpush.msra.mxu2 %v155_v5  ;;  %3759 = vmatpush.msra.mxu3 %v155_v5  ;;  %v450_v13 = vld [vmem:[#allocation8 + $0x1a0] sm:$0xff]  ;;  %v158_v33 = vld [vmem:[%s8421_s1 + $0x58] sm:$0xff]  ;;  %v153_v34 = vld [vmem:[%s8421_s1 + $0x30] sm:$0xff] }
  0x16   :  { %202 = vmatpush.msra.mxu0 %v151_v6  ;;  %3760 = vmatpush.msra.mxu1 %v151_v6  ;;  %v93_v15 = vld [vmem:[%s8420_s0 + $0x20] sm:$0xff]  ;;  %v154_v36 = vld [vmem:[%s8421_s1 + $0x38] sm:$0xff]  ;;  %v149_v38 = vld [vmem:[%s8421_s1 + $0x10] sm:$0xff] }
  0x17   :  { %3761 = vmatpush.msra.mxu2 %v151_v6  ;;  %3762 = vmatpush.msra.mxu3 %v151_v6  ;;  %v446_v16 = vld [vmem:[#allocation8 + $0x180] sm:$0xff]  ;;  %v150_v39 = vld [vmem:[%s8421_s1 + $0x18] sm:$0xff]  ;;  %v4906_v46 = vld [vmem:[#allocation8 + $0x1e8] sm:$0xff] }
  0x18   :  { %118 = vperm.xlu0 %3774, %v95_v7   ;;  %203 = vmatpush.msra.mxu0 %v147_v9  ;;  %v442_v17 = vld [vmem:[#allocation8 + $0x160] sm:$0xff]  ;;  %v4918_v51 = vld [vmem:[#allocation8 + $0x1c8] sm:$0xff]  ;;  %v4939_v63 = vld [vmem:[#allocation8 + $0x1f0] sm:$0xff] }
  0x19   :  { %121 = vperm.xlu1 %3775, %v96_v8   ;;  %3763 = vmatpush.msra.mxu1 %v147_v9  ;;  %v438_v18 = vld [vmem:[#allocation8 + $0x140] sm:$0xff]  ;;  %v4922_v53 = vld [vmem:[#allocation8 + $0x1a8] sm:$0xff]  ;;  %v4948_v2 = vld [vmem:[#allocation8 + $0x1f8] sm:$0xff] }
  0x1a   :  { %106 = vperm.xlu2 %3776, %v91_v10   ;;  %462 = vmatpush.msrb.mxu0 %v458_v11  ;;  %v434_v19 = vld [vmem:[#allocation8 + $0x120] sm:$0xff]  ;;  %v4925_v55 = vld [vmem:[#allocation8 + $0x188] sm:$0xff]  ;;  %v4954_v3 = vld [vmem:[#allocation8 + $0x1d0] sm:$0xff] }
  0x1b   :  { %3764 = vmatpush.msra.mxu2 %v147_v9  ;;  %3765 = vmatpush.msra.mxu3 %v147_v9  ;;  %v430_v20 = vld [vmem:[#allocation8 + $0x100] sm:$0xff]  ;;  %v4946_v1 = vld [vmem:[#allocation8 + $0x168] sm:$0xff]  ;;  %v4960_v6 = vld [vmem:[#allocation8 + $0x1d8] sm:$0xff] }
  0x1c   :  { %463 = vmatpush.msrb.mxu0 %v454_v12  ;;  %v426_v22 = vld [vmem:[#allocation8 + $0xe0] sm:$0xff]  ;;  %241 = vmatpush.msrb.mxu1 %v160_v21  ;;  %v4958_v5 = vld [vmem:[#allocation8 + $0x148] sm:$0xff]  ;;  %v4962_v7 = vld [vmem:[#allocation8 + $0x1b0] sm:$0xff] }
  0x1d   :  { %v422_v24 = vld [vmem:[#allocation8 + $0xc0] sm:$0xff]  ;;  %282 = vmatpush.msrb.mxu2 %v161_v29  ;;  %323 = vmatpush.msrb.mxu3 %v162_v30  ;;  %v4967_v9 = vld [vmem:[#allocation8 + $0x128] sm:$0xff]  ;;  %v4969_v10 = vld [vmem:[#allocation8 + $0x1b8] sm:$0xff] }
  0x1e   :  { %464 = vmatpush.msrb.mxu0 %v450_v13  ;;  %242 = vmatpush.msrb.mxu1 %v156_v23  ;;  %v418_v26 = vld [vmem:[#allocation8 + $0xa0] sm:$0xff]  ;;  %v4977_v12 = vld [vmem:[#allocation8 + $0x190] sm:$0xff]  ;;  %v5006_v23 = vld [vmem:[#allocation8 + $0xc8] sm:$0xff] }
  0x1f   :  { %v414_v28 = vld [vmem:[#allocation8 + $0x80] sm:$0xff]  ;;  %283 = vmatpush.msrb.mxu2 %v157_v31  ;;  %324 = vmatpush.msrb.mxu3 %v158_v33  ;;  %v5026_v29 = vld [vmem:[#allocation8 + $0x138] sm:$0xff]  ;;  %v5035_v33 = vld [vmem:[#allocation8 + $0x110] sm:$0xff] }
  0x20   :  { %109 = vperm.xlu0 %3774, %v92_v14   ;;  %465 = vmatpush.msrb.mxu0 %v446_v16  ;;  %v410_v32 = vld [vmem:[#allocation8 + $0x60] sm:$0xff]  ;;  %v4985_v14 = vld [vmem:[#allocation8 + $0x108] sm:$0xff] }
  0x21   :  { %112 = vperm.xlu1 %3775, %v93_v15   ;;  %243 = vmatpush.msrb.mxu1 %v152_v25  ;;  %v406_v35 = vld [vmem:[#allocation8 + $0x40] sm:$0xff]  ;;  %v4987_v15 = vld [vmem:[#allocation8 + $0x198] sm:$0xff]  ;;  %v5055_v41 = vld [vmem:[#allocation8 + $0x48] sm:$0xff] }
  0x22   :  { %466 = vmatpush.msrb.mxu0 %v442_v17  ;;  %284 = vmatpush.msrb.mxu2 %v153_v34  ;;  %v402_v37 = vld [vmem:[#allocation8 + $0x20] sm:$0xff]  ;;  %v4993_v17 = vld [vmem:[#allocation8 + $0x170] sm:$0xff]  ;;  %v5037_v34 = vld [vmem:[#allocation8 + $0x118] sm:$0xff] }
  0x23   :  { %244 = vmatpush.msrb.mxu1 %v148_v27  ;;  %325 = vmatpush.msrb.mxu3 %v154_v36  ;;  %v398_v40 = vld [vmem:[#allocation8] sm:$0xff]  ;;  %v5018_v27 = vld [vmem:[#allocation8 + $0xa8] sm:$0xff] }
  0x24   :  { %467 = vmatpush.msrb.mxu0 %v438_v18  ;;  %285 = vmatpush.msrb.mxu2 %v149_v38  ;;  %v606_v47 = vld [vmem:[#allocation3 + $0x1e0] sm:$0xff]  ;;  %v5041_v36 = vld [vmem:[#allocation8 + $0x68] sm:$0xff]  ;;  %v5047_v38 = vld [vmem:[#allocation8 + $0xf8] sm:$0xff] }
  0x25   :  { %326 = vmatpush.msrb.mxu3 %v150_v39  ;;  %v602_v52 = vld [vmem:[#allocation3 + $0x1c0] sm:$0xff] }
  0x26   :  { %468 = vmatpush.msrb.mxu0 %v434_v19  ;;  %v598_v54 = vld [vmem:[#allocation3 + $0x1a0] sm:$0xff]  ;;  %v4996_v19 = vld [vmem:[#allocation8 + $0xe8] sm:$0xff] }
  0x27   :  { %v594_v56 = vld [vmem:[#allocation3 + $0x180] sm:$0xff] }
  0x28   :  { %469 = vmatpush.msrb.mxu0 %v430_v20  ;;  %v590_v0 = vld [vmem:[#allocation3 + $0x160] sm:$0xff]  ;;  %v4998_v20 = vld [vmem:[#allocation8 + $0x178] sm:$0xff] }
  0x29   :  { %v586_v4 = vld [vmem:[#allocation3 + $0x140] sm:$0xff] }
  0x2a   :  { %470 = vmatpush.msrb.mxu0 %v426_v22  ;;  %v582_v8 = vld [vmem:[#allocation3 + $0x120] sm:$0xff]  ;;  %v5002_v22 = vld [vmem:[#allocation8 + $0x150] sm:$0xff] }
  0x2b   :  { %v578_v13 = vld [vmem:[#allocation3 + $0x100] sm:$0xff] }
  0x2c   :  { %471 = vmatpush.msrb.mxu0 %v422_v24  ;;  %v574_v18 = vld [vmem:[#allocation3 + $0xe0] sm:$0xff]  ;;  %v5008_v24 = vld [vmem:[#allocation8 + $0x158] sm:$0xff] }
  0x2d   :  { %v570_v21 = vld [vmem:[#allocation3 + $0xc0] sm:$0xff] }
  0x2e   :  { %472 = vmatpush.msrb.mxu0 %v418_v26  ;;  %v566_v26 = vld [vmem:[#allocation3 + $0xa0] sm:$0xff] }
  0x2f   :  { %v562_v31 = vld [vmem:[#allocation3 + $0x80] sm:$0xff] }
  0x30   :  { %473 = vmatpush.msrb.mxu0 %v414_v28  ;;  %v5024_v28 = vld [vmem:[#allocation8 + $0x130] sm:$0xff] }
  0x32   :  { %474 = vmatpush.msrb.mxu0 %v410_v32  ;;  %v5032_v32 = vld [vmem:[#allocation8 + $0x88] sm:$0xff] }
  0x34   :  { %475 = vmatpush.msrb.mxu0 %v406_v35  ;;  %v558_v35 = vld [vmem:[#allocation3 + $0x60] sm:$0xff] }
  0x36   :  { %476 = vmatpush.msrb.mxu0 %v402_v37  ;;  %v5045_v37 = vld [vmem:[#allocation8 + $0xf0] sm:$0xff] }
  0x38   :  { %477 = vmatpush.msrb.mxu0 %v398_v40  ;;  %v554_v40 = vld [vmem:[#allocation3 + $0x40] sm:$0xff] }
  0x6b   :  { %v104_v43 = vpop.permute.xlu2 %103 }
  0x6c   :  { %vm124_vm3 = vcmp.eq.s32.totalorder %v104_v43, %v4902_v42  ;;  %v5062_v43 = vld [vmem:[#allocation8 + $0xd8] sm:$0xff] }
  0x6d   :  { %v4928_v58 = vsel %vm124_vm3, 1.0, %v4754_v48 }
  0x74   :  { %v107_v62 = vpop.permute.xlu2 %106 }
  0x75   :  { %vm125_vm6 = vcmp.eq.s32.totalorder %v107_v62, %v4902_v42  ;;  %v5101_v62 = vld [vmem:[#allocation8 + $0x78] sm:$0xff] }
  0x76   :  { %v4972_v11 = vsel %vm125_vm6, 1.0, %v4754_v48 }
  0x82   :  { %v116_v44 = vpop.permute.xlu0 %115 }
  0x83   :  { %v101_v45 = vpop.permute.xlu1 %100  ;;  %vm128_vm1 = vcmp.eq.s32.totalorder %v116_v44, %v4902_v42  ;;  %v550_v44 = vld [vmem:[#allocation3 + $0x20] sm:$0xff] }
  0x84   :  { %vm123_vm2 = vcmp.eq.s32.totalorder %v101_v45, %v4902_v42  ;;  %v4909_v49 = vsel %vm128_vm1, 1.0, %v4754_v48  ;;  %v5068_v45 = vld [vmem:[#allocation8 + $0x28] sm:$0xff] }
  0x85   :  { %v4912_v50 = vsel %vm123_vm2, 1.0, %v4754_v48  ;;  %3679 = vmatmul.msk.f32.vlgmr.msra.gmra.mxu1 %vm163_vm0, %v4909_v49 }
  0x86   :  { %3674 = vmatmul.msk.f32.vlgmr.msra.gmra.mxu0 %vm163_vm0, %v4912_v50  ;;  %482 = vmatpush.msra.mxu1 %v4906_v46 }
  0x87   :  { %610 = vmatpush.msra.mxu0 %v606_v47  ;;  %v5071_v47 = vld [vmem:[#allocation8 + $0xb0] sm:$0xff] }
  0x88   :  { %483 = vmatpush.msra.mxu1 %v4918_v51 }
  0x89   :  { %611 = vmatpush.msra.mxu0 %v602_v52  ;;  %v5077_v52 = vld [vmem:[#allocation8 + $0x8] sm:$0xff] }
  0x8a   :  { %v119_v57 = vpop.permute.xlu0 %118  ;;  %484 = vmatpush.msra.mxu1 %v4922_v53 }
  0x8b   :  { %v122_v59 = vpop.permute.xlu1 %121  ;;  %612 = vmatpush.msra.mxu0 %v598_v54  ;;  %vm129_vm4 = vcmp.eq.s32.totalorder %v119_v57, %v4902_v42  ;;  %v5080_v54 = vld [vmem:[#allocation8 + $0x90] sm:$0xff]  ;;  %v5087_v57 = vld [vmem:[%s8430_s10] sm:$0xff] }
  0x8c   :  { %vm130_vm5 = vcmp.eq.s32.totalorder %v122_v59, %v4902_v42  ;;  %v4934_v60 = vsel %vm129_vm4, 1.0, %v4754_v48  ;;  %485 = vmatpush.msra.mxu1 %v4925_v55  ;;  %v5096_v59 = vld [vmem:[#allocation8 + $0x70] sm:$0xff] }
  0x8d   :  { %v4937_v61 = vsel %vm130_vm5, 1.0, %v4754_v48  ;;  %613 = vmatpush.msra.mxu0 %v594_v56  ;;  %3680 = vmatmul.msk.f32.vlgmr.msra.gmra.mxu2 %vm163_vm0, %v4934_v60  ;;  %v5082_v56 = vld [vmem:[#allocation8 + $0x98] sm:$0xff] }
  0x8e   :  { %3675 = vmatmul.msk.f32.gmra.mxu0 %vm163_vm0, %v4928_v58  ;;  %3681 = vmatmul.msk.f32.vlgmr.msra.gmra.mxu3 %vm163_vm0, %v4937_v61 }
  0x8f   :  { %3682 = vmatmul.msk.f32.vlgmr.msrb.gmra.mxu1 %vm163_vm0, %v4912_v50  ;;  %502 = vmatpush.msra.mxu2 %v4939_v63 }
  0x90   :  { %614 = vmatpush.msra.mxu0 %v590_v0  ;;  %486 = vmatpush.msra.mxu1 %v4946_v1  ;;  %v5106_v0 = vld [vmem:[#allocation3 + $0x1c8] sm:$0xff] }
  0x91   :  { %522 = vmatpush.msra.mxu3 %v4948_v2  ;;  %503 = vmatpush.msra.mxu2 %v4954_v3  ;;  %8931 = vst [vmem:[#allocation14_spill] sm:$0xff] %v5106_v0 }
  0x92   :  { %615 = vmatpush.msra.mxu0 %v586_v4  ;;  %487 = vmatpush.msra.mxu1 %v4958_v5  ;;  %v110_v16 = vpop.permute.xlu0 %109  ;;  %v5108_v4 = vld [vmem:[#allocation8 + $0x50] sm:$0xff] }
  0x93   :  { %523 = vmatpush.msra.mxu3 %v4960_v6  ;;  %504 = vmatpush.msra.mxu2 %v4962_v7  ;;  %vm126_vm7 = vcmp.eq.s32.totalorder %v110_v16, %v4902_v42  ;;  %v113_v30 = vpop.permute.xlu1 %112  ;;  %v5121_v16 = vld [vmem:[#allocation8 + $0x38] sm:$0xff] }
  0x94   :  { %616 = vmatpush.msra.mxu0 %v582_v8  ;;  %488 = vmatpush.msra.mxu1 %v4967_v9  ;;  %v5014_v25 = vsel %vm126_vm7, 1.0, %v4754_v48  ;;  %vm127_vm8 = vcmp.eq.s32.totalorder %v113_v30, %v4902_v42  ;;  %v5060_v42 = vld [vmem:[#allocation8 + $0xd0] sm:$0xff]  ;;  %v5112_v8 = vld [vmem:[#allocation8 + $0x58] sm:$0xff] }
  0x95   :  { %524 = vmatpush.msra.mxu3 %v4969_v10  ;;  %3690 = vmatmul.msk.f32.vlgmr.msrb.gmra.mxu2 %vm163_vm0, %v4912_v50  ;;  %v3670_v39 = vsel %vm127_vm8, 1.0, %v4754_v48  ;;  %v5073_v48 = vld [vmem:[#allocation8 + $0xb8] sm:$0xff]  ;;  %v5140_v30 = vld [vmem:[#allocation3 + $0x1f0] sm:$0xff] }
  0x96   :  { %3676 = vmatmul.msk.f32.gmra.mxu0 %vm163_vm0, %v4972_v11  ;;  %3698 = vmatmul.msk.f32.vlgmr.msrb.gmra.mxu3 %vm163_vm0, %v4912_v50  ;;  %v546_v50 = vld [vmem:[#allocation3] sm:$0xff]  ;;  %8934 = vst [vmem:[#allocation17_spill] sm:$0xff] %v5140_v30 }
  0x97   :  { %3683 = vmatmul.msk.f32.gmra.mxu1 %vm163_vm0, %v4928_v58  ;;  %505 = vmatpush.msra.mxu2 %v4977_v12 }
  0x98   :  { %617 = vmatpush.msra.mxu0 %v578_v13  ;;  %489 = vmatpush.msra.mxu1 %v4985_v14  ;;  %v5117_v13 = vld [vmem:[#allocation8 + $0x30] sm:$0xff] }
  0x99   :  { %525 = vmatpush.msra.mxu3 %v4987_v15  ;;  %506 = vmatpush.msra.mxu2 %v4993_v17 }
  0x9a   :  { %618 = vmatpush.msra.mxu0 %v574_v18  ;;  %490 = vmatpush.msra.mxu1 %v4996_v19  ;;  %v5126_v18 = vld [vmem:[%s8428_s8] sm:$0xff] }
  0x9b   :  { %526 = vmatpush.msra.mxu3 %v4998_v20  ;;  %507 = vmatpush.msra.mxu2 %v5002_v22 }
  0x9c   :  { %619 = vmatpush.msra.mxu0 %v570_v21  ;;  %491 = vmatpush.msra.mxu1 %v5006_v23  ;;  %v5132_v21 = vld [vmem:[#allocation3 + $0x188] sm:$0xff] }
  0x9d   :  { %527 = vmatpush.msra.mxu3 %v5008_v24  ;;  %3691 = vmatmul.msk.f32.gmra.mxu2 %vm163_vm0, %v4928_v58  ;;  %8933 = vst [vmem:[#allocation16_spill] sm:$0xff] %v5132_v21 }
  0x9e   :  { %3677 = vmatmul.msk.f32.gmra.mxu0 %vm163_vm0, %v5014_v25  ;;  %3699 = vmatmul.msk.f32.gmra.mxu3 %vm163_vm0, %v4928_v58  ;;  %v5094_v58 = vld [vmem:[#allocation3 + $0x1e8] sm:$0xff] }
  0x9f   :  { %3684 = vmatmul.msk.f32.gmra.mxu1 %vm163_vm0, %v4972_v11  ;;  %620 = vmatpush.msra.mxu0 %v566_v26  ;;  %8930 = vst [vmem:[#allocation13_spill] sm:$0xff] %v5094_v58  ;;  %v5138_v26 = vld [vmem:[#allocation8 + $0x18] sm:$0xff] }
  0xa0   :  { %492 = vmatpush.msra.mxu1 %v5018_v27  ;;  %508 = vmatpush.msra.mxu2 %v5024_v28 }
  0xa1   :  { %528 = vmatpush.msra.mxu3 %v5026_v29  ;;  %621 = vmatpush.msra.mxu0 %v562_v31  ;;  %v5145_v31 = vld [vmem:[#allocation3 + $0x168] sm:$0xff] }
  0xa2   :  { %493 = vmatpush.msra.mxu1 %v5032_v32  ;;  %509 = vmatpush.msra.mxu2 %v5035_v33  ;;  %8935 = vst [vmem:[#allocation18_spill] sm:$0xff] %v5145_v31 }
  0xa3   :  { %529 = vmatpush.msra.mxu3 %v5037_v34  ;;  %622 = vmatpush.msra.mxu0 %v558_v35  ;;  %v5147_v35 = vld [vmem:[#allocation3 + $0x1f8] sm:$0xff] }
  0xa4   :  { %494 = vmatpush.msra.mxu1 %v5041_v36  ;;  %510 = vmatpush.msra.mxu2 %v5045_v37  ;;  %8936 = vst [vmem:[#allocation19_spill] sm:$0xff] %v5147_v35 }
  0xa5   :  { %530 = vmatpush.msra.mxu3 %v5047_v38  ;;  %3692 = vmatmul.msk.f32.gmra.mxu2 %vm163_vm0, %v4972_v11 }
  0xa6   :  { %3678 = vmatmul.msk.f32.gmra.mxu0 %vm163_vm0, %v3670_v39  ;;  %3700 = vmatmul.msk.f32.gmra.mxu3 %vm163_vm0, %v4972_v11  ;;  %v5115_v11 = vld [vmem:[#allocation3 + $0x1a8] sm:$0xff] }
  0xa7   :  { %3685 = vmatmul.msk.f32.gmra.mxu1 %vm163_vm0, %v5014_v25  ;;  %623 = vmatpush.msra.mxu0 %v554_v40  ;;  %8932 = vst [vmem:[#allocation15_spill] sm:$0xff] %v5115_v11  ;;  %v5151_v40 = vld [vmem:[#allocation3 + $0x1d0] sm:$0xff] }
  0xa8   :  { %495 = vmatpush.msra.mxu1 %v5055_v41  ;;  %511 = vmatpush.msra.mxu2 %v5060_v42  ;;  %8937 = vst [vmem:[#allocation20_spill] sm:$0xff] %v5151_v40 }
  0xa9   :  { %531 = vmatpush.msra.mxu3 %v5062_v43  ;;  %624 = vmatpush.msra.mxu0 %v550_v44  ;;  %v5155_v44 = vld [vmem:[#allocation3 + $0x148] sm:$0xff] }
  0xaa   :  { %496 = vmatpush.msra.mxu1 %v5068_v45  ;;  %512 = vmatpush.msra.mxu2 %v5071_v47  ;;  %8938 = vst [vmem:[#allocation21_spill] sm:$0xff] %v5155_v44 }
  0xab   :  { %532 = vmatpush.msra.mxu3 %v5073_v48  ;;  %625 = vmatpush.msra.mxu0 %v546_v50  ;;  %v5157_v50 = vld [vmem:[#allocation3 + $0x1d8] sm:$0xff] }
  0xac   :  { %497 = vmatpush.msra.mxu1 %v5077_v52  ;;  %513 = vmatpush.msra.mxu2 %v5080_v54  ;;  %8939 = vst [vmem:[#allocation22_spill] sm:$0xff] %v5157_v50 }
  0xad   :  { %533 = vmatpush.msra.mxu3 %v5082_v56  ;;  %3693 = vmatmul.msk.f32.gmra.mxu2 %vm163_vm0, %v5014_v25 }
  0xae   :  { %478 = vmatmul.f32.vlgmr.msrb.gmra.mxu0 %v5087_v57  ;;  %3701 = vmatmul.msk.f32.gmra.mxu3 %vm163_vm0, %v5014_v25  ;;  %v5134_v25 = vld [vmem:[#allocation8 + $0x10] sm:$0xff] }
  0xaf   :  { %3686 = vmatmul.msk.f32.gmra.mxu1 %vm163_vm0, %v3670_v39  ;;  %514 = vmatpush.msra.mxu2 %v5096_v59 }
  0xb0   :  { %630 = vmatpush.msrb.mxu1 %v5094_v58  ;;  %534 = vmatpush.msra.mxu3 %v5101_v62 }
  0xb1   :  { %515 = vmatpush.msra.mxu2 %v5108_v4 }
  0xb2   :  { %631 = vmatpush.msrb.mxu1 %v5106_v0  ;;  %535 = vmatpush.msra.mxu3 %v5112_v8  ;;  %v5171_v0 = vld [vmem:[#allocation3 + $0x108] sm:$0xff] }
  0xb3   :  { %516 = vmatpush.msra.mxu2 %v5117_v13  ;;  %8943 = vst [vmem:[#allocation26_spill] sm:$0xff] %v5171_v0 }
  0xb4   :  { %632 = vmatpush.msrb.mxu1 %v5115_v11  ;;  %536 = vmatpush.msra.mxu3 %v5121_v16  ;;  %v5169_v11 = vld [vmem:[#allocation3 + $0x1b8] sm:$0xff] }
  0xb5   :  { %3694 = vmatmul.msk.f32.gmra.mxu2 %vm163_vm0, %v3670_v39  ;;  %8942 = vst [vmem:[#allocation25_spill] sm:$0xff] %v5169_v11 }
  0xb6   :  { %626 = vmatmul.f32.vlgmr.msra.gmra.mxu0 %v5126_v18  ;;  %3702 = vmatmul.msk.f32.gmra.mxu3 %vm163_vm0, %v3670_v39  ;;  %v5161_v39 = vld [vmem:[#allocation3 + $0x1b0] sm:$0xff] }
  0xb7   :  { %3687 = vmatmul.msk.f32.gmra.mxu1 %vm163_vm0, %v4909_v49  ;;  %517 = vmatpush.msra.mxu2 %v5134_v25  ;;  %8940 = vst [vmem:[#allocation23_spill] sm:$0xff] %v5161_v39 }
  0xb8   :  { %633 = vmatpush.msrb.mxu1 %v5132_v21  ;;  %537 = vmatpush.msra.mxu3 %v5138_v26  ;;  %v5164_v21 = vld [vmem:[#allocation3 + $0x128] sm:$0xff] }
  0xb9   :  { %650 = vmatpush.msrb.mxu2 %v5140_v30  ;;  %8941 = vst [vmem:[#allocation24_spill] sm:$0xff] %v5164_v21 }
  0xba   :  { %634 = vmatpush.msrb.mxu1 %v5145_v31  ;;  %670 = vmatpush.msrb.mxu3 %v5147_v35  ;;  %v5176_v31 = vld [vmem:[#allocation3 + $0x190] sm:$0xff]  ;;  %v5200_v35 = vld [vmem:[#allocation3 + $0x158] sm:$0xff] }
  0xbb   :  { %651 = vmatpush.msrb.mxu2 %v5151_v40  ;;  %8944 = vst [vmem:[#allocation27_spill] sm:$0xff] %v5176_v31  ;;  %v5193_v40 = vld [vmem:[#allocation3 + $0xc8] sm:$0xff] }
  0xbc   :  { %635 = vmatpush.msrb.mxu1 %v5155_v44  ;;  %671 = vmatpush.msrb.mxu3 %v5157_v50  ;;  %v5182_v44 = vld [vmem:[#allocation3 + $0x198] sm:$0xff]  ;;  %v5188_v50 = vld [vmem:[#allocation3 + $0x170] sm:$0xff]  ;;  %8949 = vst [vmem:[#allocation32_spill] sm:$0xff] %v5193_v40 }
  0xbd   :  { %652 = vmatpush.msrb.mxu2 %v5161_v39  ;;  %8945 = vst [vmem:[#allocation28_spill] sm:$0xff] %v5182_v44  ;;  %v5184_v39 = vld [vmem:[#allocation3 + $0xe8] sm:$0xff] }
  0xbe   :  { %3695 = vmatmul.msk.f32.gmra.mxu2 %vm163_vm0, %v4909_v49  ;;  %636 = vmatpush.msrb.mxu1 %v5164_v21  ;;  %8946 = vst [vmem:[#allocation29_spill] sm:$0xff] %v5184_v39  ;;  %v5191_v21 = vld [vmem:[#allocation3 + $0x178] sm:$0xff] }
  0xbf   :  { %3688 = vmatmul.msk.f32.gmra.mxu1 %vm163_vm0, %v4934_v60  ;;  %3703 = vmatmul.msk.f32.gmra.mxu3 %vm163_vm0, %v4909_v49  ;;  %8947 = vst [vmem:[#allocation30_spill] sm:$0xff] %v5188_v50  ;;  %v5197_v49 = vld [vmem:[#allocation3 + $0x150] sm:$0xff] }
  0xc0   :  { %672 = vmatpush.msrb.mxu3 %v5169_v11  ;;  %637 = vmatpush.msrb.mxu1 %v5171_v0  ;;  %8948 = vst [vmem:[#allocation31_spill] sm:$0xff] %v5191_v21  ;;  %v5205_v0 = vld [vmem:[#allocation3 + $0xa8] sm:$0xff] }
  0xc1   :  { %653 = vmatpush.msrb.mxu2 %v5176_v31  ;;  %8950 = vst [vmem:[#allocation33_spill] sm:$0xff] %v5197_v49  ;;  %v5207_v31 = vld [vmem:[#allocation3 + $0x130] sm:$0xff] }
  0xc2   :  { %673 = vmatpush.msrb.mxu3 %v5182_v44  ;;  %638 = vmatpush.msrb.mxu1 %v5184_v39  ;;  %8951 = vst [vmem:[#allocation34_spill] sm:$0xff] %v5200_v35  ;;  %v5212_v39 = vld [vmem:[#allocation3 + $0x138] sm:$0xff]  ;;  %v5236_v44 = vld [vmem:[#allocation3 + $0x48] sm:$0xff] }
  0xc3   :  { %654 = vmatpush.msrb.mxu2 %v5188_v50  ;;  %8952 = vst [vmem:[#allocation35_spill] sm:$0xff] %v5205_v0  ;;  %v5229_v50 = vld [vmem:[#allocation3 + $0xf0] sm:$0xff] }
  0xc4   :  { %674 = vmatpush.msrb.mxu3 %v5191_v21  ;;  %639 = vmatpush.msrb.mxu1 %v5193_v40  ;;  %8953 = vst [vmem:[#allocation36_spill] sm:$0xff] %v5207_v31  ;;  %v5218_v40 = vld [vmem:[#allocation3 + $0x88] sm:$0xff]  ;;  %v5224_v21 = vld [vmem:[#allocation3 + $0x118] sm:$0xff] }
  0xc5   :  { %655 = vmatpush.msrb.mxu2 %v5197_v49  ;;  %8954 = vst [vmem:[#allocation37_spill] sm:$0xff] %v5212_v39  ;;  %v5220_v49 = vld [vmem:[#allocation3 + $0x110] sm:$0xff] }
  0xc6   :  { %3696 = vmatmul.msk.f32.gmra.mxu2 %vm163_vm0, %v4934_v60  ;;  %675 = vmatpush.msrb.mxu3 %v5200_v35  ;;  %8955 = vst [vmem:[#allocation38_spill] sm:$0xff] %v5218_v40  ;;  %v5227_v35 = vld [vmem:[#allocation3 + $0x68] sm:$0xff] }
  0xc7   :  { %3689 = vmatmul.msk.f32.gmra.mxu1 %vm163_vm0, %v4937_v61  ;;  %3704 = vmatmul.msk.f32.gmra.mxu3 %vm163_vm0, %v4934_v60  ;;  %8956 = vst [vmem:[#allocation39_spill] sm:$0xff] %v5220_v49  ;;  %v5233_v60 = vld [vmem:[#allocation3 + $0xf8] sm:$0xff] }
  0xc8   :  { %640 = vmatpush.msrb.mxu1 %v5205_v0  ;;  %656 = vmatpush.msrb.mxu2 %v5207_v31  ;;  %8957 = vst [vmem:[#allocation40_spill] sm:$0xff] %v5224_v21  ;;  %v5241_v0 = vld [vmem:[#allocation3 + $0xd0] sm:$0xff] }
  0xc9   :  { %676 = vmatpush.msrb.mxu3 %v5212_v39  ;;  %8958 = vst [vmem:[#allocation41_spill] sm:$0xff] %v5227_v35  ;;  %v5243_v39 = vld [vmem:[#allocation3 + $0xd8] sm:$0xff] }
  0xca   :  { %8959 = vst [vmem:[#allocation42_spill] sm:$0xff] %v5229_v50  ;;  %641 = vmatpush.msrb.mxu1 %v5218_v40  ;;  %657 = vmatpush.msrb.mxu2 %v5220_v49  ;;  %v5248_v40 = vld [vmem:[#allocation3 + $0x28] sm:$0xff] }
  0xcb   :  { %8960 = vst [vmem:[#allocation43_spill] sm:$0xff] %v5233_v60  ;;  %677 = vmatpush.msrb.mxu3 %v5224_v21  ;;  %v5264_v21 = vld [vmem:[#allocation3 + $0x98] sm:$0xff] }
  0xcc   :  { %8961 = vst [vmem:[#allocation44_spill] sm:$0xff] %v5236_v44  ;;  %642 = vmatpush.msrb.mxu1 %v5227_v35  ;;  %658 = vmatpush.msrb.mxu2 %v5229_v50  ;;  %v5253_v35 = vld [vmem:[#allocation3 + $0xb0] sm:$0xff]  ;;  %v5255_v50 = vld [vmem:[#allocation3 + $0xb8] sm:$0xff] }
  0xcd   :  { %678 = vmatpush.msrb.mxu3 %v5233_v60  ;;  %8962 = vst [vmem:[#allocation45_spill] sm:$0xff] %v5241_v0  ;;  %v5259_v60 = vld [vmem:[#allocation3 + $0x8] sm:$0xff] }
  0xce   :  { %8963 = vst [vmem:[#allocation46_spill] sm:$0xff] %v5243_v39  ;;  %3697 = vmatmul.msk.f32.gmra.mxu2 %vm163_vm0, %v4937_v61  ;;  %643 = vmatpush.msrb.mxu1 %v5236_v44  ;;  %v5262_v44 = vld [vmem:[#allocation3 + $0x90] sm:$0xff] }
  0xcf   :  { %8964 = vst [vmem:[#allocation47_spill] sm:$0xff] %v5248_v40  ;;  %3705 = vmatmul.msk.f32.gmra.mxu3 %vm163_vm0, %v4937_v61  ;;  %498 = vmatmul.f32.vlgmr.msra.gmra.mxu1 %v5087_v57  ;;  %v5269_v61 = vld [vmem:[#allocation3 + $0x78] sm:$0xff] }
  0xd0   :  { %8965 = vst [vmem:[#allocation48_spill] sm:$0xff] %v5253_v35  ;;  %659 = vmatpush.msrb.mxu2 %v5241_v0  ;;  %679 = vmatpush.msrb.mxu3 %v5243_v39  ;;  %v5273_v39 = vld [vmem:[#allocation3 + $0x70] sm:$0xff]  ;;  %v5275_v0 = vld [vmem:[#allocation3 + $0x58] sm:$0xff] }
  0xd1   :  { %8966 = vst [vmem:[#allocation49_spill] sm:$0xff] %v5255_v50  ;;  %644 = vmatpush.msrb.mxu1 %v5248_v40  ;;  %v5281_v40 = vld [vmem:[#allocation3 + $0x50] sm:$0xff] }
  0xd2   :  { %8967 = vst [vmem:[#allocation50_spill] sm:$0xff] %v5259_v60  ;;  %660 = vmatpush.msrb.mxu2 %v5253_v35  ;;  %680 = vmatpush.msrb.mxu3 %v5255_v50 }
  0xd3   :  { %8968 = vst [vmem:[#allocation51_spill] sm:$0xff] %v5262_v44  ;;  %645 = vmatpush.msrb.mxu1 %v5259_v60  ;;  %v5283_v60 = vld [vmem:[#allocation3 + $0x38] sm:$0xff] }
  0xd4   :  { %8969 = vst [vmem:[#allocation52_spill] sm:$0xff] %v5264_v21  ;;  %661 = vmatpush.msrb.mxu2 %v5262_v44  ;;  %681 = vmatpush.msrb.mxu3 %v5264_v21  ;;  %v5287_v21 = vld [vmem:[#allocation3 + $0x30] sm:$0xff]  ;;  %v5289_v44 = vld [vmem:[#allocation3 + $0x18] sm:$0xff] }
  0xd5   :  { %8970 = vst [vmem:[#allocation53_spill] sm:$0xff] %v5269_v61 }
  0xd6   :  { %8971 = vst [vmem:[#allocation54_spill] sm:$0xff] %v5273_v39  ;;  %518 = vmatmul.f32.vlgmr.msra.gmra.mxu2 %v5087_v57  ;;  %682 = vmatpush.msrb.mxu3 %v5269_v61  ;;  %v5293_v61 = vld [vmem:[#allocation3 + $0x10] sm:$0xff] }
  0xd7   :  { %8972 = vst [vmem:[#allocation55_spill] sm:$0xff] %v5275_v0  ;;  %538 = vmatmul.f32.vlgmr.msra.gmra.mxu3 %v5087_v57  ;;  %646 = vmatmul.f32.vlgmr.msrb.gmra.mxu1 %v5126_v18 }
  0xd8   :  { %8973 = vst [vmem:[#allocation56_spill] sm:$0xff] %v5281_v40  ;;  %662 = vmatpush.msrb.mxu2 %v5273_v39  ;;  %683 = vmatpush.msrb.mxu3 %v5275_v0 }
  0xd9   :  { %8974 = vst [vmem:[#allocation57_spill] sm:$0xff] %v5283_v60 }
  0xda   :  { %8975 = vst [vmem:[#allocation58_spill] sm:$0xff] %v5287_v21  ;;  %663 = vmatpush.msrb.mxu2 %v5281_v40  ;;  %684 = vmatpush.msrb.mxu3 %v5283_v60 }
  0xdb   :  { %8976 = vst [vmem:[#allocation59_spill] sm:$0xff] %v5289_v44 }
  0xdc   :  { %8977 = vst [vmem:[#allocation60_spill] sm:$0xff] %v5293_v61  ;;  %664 = vmatpush.msrb.mxu2 %v5287_v21  ;;  %685 = vmatpush.msrb.mxu3 %v5289_v44 }
  0xde   :  { %665 = vmatpush.msrb.mxu2 %v5293_v61 }
  0xdf   :  { %666 = vmatmul.f32.vlgmr.msrb.gmra.mxu2 %v5126_v18  ;;  %686 = vmatmul.f32.vlgmr.msrb.gmra.mxu3 %v5126_v18 }
 0x102   :  { %v5300_v0 = vpop.f32.mrf.mxu1 }
 0x103   :  { %v205_v57 = vpop.f32.mrf.mxu0  ;;  %8978 = vst [vmem:[#allocation61_spill] sm:$0xff] %v5300_v0 }
 0x10b   :  { %v5304_v40 = vpop.f32.mrf.mxu0 }
 0x10c   :  { %v5302_v39 = vpop.f32.mrf.mxu1  ;;  %8979 = vst [vmem:[#allocation62_spill] sm:$0xff] %v5304_v40 }
 0x110   :  { %v5306_v60 = vpop.f32.mrf.mxu2 }
 0x111   :  { %8980 = vst [vmem:[#allocation63_spill] sm:$0xff] %v5306_v60  ;;  %v5308_v50 = vpop.f32.mrf.mxu3 }
 0x112   :  { %8981 = vst [vmem:[#allocation64_spill] sm:$0xff] %v5308_v50 }
 0x113   :  { %v5312_v44 = vpop.f32.mrf.mxu0 }
 0x114   :  { %v5310_v21 = vpop.f32.mrf.mxu1  ;;  %8983 = vst [vmem:[#allocation66_spill] sm:$0xff] %v5312_v44 }
 0x115   :  { %8982 = vst [vmem:[#allocation65_spill] sm:$0xff] %v5310_v21 }
 0x118   :  { %v5314_v61 = vpop.f32.mrf.mxu2 }
 0x119   :  { %v5316_v35 = vpop.f32.mrf.mxu3 }
 0x11b   :  { %v5320_v49 = vpop.f32.mrf.mxu0 }
 0x11c   :  { %v5318_v18 = vpop.f32.mrf.mxu1  ;;  %8985 = vst [vmem:[#allocation68_spill] sm:$0xff] %v5320_v49 }
 0x11d   :  { %8984 = vst [vmem:[#allocation67_spill] sm:$0xff] %v5318_v18 }
 0x120   :  { %v5322_v0 = vpop.f32.mrf.mxu2 }
 0x121   :  { %8986 = vst [vmem:[#allocation69_spill] sm:$0xff] %v5322_v0  ;;  %v5324_v31 = vpop.f32.mrf.mxu3 }
 0x122   :  { %8987 = vst [vmem:[#allocation70_spill] sm:$0xff] %v5324_v31 }
 0x123   :  { %v5332_v21 = vpop.f32.mrf.mxu0 }
 0x124   :  { %v5326_v40 = vpop.f32.mrf.mxu1  ;;  %8991 = vst [vmem:[#allocation74_spill] sm:$0xff] %v5332_v21 }
 0x125   :  { %8988 = vst [vmem:[#allocation71_spill] sm:$0xff] %v5326_v40 }
 0x128   :  { %v5328_v60 = vpop.f32.mrf.mxu2 }
 0x129   :  { %8989 = vst [vmem:[#allocation72_spill] sm:$0xff] %v5328_v60  ;;  %v5330_v50 = vpop.f32.mrf.mxu3 }
 0x12a   :  { %8990 = vst [vmem:[#allocation73_spill] sm:$0xff] %v5330_v50 }
 0x12b   :  { %v5342_v49 = vpop.f32.mrf.mxu0 }
 0x12c   :  { %v5334_v44 = vpop.f32.mrf.mxu1  ;;  %8996 = vst [vmem:[#allocation79_spill] sm:$0xff] %v5342_v49 }
 0x12d   :  { %8992 = vst [vmem:[#allocation75_spill] sm:$0xff] %v5334_v44  ;;  %v5354_v44 = vld [vmem:[#allocation6 + $0x1e0] sm:$0xff] }
 0x12e   :  { %9002 = vst [vmem:[#allocation85_spill] sm:$0xff] %v5354_v44  ;;  %821 = vmatpush.msrb.mxu0 %v5354_v44 }
 0x130   :  { %v5336_v11 = vpop.f32.mrf.mxu2 }
 0x131   :  { %8993 = vst [vmem:[#allocation76_spill] sm:$0xff] %v5336_v11  ;;  %v5338_v30 = vpop.f32.mrf.mxu3  ;;  %v5356_v11 = vld [vmem:[#allocation6 + $0x1e8] sm:$0xff] }
 0x132   :  { %8994 = vst [vmem:[#allocation77_spill] sm:$0xff] %v5338_v30  ;;  %v5358_v30 = vld [vmem:[#allocation6 + $0x1f0] sm:$0xff]  ;;  %841 = vmatpush.msra.mxu1 %v5356_v11 }
 0x133   :  { %v627_v60 = vpop.f32.mrf.mxu0  ;;  %9003 = vst [vmem:[#allocation86_spill] sm:$0xff] %v5356_v11  ;;  %861 = vmatpush.msra.mxu2 %v5358_v30 }
 0x134   :  { %v5340_v18 = vpop.f32.mrf.mxu1  ;;  %v690_v21 = vadd.f32 %v627_v60, %v205_v57  ;;  %9004 = vst [vmem:[#allocation87_spill] sm:$0xff] %v5358_v30  ;;  %v5368_v60 = vld [vmem:[#allocation6 + $0x1c0] sm:$0xff]  ;;  %v5370_v57 = vld [vmem:[#allocation6 + $0x1c8] sm:$0xff]  ;;  %v5452_v30 = vld [vmem:[#allocation6 + $0x110] sm:$0xff] }
 0x135   :  { %8995 = vst [vmem:[#allocation78_spill] sm:$0xff] %v5340_v18  ;;  %822 = vmatpush.msrb.mxu0 %v5368_v60  ;;  %842 = vmatpush.msra.mxu1 %v5370_v57 }
 0x136   :  { %9007 = vst [vmem:[#allocation90_spill] sm:$0xff] %v5368_v60 }
 0x137   :  { %9008 = vst [vmem:[#allocation91_spill] sm:$0xff] %v5370_v57 }
 0x138   :  { %v5344_v0 = vpop.f32.mrf.mxu2  ;;  %9037 = vst [vmem:[#allocation120_spill] sm:$0xff] %v5452_v30 }
 0x139   :  { %8997 = vst [vmem:[#allocation80_spill] sm:$0xff] %v5344_v0  ;;  %v5346_v31 = vpop.f32.mrf.mxu3  ;;  %v5382_v0 = vld [vmem:[#allocation6 + $0x1a8] sm:$0xff] }
 0x13a   :  { %8998 = vst [vmem:[#allocation81_spill] sm:$0xff] %v5346_v31  ;;  %v5364_v31 = vld [vmem:[#allocation6 + $0x1f8] sm:$0xff]  ;;  %843 = vmatpush.msra.mxu1 %v5382_v0 }
 0x13b   :  { %9006 = vst [vmem:[#allocation89_spill] sm:$0xff] %v5364_v31  ;;  %881 = vmatpush.msra.mxu3 %v5364_v31  ;;  %v5384_v31 = vld [vmem:[#allocation6 + $0x1b0] sm:$0xff] }
 0x13c   :  { %v5348_v40 = vpop.f32.mrf.mxu1  ;;  %9012 = vst [vmem:[#allocation95_spill] sm:$0xff] %v5382_v0  ;;  %v5402_v0 = vld [vmem:[#allocation6 + $0x190] sm:$0xff] }
 0x13d   :  { %8999 = vst [vmem:[#allocation82_spill] sm:$0xff] %v5348_v40  ;;  %v5372_v40 = vld [vmem:[#allocation6 + $0x1d0] sm:$0xff] }
 0x13e   :  { %9009 = vst [vmem:[#allocation92_spill] sm:$0xff] %v5372_v40  ;;  %862 = vmatpush.msra.mxu2 %v5372_v40  ;;  %v5394_v40 = vld [vmem:[#allocation6 + $0x180] sm:$0xff] }
 0x13f   :  { %9013 = vst [vmem:[#allocation96_spill] sm:$0xff] %v5384_v31 }
 0x140   :  { %863 = vmatpush.msra.mxu2 %v5384_v31  ;;  %9016 = vst [vmem:[#allocation99_spill] sm:$0xff] %v5394_v40  ;;  %v5412_v31 = vld [vmem:[#allocation6 + $0x170] sm:$0xff] }
 0x141   :  { %v5350_v50 = vpop.f32.mrf.mxu2  ;;  %9019 = vst [vmem:[#allocation102_spill] sm:$0xff] %v5402_v0 }
 0x142   :  { %9000 = vst [vmem:[#allocation83_spill] sm:$0xff] %v5350_v50  ;;  %v5352_v58 = vpop.f32.mrf.mxu3  ;;  %v5380_v50 = vld [vmem:[#allocation6 + $0x1a0] sm:$0xff]  ;;  %864 = vmatpush.msra.mxu2 %v5402_v0 }
 0x143   :  { %9001 = vst [vmem:[#allocation84_spill] sm:$0xff] %v5352_v58  ;;  %v3706_v58 = vmul.f32 -1.442695, %v690_v21  ;;  %823 = vmatpush.msrb.mxu0 %v5380_v50  ;;  %v5388_v21 = vld [vmem:[#allocation6 + $0x1b8] sm:$0xff]  ;;  %v5422_v0 = vld [vmem:[#allocation6 + $0x140] sm:$0xff] }
 0x144   :  { %v5360_v18 = vpop.f32.mrf.mxu1  ;;  %9011 = vst [vmem:[#allocation94_spill] sm:$0xff] %v5380_v50  ;;  %v5404_v50 = vld [vmem:[#allocation6 + $0x198] sm:$0xff]  ;;  %865 = vmatpush.msra.mxu2 %v5412_v31 }
 0x145   :  { %9005 = vst [vmem:[#allocation88_spill] sm:$0xff] %v5360_v18  ;;  %v5376_v18 = vld [vmem:[#allocation6 + $0x1d8] sm:$0xff]  ;;  %3778 = vpow2.f32 %v3706_v58  ;;  %824 = vmatpush.msrb.mxu0 %v5394_v40 }
 0x146   :  { %9010 = vst [vmem:[#allocation93_spill] sm:$0xff] %v5376_v18  ;;  %882 = vmatpush.msra.mxu3 %v5376_v18  ;;  %v5396_v18 = vld [vmem:[#allocation6 + $0x188] sm:$0xff]  ;;  %v5430_v40 = vld [vmem:[#allocation6 + $0x158] sm:$0xff] }
 0x147   :  { %9014 = vst [vmem:[#allocation97_spill] sm:$0xff] %v5388_v21  ;;  %844 = vmatpush.msra.mxu1 %v5396_v18 }
 0x148   :  { %883 = vmatpush.msra.mxu3 %v5388_v21  ;;  %9017 = vst [vmem:[#allocation100_spill] sm:$0xff] %v5396_v18  ;;  %v5410_v21 = vld [vmem:[#allocation6 + $0x168] sm:$0xff]  ;;  %v5426_v18 = vld [vmem:[#allocation6 + $0x150] sm:$0xff] }
 0x149   :  { %v5390_v60 = vpop.f32.mrf.mxu2  ;;  %9020 = vst [vmem:[#allocation103_spill] sm:$0xff] %v5404_v50  ;;  %845 = vmatpush.msra.mxu1 %v5410_v21  ;;  %866 = vmatpush.msra.mxu2 %v5426_v18 }
 0x14a   :  { %9015 = vst [vmem:[#allocation98_spill] sm:$0xff] %v5390_v60  ;;  %v5398_v57 = vpop.f32.mrf.mxu3  ;;  %884 = vmatpush.msra.mxu3 %v5404_v50  ;;  %v5408_v60 = vld [vmem:[#allocation6 + $0x160] sm:$0xff]  ;;  %v5424_v50 = vld [vmem:[#allocation6 + $0x148] sm:$0xff] }
 0x14b   :  { %9018 = vst [vmem:[#allocation101_spill] sm:$0xff] %v5398_v57  ;;  %825 = vmatpush.msrb.mxu0 %v5408_v60  ;;  %v5418_v57 = vld [vmem:[#allocation6 + $0x178] sm:$0xff]  ;;  %846 = vmatpush.msra.mxu1 %v5424_v50 }
 0x14c   :  { %9021 = vst [vmem:[#allocation104_spill] sm:$0xff] %v5408_v60  ;;  %v5414_v58 = vpop.f32.mrf.mxu1  ;;  %885 = vmatpush.msra.mxu3 %v5418_v57  ;;  %v3779_v60 = vpop.eup %3778 }
 0x14d   :  { %9022 = vst [vmem:[#allocation105_spill] sm:$0xff] %v5410_v21  ;;  %826 = vmatpush.msrb.mxu0 %v5422_v0  ;;  %v5434_v21 = vld [vmem:[#allocation6 + $0x120] sm:$0xff] }
 0x14e   :  { %9023 = vst [vmem:[#allocation106_spill] sm:$0xff] %v5412_v31  ;;  %886 = vmatpush.msra.mxu3 %v5430_v40  ;;  %v5436_v31 = vld [vmem:[#allocation6 + $0x128] sm:$0xff] }
 0x14f   :  { %9024 = vst [vmem:[#allocation107_spill] sm:$0xff] %v5414_v58  ;;  %827 = vmatpush.msrb.mxu0 %v5434_v21  ;;  %847 = vmatpush.msra.mxu1 %v5436_v31  ;;  %v5574_v58 = vld [vmem:[#allocation8 + $0x1e0] sm:$0xff] }
 0x150   :  { %9025 = vst [vmem:[#allocation108_spill] sm:$0xff] %v5418_v57  ;;  %v5438_v57 = vld [vmem:[#allocation6 + $0x130] sm:$0xff] }
 0x151   :  { %9026 = vst [vmem:[#allocation109_spill] sm:$0xff] %v5422_v0  ;;  %v5442_v0 = vld [vmem:[#allocation6 + $0x138] sm:$0xff]  ;;  %867 = vmatpush.msra.mxu2 %v5438_v57 }
 0x152   :  { %9027 = vst [vmem:[#allocation110_spill] sm:$0xff] %v5424_v50  ;;  %v5444_v50 = vpop.f32.mrf.mxu2  ;;  %887 = vmatpush.msra.mxu3 %v5442_v0  ;;  %v5454_v11 = vpop.f32.mrf.mxu3 }
 0x153   :  { %9028 = vst [vmem:[#allocation111_spill] sm:$0xff] %v5426_v18  ;;  %v5450_v18 = vld [vmem:[#allocation6 + $0x108] sm:$0xff]  ;;  %868 = vmatpush.msra.mxu2 %v5452_v30 }
 0x154   :  { %9029 = vst [vmem:[#allocation112_spill] sm:$0xff] %v5430_v40  ;;  %v5448_v40 = vld [vmem:[#allocation6 + $0x100] sm:$0xff]  ;;  %848 = vmatpush.msra.mxu1 %v5450_v18  ;;  %v647_v44 = vpop.f32.mrf.mxu1  ;;  %v5479_v30 = vld [vmem:[#allocation6 + $0xc8] sm:$0xff] }
 0x155   :  { %9030 = vst [vmem:[#allocation113_spill] sm:$0xff] %v5434_v21  ;;  %828 = vmatpush.msrb.mxu0 %v5448_v40  ;;  %v5460_v21 = vadd.f32 1.0, %v3779_v60  ;;  %v691_v60 = vadd.f32 %v647_v44, %v5302_v39  ;;  %v5490_v44 = vld [vmem:[#allocation6 + $0xa0] sm:$0xff]  ;;  %v5492_v39 = vld [vmem:[#allocation6 + $0xa8] sm:$0xff] }
 0x156   :  { %9031 = vst [vmem:[#allocation114_spill] sm:$0xff] %v5436_v31  ;;  %v5458_v31 = vld [vmem:[#allocation6 + $0x118] sm:$0xff] }
 0x157   :  { %9032 = vst [vmem:[#allocation115_spill] sm:$0xff] %v5438_v57  ;;  %888 = vmatpush.msra.mxu3 %v5458_v31  ;;  %v5468_v57 = vld [vmem:[#allocation6 + $0xf0] sm:$0xff]  ;;  %3780 = vrcp.f32 %v5460_v21  ;;  %vm711_vm11 = vweird.f32 %v5460_v21 }
 0x158   :  { %9033 = vst [vmem:[#allocation116_spill] sm:$0xff] %v5442_v0  ;;  %v5466_v0 = vld [vmem:[#allocation6 + $0xe8] sm:$0xff]  ;;  %869 = vmatpush.msra.mxu2 %v5468_v57 }
 0x159   :  { %9034 = vst [vmem:[#allocation117_spill] sm:$0xff] %v5444_v50  ;;  %v5464_v50 = vld [vmem:[#allocation6 + $0xe0] sm:$0xff]  ;;  %849 = vmatpush.msra.mxu1 %v5466_v0 }
 0x15a   :  { %9035 = vst [vmem:[#allocation118_spill] sm:$0xff] %v5448_v40  ;;  %829 = vmatpush.msrb.mxu0 %v5464_v50  ;;  %v5548_v40 = vld [vmem:[#allocation6 + $0x30] sm:$0xff] }
 0x15b   :  { %9036 = vst [vmem:[#allocation119_spill] sm:$0xff] %v5450_v18  ;;  %v5481_v18 = vld [vmem:[#allocation6 + $0xd0] sm:$0xff]  ;;  %850 = vmatpush.msra.mxu1 %v5479_v30 }
 0x15c   :  { %9038 = vst [vmem:[#allocation121_spill] sm:$0xff] %v5454_v11  ;;  %v5472_v11 = vld [vmem:[#allocation6 + $0xf8] sm:$0xff]  ;;  %870 = vmatpush.msra.mxu2 %v5481_v18 }
 0x15d   :  { %9039 = vst [vmem:[#allocation122_spill] sm:$0xff] %v5458_v31  ;;  %889 = vmatpush.msra.mxu3 %v5472_v11  ;;  %v5477_v31 = vld [vmem:[#allocation6 + $0xc0] sm:$0xff]  ;;  %851 = vmatpush.msra.mxu1 %v5492_v39 }
 0x15e   :  { %9040 = vst [vmem:[#allocation123_spill] sm:$0xff] %v5464_v50  ;;  %830 = vmatpush.msrb.mxu0 %v5477_v31  ;;  %v5485_v50 = vld [vmem:[#allocation6 + $0xd8] sm:$0xff] }
 0x15f   :  { %9041 = vst [vmem:[#allocation124_spill] sm:$0xff] %v5466_v0  ;;  %v3707_v0 = vmul.f32 -1.442695, %v691_v60  ;;  %890 = vmatpush.msra.mxu3 %v5485_v50  ;;  %v5504_v60 = vld [vmem:[#allocation6 + $0x80] sm:$0xff] }
 0x160   :  { %9042 = vst [vmem:[#allocation125_spill] sm:$0xff] %v5468_v57  ;;  %831 = vmatpush.msrb.mxu0 %v5490_v44  ;;  %v5510_v57 = vpop.f32.mrf.mxu3 }
 0x161   :  { %9043 = vst [vmem:[#allocation126_spill] sm:$0xff] %v5472_v11  ;;  %v5494_v11 = vld [vmem:[#allocation6 + $0xb0] sm:$0xff]  ;;  %3782 = vpow2.f32 %v3707_v0  ;;  %v5518_v0 = vld [vmem:[#allocation6 + $0x60] sm:$0xff] }
 0x162   :  { %9044 = vst [vmem:[#allocation127_spill] sm:$0xff] %v5477_v31  ;;  %v5500_v31 = vpop.f32.mrf.mxu2  ;;  %871 = vmatpush.msra.mxu2 %v5494_v11  ;;  %832 = vmatpush.msrb.mxu0 %v5504_v60 }
 0x163   :  { %9045 = vst [vmem:[#allocation128_spill] sm:$0xff] %v5479_v30  ;;  %v5498_v30 = vld [vmem:[#allocation6 + $0xb8] sm:$0xff] }
 0x164   :  { %9046 = vst [vmem:[#allocation129_spill] sm:$0xff] %v5481_v18  ;;  %891 = vmatpush.msra.mxu3 %v5498_v30  ;;  %v5508_v18 = vld [vmem:[#allocation6 + $0x90] sm:$0xff]  ;;  %833 = vmatpush.msrb.mxu0 %v5518_v0 }
 0x165   :  { %9047 = vst [vmem:[#allocation130_spill] sm:$0xff] %v5485_v50  ;;  %v5506_v50 = vld [vmem:[#allocation6 + $0x88] sm:$0xff]  ;;  %872 = vmatpush.msra.mxu2 %v5508_v18 }
 0x166   :  { %9048 = vst [vmem:[#allocation131_spill] sm:$0xff] %v5490_v44  ;;  %852 = vmatpush.msra.mxu1 %v5506_v50  ;;  %v5526_v44 = vld [vmem:[#allocation6 + $0x78] sm:$0xff] }
 0x167   :  { %9049 = vst [vmem:[#allocation132_spill] sm:$0xff] %v5492_v39  ;;  %v5514_v39 = vld [vmem:[#allocation6 + $0x98] sm:$0xff] }
 0x168   :  { %9050 = vst [vmem:[#allocation133_spill] sm:$0xff] %v5494_v11  ;;  %892 = vmatpush.msra.mxu3 %v5514_v39  ;;  %v5522_v11 = vld [vmem:[#allocation6 + $0x70] sm:$0xff] }
 0x169   :  { %9051 = vst [vmem:[#allocation134_spill] sm:$0xff] %v5498_v30  ;;  %v5520_v30 = vld [vmem:[#allocation6 + $0x68] sm:$0xff]  ;;  %873 = vmatpush.msra.mxu2 %v5522_v11 }
 0x16a   :  { %9052 = vst [vmem:[#allocation135_spill] sm:$0xff] %v5500_v31  ;;  %853 = vmatpush.msra.mxu1 %v5520_v30  ;;  %893 = vmatpush.msra.mxu3 %v5526_v44 }
 0x16b   :  { %9053 = vst [vmem:[#allocation136_spill] sm:$0xff] %v5504_v60  ;;  %v5528_v60 = vpop.eup %3780 }
 0x16c   :  { %9054 = vst [vmem:[#allocation137_spill] sm:$0xff] %v5506_v50  ;;  %v5536_v50 = vld [vmem:[#allocation6 + $0x50] sm:$0xff]  ;;  %vm712_vm9 = vweird.f32 %v5528_v60 }
 0x16d   :  { %9055 = vst [vmem:[#allocation138_spill] sm:$0xff] %v5508_v18  ;;  %v5532_v18 = vld [vmem:[#allocation6 + $0x40] sm:$0xff]  ;;  %874 = vmatpush.msra.mxu2 %v5536_v50  ;;  %vm5623_vm13 = vmor %vm711_vm11, %vm712_vm9 }
 0x16e   :  { %9056 = vst [vmem:[#allocation139_spill] sm:$0xff] %v5510_v57  ;;  %834 = vmatpush.msrb.mxu0 %v5532_v18  ;;  %v707_v57 = vmul.f32 %v5528_v60, %v5460_v21 }
 0x16f   :  { %9057 = vst [vmem:[#allocation140_spill] sm:$0xff] %v5514_v39  ;;  %v5534_v39 = vld [vmem:[#allocation6 + $0x48] sm:$0xff]  ;;  %875 = vmatpush.msra.mxu2 %v5548_v40 }
 0x170   :  { %9058 = vst [vmem:[#allocation141_spill] sm:$0xff] %v5518_v0  ;;  %854 = vmatpush.msra.mxu1 %v5534_v39  ;;  %v5540_v0 = vld [vmem:[#allocation6 + $0x58] sm:$0xff] }
 0x171   :  { %9059 = vst [vmem:[#allocation142_spill] sm:$0xff] %v5520_v30  ;;  %v3783_v30 = vpop.eup %3782  ;;  %894 = vmatpush.msra.mxu3 %v5540_v0 }
 0x172   :  { %9060 = vst [vmem:[#allocation143_spill] sm:$0xff] %v5522_v11  ;;  %v5544_v11 = vld [vmem:[#allocation6 + $0x20] sm:$0xff]  ;;  %v5552_v31 = vadd.f32 1.0, %v3783_v30  ;;  %v667_v30 = vpop.f32.mrf.mxu2 }
 0x173   :  { %9061 = vst [vmem:[#allocation144_spill] sm:$0xff] %v5526_v44  ;;  %v5546_v44 = vld [vmem:[#allocation6 + $0x28] sm:$0xff]  ;;  %835 = vmatpush.msrb.mxu0 %v5544_v11 }
 0x174   :  { %9062 = vst [vmem:[#allocation145_spill] sm:$0xff] %v5532_v18  ;;  %855 = vmatpush.msra.mxu1 %v5546_v44  ;;  %v5564_v18 = vld [vmem:[#allocation6 + $0x10] sm:$0xff]  ;;  %3784 = vrcp.f32 %v5552_v31  ;;  %vm726_vm12 = vweird.f32 %v5552_v31 }
 0x175   :  { %9063 = vst [vmem:[#allocation146_spill] sm:$0xff] %v5534_v39  ;;  %v5556_v39 = vld [vmem:[#allocation6 + $0x38] sm:$0xff]  ;;  %876 = vmatpush.msra.mxu2 %v5564_v18 }
 0x176   :  { %9064 = vst [vmem:[#allocation147_spill] sm:$0xff] %v5536_v50  ;;  %895 = vmatpush.msra.mxu3 %v5556_v39  ;;  %v5562_v50 = vld [vmem:[#allocation6 + $0x8] sm:$0xff] }
 0x177   :  { %9065 = vst [vmem:[#allocation148_spill] sm:$0xff] %v5540_v0  ;;  %v5560_v0 = vld [vmem:[#allocation6] sm:$0xff]  ;;  %856 = vmatpush.msra.mxu1 %v5562_v50  ;;  %1004 = vmatpush.msrb.mxu2 %v4939_v63 }
 0x178   :  { %9066 = vst [vmem:[#allocation149_spill] sm:$0xff] %v5544_v11  ;;  %836 = vmatpush.msrb.mxu0 %v5560_v0  ;;  %v692_v11 = vadd.f32 %v667_v30, %v5314_v61 }
 0x179   :  { %9067 = vst [vmem:[#allocation150_spill] sm:$0xff] %v5546_v44  ;;  %v5569_v44 = vld [vmem:[#allocation6 + $0x18] sm:$0xff]  ;;  %984 = vmatpush.msrb.mxu1 %v4906_v46  ;;  %1005 = vmatpush.msrb.mxu2 %v4954_v3 }
 0x17a   :  { %9068 = vst [vmem:[#allocation151_spill] sm:$0xff] %v5548_v40  ;;  %896 = vmatpush.msra.mxu3 %v5569_v44  ;;  %v687_v40 = vpop.f32.mrf.mxu3  ;;  %964 = vmatpush.msra.mxu0 %v5574_v58  ;;  %v3708_v49 = vmul.f32 -1.442695, %v692_v11  ;;  %v5588_v11 = vld [vmem:[#allocation8 + $0x1a0] sm:$0xff] }
 0x17b   :  { %9069 = vst [vmem:[#allocation152_spill] sm:$0xff] %v5556_v39  ;;  %v708_v39 = vsub.f32 1.0, %v707_v57  ;;  %985 = vmatpush.msrb.mxu1 %v4918_v51  ;;  %v693_v61 = vadd.f32 %v687_v40, %v5316_v35  ;;  %v3785_v57 = vpop.eup %3784  ;;  %1006 = vmatpush.msrb.mxu2 %v4962_v7  ;;  %v5595_v51 = vld [vmem:[#allocation8 + $0x180] sm:$0xff]  ;;  %v715_v35 = vand.u32 2147483647, %v5460_v21 }
 0x17c   :  { %9070 = vst [vmem:[#allocation153_spill] sm:$0xff] %v5562_v50  ;;  %1024 = vmatpush.msrb.mxu3 %v4948_v2  ;;  %v5580_v50 = vld [vmem:[#allocation8 + $0x1c0] sm:$0xff]  ;;  %3786 = vpow2.f32 %v3708_v49  ;;  %v722_v63 = vmul.f32 %v3785_v57, %v5552_v31  ;;  %vm727_vm10 = vweird.f32 %v3785_v57 }
 0x17d   :  { %965 = vmatpush.msra.mxu0 %v5580_v50  ;;  %v709_v46 = vmul.f32 %v5528_v60, %v708_v39  ;;  %986 = vmatpush.msrb.mxu1 %v4922_v53  ;;  %3788 = vtanh.f32 %v693_v61  ;;  %v732_v53 = vand.u32 2147483648, %v5552_v31  ;;  %v5616_v40 = vld [vmem:[#allocation8 + $0x140] sm:$0xff]  ;;  %vm5630_vm14 = vmor %vm726_vm12, %vm727_vm10  ;;  %vm716_vm0 = vcmp.eq.f32.partialorder %v715_v35, 8.507059e+37  ;;  %v9088_v35 = vld [vmem:[#allocation30_spill] sm:$0xff] }
 0x17e   :  { %1025 = vmatpush.msrb.mxu3 %v4960_v6  ;;  %v723_v2 = vsub.f32 1.0, %v722_v63  ;;  %1007 = vmatpush.msrb.mxu2 %v4977_v12  ;;  %v5604_v6 = vld [vmem:[#allocation8 + $0x160] sm:$0xff]  ;;  %v730_v12 = vand.u32 2147483647, %v5552_v31  ;;  %v9081_v63 = vld [vmem:[#allocation15_spill] sm:$0xff] }
 0x17f   :  { %966 = vmatpush.msra.mxu0 %v5588_v11  ;;  %987 = vmatpush.msrb.mxu1 %v4925_v55  ;;  %v710_v3 = vadd.f32 %v5528_v60, %v709_v46  ;;  %v733_v49 = vor.u32 1.1754944e-38, %v732_v53  ;;  %v5649_v61 = vld [vmem:[#allocation8 + $0x100] sm:$0xff]  ;;  %v9083_v53 = vld [vmem:[#allocation25_spill] sm:$0xff] }
 0x180   :  { %1026 = vmatpush.msrb.mxu3 %v4969_v10  ;;  %v724_v55 = vmul.f32 %v3785_v57, %v723_v2  ;;  %v717_v10 = vand.u32 2147483648, %v5460_v21  ;;  %1008 = vmatpush.msrb.mxu2 %v4993_v17  ;;  %v5641_v21 = vld [vmem:[#allocation8 + $0x120] sm:$0xff]  ;;  %vm731_vm15 = vcmp.eq.f32.partialorder %v730_v12, 8.507059e+37  ;;  %v9082_v2 = vld [vmem:[#allocation23_spill] sm:$0xff] }
 0x181   :  { %967 = vmatpush.msra.mxu0 %v5595_v51  ;;  %988 = vmatpush.msrb.mxu1 %v4946_v1  ;;  %v714_v31 = vsel %vm5623_vm13, %v5528_v60, %v710_v3  ;;  %v5655_v46 = vld [vmem:[#allocation8 + $0xe0] sm:$0xff]  ;;  %v9089_v1 = vld [vmem:[#allocation31_spill] sm:$0xff] }
 0x182   :  { %1027 = vmatpush.msrb.mxu3 %v4987_v15  ;;  %v3787_v7 = vpop.eup %3786  ;;  %v725_v17 = vadd.f32 %v3785_v57, %v724_v55  ;;  %1009 = vmatpush.msrb.mxu2 %v5002_v22  ;;  %v5734_v3 = vld [vmem:[#allocation3 + $0x180] sm:$0xff]  ;;  %v9085_v55 = vld [vmem:[#allocation27_spill] sm:$0xff] }
 0x183   :  { %968 = vmatpush.msra.mxu0 %v5604_v6  ;;  %v5612_v15 = vadd.f32 1.0, %v3787_v7  ;;  %989 = vmatpush.msrb.mxu1 %v4958_v5  ;;  %v395_v5 = vld [vmem:[%s8429_s9] sm:$0xff]  ;;  %v3789_v22 = vpop.eup %3788 }
 0x184   :  { %1028 = vmatpush.msrb.mxu3 %v4998_v20  ;;  %v729_v39 = vsel %vm5630_vm14, %v3785_v57, %v725_v17  ;;  %1010 = vmatpush.msrb.mxu2 %v5024_v28  ;;  %v9084_v7 = vld [vmem:[#allocation16_spill] sm:$0xff]  ;;  %v9090_v20 = vld [vmem:[#allocation21_spill] sm:$0xff] }
 0x185   :  { %969 = vmatpush.msra.mxu0 %v5616_v40  ;;  %3790 = vrcp.f32 %v5612_v15  ;;  %990 = vmatpush.msrb.mxu1 %v4967_v9  ;;  %v734_v30 = vsel %vm731_vm15, %v733_v49, %v729_v39  ;;  %vm741_vm2 = vweird.f32 %v5612_v15  ;;  %v5740_v12 = vld [vmem:[#allocation3 + $0x160] sm:$0xff]  ;;  %v9091_v49 = vld [vmem:[#allocation33_spill] sm:$0xff] }
 0x186   :  { %1029 = vmatpush.msrb.mxu3 %v5008_v24  ;;  %v718_v24 = vor.u32 1.1754944e-38, %v717_v10  ;;  %v752_v9 = vmul.f32 %v734_v30, %v395_v5  ;;  %1011 = vmatpush.msrb.mxu2 %v5035_v33  ;;  %v9086_v10 = vld [vmem:[#allocation28_spill] sm:$0xff]  ;;  %v9092_v5 = vld [vmem:[#allocation34_spill] sm:$0xff]  ;;  %v9095_v39 = vld [vmem:[#allocation37_spill] sm:$0xff] }
 0x187   :  { %970 = vmatpush.msra.mxu0 %v5641_v21  ;;  %991 = vmatpush.msrb.mxu1 %v4985_v14  ;;  %v5663_v14 = vld [vmem:[#allocation8 + $0xc0] sm:$0xff] }
 0x188   :  { %1030 = vmatpush.msrb.mxu3 %v5026_v29  ;;  %v719_v60 = vsel %vm716_vm0, %v718_v24, %v714_v31  ;;  %1012 = vmatpush.msrb.mxu2 %v5045_v37  ;;  %v747_v37 = vand.u32 2147483648, %v5612_v15  ;;  %v5746_v17 = vld [vmem:[#allocation3 + $0x140] sm:$0xff] }
 0x189   :  { %971 = vmatpush.msra.mxu0 %v5649_v61  ;;  %v753_v57 = vmul.f32 %v3789_v22, %v719_v60  ;;  %992 = vmatpush.msrb.mxu1 %v4996_v19  ;;  %v5670_v19 = vld [vmem:[#allocation8 + $0xa0] sm:$0xff]  ;;  %v9096_v60 = vld [vmem:[#allocation26_spill] sm:$0xff] }
 0x18a   :  { %1031 = vmatpush.msrb.mxu3 %v5037_v34  ;;  %1013 = vmatpush.msrb.mxu2 %v5060_v42  ;;  %v745_v42 = vand.u32 2147483647, %v5612_v15  ;;  %v5752_v31 = vld [vmem:[#allocation3 + $0x120] sm:$0xff] }
 0x18b   :  { %972 = vmatpush.msra.mxu0 %v5655_v46  ;;  %v3791_v28 = vpop.eup %3790  ;;  %v5661_v29 = vadd.f32 %v753_v57, %v752_v9  ;;  %993 = vmatpush.msrb.mxu1 %v5006_v23  ;;  %v5678_v23 = vld [vmem:[#allocation8 + $0x80] sm:$0xff]  ;;  %v9097_v9 = vld [vmem:[#allocation39_spill] sm:$0xff] }
 0x18c   :  { %1032 = vmatpush.msrb.mxu3 %v5047_v38  ;;  %v737_v33 = vmul.f32 %v3791_v28, %v5612_v15  ;;  %1014 = vmatpush.msrb.mxu2 %v5071_v47  ;;  %vm742_vm1 = vweird.f32 %v3791_v28  ;;  %v5692_v47 = vld [vmem:[#allocation8 + $0x40] sm:$0xff]  ;;  %vm746_vm4 = vcmp.eq.f32.partialorder %v745_v42, 8.507059e+37  ;;  %v9087_v15 = vld [vmem:[#allocation18_spill] sm:$0xff] }
 0x18d   :  { %973 = vmatpush.msra.mxu0 %v5663_v14  ;;  %994 = vmatpush.msrb.mxu1 %v5018_v27  ;;  %3792 = vtanh.f32 %v5661_v29  ;;  %v5685_v27 = vld [vmem:[#allocation8 + $0x60] sm:$0xff]  ;;  %vm743_vm3 = vmor %vm741_vm2, %vm742_vm1 }
 0x18e   :  { %1033 = vmatpush.msrb.mxu3 %v5062_v43  ;;  %v738_v34 = vsub.f32 1.0, %v737_v33  ;;  %1015 = vmatpush.msrb.mxu2 %v5080_v54  ;;  %v9093_v22 = vld [vmem:[#allocation24_spill] sm:$0xff]  ;;  %v9099_v33 = vld [vmem:[#allocation29_spill] sm:$0xff] }
 0x18f   :  { %974 = vmatpush.msra.mxu0 %v5670_v19  ;;  %995 = vmatpush.msrb.mxu1 %v5032_v32  ;;  %v748_v32 = vor.u32 1.1754944e-38, %v747_v37  ;;  %v9094_v24 = vld [vmem:[#allocation36_spill] sm:$0xff]  ;;  %v9101_v37 = vld [vmem:[#allocation43_spill] sm:$0xff] }
 0x190   :  { %1034 = vmatpush.msrb.mxu3 %v5073_v48  ;;  %v739_v38 = vmul.f32 %v3791_v28, %v738_v34  ;;  %1016 = vmatpush.msrb.mxu2 %v5096_v59  ;;  %v5758_v30 = vld [vmem:[#allocation3 + $0x100] sm:$0xff]  ;;  %v9100_v34 = vld [vmem:[#allocation42_spill] sm:$0xff] }
 0x191   :  { %975 = vmatpush.msra.mxu0 %v5678_v23  ;;  %996 = vmatpush.msrb.mxu1 %v5041_v36  ;;  %v9098_v57 = vld [vmem:[#allocation40_spill] sm:$0xff] }
 0x192   :  { %1035 = vmatpush.msrb.mxu3 %v5082_v56  ;;  %v740_v43 = vadd.f32 %v3791_v28, %v739_v38  ;;  %1017 = vmatpush.msrb.mxu2 %v5108_v4  ;;  %v5698_v56 = vld [vmem:[#allocation8 + $0x20] sm:$0xff]  ;;  %v9076_v4 = vld [vmem:[#allocation17_spill] sm:$0xff] }
 0x193   :  { %976 = vmatpush.msra.mxu0 %v5685_v27  ;;  %997 = vmatpush.msrb.mxu1 %v5055_v41  ;;  %v3793_v36 = vpop.eup %3792  ;;  %v5706_v41 = vld [vmem:[#allocation8] sm:$0xff] }
 0x194   :  { %1036 = vmatpush.msrb.mxu3 %v5101_v62  ;;  %v744_v48 = vsel %vm743_vm3, %v3791_v28, %v740_v43  ;;  %1018 = vmatpush.msrb.mxu2 %v5117_v13  ;;  %v9075_v62 = vld [vmem:[#allocation13_spill] sm:$0xff]  ;;  %v9078_v13 = vld [vmem:[#allocation14_spill] sm:$0xff]  ;;  %v5764_v28 = vld [vmem:[#allocation3 + $0xe0] sm:$0xff] }
 0x195   :  { %977 = vmatpush.msra.mxu0 %v5692_v47  ;;  %v749_v54 = vsel %vm746_vm4, %v748_v32, %v744_v48  ;;  %998 = vmatpush.msrb.mxu1 %v5068_v45  ;;  %v5716_v45 = vld [vmem:[#allocation3 + $0x1e0] sm:$0xff]  ;;  %v9103_v43 = vld [vmem:[#allocation45_spill] sm:$0xff]  ;;  %v9104_v32 = vld [vmem:[#allocation46_spill] sm:$0xff] }
 0x196   :  { %1037 = vmatpush.msrb.mxu3 %v5112_v8  ;;  %v5702_v59 = vmul.f32 %v3793_v36, %v749_v54  ;;  %1019 = vmatpush.msrb.mxu2 %v5134_v25  ;;  %v5722_v8 = vld [vmem:[#allocation3 + $0x1c0] sm:$0xff]  ;;  %v9080_v25 = vld [vmem:[#allocation22_spill] sm:$0xff]  ;;  %v9105_v36 = vld [vmem:[#allocation35_spill] sm:$0xff] }
 0x197   :  { %978 = vmatpush.msra.mxu0 %v5698_v56  ;;  %999 = vmatpush.msrb.mxu1 %v5077_v52  ;;  %v9077_v52 = vld [vmem:[#allocation19_spill] sm:$0xff]  ;;  %v5770_v38 = vld [vmem:[#allocation3 + $0xc0] sm:$0xff] }
 0x198   :  { %1038 = vmatpush.msrb.mxu3 %v5121_v16  ;;  %837 = vmatmul.f32.vlgmr.msrb.gmra.mxu0 %v5702_v59  ;;  %v9079_v16 = vld [vmem:[#allocation20_spill] sm:$0xff] }
 0x199   :  { %979 = vmatpush.msra.mxu0 %v5706_v41  ;;  %857 = vmatmul.f32.vlgmr.msra.gmra.mxu1 %v5702_v59  ;;  %v9102_v42 = vld [vmem:[#allocation32_spill] sm:$0xff] }
 0x19a   :  { %877 = vmatmul.f32.vlgmr.msra.gmra.mxu2 %v5702_v59  ;;  %897 = vmatmul.f32.vlgmr.msra.gmra.mxu3 %v5702_v59  ;;  %v5776_v48 = vld [vmem:[#allocation3 + $0xa0] sm:$0xff] }
 0x19b   :  { %1039 = vmatpush.msrb.mxu3 %v5138_v26  ;;  %1048 = vmatpush.msrb.mxu0 %v5716_v45  ;;  %v5728_v26 = vld [vmem:[#allocation3 + $0x1a0] sm:$0xff] }
 0x19c   :  { %1068 = vmatpush.msra.mxu1 %v9075_v62  ;;  %1088 = vmatpush.msra.mxu2 %v9076_v4  ;;  %v9106_v54 = vld [vmem:[#allocation48_spill] sm:$0xff]  ;;  %v9107_v62 = vld [vmem:[#allocation49_spill] sm:$0xff] }
 0x19d   :  { %1108 = vmatpush.msra.mxu3 %v9077_v52  ;;  %1049 = vmatpush.msrb.mxu0 %v5722_v8  ;;  %v5782_v4 = vld [vmem:[#allocation3 + $0x80] sm:$0xff]  ;;  %v9108_v52 = vld [vmem:[#allocation38_spill] sm:$0xff] }
 0x19e   :  { %1069 = vmatpush.msra.mxu1 %v9078_v13  ;;  %1089 = vmatpush.msra.mxu2 %v9079_v16  ;;  %v9109_v13 = vld [vmem:[#allocation51_spill] sm:$0xff]  ;;  %v9110_v16 = vld [vmem:[#allocation52_spill] sm:$0xff] }
 0x19f   :  { %1109 = vmatpush.msra.mxu3 %v9080_v25  ;;  %1050 = vmatpush.msrb.mxu0 %v5728_v26  ;;  %v5788_v25 = vld [vmem:[#allocation3 + $0x60] sm:$0xff] }
 0x1a0   :  { %1070 = vmatpush.msra.mxu1 %v9081_v63  ;;  %1090 = vmatpush.msra.mxu2 %v9082_v2  ;;  %v9111_v63 = vld [vmem:[#allocation41_spill] sm:$0xff]  ;;  %v9112_v2 = vld [vmem:[#allocation54_spill] sm:$0xff] }
 0x1a1   :  { %1110 = vmatpush.msra.mxu3 %v9083_v53  ;;  %1051 = vmatpush.msrb.mxu0 %v5734_v3  ;;  %v9113_v53 = vld [vmem:[#allocation53_spill] sm:$0xff] }
 0x1a2   :  { %1071 = vmatpush.msra.mxu1 %v9084_v7  ;;  %1091 = vmatpush.msra.mxu2 %v9085_v55  ;;  %v5794_v7 = vld [vmem:[#allocation3 + $0x40] sm:$0xff] }
 0x1a3   :  { %1111 = vmatpush.msra.mxu3 %v9086_v10  ;;  %1052 = vmatpush.msrb.mxu0 %v5740_v12  ;;  %v9114_v55 = vld [vmem:[#allocation44_spill] sm:$0xff] }
 0x1a4   :  { %1072 = vmatpush.msra.mxu1 %v9087_v15  ;;  %1092 = vmatpush.msra.mxu2 %v9088_v35  ;;  %v9115_v10 = vld [vmem:[#allocation56_spill] sm:$0xff]  ;;  %v9116_v15 = vld [vmem:[#allocation55_spill] sm:$0xff] }
 0x1a5   :  { %1112 = vmatpush.msra.mxu3 %v9089_v1  ;;  %1053 = vmatpush.msrb.mxu0 %v5746_v17  ;;  %v5800_v35 = vld [vmem:[#allocation3 + $0x20] sm:$0xff]  ;;  %v9117_v1 = vld [vmem:[#allocation47_spill] sm:$0xff] }
 0x1a6   :  { %1073 = vmatpush.msra.mxu1 %v9090_v20  ;;  %1093 = vmatpush.msra.mxu2 %v9091_v49  ;;  %v9118_v20 = vld [vmem:[#allocation58_spill] sm:$0xff]  ;;  %v9119_v49 = vld [vmem:[#allocation57_spill] sm:$0xff] }
 0x1a7   :  { %1113 = vmatpush.msra.mxu3 %v9092_v5  ;;  %1054 = vmatpush.msrb.mxu0 %v5752_v31  ;;  %v5806_v5 = vld [vmem:[#allocation3] sm:$0xff] }
 0x1a8   :  { %1074 = vmatpush.msra.mxu1 %v9093_v22  ;;  %1094 = vmatpush.msra.mxu2 %v9094_v24  ;;  %v9120_v22 = vld [vmem:[#allocation50_spill] sm:$0xff]  ;;  %v9121_v24 = vld [vmem:[#allocation60_spill] sm:$0xff] }
 0x1a9   :  { %1114 = vmatpush.msra.mxu3 %v9095_v39  ;;  %1055 = vmatpush.msrb.mxu0 %v5758_v30  ;;  %v9122_v39 = vld [vmem:[#allocation59_spill] sm:$0xff] }
 0x1aa   :  { %1075 = vmatpush.msra.mxu1 %v9096_v60  ;;  %1095 = vmatpush.msra.mxu2 %v9097_v9  ;;  %v384_v60 = vld [vmem:[%s8425_s5] sm:$0xf] }
 0x1ab   :  { %1115 = vmatpush.msra.mxu3 %v9098_v57  ;;  %1056 = vmatpush.msrb.mxu0 %v5764_v28  ;;  %v5815_v9 = vperm.slane %v384_v60, 0  ;;  %v5817_v57 = vperm.slane %v384_v60, 1 }
 0x1ac   :  { %1076 = vmatpush.msra.mxu1 %v9099_v33  ;;  %1096 = vmatpush.msra.mxu2 %v9100_v34  ;;  %v9125_v33 = vld [vmem:[#allocation79_spill] sm:$0xff] }
 0x1ad   :  { %1116 = vmatpush.msra.mxu3 %v9101_v37  ;;  %1057 = vmatpush.msrb.mxu0 %v5770_v38  ;;  %9123 = vst [vmem:[#allocation13_spill] sm:$0xff] %v5815_v9  ;;  %v480_v34 = vadd.f32 %v9125_v33, %v5815_v9  ;;  %v9126_v37 = vld [vmem:[#allocation107_spill] sm:$0xff] }
 0x1ae   :  { %1077 = vmatpush.msra.mxu1 %v9102_v42  ;;  %1097 = vmatpush.msra.mxu2 %v9103_v43  ;;  %9124 = vst [vmem:[#allocation17_spill] sm:$0xff] %v5817_v57  ;;  %v500_v42 = vadd.f32 %v9126_v37, %v5817_v57 }
 0x1af   :  { %1117 = vmatpush.msra.mxu3 %v9104_v32  ;;  %1058 = vmatpush.msrb.mxu0 %v5776_v48 }
 0x1b0   :  { %1078 = vmatpush.msra.mxu1 %v9105_v36  ;;  %1098 = vmatpush.msra.mxu2 %v9106_v54 }
 0x1b1   :  { %1118 = vmatpush.msra.mxu3 %v9107_v62  ;;  %1059 = vmatpush.msrb.mxu0 %v5782_v4  ;;  %v5823_v62 = vperm.slane %v384_v60, 2 }
 0x1b2   :  { %1079 = vmatpush.msra.mxu1 %v9108_v52  ;;  %1099 = vmatpush.msra.mxu2 %v9109_v13 }
 0x1b3   :  { %1119 = vmatpush.msra.mxu3 %v9110_v16  ;;  %1060 = vmatpush.msrb.mxu0 %v5788_v25  ;;  %9127 = vst [vmem:[#allocation19_spill] sm:$0xff] %v5823_v62  ;;  %v9128_v16 = vld [vmem:[#allocation135_spill] sm:$0xff] }
 0x1b4   :  { %1080 = vmatpush.msra.mxu1 %v9111_v63  ;;  %1100 = vmatpush.msra.mxu2 %v9112_v2  ;;  %v520_v63 = vadd.f32 %v9128_v16, %v5823_v62 }
 0x1b5   :  { %1120 = vmatpush.msra.mxu3 %v9113_v53  ;;  %1061 = vmatpush.msrb.mxu0 %v5794_v7 }
 0x1b6   :  { %1081 = vmatpush.msra.mxu1 %v9114_v55  ;;  %1101 = vmatpush.msra.mxu2 %v9115_v10 }
 0x1b7   :  { %1121 = vmatpush.msra.mxu3 %v9116_v15  ;;  %1062 = vmatpush.msrb.mxu0 %v5800_v35 }
 0x1b8   :  { %1082 = vmatpush.msra.mxu1 %v9117_v1  ;;  %1102 = vmatpush.msra.mxu2 %v9118_v20 }
 0x1b9   :  { %1122 = vmatpush.msra.mxu3 %v9119_v49  ;;  %1063 = vmatpush.msrb.mxu0 %v5806_v5  ;;  %v5827_v49 = vperm.slane %v384_v60, 3 }
 0x1ba   :  { %1083 = vmatpush.msra.mxu1 %v9120_v22  ;;  %1103 = vmatpush.msra.mxu2 %v9121_v24 }
 0x1bb   :  { %1123 = vmatpush.msra.mxu3 %v9122_v39  ;;  %9129 = vst [vmem:[#allocation14_spill] sm:$0xff] %v5827_v49  ;;  %v9130_v39 = vld [vmem:[#allocation139_spill] sm:$0xff] }
 0x1bc   :  { %v540_v33 = vadd.f32 %v9130_v39, %v5827_v49 }
 0x215   :  { %v838_v43 = vpop.f32.mrf.mxu0 }
 0x216   :  { %v858_v32 = vpop.f32.mrf.mxu1  ;;  %v839_v36 = vadd.f32 %v838_v43, %v480_v34 }
 0x217   :  { %v859_v54 = vadd.f32 %v858_v32, %v500_v42 }
 0x218   :  { %v3709_v52 = vmul.f32 -1.442695, %v839_v36 }
 0x219   :  { %v3710_v13 = vmul.f32 -1.442695, %v859_v54 }
 0x21a   :  { %3794 = vpow2.f32 %v3709_v52 }
 0x21b   :  { %3796 = vpow2.f32 %v3710_v13 }
 0x21d   :  { %v878_v2 = vpop.f32.mrf.mxu2  ;;  %v898_v22 = vpop.f32.mrf.mxu3 }
 0x21e   :  { %v879_v53 = vadd.f32 %v878_v2, %v520_v63  ;;  %v899_v42 = vadd.f32 %v898_v22, %v540_v33  ;;  %v397_v33 = vld [vmem:[%s8431_s11] sm:$0xff] }
 0x220   :  { %v3711_v55 = vmul.f32 -1.442695, %v879_v53  ;;  %v3795_v10 = vpop.eup %3794 }
 0x221   :  { %v3797_v15 = vpop.eup %3796  ;;  %v910_v1 = vadd.f32 1.0, %v3795_v10 }
 0x222   :  { %3798 = vpow2.f32 %v3711_v55  ;;  %v911_v20 = vadd.f32 1.0, %v3797_v15 }
 0x223   :  { %3800 = vrcp.f32 %v910_v1  ;;  %v924_v13 = vand.u32 2147483648, %v910_v1  ;;  %v922_v63 = vand.u32 2147483647, %v910_v1  ;;  %vm918_vm7 = vweird.f32 %v910_v1 }
 0x224   :  { %3802 = vrcp.f32 %v911_v20  ;;  %v939_v60 = vand.u32 2147483648, %v911_v20  ;;  %v937_v53 = vand.u32 2147483647, %v911_v20  ;;  %vm933_vm8 = vweird.f32 %v911_v20 }
 0x225   :  { %v925_v22 = vor.u32 1.1754944e-38, %v924_v13  ;;  %vm923_vm11 = vcmp.eq.f32.partialorder %v922_v63, 8.507059e+37 }
 0x226   :  { %v940_v39 = vor.u32 1.1754944e-38, %v939_v60  ;;  %vm938_vm12 = vcmp.eq.f32.partialorder %v937_v53, 8.507059e+37 }
 0x228   :  { %v3799_v24 = vpop.eup %3798 }
 0x229   :  { %v912_v34 = vadd.f32 1.0, %v3799_v24  ;;  %v3801_v37 = vpop.eup %3800 }
 0x22a   :  { %v3803_v43 = vpop.eup %3802  ;;  %v914_v32 = vmul.f32 %v3801_v37, %v910_v1  ;;  %vm919_vm5 = vweird.f32 %v3801_v37 }
 0x22b   :  { %3804 = vrcp.f32 %v912_v34  ;;  %v929_v36 = vmul.f32 %v3803_v43, %v911_v20  ;;  %vm934_vm6 = vweird.f32 %v3803_v43  ;;  %vm920_vm9 = vmor %vm918_vm7, %vm919_vm5  ;;  %v954_v60 = vand.u32 2147483648, %v912_v34 }
 0x22c   :  { %v915_v54 = vsub.f32 1.0, %v914_v32  ;;  %3806 = vtanh.f32 %v899_v42  ;;  %vm935_vm10 = vmor %vm933_vm8, %vm934_vm6  ;;  %vm948_vm14 = vweird.f32 %v912_v34 }
 0x22d   :  { %v930_v52 = vsub.f32 1.0, %v929_v36  ;;  %v955_v63 = vor.u32 1.1754944e-38, %v954_v60  ;;  %v9148_v60 = vld [vmem:[#allocation105_spill] sm:$0xff] }
 0x22e   :  { %v916_v16 = vmul.f32 %v3801_v37, %v915_v54 }
 0x22f   :  { %v931_v2 = vmul.f32 %v3803_v43, %v930_v52 }
 0x230   :  { %v917_v10 = vadd.f32 %v3801_v37, %v916_v16 }
 0x231   :  { %v3805_v55 = vpop.eup %3804  ;;  %v932_v24 = vadd.f32 %v3803_v43, %v931_v2  ;;  %v952_v2 = vand.u32 2147483647, %v912_v34 }
 0x232   :  { %v944_v15 = vmul.f32 %v3805_v55, %v912_v34  ;;  %v921_v42 = vsel %vm920_vm9, %v3801_v37, %v917_v10  ;;  %v3807_v32 = vpop.eup %3806  ;;  %vm949_vm13 = vweird.f32 %v3805_v55  ;;  %v9135_v34 = vld [vmem:[#allocation90_spill] sm:$0xff] }
 0x233   :  { %v926_v54 = vsel %vm923_vm11, %v925_v22, %v921_v42  ;;  %v936_v52 = vsel %vm935_vm10, %v3803_v43, %v932_v24  ;;  %vm950_vm15 = vmor %vm948_vm14, %vm949_vm13  ;;  %vm953_vm0 = vcmp.eq.f32.partialorder %v952_v2, 8.507059e+37  ;;  %v9133_v22 = vld [vmem:[#allocation87_spill] sm:$0xff]  ;;  %v9134_v24 = vld [vmem:[#allocation89_spill] sm:$0xff] }
 0x234   :  { %v945_v36 = vsub.f32 1.0, %v944_v15  ;;  %v941_v16 = vsel %vm938_vm12, %v940_v39, %v936_v52  ;;  %v960_v1 = vmul.f32 %v3807_v32, %v926_v54  ;;  %v9131_v15 = vld [vmem:[#allocation85_spill] sm:$0xff]  ;;  %v9137_v39 = vld [vmem:[#allocation92_spill] sm:$0xff]  ;;  %v9139_v42 = vld [vmem:[#allocation94_spill] sm:$0xff] }
 0x235   :  { %v959_v20 = vmul.f32 %v941_v16, %v397_v33  ;;  %v9138_v33 = vld [vmem:[#allocation93_spill] sm:$0xff]  ;;  %v9140_v32 = vld [vmem:[#allocation95_spill] sm:$0xff]  ;;  %v9144_v16 = vld [vmem:[#allocation100_spill] sm:$0xff] }
 0x236   :  { %v946_v49 = vmul.f32 %v3805_v55, %v945_v36  ;;  %v9141_v36 = vld [vmem:[#allocation96_spill] sm:$0xff]  ;;  %v9142_v54 = vld [vmem:[#allocation97_spill] sm:$0xff]  ;;  %v9143_v52 = vld [vmem:[#allocation99_spill] sm:$0xff] }
 0x237   :  { %v5834_v62 = vadd.f32 %v960_v1, %v959_v20  ;;  %v9145_v1 = vld [vmem:[#allocation102_spill] sm:$0xff]  ;;  %v9146_v20 = vld [vmem:[#allocation103_spill] sm:$0xff] }
 0x238   :  { %v947_v13 = vadd.f32 %v3805_v55, %v946_v49  ;;  %v9132_v49 = vld [vmem:[#allocation86_spill] sm:$0xff] }
 0x239   :  { %3808 = vtanh.f32 %v5834_v62  ;;  %v9149_v2 = vld [vmem:[#allocation106_spill] sm:$0xff] }
 0x23a   :  { %v951_v37 = vsel %vm950_vm15, %v3805_v55, %v947_v13  ;;  %v9136_v55 = vld [vmem:[#allocation91_spill] sm:$0xff]  ;;  %v9147_v13 = vld [vmem:[#allocation104_spill] sm:$0xff] }
 0x23b   :  { %v956_v43 = vsel %vm953_vm0, %v955_v63, %v951_v37  ;;  %v9150_v37 = vld [vmem:[#allocation108_spill] sm:$0xff]  ;;  %v9151_v63 = vld [vmem:[#allocation109_spill] sm:$0xff] }
 0x23f   :  { %v3809_v10 = vpop.eup %3808 }
 0x240   :  { %v963_v53 = vmul.f32 %v3809_v10, %v956_v43  ;;  %v9152_v10 = vld [vmem:[#allocation110_spill] sm:$0xff]  ;;  %v9154_v43 = vld [vmem:[#allocation112_spill] sm:$0xff] }
 0x242   :  { %980 = vmatmul.f32.vlgmr.msra.gmra.mxu0 %v963_v53  ;;  %1000 = vmatmul.f32.vlgmr.msrb.gmra.mxu1 %v963_v53 }
 0x243   :  { %1020 = vmatmul.f32.vlgmr.msrb.gmra.mxu2 %v963_v53  ;;  %1040 = vmatmul.f32.vlgmr.msrb.gmra.mxu3 %v963_v53  ;;  %v9155_v53 = vld [vmem:[#allocation113_spill] sm:$0xff] }
 0x244   :  { %1195 = vmatpush.msra.mxu0 %v9131_v15  ;;  %1215 = vmatpush.msrb.mxu1 %v9132_v49  ;;  %v9156_v15 = vld [vmem:[#allocation114_spill] sm:$0xff]  ;;  %v9157_v49 = vld [vmem:[#allocation115_spill] sm:$0xff] }
 0x245   :  { %1235 = vmatpush.msrb.mxu2 %v9133_v22  ;;  %1255 = vmatpush.msrb.mxu3 %v9134_v24  ;;  %v9158_v22 = vld [vmem:[#allocation116_spill] sm:$0xff]  ;;  %v9159_v24 = vld [vmem:[#allocation118_spill] sm:$0xff] }
 0x246   :  { %1196 = vmatpush.msra.mxu0 %v9135_v34  ;;  %1216 = vmatpush.msrb.mxu1 %v9136_v55  ;;  %v9160_v34 = vld [vmem:[#allocation119_spill] sm:$0xff]  ;;  %v9161_v55 = vld [vmem:[#allocation120_spill] sm:$0xff] }
 0x247   :  { %1236 = vmatpush.msrb.mxu2 %v9137_v39  ;;  %1256 = vmatpush.msrb.mxu3 %v9138_v33  ;;  %v9162_v39 = vld [vmem:[#allocation122_spill] sm:$0xff]  ;;  %v9163_v33 = vld [vmem:[#allocation123_spill] sm:$0xff] }
 0x248   :  { %1197 = vmatpush.msra.mxu0 %v9139_v42  ;;  %1217 = vmatpush.msrb.mxu1 %v9140_v32  ;;  %v9164_v42 = vld [vmem:[#allocation124_spill] sm:$0xff]  ;;  %v9165_v32 = vld [vmem:[#allocation125_spill] sm:$0xff] }
 0x249   :  { %1237 = vmatpush.msrb.mxu2 %v9141_v36  ;;  %1257 = vmatpush.msrb.mxu3 %v9142_v54  ;;  %v9166_v36 = vld [vmem:[#allocation126_spill] sm:$0xff]  ;;  %v9167_v54 = vld [vmem:[#allocation127_spill] sm:$0xff] }
 0x24a   :  { %1064 = vmatmul.f32.vlgmr.msrb.gmra.mxu0 %v5702_v59  ;;  %1084 = vmatmul.f32.vlgmr.msra.gmra.mxu1 %v5702_v59 }
 0x24b   :  { %1104 = vmatmul.f32.vlgmr.msra.gmra.mxu2 %v5702_v59  ;;  %1124 = vmatmul.f32.vlgmr.msra.gmra.mxu3 %v5702_v59  ;;  %v9153_v59 = vld [vmem:[#allocation111_spill] sm:$0xff] }
 0x24c   :  { %1198 = vmatpush.msra.mxu0 %v9143_v52  ;;  %1218 = vmatpush.msrb.mxu1 %v9144_v16  ;;  %v9168_v52 = vld [vmem:[#allocation128_spill] sm:$0xff]  ;;  %v9169_v16 = vld [vmem:[#allocation129_spill] sm:$0xff] }
 0x24d   :  { %1238 = vmatpush.msrb.mxu2 %v9145_v1  ;;  %1258 = vmatpush.msrb.mxu3 %v9146_v20  ;;  %v9170_v1 = vld [vmem:[#allocation130_spill] sm:$0xff]  ;;  %v9171_v20 = vld [vmem:[#allocation131_spill] sm:$0xff] }
 0x24e   :  { %1199 = vmatpush.msra.mxu0 %v9147_v13  ;;  %1219 = vmatpush.msrb.mxu1 %v9148_v60  ;;  %v9172_v13 = vld [vmem:[#allocation132_spill] sm:$0xff]  ;;  %v9173_v60 = vld [vmem:[#allocation133_spill] sm:$0xff] }
 0x24f   :  { %1239 = vmatpush.msrb.mxu2 %v9149_v2  ;;  %1259 = vmatpush.msrb.mxu3 %v9150_v37  ;;  %v9174_v2 = vld [vmem:[#allocation134_spill] sm:$0xff]  ;;  %v9175_v37 = vld [vmem:[#allocation136_spill] sm:$0xff] }
 0x250   :  { %1200 = vmatpush.msra.mxu0 %v9151_v63  ;;  %1220 = vmatpush.msrb.mxu1 %v9152_v10  ;;  %v9176_v63 = vld [vmem:[#allocation137_spill] sm:$0xff]  ;;  %v9177_v10 = vld [vmem:[#allocation138_spill] sm:$0xff] }
 0x251   :  { %1240 = vmatpush.msrb.mxu2 %v9153_v59  ;;  %1260 = vmatpush.msrb.mxu3 %v9154_v43  ;;  %v9178_v59 = vld [vmem:[#allocation140_spill] sm:$0xff]  ;;  %v9179_v43 = vld [vmem:[#allocation141_spill] sm:$0xff] }
 0x252   :  { %1201 = vmatpush.msra.mxu0 %v9155_v53  ;;  %1221 = vmatpush.msrb.mxu1 %v9156_v15  ;;  %v9180_v53 = vld [vmem:[#allocation142_spill] sm:$0xff]  ;;  %v9181_v15 = vld [vmem:[#allocation143_spill] sm:$0xff] }
 0x253   :  { %1241 = vmatpush.msrb.mxu2 %v9157_v49  ;;  %1261 = vmatpush.msrb.mxu3 %v9158_v22  ;;  %v9182_v49 = vld [vmem:[#allocation144_spill] sm:$0xff]  ;;  %v9183_v22 = vld [vmem:[#allocation145_spill] sm:$0xff] }
 0x254   :  { %1202 = vmatpush.msra.mxu0 %v9159_v24  ;;  %1222 = vmatpush.msrb.mxu1 %v9160_v34  ;;  %v9184_v24 = vld [vmem:[#allocation146_spill] sm:$0xff]  ;;  %v9185_v34 = vld [vmem:[#allocation147_spill] sm:$0xff] }
 0x255   :  { %1242 = vmatpush.msrb.mxu2 %v9161_v55  ;;  %1262 = vmatpush.msrb.mxu3 %v9162_v39  ;;  %v9186_v55 = vld [vmem:[#allocation148_spill] sm:$0xff]  ;;  %v9187_v39 = vld [vmem:[#allocation149_spill] sm:$0xff] }
 0x256   :  { %1203 = vmatpush.msra.mxu0 %v9163_v33  ;;  %1223 = vmatpush.msrb.mxu1 %v9164_v42  ;;  %v9188_v33 = vld [vmem:[#allocation150_spill] sm:$0xff]  ;;  %v9189_v42 = vld [vmem:[#allocation151_spill] sm:$0xff] }
 0x257   :  { %1243 = vmatpush.msrb.mxu2 %v9165_v32  ;;  %1263 = vmatpush.msrb.mxu3 %v9166_v36  ;;  %v9190_v32 = vld [vmem:[#allocation152_spill] sm:$0xff]  ;;  %v9191_v36 = vld [vmem:[#allocation153_spill] sm:$0xff] }
 0x258   :  { %1204 = vmatpush.msra.mxu0 %v9167_v54  ;;  %1224 = vmatpush.msrb.mxu1 %v9168_v52  ;;  %v5906_v54 = vld [vmem:[#allocation8 + $0x1e8] sm:$0xff]  ;;  %v5909_v52 = vld [vmem:[#allocation8 + $0x1f0] sm:$0xff] }
 0x259   :  { %1244 = vmatpush.msrb.mxu2 %v9169_v16  ;;  %1264 = vmatpush.msrb.mxu3 %v9170_v1  ;;  %v5912_v16 = vld [vmem:[#allocation8 + $0x1f8] sm:$0xff]  ;;  %v5929_v1 = vld [vmem:[#allocation8 + $0x1b0] sm:$0xff] }
 0x25a   :  { %1205 = vmatpush.msra.mxu0 %v9171_v20  ;;  %1225 = vmatpush.msrb.mxu1 %v9172_v13  ;;  %v5936_v20 = vld [vmem:[#allocation8 + $0x188] sm:$0xff]  ;;  %v5939_v13 = vld [vmem:[#allocation8 + $0x190] sm:$0xff] }
 0x25b   :  { %1245 = vmatpush.msrb.mxu2 %v9173_v60  ;;  %1265 = vmatpush.msrb.mxu3 %v9174_v2  ;;  %v5946_v60 = vld [vmem:[#allocation8 + $0x168] sm:$0xff]  ;;  %v5949_v2 = vld [vmem:[#allocation8 + $0x170] sm:$0xff] }
 0x25c   :  { %1206 = vmatpush.msra.mxu0 %v9175_v37  ;;  %1226 = vmatpush.msrb.mxu1 %v9176_v63  ;;  %v5956_v37 = vld [vmem:[#allocation8 + $0x148] sm:$0xff]  ;;  %v5959_v63 = vld [vmem:[#allocation8 + $0x150] sm:$0xff] }
 0x25d   :  { %1246 = vmatpush.msrb.mxu2 %v9177_v10  ;;  %1266 = vmatpush.msrb.mxu3 %v9178_v59  ;;  %9192 = vst [vmem:[#allocation20_spill] sm:$0xff] %v5956_v37  ;;  %v5966_v10 = vld [vmem:[#allocation8 + $0x128] sm:$0xff]  ;;  %v5969_v59 = vld [vmem:[#allocation8 + $0x130] sm:$0xff] }
 0x25e   :  { %1207 = vmatpush.msra.mxu0 %v9179_v43  ;;  %1227 = vmatpush.msrb.mxu1 %v9180_v53  ;;  %9193 = vst [vmem:[#allocation22_spill] sm:$0xff] %v5959_v63  ;;  %v5976_v43 = vld [vmem:[#allocation8 + $0x108] sm:$0xff]  ;;  %v5979_v53 = vld [vmem:[#allocation8 + $0x110] sm:$0xff] }
 0x25f   :  { %1247 = vmatpush.msrb.mxu2 %v9181_v15  ;;  %1267 = vmatpush.msrb.mxu3 %v9182_v49  ;;  %9195 = vst [vmem:[#allocation23_spill] sm:$0xff] %v5966_v10  ;;  %v5986_v15 = vld [vmem:[#allocation8 + $0xe8] sm:$0xff]  ;;  %v5989_v49 = vld [vmem:[#allocation8 + $0xf0] sm:$0xff] }
 0x260   :  { %1208 = vmatpush.msra.mxu0 %v9183_v22  ;;  %1228 = vmatpush.msrb.mxu1 %v9184_v24  ;;  %9196 = vst [vmem:[#allocation25_spill] sm:$0xff] %v5969_v59  ;;  %v5996_v22 = vld [vmem:[#allocation8 + $0xc8] sm:$0xff]  ;;  %v5999_v24 = vld [vmem:[#allocation8 + $0xd0] sm:$0xff] }
 0x261   :  { %1248 = vmatpush.msrb.mxu2 %v9185_v34  ;;  %1268 = vmatpush.msrb.mxu3 %v9186_v55  ;;  %9198 = vst [vmem:[#allocation27_spill] sm:$0xff] %v5976_v43  ;;  %v6006_v34 = vld [vmem:[#allocation8 + $0xa8] sm:$0xff]  ;;  %v6009_v55 = vld [vmem:[#allocation8 + $0xb0] sm:$0xff] }
 0x262   :  { %1209 = vmatpush.msra.mxu0 %v9187_v39  ;;  %1229 = vmatpush.msrb.mxu1 %v9188_v33  ;;  %9199 = vst [vmem:[#allocation28_spill] sm:$0xff] %v5979_v53  ;;  %v6016_v39 = vld [vmem:[#allocation8 + $0x88] sm:$0xff]  ;;  %v6019_v33 = vld [vmem:[#allocation8 + $0x90] sm:$0xff] }
 0x263   :  { %1249 = vmatpush.msrb.mxu2 %v9189_v42  ;;  %1269 = vmatpush.msrb.mxu3 %v9190_v32  ;;  %9201 = vst [vmem:[#allocation30_spill] sm:$0xff] %v5986_v15  ;;  %v6026_v42 = vld [vmem:[#allocation8 + $0x68] sm:$0xff]  ;;  %v6029_v32 = vld [vmem:[#allocation8 + $0x70] sm:$0xff] }
 0x264   :  { %1210 = vmatpush.msra.mxu0 %v5560_v0  ;;  %1230 = vmatpush.msrb.mxu1 %v9191_v36  ;;  %v5916_v0 = vld [vmem:[#allocation8 + $0x1c8] sm:$0xff]  ;;  %9202 = vst [vmem:[#allocation31_spill] sm:$0xff] %v5989_v49 }
 0x265   :  { %1250 = vmatpush.msrb.mxu2 %v5564_v18  ;;  %1270 = vmatpush.msrb.mxu3 %v5569_v44  ;;  %v5919_v18 = vld [vmem:[#allocation8 + $0x1d0] sm:$0xff]  ;;  %v5926_v44 = vld [vmem:[#allocation8 + $0x1a8] sm:$0xff]  ;;  %9204 = vst [vmem:[#allocation33_spill] sm:$0xff] %v5996_v22 }
 0x266   :  { %1338 = vmatpush.msrb.mxu0 %v5574_v58  ;;  %1358 = vmatpush.msra.mxu1 %v5906_v54  ;;  %v5922_v58 = vld [vmem:[#allocation8 + $0x1d8] sm:$0xff]  ;;  %9205 = vst [vmem:[#allocation34_spill] sm:$0xff] %v5999_v24  ;;  %v6036_v36 = vld [vmem:[#allocation8 + $0x48] sm:$0xff] }
 0x267   :  { %1378 = vmatpush.msra.mxu2 %v5909_v52  ;;  %1398 = vmatpush.msra.mxu3 %v5912_v16  ;;  %9207 = vst [vmem:[#allocation36_spill] sm:$0xff] %v6006_v34 }
 0x268   :  { %1339 = vmatpush.msrb.mxu0 %v5580_v50  ;;  %1359 = vmatpush.msra.mxu1 %v5916_v0  ;;  %v5932_v50 = vld [vmem:[#allocation8 + $0x1b8] sm:$0xff]  ;;  %9208 = vst [vmem:[#allocation37_spill] sm:$0xff] %v6009_v55 }
 0x269   :  { %1379 = vmatpush.msra.mxu2 %v5919_v18  ;;  %1399 = vmatpush.msra.mxu3 %v5922_v58  ;;  %9210 = vst [vmem:[#allocation39_spill] sm:$0xff] %v6016_v39 }
 0x26a   :  { %1340 = vmatpush.msrb.mxu0 %v5588_v11  ;;  %1360 = vmatpush.msra.mxu1 %v5926_v44  ;;  %v5942_v11 = vld [vmem:[#allocation8 + $0x198] sm:$0xff]  ;;  %9211 = vst [vmem:[#allocation40_spill] sm:$0xff] %v6019_v33 }
 0x26b   :  { %1380 = vmatpush.msra.mxu2 %v5929_v1  ;;  %1400 = vmatpush.msra.mxu3 %v5932_v50  ;;  %9213 = vst [vmem:[#allocation42_spill] sm:$0xff] %v6026_v42 }
 0x26c   :  { %1341 = vmatpush.msrb.mxu0 %v5595_v51  ;;  %1361 = vmatpush.msra.mxu1 %v5936_v20  ;;  %v5952_v51 = vld [vmem:[#allocation8 + $0x178] sm:$0xff]  ;;  %9214 = vst [vmem:[#allocation43_spill] sm:$0xff] %v6029_v32 }
 0x26d   :  { %1381 = vmatpush.msra.mxu2 %v5939_v13  ;;  %1401 = vmatpush.msra.mxu3 %v5942_v11  ;;  %9216 = vst [vmem:[#allocation45_spill] sm:$0xff] %v6036_v36 }
 0x26e   :  { %1342 = vmatpush.msrb.mxu0 %v5604_v6  ;;  %1362 = vmatpush.msra.mxu1 %v5946_v60  ;;  %v5962_v6 = vld [vmem:[#allocation8 + $0x158] sm:$0xff] }
 0x26f   :  { %1382 = vmatpush.msra.mxu2 %v5949_v2  ;;  %1402 = vmatpush.msra.mxu3 %v5952_v51  ;;  %9194 = vst [vmem:[#allocation15_spill] sm:$0xff] %v5962_v6 }
 0x270   :  { %1343 = vmatpush.msrb.mxu0 %v5616_v40  ;;  %1363 = vmatpush.msra.mxu1 %v5956_v37  ;;  %v5972_v40 = vld [vmem:[#allocation8 + $0x138] sm:$0xff] }
 0x271   :  { %1383 = vmatpush.msra.mxu2 %v5959_v63  ;;  %1403 = vmatpush.msra.mxu3 %v5962_v6  ;;  %9197 = vst [vmem:[#allocation16_spill] sm:$0xff] %v5972_v40 }
 0x272   :  { %1344 = vmatpush.msrb.mxu0 %v5641_v21  ;;  %1364 = vmatpush.msra.mxu1 %v5966_v10  ;;  %v5982_v21 = vld [vmem:[#allocation8 + $0x118] sm:$0xff] }
 0x273   :  { %1384 = vmatpush.msra.mxu2 %v5969_v59  ;;  %1404 = vmatpush.msra.mxu3 %v5972_v40  ;;  %9200 = vst [vmem:[#allocation18_spill] sm:$0xff] %v5982_v21 }
 0x274   :  { %1345 = vmatpush.msrb.mxu0 %v5649_v61  ;;  %1365 = vmatpush.msra.mxu1 %v5976_v43  ;;  %v5992_v61 = vld [vmem:[#allocation8 + $0xf8] sm:$0xff] }
 0x275   :  { %1385 = vmatpush.msra.mxu2 %v5979_v53  ;;  %1405 = vmatpush.msra.mxu3 %v5982_v21  ;;  %9203 = vst [vmem:[#allocation21_spill] sm:$0xff] %v5992_v61 }
 0x276   :  { %1346 = vmatpush.msrb.mxu0 %v5655_v46  ;;  %1366 = vmatpush.msra.mxu1 %v5986_v15  ;;  %v6002_v46 = vld [vmem:[#allocation8 + $0xd8] sm:$0xff] }
 0x277   :  { %1386 = vmatpush.msra.mxu2 %v5989_v49  ;;  %1406 = vmatpush.msra.mxu3 %v5992_v61  ;;  %9206 = vst [vmem:[#allocation24_spill] sm:$0xff] %v6002_v46 }
 0x278   :  { %1347 = vmatpush.msrb.mxu0 %v5663_v14  ;;  %1367 = vmatpush.msra.mxu1 %v5996_v22  ;;  %v6012_v14 = vld [vmem:[#allocation8 + $0xb8] sm:$0xff] }
 0x279   :  { %1387 = vmatpush.msra.mxu2 %v5999_v24  ;;  %1407 = vmatpush.msra.mxu3 %v6002_v46  ;;  %9209 = vst [vmem:[#allocation26_spill] sm:$0xff] %v6012_v14 }
 0x27a   :  { %1348 = vmatpush.msrb.mxu0 %v5670_v19  ;;  %1368 = vmatpush.msra.mxu1 %v6006_v34  ;;  %v6022_v19 = vld [vmem:[#allocation8 + $0x98] sm:$0xff] }
 0x27b   :  { %1388 = vmatpush.msra.mxu2 %v6009_v55  ;;  %1408 = vmatpush.msra.mxu3 %v6012_v14  ;;  %9212 = vst [vmem:[#allocation29_spill] sm:$0xff] %v6022_v19 }
 0x27c   :  { %1349 = vmatpush.msrb.mxu0 %v5678_v23  ;;  %1369 = vmatpush.msra.mxu1 %v6016_v39  ;;  %v6032_v23 = vld [vmem:[#allocation8 + $0x78] sm:$0xff]  ;;  %v9226_v39 = vld [vmem:[#allocation65_spill] sm:$0xff] }
 0x27d   :  { %1389 = vmatpush.msra.mxu2 %v6019_v33  ;;  %1409 = vmatpush.msra.mxu3 %v6022_v19  ;;  %9215 = vst [vmem:[#allocation32_spill] sm:$0xff] %v6032_v23  ;;  %v6039_v19 = vld [vmem:[#allocation8 + $0x50] sm:$0xff] }
 0x27e   :  { %1350 = vmatpush.msrb.mxu0 %v5685_v27  ;;  %1370 = vmatpush.msra.mxu1 %v6026_v42  ;;  %9217 = vst [vmem:[#allocation46_spill] sm:$0xff] %v6039_v19  ;;  %v6042_v27 = vld [vmem:[#allocation8 + $0x58] sm:$0xff]  ;;  %v9225_v42 = vld [vmem:[#allocation62_spill] sm:$0xff] }
 0x27f   :  { %1390 = vmatpush.msra.mxu2 %v6029_v32  ;;  %1410 = vmatpush.msra.mxu3 %v6032_v23  ;;  %9218 = vst [vmem:[#allocation35_spill] sm:$0xff] %v6042_v27  ;;  %v6046_v32 = vld [vmem:[#allocation8 + $0x28] sm:$0xff]  ;;  %v6049_v23 = vld [vmem:[#allocation8 + $0x30] sm:$0xff] }
 0x280   :  { %1351 = vmatpush.msrb.mxu0 %v5692_v47  ;;  %1371 = vmatpush.msra.mxu1 %v6036_v36  ;;  %9219 = vst [vmem:[#allocation48_spill] sm:$0xff] %v6046_v32  ;;  %v6052_v47 = vld [vmem:[#allocation8 + $0x38] sm:$0xff] }
 0x281   :  { %1391 = vmatpush.msra.mxu2 %v6039_v19  ;;  %1411 = vmatpush.msra.mxu3 %v6042_v27  ;;  %9220 = vst [vmem:[#allocation49_spill] sm:$0xff] %v6049_v23  ;;  %v6056_v19 = vld [vmem:[#allocation8 + $0x8] sm:$0xff]  ;;  %v6059_v27 = vld [vmem:[#allocation8 + $0x10] sm:$0xff] }
 0x282   :  { %1352 = vmatpush.msrb.mxu0 %v5698_v56  ;;  %1372 = vmatpush.msra.mxu1 %v6046_v32  ;;  %9221 = vst [vmem:[#allocation38_spill] sm:$0xff] %v6052_v47  ;;  %v6062_v56 = vld [vmem:[#allocation8 + $0x18] sm:$0xff] }
 0x283   :  { %1392 = vmatpush.msra.mxu2 %v6049_v23  ;;  %1412 = vmatpush.msra.mxu3 %v6052_v47  ;;  %9222 = vst [vmem:[#allocation51_spill] sm:$0xff] %v6056_v19 }
 0x284   :  { %1353 = vmatpush.msrb.mxu0 %v5706_v41  ;;  %1373 = vmatpush.msra.mxu1 %v6056_v19  ;;  %9223 = vst [vmem:[#allocation52_spill] sm:$0xff] %v6059_v27 }
 0x285   :  { %1393 = vmatpush.msra.mxu2 %v6059_v27  ;;  %9224 = vst [vmem:[#allocation41_spill] sm:$0xff] %v6062_v56  ;;  %1413 = vmatpush.msra.mxu3 %v6062_v56  ;;  %v9227_v56 = vld [vmem:[#allocation69_spill] sm:$0xff] }
 0x2bf   :  { %v6065_v32 = vpop.f32.mrf.mxu0  ;;  %v6067_v23 = vpop.f32.mrf.mxu1 }
 0x2c6   :  { %v6069_v36 = vpop.f32.mrf.mxu2  ;;  %v6073_v27 = vpop.f32.mrf.mxu3 }
 0x2c7   :  { %v1065_v47 = vpop.f32.mrf.mxu0  ;;  %v1085_v41 = vpop.f32.mrf.mxu1 }
 0x2c8   :  { %v1128_v33 = vadd.f32 %v1065_v47, %v9225_v42  ;;  %v1129_v19 = vadd.f32 %v1085_v41, %v9226_v39 }
 0x2ca   :  { %v3712_v14 = vmul.f32 -1.442695, %v1128_v33  ;;  %v3713_v55 = vmul.f32 -1.442695, %v1129_v19  ;;  %v9228_v19 = vld [vmem:[#allocation70_spill] sm:$0xff] }
 0x2cc   :  { %3810 = vpow2.f32 %v3712_v14 }
 0x2cd   :  { %3812 = vpow2.f32 %v3713_v55 }
 0x2ce   :  { %v1105_v34 = vpop.f32.mrf.mxu2  ;;  %v1125_v42 = vpop.f32.mrf.mxu3 }
 0x2cf   :  { %v1130_v46 = vadd.f32 %v1105_v34, %v9227_v56  ;;  %v1131_v14 = vadd.f32 %v1125_v42, %v9228_v19 }
 0x2d1   :  { %v3714_v24 = vmul.f32 -1.442695, %v1130_v46 }
 0x2d2   :  { %v3811_v22 = vpop.eup %3810 }
 0x2d3   :  { %v3813_v61 = vpop.eup %3812  ;;  %v1141_v49 = vadd.f32 1.0, %v3811_v22  ;;  %3814 = vpow2.f32 %v3714_v24 }
 0x2d4   :  { %v1142_v15 = vadd.f32 1.0, %v3813_v61 }
 0x2d5   :  { %3816 = vrcp.f32 %v1141_v49  ;;  %v1155_v46 = vand.u32 2147483648, %v1141_v49  ;;  %v1153_v61 = vand.u32 2147483647, %v1141_v49  ;;  %vm1149_vm3 = vweird.f32 %v1141_v49 }
 0x2d6   :  { %3818 = vrcp.f32 %v1142_v15  ;;  %v1170_v56 = vand.u32 2147483648, %v1142_v15  ;;  %v1168_v43 = vand.u32 2147483647, %v1142_v15  ;;  %vm1164_vm4 = vweird.f32 %v1142_v15 }
 0x2d7   :  { %v1156_v19 = vor.u32 1.1754944e-38, %v1155_v46  ;;  %vm1154_vm7 = vcmp.eq.f32.partialorder %v1153_v61, 8.507059e+37 }
 0x2d8   :  { %vm1169_vm8 = vcmp.eq.f32.partialorder %v1168_v43, 8.507059e+37 }
 0x2d9   :  { %v3815_v47 = vpop.eup %3814 }
 0x2da   :  { %v1143_v39 = vadd.f32 1.0, %v3815_v47 }
 0x2db   :  { %v3817_v33 = vpop.eup %3816 }
 0x2dc   :  { %v3819_v55 = vpop.eup %3818  ;;  %v1145_v41 = vmul.f32 %v3817_v33, %v1141_v49  ;;  %3820 = vrcp.f32 %v1143_v39  ;;  %vm1150_vm1 = vweird.f32 %v3817_v33  ;;  %v1185_v46 = vand.u32 2147483648, %v1143_v39 }
 0x2dd   :  { %v1160_v21 = vmul.f32 %v3819_v55, %v1142_v15  ;;  %3822 = vtanh.f32 %v1131_v14  ;;  %vm1165_vm2 = vweird.f32 %v3819_v55  ;;  %vm1151_vm5 = vmor %vm1149_vm3, %vm1150_vm1  ;;  %vm1179_vm10 = vweird.f32 %v1143_v39 }
 0x2de   :  { %v1146_v53 = vsub.f32 1.0, %v1145_v41  ;;  %vm1166_vm6 = vmor %vm1164_vm4, %vm1165_vm2  ;;  %v1171_v41 = vor.u32 1.1754944e-38, %v1170_v56  ;;  %v1186_v61 = vor.u32 1.1754944e-38, %v1185_v46  ;;  %v6171_v46 = vld [vmem:[#allocation3 + $0xf0] sm:$0xff] }
 0x2df   :  { %v1161_v34 = vsub.f32 1.0, %v1160_v21  ;;  %9233 = vst [vmem:[#allocation55_spill] sm:$0xff] %v6171_v46 }
 0x2e0   :  { %v1147_v22 = vmul.f32 %v3817_v33, %v1146_v53 }
 0x2e1   :  { %v1162_v24 = vmul.f32 %v3819_v55, %v1161_v34 }
 0x2e2   :  { %v3821_v40 = vpop.eup %3820  ;;  %v1148_v47 = vadd.f32 %v3817_v33, %v1147_v22 }
 0x2e3   :  { %v1175_v42 = vmul.f32 %v3821_v40, %v1143_v39  ;;  %v1163_v59 = vadd.f32 %v3819_v55, %v1162_v24  ;;  %v3823_v14 = vpop.eup %3822  ;;  %vm1180_vm9 = vweird.f32 %v3821_v40  ;;  %v6118_v24 = vld [vmem:[#allocation3 + $0x188] sm:$0xff] }
 0x2e4   :  { %v1152_v21 = vsel %vm1151_vm5, %v3817_v33, %v1148_v47  ;;  %v1183_v33 = vand.u32 2147483647, %v1143_v39  ;;  %vm1181_vm11 = vmor %vm1179_vm10, %vm1180_vm9  ;;  %v6108_v39 = vld [vmem:[#allocation3 + $0x1a8] sm:$0xff]  ;;  %v6121_v47 = vld [vmem:[#allocation3 + $0x190] sm:$0xff] }
 0x2e5   :  { %v1176_v10 = vsub.f32 1.0, %v1175_v42  ;;  %v1157_v53 = vsel %vm1154_vm7, %v1156_v19, %v1152_v21  ;;  %v1167_v6 = vsel %vm1166_vm6, %v3819_v55, %v1163_v59  ;;  %v6111_v55 = vld [vmem:[#allocation3 + $0x1b0] sm:$0xff]  ;;  %v6128_v42 = vld [vmem:[#allocation3 + $0x168] sm:$0xff] }
 0x2e6   :  { %v1172_v34 = vsel %vm1169_vm8, %v1171_v41, %v1167_v6  ;;  %v1191_v63 = vmul.f32 %v3823_v14, %v1157_v53  ;;  %vm1184_vm12 = vcmp.eq.f32.partialorder %v1183_v33, 8.507059e+37  ;;  %v6131_v19 = vld [vmem:[#allocation3 + $0x170] sm:$0xff]  ;;  %v6138_v41 = vld [vmem:[#allocation3 + $0x148] sm:$0xff] }
 0x2e7   :  { %v1177_v37 = vmul.f32 %v3821_v40, %v1176_v10  ;;  %v1190_v22 = vmul.f32 %v1172_v34, %v5661_v29  ;;  %v6088_v29 = vld [vmem:[#allocation3 + $0x1e8] sm:$0xff]  ;;  %v6141_v21 = vld [vmem:[#allocation3 + $0x150] sm:$0xff] }
 0x2e8   :  { %v6098_v10 = vld [vmem:[#allocation3 + $0x1c8] sm:$0xff]  ;;  %v6151_v53 = vld [vmem:[#allocation3 + $0x130] sm:$0xff] }
 0x2e9   :  { %v6078_v49 = vadd.f32 %v1191_v63, %v1190_v22  ;;  %v1178_v15 = vadd.f32 %v3821_v40, %v1177_v37  ;;  %v6091_v37 = vld [vmem:[#allocation3 + $0x1f0] sm:$0xff]  ;;  %v6094_v63 = vld [vmem:[#allocation3 + $0x1f8] sm:$0xff]  ;;  %v6148_v14 = vld [vmem:[#allocation3 + $0x128] sm:$0xff] }
 0x2ea   :  { %v6158_v34 = vld [vmem:[#allocation3 + $0x108] sm:$0xff]  ;;  %v6161_v22 = vld [vmem:[#allocation3 + $0x110] sm:$0xff] }
 0x2eb   :  { %3824 = vtanh.f32 %v6078_v49  ;;  %v1182_v56 = vsel %vm1181_vm11, %v3821_v40, %v1178_v15  ;;  %v6101_v40 = vld [vmem:[#allocation3 + $0x1d0] sm:$0xff]  ;;  %9229 = vst [vmem:[#allocation54_spill] sm:$0xff] %v6158_v34  ;;  %v6168_v15 = vld [vmem:[#allocation3 + $0xe8] sm:$0xff] }
 0x2ec   :  { %v1187_v43 = vsel %vm1184_vm12, %v1186_v61, %v1182_v56  ;;  %9230 = vst [vmem:[#allocation53_spill] sm:$0xff] %v6161_v22  ;;  %v6178_v33 = vld [vmem:[#allocation3 + $0xc8] sm:$0xff]  ;;  %v6181_v56 = vld [vmem:[#allocation3 + $0xd0] sm:$0xff] }
 0x2ed   :  { %9232 = vst [vmem:[#allocation56_spill] sm:$0xff] %v6168_v15  ;;  %v6188_v61 = vld [vmem:[#allocation3 + $0xa8] sm:$0xff] }
 0x2ee   :  { %9235 = vst [vmem:[#allocation58_spill] sm:$0xff] %v6178_v33 }
 0x2ef   :  { %9236 = vst [vmem:[#allocation57_spill] sm:$0xff] %v6181_v56 }
 0x2f0   :  { %9238 = vst [vmem:[#allocation60_spill] sm:$0xff] %v6188_v61 }
 0x2f1   :  { %v3825_v59 = vpop.eup %3824 }
 0x2f2   :  { %v6081_v6 = vmul.f32 %v3825_v59, %v1187_v43  ;;  %v6191_v59 = vld [vmem:[#allocation3 + $0xb0] sm:$0xff]  ;;  %v6198_v43 = vld [vmem:[#allocation3 + $0x88] sm:$0xff] }
 0x2f3   :  { %9239 = vst [vmem:[#allocation59_spill] sm:$0xff] %v6191_v59 }
 0x2f4   :  { %1211 = vmatmul.f32.vlgmr.msra.gmra.mxu0 %v6081_v6  ;;  %1231 = vmatmul.f32.vlgmr.msrb.gmra.mxu1 %v6081_v6  ;;  %9241 = vst [vmem:[#allocation107_spill] sm:$0xff] %v6198_v43 }
 0x2f5   :  { %1251 = vmatmul.f32.vlgmr.msrb.gmra.mxu2 %v6081_v6  ;;  %1271 = vmatmul.f32.vlgmr.msrb.gmra.mxu3 %v6081_v6 }
 0x2f6   :  { %1422 = vmatpush.msra.mxu0 %v5716_v45  ;;  %1442 = vmatpush.msrb.mxu1 %v6088_v29  ;;  %v6104_v45 = vld [vmem:[#allocation3 + $0x1d8] sm:$0xff] }
 0x2f7   :  { %1462 = vmatpush.msrb.mxu2 %v6091_v37  ;;  %1482 = vmatpush.msrb.mxu3 %v6094_v63 }
 0x2f8   :  { %1423 = vmatpush.msra.mxu0 %v5722_v8  ;;  %1443 = vmatpush.msrb.mxu1 %v6098_v10  ;;  %v6114_v8 = vld [vmem:[#allocation3 + $0x1b8] sm:$0xff] }
 0x2f9   :  { %1463 = vmatpush.msrb.mxu2 %v6101_v40  ;;  %1483 = vmatpush.msrb.mxu3 %v6104_v45 }
 0x2fa   :  { %1424 = vmatpush.msra.mxu0 %v5728_v26  ;;  %1444 = vmatpush.msrb.mxu1 %v6108_v39  ;;  %v6124_v26 = vld [vmem:[#allocation3 + $0x198] sm:$0xff] }
 0x2fb   :  { %1464 = vmatpush.msrb.mxu2 %v6111_v55  ;;  %1484 = vmatpush.msrb.mxu3 %v6114_v8 }
 0x2fc   :  { %1425 = vmatpush.msra.mxu0 %v5734_v3  ;;  %1445 = vmatpush.msrb.mxu1 %v6118_v24  ;;  %v6134_v3 = vld [vmem:[#allocation3 + $0x178] sm:$0xff] }
 0x2fd   :  { %1465 = vmatpush.msrb.mxu2 %v6121_v47  ;;  %1485 = vmatpush.msrb.mxu3 %v6124_v26 }
 0x2fe   :  { %1426 = vmatpush.msra.mxu0 %v5740_v12  ;;  %1446 = vmatpush.msrb.mxu1 %v6128_v42  ;;  %v6144_v12 = vld [vmem:[#allocation3 + $0x158] sm:$0xff] }
 0x2ff   :  { %1466 = vmatpush.msrb.mxu2 %v6131_v19  ;;  %1486 = vmatpush.msrb.mxu3 %v6134_v3 }
 0x300   :  { %1427 = vmatpush.msra.mxu0 %v5746_v17  ;;  %1447 = vmatpush.msrb.mxu1 %v6138_v41  ;;  %v6154_v17 = vld [vmem:[#allocation3 + $0x138] sm:$0xff] }
 0x301   :  { %1467 = vmatpush.msrb.mxu2 %v6141_v21  ;;  %1487 = vmatpush.msrb.mxu3 %v6144_v12 }
 0x302   :  { %1428 = vmatpush.msra.mxu0 %v5752_v31  ;;  %1448 = vmatpush.msrb.mxu1 %v6148_v14  ;;  %v6164_v31 = vld [vmem:[#allocation3 + $0x118] sm:$0xff] }
 0x303   :  { %1468 = vmatpush.msrb.mxu2 %v6151_v53  ;;  %1488 = vmatpush.msrb.mxu3 %v6154_v17  ;;  %9231 = vst [vmem:[#allocation44_spill] sm:$0xff] %v6164_v31 }
 0x304   :  { %1429 = vmatpush.msra.mxu0 %v5758_v30  ;;  %1449 = vmatpush.msrb.mxu1 %v6158_v34  ;;  %v6174_v30 = vld [vmem:[#allocation3 + $0xf8] sm:$0xff] }
 0x305   :  { %1469 = vmatpush.msrb.mxu2 %v6161_v22  ;;  %1489 = vmatpush.msrb.mxu3 %v6164_v31  ;;  %9234 = vst [vmem:[#allocation47_spill] sm:$0xff] %v6174_v30 }
 0x306   :  { %1430 = vmatpush.msra.mxu0 %v5764_v28  ;;  %1450 = vmatpush.msrb.mxu1 %v6168_v15  ;;  %v6184_v28 = vld [vmem:[#allocation3 + $0xd8] sm:$0xff] }
 0x307   :  { %1470 = vmatpush.msrb.mxu2 %v6171_v46  ;;  %1490 = vmatpush.msrb.mxu3 %v6174_v30  ;;  %9237 = vst [vmem:[#allocation50_spill] sm:$0xff] %v6184_v28 }
 0x308   :  { %1431 = vmatpush.msra.mxu0 %v5770_v38  ;;  %1451 = vmatpush.msrb.mxu1 %v6178_v33  ;;  %v6194_v38 = vld [vmem:[#allocation3 + $0xb8] sm:$0xff] }
 0x309   :  { %1471 = vmatpush.msrb.mxu2 %v6181_v56  ;;  %1491 = vmatpush.msrb.mxu3 %v6184_v28  ;;  %9240 = vst [vmem:[#allocation79_spill] sm:$0xff] %v6194_v38  ;;  %v6201_v28 = vld [vmem:[#allocation3 + $0x90] sm:$0xff] }
 0x30a   :  { %1432 = vmatpush.msra.mxu0 %v5776_v48  ;;  %1452 = vmatpush.msrb.mxu1 %v6188_v61  ;;  %9242 = vst [vmem:[#allocation135_spill] sm:$0xff] %v6201_v28  ;;  %v6204_v48 = vld [vmem:[#allocation3 + $0x98] sm:$0xff] }
 0x30b   :  { %1472 = vmatpush.msrb.mxu2 %v6191_v59  ;;  %1492 = vmatpush.msrb.mxu3 %v6194_v38  ;;  %9243 = vst [vmem:[#allocation139_spill] sm:$0xff] %v6204_v48  ;;  %v6208_v59 = vld [vmem:[#allocation3 + $0x68] sm:$0xff]  ;;  %v6211_v38 = vld [vmem:[#allocation3 + $0x70] sm:$0xff]  ;;  %v9256_v61 = vld [vmem:[#allocation19_spill] sm:$0xff] }
 0x30c   :  { %1433 = vmatpush.msra.mxu0 %v5782_v4  ;;  %1453 = vmatpush.msrb.mxu1 %v6198_v43  ;;  %9244 = vst [vmem:[#allocation85_spill] sm:$0xff] %v6208_v59  ;;  %v6214_v4 = vld [vmem:[#allocation3 + $0x78] sm:$0xff] }
 0x30d   :  { %1473 = vmatpush.msrb.mxu2 %v6201_v28  ;;  %1493 = vmatpush.msrb.mxu3 %v6204_v48  ;;  %9245 = vst [vmem:[#allocation86_spill] sm:$0xff] %v6211_v38  ;;  %v6218_v28 = vld [vmem:[#allocation3 + $0x48] sm:$0xff]  ;;  %v6221_v48 = vld [vmem:[#allocation3 + $0x50] sm:$0xff] }
 0x30e   :  { %1434 = vmatpush.msra.mxu0 %v5788_v25  ;;  %1454 = vmatpush.msrb.mxu1 %v6208_v59  ;;  %9246 = vst [vmem:[#allocation87_spill] sm:$0xff] %v6214_v4  ;;  %v6224_v25 = vld [vmem:[#allocation3 + $0x58] sm:$0xff] }
 0x30f   :  { %1474 = vmatpush.msrb.mxu2 %v6211_v38  ;;  %1494 = vmatpush.msrb.mxu3 %v6214_v4  ;;  %9247 = vst [vmem:[#allocation89_spill] sm:$0xff] %v6218_v28  ;;  %v6228_v38 = vld [vmem:[#allocation3 + $0x28] sm:$0xff]  ;;  %v6231_v4 = vld [vmem:[#allocation3 + $0x30] sm:$0xff] }
 0x310   :  { %1435 = vmatpush.msra.mxu0 %v5794_v7  ;;  %1455 = vmatpush.msrb.mxu1 %v6218_v28  ;;  %9248 = vst [vmem:[#allocation90_spill] sm:$0xff] %v6221_v48  ;;  %v6234_v7 = vld [vmem:[#allocation3 + $0x38] sm:$0xff] }
 0x311   :  { %1475 = vmatpush.msrb.mxu2 %v6221_v48  ;;  %9249 = vst [vmem:[#allocation91_spill] sm:$0xff] %v6224_v25  ;;  %1495 = vmatpush.msrb.mxu3 %v6224_v25  ;;  %v6238_v48 = vld [vmem:[#allocation3 + $0x8] sm:$0xff]  ;;  %v6241_v25 = vld [vmem:[#allocation3 + $0x10] sm:$0xff] }
 0x312   :  { %1436 = vmatpush.msra.mxu0 %v5800_v35  ;;  %9250 = vst [vmem:[#allocation92_spill] sm:$0xff] %v6228_v38  ;;  %1456 = vmatpush.msrb.mxu1 %v6228_v38  ;;  %v6244_v35 = vld [vmem:[#allocation3 + $0x18] sm:$0xff] }
 0x313   :  { %9251 = vst [vmem:[#allocation93_spill] sm:$0xff] %v6231_v4  ;;  %1476 = vmatpush.msrb.mxu2 %v6231_v4  ;;  %1496 = vmatpush.msrb.mxu3 %v6234_v7  ;;  %v982_v4 = vadd.f32 %v6065_v32, %v5815_v9 }
 0x314   :  { %9252 = vst [vmem:[#allocation94_spill] sm:$0xff] %v6234_v7  ;;  %1437 = vmatpush.msra.mxu0 %v5806_v5  ;;  %1457 = vmatpush.msrb.mxu1 %v6238_v48  ;;  %v1002_v7 = vadd.f32 %v6067_v23, %v5817_v57 }
 0x315   :  { %9253 = vst [vmem:[#allocation95_spill] sm:$0xff] %v6238_v48  ;;  %1477 = vmatpush.msrb.mxu2 %v6241_v25  ;;  %1497 = vmatpush.msrb.mxu3 %v6244_v35 }
 0x316   :  { %9254 = vst [vmem:[#allocation96_spill] sm:$0xff] %v6241_v25  ;;  %v1022_v25 = vadd.f32 %v6069_v36, %v9256_v61 }
 0x317   :  { %9255 = vst [vmem:[#allocation97_spill] sm:$0xff] %v6244_v35 }
 0x371   :  { %v1212_v38 = vpop.f32.mrf.mxu0  ;;  %v1232_v5 = vpop.f32.mrf.mxu1 }
 0x372   :  { %v1213_v28 = vadd.f32 %v1212_v38, %v982_v4  ;;  %v1233_v59 = vadd.f32 %v1232_v5, %v1002_v7  ;;  %v9257_v4 = vld [vmem:[#allocation14_spill] sm:$0xff] }
 0x374   :  { %v3715_v43 = vmul.f32 -1.442695, %v1213_v28  ;;  %v3716_v48 = vmul.f32 -1.442695, %v1233_v59  ;;  %v1042_v28 = vadd.f32 %v6073_v27, %v9257_v4 }
 0x376   :  { %3826 = vpow2.f32 %v3715_v43 }
 0x377   :  { %3828 = vpow2.f32 %v3716_v48 }
 0x378   :  { %v1252_v56 = vpop.f32.mrf.mxu2  ;;  %v1272_v23 = vpop.f32.mrf.mxu3 }
 0x379   :  { %v1253_v33 = vadd.f32 %v1252_v56, %v1022_v25  ;;  %v1273_v7 = vadd.f32 %v1272_v23, %v1042_v28 }
 0x37b   :  { %v3717_v35 = vmul.f32 -1.442695, %v1253_v33 }
 0x37c   :  { %v3827_v30 = vpop.eup %3826 }
 0x37d   :  { %v3829_v46 = vpop.eup %3828  ;;  %v1284_v32 = vadd.f32 1.0, %v3827_v30  ;;  %3830 = vpow2.f32 %v3717_v35 }
 0x37e   :  { %v1285_v9 = vadd.f32 1.0, %v3829_v46 }
 0x37f   :  { %3832 = vrcp.f32 %v1284_v32  ;;  %v1298_v5 = vand.u32 2147483648, %v1284_v32  ;;  %v1296_v35 = vand.u32 2147483647, %v1284_v32  ;;  %vm1292_vm15 = vweird.f32 %v1284_v32 }
 0x380   :  { %3834 = vrcp.f32 %v1285_v9  ;;  %v1313_v30 = vand.u32 2147483648, %v1285_v9  ;;  %v1311_v57 = vand.u32 2147483647, %v1285_v9  ;;  %vm1307_vm0 = vweird.f32 %v1285_v9 }
 0x381   :  { %vm1297_vm3 = vcmp.eq.f32.partialorder %v1296_v35, 8.507059e+37  ;;  %v6277_v35 = vld [vmem:[#allocation6 + $0x1d0] sm:$0xff] }
 0x382   :  { %vm1312_vm4 = vcmp.eq.f32.partialorder %v1311_v57, 8.507059e+37 }
 0x383   :  { %v3831_v38 = vpop.eup %3830 }
 0x384   :  { %v1286_v59 = vadd.f32 1.0, %v3831_v38  ;;  %v1299_v38 = vor.u32 1.1754944e-38, %v1298_v5 }
 0x385   :  { %v3833_v43 = vpop.eup %3832 }
 0x386   :  { %v3835_v36 = vpop.eup %3834  ;;  %v1288_v48 = vmul.f32 %v3833_v43, %v1284_v32  ;;  %3836 = vrcp.f32 %v1286_v59  ;;  %vm1293_vm13 = vweird.f32 %v3833_v43  ;;  %vm1322_vm6 = vweird.f32 %v1286_v59 }
 0x387   :  { %v1303_v56 = vmul.f32 %v3835_v36, %v1285_v9  ;;  %3838 = vtanh.f32 %v1273_v7  ;;  %vm1308_vm14 = vweird.f32 %v3835_v36  ;;  %vm1294_vm1 = vmor %vm1292_vm15, %vm1293_vm13 }
 0x388   :  { %v1289_v33 = vsub.f32 1.0, %v1288_v48  ;;  %vm1309_vm2 = vmor %vm1307_vm0, %vm1308_vm14  ;;  %v1314_v48 = vor.u32 1.1754944e-38, %v1313_v30 }
 0x389   :  { %v1304_v25 = vsub.f32 1.0, %v1303_v56 }
 0x38a   :  { %v1290_v46 = vmul.f32 %v3833_v43, %v1289_v33 }
 0x38b   :  { %v1305_v61 = vmul.f32 %v3835_v36, %v1304_v25 }
 0x38c   :  { %v3837_v15 = vpop.eup %3836  ;;  %v1291_v27 = vadd.f32 %v3833_v43, %v1290_v46 }
 0x38d   :  { %v1318_v23 = vmul.f32 %v3837_v15, %v1286_v59  ;;  %v1306_v28 = vadd.f32 %v3835_v36, %v1305_v61  ;;  %v3839_v7 = vpop.eup %3838  ;;  %vm1323_vm5 = vweird.f32 %v3837_v15  ;;  %v1328_v61 = vand.u32 2147483648, %v1286_v59 }
 0x38e   :  { %v1295_v56 = vsel %vm1294_vm1, %v3833_v43, %v1291_v27  ;;  %v1326_v43 = vand.u32 2147483647, %v1286_v59  ;;  %vm1324_vm7 = vmor %vm1322_vm6, %vm1323_vm5  ;;  %v6274_v59 = vld [vmem:[#allocation6 + $0x1c8] sm:$0xff]  ;;  %v6280_v27 = vld [vmem:[#allocation6 + $0x1d8] sm:$0xff] }
 0x38f   :  { %v1319_v4 = vsub.f32 1.0, %v1318_v23  ;;  %v1300_v33 = vsel %vm1297_vm3, %v1299_v38, %v1295_v56  ;;  %v1310_v31 = vsel %vm1309_vm2, %v3835_v36, %v1306_v28  ;;  %v1329_v30 = vor.u32 1.1754944e-38, %v1328_v61  ;;  %v6283_v23 = vld [vmem:[#allocation6 + $0x1a0] sm:$0xff]  ;;  %v6286_v38 = vld [vmem:[#allocation6 + $0x1a8] sm:$0xff]  ;;  %v6289_v28 = vld [vmem:[#allocation6 + $0x1b0] sm:$0xff] }
 0x390   :  { %v1315_v25 = vsel %vm1312_vm4, %v1314_v48, %v1310_v31  ;;  %v1334_v22 = vmul.f32 %v3839_v7, %v1300_v33  ;;  %vm1327_vm8 = vcmp.eq.f32.partialorder %v1326_v43, 8.507059e+37  ;;  %v6292_v48 = vld [vmem:[#allocation6 + $0x1b8] sm:$0xff]  ;;  %v6299_v56 = vld [vmem:[#allocation6 + $0x180] sm:$0xff]  ;;  %v6302_v7 = vld [vmem:[#allocation6 + $0x188] sm:$0xff] }
 0x391   :  { %v1333_v34 = vmul.f32 %v1315_v25, %v5834_v62  ;;  %v1320_v46 = vmul.f32 %v3837_v15, %v1319_v4  ;;  %v6259_v62 = vld [vmem:[#allocation6 + $0x1e0] sm:$0xff]  ;;  %9258 = vst [vmem:[#allocation99_spill] sm:$0xff] %v6299_v56  ;;  %v6305_v33 = vld [vmem:[#allocation6 + $0x190] sm:$0xff]  ;;  %v6308_v25 = vld [vmem:[#allocation6 + $0x198] sm:$0xff] }
 0x392   :  { %v6271_v4 = vld [vmem:[#allocation6 + $0x1c0] sm:$0xff]  ;;  %9259 = vst [vmem:[#allocation100_spill] sm:$0xff] %v6302_v7  ;;  %v6320_v61 = vld [vmem:[#allocation6 + $0x178] sm:$0xff] }
 0x393   :  { %v6256_v32 = vadd.f32 %v1334_v22, %v1333_v34  ;;  %v1321_v9 = vadd.f32 %v3837_v15, %v1320_v46  ;;  %v6262_v34 = vld [vmem:[#allocation6 + $0x1e8] sm:$0xff]  ;;  %v6265_v22 = vld [vmem:[#allocation6 + $0x1f0] sm:$0xff]  ;;  %9260 = vst [vmem:[#allocation102_spill] sm:$0xff] %v6305_v33  ;;  %v6311_v46 = vld [vmem:[#allocation6 + $0x160] sm:$0xff] }
 0x394   :  { %9261 = vst [vmem:[#allocation103_spill] sm:$0xff] %v6308_v25  ;;  %v6323_v43 = vld [vmem:[#allocation6 + $0x140] sm:$0xff] }
 0x395   :  { %3840 = vtanh.f32 %v6256_v32  ;;  %v1325_v5 = vsel %vm1324_vm7, %v3837_v15, %v1321_v9  ;;  %v6268_v15 = vld [vmem:[#allocation6 + $0x1f8] sm:$0xff]  ;;  %9262 = vst [vmem:[#allocation104_spill] sm:$0xff] %v6311_v46  ;;  %v6317_v9 = vld [vmem:[#allocation6 + $0x170] sm:$0xff] }
 0x396   :  { %v1330_v57 = vsel %vm1327_vm8, %v1329_v30, %v1325_v5  ;;  %9264 = vst [vmem:[#allocation106_spill] sm:$0xff] %v6317_v9  ;;  %v6326_v5 = vld [vmem:[#allocation6 + $0x148] sm:$0xff]  ;;  %v6329_v30 = vld [vmem:[#allocation6 + $0x150] sm:$0xff] }
 0x397   :  { %9265 = vst [vmem:[#allocation108_spill] sm:$0xff] %v6320_v61 }
 0x398   :  { %9266 = vst [vmem:[#allocation109_spill] sm:$0xff] %v6323_v43 }
 0x399   :  { %9267 = vst [vmem:[#allocation110_spill] sm:$0xff] %v6326_v5 }
 0x39a   :  { %9268 = vst [vmem:[#allocation111_spill] sm:$0xff] %v6329_v30 }
 0x39b   :  { %v3841_v36 = vpop.eup %3840 }
 0x39c   :  { %v1337_v31 = vmul.f32 %v3841_v36, %v1330_v57  ;;  %v6332_v36 = vld [vmem:[#allocation6 + $0x158] sm:$0xff]  ;;  %v6335_v57 = vld [vmem:[#allocation6 + $0x120] sm:$0xff] }
 0x39d   :  { %9269 = vst [vmem:[#allocation112_spill] sm:$0xff] %v6332_v36 }
 0x39e   :  { %1354 = vmatmul.f32.vlgmr.msrb.gmra.mxu0 %v1337_v31  ;;  %1374 = vmatmul.f32.vlgmr.msra.gmra.mxu1 %v1337_v31  ;;  %9270 = vst [vmem:[#allocation113_spill] sm:$0xff] %v6335_v57 }
 0x39f   :  { %1394 = vmatmul.f32.vlgmr.msra.gmra.mxu2 %v1337_v31  ;;  %1414 = vmatmul.f32.vlgmr.msra.gmra.mxu3 %v1337_v31  ;;  %v6338_v31 = vld [vmem:[#allocation6 + $0x128] sm:$0xff] }
 0x3a0   :  { %1569 = vmatpush.msrb.mxu0 %v6259_v62  ;;  %1589 = vmatpush.msra.mxu1 %v6262_v34  ;;  %9271 = vst [vmem:[#allocation114_spill] sm:$0xff] %v6338_v31 }
 0x3a1   :  { %1609 = vmatpush.msra.mxu2 %v6265_v22  ;;  %1629 = vmatpush.msra.mxu3 %v6268_v15 }
 0x3a2   :  { %1570 = vmatpush.msrb.mxu0 %v6271_v4  ;;  %1590 = vmatpush.msra.mxu1 %v6274_v59 }
 0x3a3   :  { %1610 = vmatpush.msra.mxu2 %v6277_v35  ;;  %1630 = vmatpush.msra.mxu3 %v6280_v27 }
 0x3a4   :  { %1571 = vmatpush.msrb.mxu0 %v6283_v23  ;;  %1591 = vmatpush.msra.mxu1 %v6286_v38 }
 0x3a5   :  { %1611 = vmatpush.msra.mxu2 %v6289_v28  ;;  %1631 = vmatpush.msra.mxu3 %v6292_v48 }
 0x3a6   :  { %1438 = vmatmul.f32.vlgmr.msra.gmra.mxu0 %v6081_v6  ;;  %1458 = vmatmul.f32.vlgmr.msrb.gmra.mxu1 %v6081_v6 }
 0x3a7   :  { %1478 = vmatmul.f32.vlgmr.msrb.gmra.mxu2 %v6081_v6  ;;  %1498 = vmatmul.f32.vlgmr.msrb.gmra.mxu3 %v6081_v6  ;;  %v6314_v6 = vld [vmem:[#allocation6 + $0x168] sm:$0xff] }
 0x3a8   :  { %1572 = vmatpush.msrb.mxu0 %v6299_v56  ;;  %1592 = vmatpush.msra.mxu1 %v6302_v7  ;;  %9263 = vst [vmem:[#allocation105_spill] sm:$0xff] %v6314_v6 }
 0x3a9   :  { %1612 = vmatpush.msra.mxu2 %v6305_v33  ;;  %1632 = vmatpush.msra.mxu3 %v6308_v25 }
 0x3aa   :  { %1573 = vmatpush.msrb.mxu0 %v6311_v46  ;;  %1593 = vmatpush.msra.mxu1 %v6314_v6 }
 0x3ab   :  { %1613 = vmatpush.msra.mxu2 %v6317_v9  ;;  %1633 = vmatpush.msra.mxu3 %v6320_v61 }
 0x3ac   :  { %1574 = vmatpush.msrb.mxu0 %v6323_v43  ;;  %1594 = vmatpush.msra.mxu1 %v6326_v5  ;;  %v6341_v43 = vld [vmem:[#allocation6 + $0x130] sm:$0xff]  ;;  %v6344_v5 = vld [vmem:[#allocation6 + $0x138] sm:$0xff] }
 0x3ad   :  { %1614 = vmatpush.msra.mxu2 %v6329_v30  ;;  %1634 = vmatpush.msra.mxu3 %v6332_v36  ;;  %9272 = vst [vmem:[#allocation115_spill] sm:$0xff] %v6341_v43  ;;  %v6347_v30 = vld [vmem:[#allocation6 + $0x100] sm:$0xff]  ;;  %v6350_v36 = vld [vmem:[#allocation6 + $0x108] sm:$0xff] }
 0x3ae   :  { %1575 = vmatpush.msrb.mxu0 %v6335_v57  ;;  %1595 = vmatpush.msra.mxu1 %v6338_v31  ;;  %9273 = vst [vmem:[#allocation116_spill] sm:$0xff] %v6344_v5  ;;  %v6353_v57 = vld [vmem:[#allocation6 + $0x110] sm:$0xff]  ;;  %v6356_v31 = vld [vmem:[#allocation6 + $0x118] sm:$0xff] }
 0x3af   :  { %1615 = vmatpush.msra.mxu2 %v6341_v43  ;;  %1635 = vmatpush.msra.mxu3 %v6344_v5  ;;  %9274 = vst [vmem:[#allocation118_spill] sm:$0xff] %v6347_v30  ;;  %v6359_v43 = vld [vmem:[#allocation6 + $0xe0] sm:$0xff]  ;;  %v6362_v5 = vld [vmem:[#allocation6 + $0xe8] sm:$0xff] }
 0x3b0   :  { %1576 = vmatpush.msrb.mxu0 %v6347_v30  ;;  %9275 = vst [vmem:[#allocation119_spill] sm:$0xff] %v6350_v36  ;;  %1596 = vmatpush.msra.mxu1 %v6350_v36  ;;  %v6365_v30 = vld [vmem:[#allocation6 + $0xf0] sm:$0xff]  ;;  %v6368_v36 = vld [vmem:[#allocation6 + $0xf8] sm:$0xff] }
 0x3b1   :  { %9276 = vst [vmem:[#allocation120_spill] sm:$0xff] %v6353_v57  ;;  %1616 = vmatpush.msra.mxu2 %v6353_v57  ;;  %1636 = vmatpush.msra.mxu3 %v6356_v31  ;;  %v6371_v57 = vld [vmem:[#allocation6 + $0xc0] sm:$0xff] }
 0x3b2   :  { %9277 = vst [vmem:[#allocation122_spill] sm:$0xff] %v6356_v31  ;;  %1577 = vmatpush.msrb.mxu0 %v6359_v43  ;;  %1597 = vmatpush.msra.mxu1 %v6362_v5  ;;  %v6374_v31 = vld [vmem:[#allocation6 + $0xc8] sm:$0xff] }
 0x3b3   :  { %9278 = vst [vmem:[#allocation123_spill] sm:$0xff] %v6359_v43  ;;  %1617 = vmatpush.msra.mxu2 %v6365_v30  ;;  %1637 = vmatpush.msra.mxu3 %v6368_v36  ;;  %v6377_v43 = vld [vmem:[#allocation6 + $0xd0] sm:$0xff] }
 0x3b4   :  { %9279 = vst [vmem:[#allocation124_spill] sm:$0xff] %v6362_v5  ;;  %1578 = vmatpush.msrb.mxu0 %v6371_v57  ;;  %1598 = vmatpush.msra.mxu1 %v6374_v31  ;;  %v6380_v5 = vld [vmem:[#allocation6 + $0xd8] sm:$0xff] }
 0x3b5   :  { %9280 = vst [vmem:[#allocation125_spill] sm:$0xff] %v6365_v30  ;;  %1618 = vmatpush.msra.mxu2 %v6377_v43  ;;  %1638 = vmatpush.msra.mxu3 %v6380_v5  ;;  %v6383_v30 = vld [vmem:[#allocation6 + $0xa0] sm:$0xff] }
 0x3b6   :  { %9281 = vst [vmem:[#allocation126_spill] sm:$0xff] %v6368_v36  ;;  %1579 = vmatpush.msrb.mxu0 %v6383_v30  ;;  %v6386_v36 = vld [vmem:[#allocation6 + $0xa8] sm:$0xff] }
 0x3b7   :  { %9282 = vst [vmem:[#allocation127_spill] sm:$0xff] %v6371_v57  ;;  %1599 = vmatpush.msra.mxu1 %v6386_v36  ;;  %v6389_v57 = vld [vmem:[#allocation6 + $0xb0] sm:$0xff] }
 0x3b8   :  { %9283 = vst [vmem:[#allocation128_spill] sm:$0xff] %v6374_v31  ;;  %1619 = vmatpush.msra.mxu2 %v6389_v57  ;;  %v6392_v31 = vld [vmem:[#allocation6 + $0xb8] sm:$0xff] }
 0x3b9   :  { %9284 = vst [vmem:[#allocation129_spill] sm:$0xff] %v6377_v43  ;;  %1639 = vmatpush.msra.mxu3 %v6392_v31  ;;  %v6395_v43 = vld [vmem:[#allocation6 + $0x80] sm:$0xff] }
 0x3ba   :  { %9285 = vst [vmem:[#allocation130_spill] sm:$0xff] %v6380_v5  ;;  %1580 = vmatpush.msrb.mxu0 %v6395_v43  ;;  %v6398_v5 = vld [vmem:[#allocation6 + $0x88] sm:$0xff] }
 0x3bb   :  { %9286 = vst [vmem:[#allocation131_spill] sm:$0xff] %v6383_v30  ;;  %1600 = vmatpush.msra.mxu1 %v6398_v5  ;;  %v6401_v30 = vld [vmem:[#allocation6 + $0x90] sm:$0xff] }
 0x3bc   :  { %9287 = vst [vmem:[#allocation132_spill] sm:$0xff] %v6386_v36  ;;  %1620 = vmatpush.msra.mxu2 %v6401_v30  ;;  %v6404_v36 = vld [vmem:[#allocation6 + $0x98] sm:$0xff] }
 0x3bd   :  { %9288 = vst [vmem:[#allocation133_spill] sm:$0xff] %v6389_v57  ;;  %1640 = vmatpush.msra.mxu3 %v6404_v36  ;;  %v6407_v57 = vld [vmem:[#allocation6 + $0x60] sm:$0xff] }
 0x3be   :  { %9289 = vst [vmem:[#allocation134_spill] sm:$0xff] %v6392_v31  ;;  %1581 = vmatpush.msrb.mxu0 %v6407_v57  ;;  %v6410_v31 = vld [vmem:[#allocation6 + $0x68] sm:$0xff] }
 0x3bf   :  { %9290 = vst [vmem:[#allocation136_spill] sm:$0xff] %v6395_v43  ;;  %1601 = vmatpush.msra.mxu1 %v6410_v31  ;;  %v6413_v43 = vld [vmem:[#allocation6 + $0x70] sm:$0xff] }
 0x3c0   :  { %9291 = vst [vmem:[#allocation137_spill] sm:$0xff] %v6398_v5  ;;  %1621 = vmatpush.msra.mxu2 %v6413_v43  ;;  %v6416_v5 = vld [vmem:[#allocation6 + $0x78] sm:$0xff] }
 0x3c1   :  { %9292 = vst [vmem:[#allocation138_spill] sm:$0xff] %v6401_v30  ;;  %1641 = vmatpush.msra.mxu3 %v6416_v5  ;;  %v6419_v30 = vld [vmem:[#allocation6 + $0x40] sm:$0xff] }
 0x3c2   :  { %9293 = vst [vmem:[#allocation140_spill] sm:$0xff] %v6404_v36  ;;  %1582 = vmatpush.msrb.mxu0 %v6419_v30  ;;  %v6422_v36 = vld [vmem:[#allocation6 + $0x48] sm:$0xff] }
 0x3c3   :  { %9294 = vst [vmem:[#allocation141_spill] sm:$0xff] %v6407_v57  ;;  %1602 = vmatpush.msra.mxu1 %v6422_v36  ;;  %v6425_v57 = vld [vmem:[#allocation6 + $0x50] sm:$0xff] }
 0x3c4   :  { %9295 = vst [vmem:[#allocation142_spill] sm:$0xff] %v6410_v31  ;;  %1622 = vmatpush.msra.mxu2 %v6425_v57  ;;  %v6428_v31 = vld [vmem:[#allocation6 + $0x58] sm:$0xff] }
 0x3c5   :  { %9296 = vst [vmem:[#allocation143_spill] sm:$0xff] %v6413_v43  ;;  %1642 = vmatpush.msra.mxu3 %v6428_v31  ;;  %v6431_v43 = vld [vmem:[#allocation6 + $0x20] sm:$0xff] }
 0x3c6   :  { %9297 = vst [vmem:[#allocation144_spill] sm:$0xff] %v6416_v5  ;;  %1583 = vmatpush.msrb.mxu0 %v6431_v43  ;;  %v6434_v5 = vld [vmem:[#allocation6 + $0x28] sm:$0xff] }
 0x3c7   :  { %9298 = vst [vmem:[#allocation145_spill] sm:$0xff] %v6419_v30  ;;  %1603 = vmatpush.msra.mxu1 %v6434_v5  ;;  %v6437_v30 = vld [vmem:[#allocation6 + $0x30] sm:$0xff] }
 0x3c8   :  { %9299 = vst [vmem:[#allocation146_spill] sm:$0xff] %v6422_v36  ;;  %1623 = vmatpush.msra.mxu2 %v6437_v30  ;;  %v6440_v36 = vld [vmem:[#allocation6 + $0x38] sm:$0xff] }
 0x3c9   :  { %9300 = vst [vmem:[#allocation147_spill] sm:$0xff] %v6425_v57  ;;  %1643 = vmatpush.msra.mxu3 %v6440_v36  ;;  %v6443_v57 = vld [vmem:[#allocation6] sm:$0xff] }
 0x3ca   :  { %9301 = vst [vmem:[#allocation148_spill] sm:$0xff] %v6428_v31  ;;  %1584 = vmatpush.msrb.mxu0 %v6443_v57  ;;  %v6446_v31 = vld [vmem:[#allocation6 + $0x8] sm:$0xff] }
 0x3cb   :  { %9302 = vst [vmem:[#allocation149_spill] sm:$0xff] %v6431_v43  ;;  %1604 = vmatpush.msra.mxu1 %v6446_v31  ;;  %v6449_v43 = vld [vmem:[#allocation6 + $0x10] sm:$0xff] }
 0x3cc   :  { %9303 = vst [vmem:[#allocation150_spill] sm:$0xff] %v6434_v5  ;;  %1624 = vmatpush.msra.mxu2 %v6449_v43  ;;  %v6452_v5 = vld [vmem:[#allocation6 + $0x18] sm:$0xff] }
 0x3cd   :  { %9304 = vst [vmem:[#allocation151_spill] sm:$0xff] %v6437_v30  ;;  %1644 = vmatpush.msra.mxu3 %v6452_v5  ;;  %v6455_v30 = vld [vmem:[#allocation8 + $0x1e0] sm:$0xff]  ;;  %1732 = vmatpush.msrb.mxu1 %v5906_v54 }
 0x3ce   :  { %9305 = vst [vmem:[#allocation152_spill] sm:$0xff] %v6440_v36  ;;  %1712 = vmatpush.msra.mxu0 %v6455_v30  ;;  %1752 = vmatpush.msrb.mxu2 %v5909_v52  ;;  %v6473_v54 = vld [vmem:[#allocation8 + $0x180] sm:$0xff] }
 0x3cf   :  { %9306 = vst [vmem:[#allocation153_spill] sm:$0xff] %v6443_v57  ;;  %1772 = vmatpush.msrb.mxu3 %v5912_v16  ;;  %v6461_v57 = vld [vmem:[#allocation8 + $0x1c0] sm:$0xff]  ;;  %1733 = vmatpush.msrb.mxu1 %v5916_v0 }
 0x3d0   :  { %9307 = vst [vmem:[#allocation62_spill] sm:$0xff] %v6446_v31  ;;  %1713 = vmatpush.msra.mxu0 %v6461_v57  ;;  %1753 = vmatpush.msrb.mxu2 %v5919_v18  ;;  %v6479_v52 = vld [vmem:[#allocation8 + $0x160] sm:$0xff]  ;;  %v9317_v18 = vld [vmem:[#allocation22_spill] sm:$0xff] }
 0x3d1   :  { %9308 = vst [vmem:[#allocation65_spill] sm:$0xff] %v6449_v43  ;;  %1773 = vmatpush.msrb.mxu3 %v5922_v58  ;;  %1734 = vmatpush.msrb.mxu1 %v5926_v44  ;;  %v6485_v16 = vld [vmem:[#allocation8 + $0x140] sm:$0xff]  ;;  %v9318_v58 = vld [vmem:[#allocation15_spill] sm:$0xff] }
 0x3d2   :  { %9309 = vst [vmem:[#allocation69_spill] sm:$0xff] %v6452_v5  ;;  %v6467_v5 = vld [vmem:[#allocation8 + $0x1a0] sm:$0xff]  ;;  %1754 = vmatpush.msrb.mxu2 %v5929_v1  ;;  %v9320_v1 = vld [vmem:[#allocation23_spill] sm:$0xff] }
 0x3d3   :  { %9310 = vst [vmem:[#allocation70_spill] sm:$0xff] %v6455_v30  ;;  %1714 = vmatpush.msra.mxu0 %v6467_v5  ;;  %1774 = vmatpush.msrb.mxu3 %v5932_v50  ;;  %v9316_v0 = vld [vmem:[#allocation20_spill] sm:$0xff]  ;;  %v9321_v50 = vld [vmem:[#allocation25_spill] sm:$0xff] }
 0x3d4   :  { %9311 = vst [vmem:[#allocation154_spill] sm:$0xff] %v6461_v57  ;;  %1735 = vmatpush.msrb.mxu1 %v5936_v20  ;;  %1755 = vmatpush.msrb.mxu2 %v5939_v13  ;;  %v6491_v44 = vld [vmem:[#allocation8 + $0x120] sm:$0xff] }
 0x3d5   :  { %9312 = vst [vmem:[#allocation155_spill] sm:$0xff] %v6467_v5  ;;  %1715 = vmatpush.msra.mxu0 %v6473_v54  ;;  %1775 = vmatpush.msrb.mxu3 %v5942_v11  ;;  %v9322_v20 = vld [vmem:[#allocation16_spill] sm:$0xff]  ;;  %v9324_v11 = vld [vmem:[#allocation27_spill] sm:$0xff] }
 0x3d6   :  { %9313 = vst [vmem:[#allocation156_spill] sm:$0xff] %v6473_v54  ;;  %1736 = vmatpush.msrb.mxu1 %v5946_v60  ;;  %1756 = vmatpush.msrb.mxu2 %v5949_v2  ;;  %v6497_v13 = vld [vmem:[#allocation8 + $0x100] sm:$0xff]  ;;  %v9326_v2 = vld [vmem:[#allocation18_spill] sm:$0xff] }
 0x3d7   :  { %9314 = vst [vmem:[#allocation157_spill] sm:$0xff] %v6479_v52  ;;  %1716 = vmatpush.msra.mxu0 %v6479_v52  ;;  %1776 = vmatpush.msrb.mxu3 %v5952_v51  ;;  %v9325_v60 = vld [vmem:[#allocation28_spill] sm:$0xff] }
 0x3d8   :  { %9315 = vst [vmem:[#allocation158_spill] sm:$0xff] %v6485_v16  ;;  %1737 = vmatpush.msrb.mxu1 %v9316_v0  ;;  %1757 = vmatpush.msrb.mxu2 %v9317_v18  ;;  %v6503_v51 = vld [vmem:[#allocation8 + $0xe0] sm:$0xff]  ;;  %v9328_v0 = vld [vmem:[#allocation30_spill] sm:$0xff]  ;;  %v9329_v18 = vld [vmem:[#allocation31_spill] sm:$0xff] }
 0x3d9   :  { %1717 = vmatpush.msra.mxu0 %v6485_v16  ;;  %1777 = vmatpush.msrb.mxu3 %v9318_v58  ;;  %9319 = vst [vmem:[#allocation20_spill] sm:$0xff] %v6491_v44  ;;  %v9330_v58 = vld [vmem:[#allocation21_spill] sm:$0xff] }
 0x3da   :  { %1738 = vmatpush.msrb.mxu1 %v9320_v1  ;;  %1758 = vmatpush.msrb.mxu2 %v9321_v50  ;;  %9323 = vst [vmem:[#allocation22_spill] sm:$0xff] %v6497_v13  ;;  %v6509_v1 = vld [vmem:[#allocation8 + $0xc0] sm:$0xff]  ;;  %v9332_v50 = vld [vmem:[#allocation33_spill] sm:$0xff] }
 0x3db   :  { %1718 = vmatpush.msra.mxu0 %v6491_v44  ;;  %1778 = vmatpush.msrb.mxu3 %v9322_v20  ;;  %9327 = vst [vmem:[#allocation15_spill] sm:$0xff] %v6503_v51  ;;  %v9333_v20 = vld [vmem:[#allocation34_spill] sm:$0xff]  ;;  %v9360_v44 = vld [vmem:[#allocation67_spill] sm:$0xff] }
 0x3dc   :  { %1739 = vmatpush.msrb.mxu1 %v9324_v11  ;;  %1759 = vmatpush.msrb.mxu2 %v9325_v60  ;;  %9331 = vst [vmem:[#allocation23_spill] sm:$0xff] %v6509_v1  ;;  %v9334_v11 = vld [vmem:[#allocation24_spill] sm:$0xff] }
 0x3dd   :  { %1719 = vmatpush.msra.mxu0 %v6497_v13  ;;  %1779 = vmatpush.msrb.mxu3 %v9326_v2  ;;  %v6515_v60 = vld [vmem:[#allocation8 + $0xa0] sm:$0xff]  ;;  %v9359_v13 = vld [vmem:[#allocation66_spill] sm:$0xff] }
 0x3de   :  { %1740 = vmatpush.msrb.mxu1 %v9328_v0  ;;  %1760 = vmatpush.msrb.mxu2 %v9329_v18  ;;  %9335 = vst [vmem:[#allocation25_spill] sm:$0xff] %v6515_v60  ;;  %v9336_v2 = vld [vmem:[#allocation36_spill] sm:$0xff]  ;;  %v9337_v0 = vld [vmem:[#allocation37_spill] sm:$0xff]  ;;  %v9338_v18 = vld [vmem:[#allocation26_spill] sm:$0xff] }
 0x3df   :  { %1720 = vmatpush.msra.mxu0 %v6503_v51  ;;  %1780 = vmatpush.msrb.mxu3 %v9330_v58  ;;  %v6521_v58 = vld [vmem:[#allocation8 + $0x80] sm:$0xff] }
 0x3e0   :  { %1741 = vmatpush.msrb.mxu1 %v9332_v50  ;;  %1761 = vmatpush.msrb.mxu2 %v9333_v20  ;;  %9339 = vst [vmem:[#allocation16_spill] sm:$0xff] %v6521_v58  ;;  %v9341_v50 = vld [vmem:[#allocation40_spill] sm:$0xff]  ;;  %v9342_v20 = vld [vmem:[#allocation29_spill] sm:$0xff] }
 0x3e1   :  { %1721 = vmatpush.msra.mxu0 %v6509_v1  ;;  %1781 = vmatpush.msrb.mxu3 %v9334_v11  ;;  %v9340_v1 = vld [vmem:[#allocation39_spill] sm:$0xff]  ;;  %v6527_v11 = vld [vmem:[#allocation8 + $0x60] sm:$0xff] }
 0x3e2   :  { %1742 = vmatpush.msrb.mxu1 %v9336_v2  ;;  %1762 = vmatpush.msrb.mxu2 %v9337_v0  ;;  %9343 = vst [vmem:[#allocation27_spill] sm:$0xff] %v6527_v11  ;;  %v9345_v2 = vld [vmem:[#allocation43_spill] sm:$0xff]  ;;  %v9346_v0 = vld [vmem:[#allocation32_spill] sm:$0xff] }
 0x3e3   :  { %1722 = vmatpush.msra.mxu0 %v6515_v60  ;;  %1782 = vmatpush.msrb.mxu3 %v9338_v18  ;;  %v9344_v60 = vld [vmem:[#allocation42_spill] sm:$0xff]  ;;  %v6533_v18 = vld [vmem:[#allocation8 + $0x40] sm:$0xff] }
 0x3e4   :  { %1743 = vmatpush.msrb.mxu1 %v9340_v1  ;;  %1763 = vmatpush.msrb.mxu2 %v9341_v50  ;;  %9347 = vst [vmem:[#allocation28_spill] sm:$0xff] %v6533_v18  ;;  %v9349_v1 = vld [vmem:[#allocation46_spill] sm:$0xff]  ;;  %v9350_v50 = vld [vmem:[#allocation35_spill] sm:$0xff] }
 0x3e5   :  { %1723 = vmatpush.msra.mxu0 %v6521_v58  ;;  %1783 = vmatpush.msrb.mxu3 %v9342_v20  ;;  %v9348_v58 = vld [vmem:[#allocation45_spill] sm:$0xff]  ;;  %v6539_v20 = vld [vmem:[#allocation8 + $0x20] sm:$0xff] }
 0x3e6   :  { %1744 = vmatpush.msrb.mxu1 %v9344_v60  ;;  %1764 = vmatpush.msrb.mxu2 %v9345_v2  ;;  %9351 = vst [vmem:[#allocation18_spill] sm:$0xff] %v6539_v20  ;;  %v9353_v60 = vld [vmem:[#allocation49_spill] sm:$0xff]  ;;  %v9354_v2 = vld [vmem:[#allocation38_spill] sm:$0xff] }
 0x3e7   :  { %1724 = vmatpush.msra.mxu0 %v6527_v11  ;;  %1784 = vmatpush.msrb.mxu3 %v9346_v0  ;;  %v9352_v11 = vld [vmem:[#allocation48_spill] sm:$0xff] }
 0x3e8   :  { %1745 = vmatpush.msrb.mxu1 %v9348_v58  ;;  %1765 = vmatpush.msrb.mxu2 %v9349_v1  ;;  %v6545_v0 = vld [vmem:[#allocation8] sm:$0xff]  ;;  %v9358_v1 = vld [vmem:[#allocation41_spill] sm:$0xff] }
 0x3e9   :  { %1725 = vmatpush.msra.mxu0 %v6533_v18  ;;  %1785 = vmatpush.msrb.mxu3 %v9350_v50  ;;  %9355 = vst [vmem:[#allocation30_spill] sm:$0xff] %v6545_v0  ;;  %v9356_v18 = vld [vmem:[#allocation51_spill] sm:$0xff]  ;;  %v9357_v58 = vld [vmem:[#allocation52_spill] sm:$0xff] }
 0x3ea   :  { %1746 = vmatpush.msrb.mxu1 %v9352_v11  ;;  %1766 = vmatpush.msrb.mxu2 %v9353_v60 }
 0x3eb   :  { %1726 = vmatpush.msra.mxu0 %v6539_v20  ;;  %1786 = vmatpush.msrb.mxu3 %v9354_v2 }
 0x3ec   :  { %1747 = vmatpush.msrb.mxu1 %v9356_v18  ;;  %1767 = vmatpush.msrb.mxu2 %v9357_v58 }
 0x3ed   :  { %1727 = vmatpush.msra.mxu0 %v6545_v0  ;;  %1787 = vmatpush.msrb.mxu3 %v9358_v1  ;;  %v9361_v1 = vld [vmem:[#allocation72_spill] sm:$0xff] }
 0x41b   :  { %v6551_v50 = vpop.f32.mrf.mxu0  ;;  %v6553_v51 = vpop.f32.mrf.mxu1 }
 0x422   :  { %v6555_v20 = vpop.f32.mrf.mxu2  ;;  %v6559_v18 = vpop.f32.mrf.mxu3 }
 0x423   :  { %v1439_v11 = vpop.f32.mrf.mxu0  ;;  %v1459_v60 = vpop.f32.mrf.mxu1 }
 0x424   :  { %v1502_v2 = vadd.f32 %v1439_v11, %v9359_v13  ;;  %v1503_v16 = vadd.f32 %v1459_v60, %v9360_v44 }
 0x426   :  { %v3718_v52 = vmul.f32 -1.442695, %v1502_v2  ;;  %v3719_v0 = vmul.f32 -1.442695, %v1503_v16  ;;  %v9362_v16 = vld [vmem:[#allocation73_spill] sm:$0xff] }
 0x428   :  { %3842 = vpow2.f32 %v3718_v52 }
 0x429   :  { %3844 = vpow2.f32 %v3719_v0 }
 0x42a   :  { %v1479_v58 = vpop.f32.mrf.mxu2  ;;  %v1499_v13 = vpop.f32.mrf.mxu3 }
 0x42b   :  { %v1504_v54 = vadd.f32 %v1479_v58, %v9361_v1  ;;  %v1505_v52 = vadd.f32 %v1499_v13, %v9362_v16 }
 0x42d   :  { %v3720_v5 = vmul.f32 -1.442695, %v1504_v54 }
 0x42e   :  { %v3843_v57 = vpop.eup %3842 }
 0x42f   :  { %v3845_v30 = vpop.eup %3844  ;;  %v1515_v43 = vadd.f32 1.0, %v3843_v57  ;;  %3846 = vpow2.f32 %v3720_v5 }
 0x430   :  { %v1516_v31 = vadd.f32 1.0, %v3845_v30 }
 0x431   :  { %3848 = vrcp.f32 %v1515_v43  ;;  %v1529_v54 = vand.u32 2147483648, %v1515_v43  ;;  %v1527_v5 = vand.u32 2147483647, %v1515_v43  ;;  %vm1523_vm11 = vweird.f32 %v1515_v43 }
 0x432   :  { %3850 = vrcp.f32 %v1516_v31  ;;  %v1544_v1 = vand.u32 2147483648, %v1516_v31  ;;  %v1542_v9 = vand.u32 2147483647, %v1516_v31  ;;  %vm1538_vm12 = vweird.f32 %v1516_v31 }
 0x433   :  { %v1530_v16 = vor.u32 1.1754944e-38, %v1529_v54  ;;  %vm1528_vm15 = vcmp.eq.f32.partialorder %v1527_v5, 8.507059e+37 }
 0x434   :  { %vm1543_vm0 = vcmp.eq.f32.partialorder %v1542_v9, 8.507059e+37 }
 0x435   :  { %v3847_v11 = vpop.eup %3846 }
 0x436   :  { %v1517_v44 = vadd.f32 1.0, %v3847_v11 }
 0x437   :  { %v3849_v60 = vpop.eup %3848 }
 0x438   :  { %v3851_v0 = vpop.eup %3850  ;;  %v1519_v2 = vmul.f32 %v3849_v60, %v1515_v43  ;;  %3852 = vrcp.f32 %v1517_v44  ;;  %vm1524_vm9 = vweird.f32 %v3849_v60  ;;  %v1559_v54 = vand.u32 2147483648, %v1517_v44 }
 0x439   :  { %v1534_v36 = vmul.f32 %v3851_v0, %v1516_v31  ;;  %3854 = vtanh.f32 %v1505_v52  ;;  %vm1539_vm10 = vweird.f32 %v3851_v0  ;;  %vm1525_vm13 = vmor %vm1523_vm11, %vm1524_vm9  ;;  %vm1553_vm2 = vweird.f32 %v1517_v44 }
 0x43a   :  { %v1520_v61 = vsub.f32 1.0, %v1519_v2  ;;  %vm1540_vm14 = vmor %vm1538_vm12, %vm1539_vm10  ;;  %v1545_v2 = vor.u32 1.1754944e-38, %v1544_v1  ;;  %v1560_v5 = vor.u32 1.1754944e-38, %v1559_v54  ;;  %v6663_v54 = vld [vmem:[#allocation3] sm:$0xff] }
 0x43b   :  { %v1535_v58 = vsub.f32 1.0, %v1534_v36 }
 0x43c   :  { %v1521_v57 = vmul.f32 %v3849_v60, %v1520_v61 }
 0x43d   :  { %v1536_v30 = vmul.f32 %v3851_v0, %v1535_v58 }
 0x43e   :  { %v3853_v6 = vpop.eup %3852  ;;  %v1522_v11 = vadd.f32 %v3849_v60, %v1521_v57 }
 0x43f   :  { %v1549_v13 = vmul.f32 %v3853_v6, %v1517_v44  ;;  %v1537_v46 = vadd.f32 %v3851_v0, %v1536_v30  ;;  %v3855_v52 = vpop.eup %3854  ;;  %vm1554_vm1 = vweird.f32 %v3853_v6  ;;  %v9378_v30 = vld [vmem:[#allocation85_spill] sm:$0xff] }
 0x440   :  { %v1526_v36 = vsel %vm1525_vm13, %v3849_v60, %v1522_v11  ;;  %v1557_v60 = vand.u32 2147483647, %v1517_v44  ;;  %vm1555_vm3 = vmor %vm1553_vm2, %vm1554_vm1  ;;  %v9377_v44 = vld [vmem:[#allocation139_spill] sm:$0xff]  ;;  %v9379_v11 = vld [vmem:[#allocation86_spill] sm:$0xff] }
 0x441   :  { %v1550_v25 = vsub.f32 1.0, %v1549_v13  ;;  %v1531_v61 = vsel %vm1528_vm15, %v1530_v16, %v1526_v36  ;;  %v1541_v33 = vsel %vm1540_vm14, %v3851_v0, %v1537_v46  ;;  %v6645_v0 = vld [vmem:[#allocation3 + $0x60] sm:$0xff]  ;;  %v9380_v13 = vld [vmem:[#allocation87_spill] sm:$0xff]  ;;  %v9382_v36 = vld [vmem:[#allocation90_spill] sm:$0xff] }
 0x442   :  { %v1546_v58 = vsel %vm1543_vm0, %v1545_v2, %v1541_v33  ;;  %v1565_v7 = vmul.f32 %v3855_v52, %v1531_v61  ;;  %vm1558_vm4 = vcmp.eq.f32.partialorder %v1557_v60, 8.507059e+37  ;;  %v6651_v16 = vld [vmem:[#allocation3 + $0x40] sm:$0xff]  ;;  %v9381_v2 = vld [vmem:[#allocation89_spill] sm:$0xff]  ;;  %v9383_v52 = vld [vmem:[#allocation91_spill] sm:$0xff] }
 0x443   :  { %v1551_v56 = vmul.f32 %v3853_v6, %v1550_v25  ;;  %v1564_v57 = vmul.f32 %v1546_v58, %v6078_v49  ;;  %v6573_v49 = vld [vmem:[#allocation3 + $0x1e0] sm:$0xff]  ;;  %v9375_v25 = vld [vmem:[#allocation107_spill] sm:$0xff] }
 0x444   :  { %v6657_v61 = vld [vmem:[#allocation3 + $0x20] sm:$0xff]  ;;  %v9387_v60 = vld [vmem:[#allocation95_spill] sm:$0xff] }
 0x445   :  { %v6564_v43 = vadd.f32 %v1565_v7, %v1564_v57  ;;  %v1552_v31 = vadd.f32 %v3853_v6, %v1551_v56  ;;  %v6579_v56 = vld [vmem:[#allocation3 + $0x1c0] sm:$0xff]  ;;  %v9385_v57 = vld [vmem:[#allocation93_spill] sm:$0xff] }
 0x446   :  { %v6585_v7 = vld [vmem:[#allocation3 + $0x1a0] sm:$0xff] }
 0x447   :  { %3856 = vtanh.f32 %v6564_v43  ;;  %v1556_v1 = vsel %vm1555_vm3, %v3853_v6, %v1552_v31  ;;  %v9376_v6 = vld [vmem:[#allocation135_spill] sm:$0xff]  ;;  %v9384_v58 = vld [vmem:[#allocation92_spill] sm:$0xff]  ;;  %v9386_v31 = vld [vmem:[#allocation94_spill] sm:$0xff] }
 0x448   :  { %v1561_v9 = vsel %vm1558_vm4, %v1560_v5, %v1556_v1  ;;  %v9388_v1 = vld [vmem:[#allocation96_spill] sm:$0xff]  ;;  %v9389_v5 = vld [vmem:[#allocation97_spill] sm:$0xff] }
 0x44d   :  { %v3857_v46 = vpop.eup %3856 }
 0x44e   :  { %v6567_v33 = vmul.f32 %v3857_v46, %v1561_v9  ;;  %v9390_v46 = vld [vmem:[#allocation13_spill] sm:$0xff] }
 0x44f   :  { %v1356_v9 = vadd.f32 %v6551_v50, %v9390_v46 }
 0x450   :  { %1585 = vmatmul.f32.vlgmr.msrb.gmra.mxu0 %v6567_v33  ;;  %1605 = vmatmul.f32.vlgmr.msra.gmra.mxu1 %v6567_v33 }
 0x451   :  { %1625 = vmatmul.f32.vlgmr.msra.gmra.mxu2 %v6567_v33  ;;  %1645 = vmatmul.f32.vlgmr.msra.gmra.mxu3 %v6567_v33 }
 0x452   :  { %1796 = vmatpush.msrb.mxu0 %v6573_v49  ;;  %1816 = vmatpush.msra.mxu1 %v6088_v29  ;;  %v6591_v29 = vld [vmem:[#allocation3 + $0x180] sm:$0xff] }
 0x453   :  { %1836 = vmatpush.msra.mxu2 %v6091_v37  ;;  %1856 = vmatpush.msra.mxu3 %v6094_v63  ;;  %v6597_v37 = vld [vmem:[#allocation3 + $0x160] sm:$0xff] }
 0x454   :  { %1797 = vmatpush.msrb.mxu0 %v6579_v56  ;;  %1817 = vmatpush.msra.mxu1 %v6098_v10  ;;  %v6603_v63 = vld [vmem:[#allocation3 + $0x140] sm:$0xff] }
 0x455   :  { %1837 = vmatpush.msra.mxu2 %v6101_v40  ;;  %1857 = vmatpush.msra.mxu3 %v6104_v45  ;;  %v6609_v10 = vld [vmem:[#allocation3 + $0x120] sm:$0xff]  ;;  %v9363_v45 = vld [vmem:[#allocation54_spill] sm:$0xff] }
 0x456   :  { %1798 = vmatpush.msrb.mxu0 %v6585_v7  ;;  %1818 = vmatpush.msra.mxu1 %v6108_v39  ;;  %v6615_v40 = vld [vmem:[#allocation3 + $0x100] sm:$0xff]  ;;  %v9364_v39 = vld [vmem:[#allocation53_spill] sm:$0xff] }
 0x457   :  { %1838 = vmatpush.msra.mxu2 %v6111_v55  ;;  %1858 = vmatpush.msra.mxu3 %v6114_v8  ;;  %v9365_v55 = vld [vmem:[#allocation44_spill] sm:$0xff] }
 0x458   :  { %1799 = vmatpush.msrb.mxu0 %v6591_v29  ;;  %1819 = vmatpush.msra.mxu1 %v6118_v24  ;;  %v6621_v8 = vld [vmem:[#allocation3 + $0xe0] sm:$0xff] }
 0x459   :  { %1839 = vmatpush.msra.mxu2 %v6121_v47  ;;  %1859 = vmatpush.msra.mxu3 %v6124_v26  ;;  %v9366_v24 = vld [vmem:[#allocation56_spill] sm:$0xff]  ;;  %v9367_v47 = vld [vmem:[#allocation55_spill] sm:$0xff] }
 0x45a   :  { %1800 = vmatpush.msrb.mxu0 %v6597_v37  ;;  %1820 = vmatpush.msra.mxu1 %v6128_v42  ;;  %v9368_v26 = vld [vmem:[#allocation47_spill] sm:$0xff]  ;;  %v6627_v42 = vld [vmem:[#allocation3 + $0xc0] sm:$0xff] }
 0x45b   :  { %1840 = vmatpush.msra.mxu2 %v6131_v19  ;;  %1860 = vmatpush.msra.mxu3 %v6134_v3  ;;  %v9369_v19 = vld [vmem:[#allocation58_spill] sm:$0xff]  ;;  %v9370_v3 = vld [vmem:[#allocation57_spill] sm:$0xff] }
 0x45c   :  { %1801 = vmatpush.msrb.mxu0 %v6603_v63  ;;  %1821 = vmatpush.msra.mxu1 %v6138_v41  ;;  %v9371_v41 = vld [vmem:[#allocation50_spill] sm:$0xff] }
 0x45d   :  { %1841 = vmatpush.msra.mxu2 %v6141_v21  ;;  %1861 = vmatpush.msra.mxu3 %v6144_v12  ;;  %v6633_v21 = vld [vmem:[#allocation3 + $0xa0] sm:$0xff] }
 0x45e   :  { %1802 = vmatpush.msrb.mxu0 %v6609_v10  ;;  %1822 = vmatpush.msra.mxu1 %v6148_v14  ;;  %v9372_v12 = vld [vmem:[#allocation60_spill] sm:$0xff]  ;;  %v9373_v14 = vld [vmem:[#allocation59_spill] sm:$0xff] }
 0x45f   :  { %1842 = vmatpush.msra.mxu2 %v6151_v53  ;;  %1862 = vmatpush.msra.mxu3 %v6154_v17  ;;  %v9374_v53 = vld [vmem:[#allocation79_spill] sm:$0xff]  ;;  %v6639_v17 = vld [vmem:[#allocation3 + $0x80] sm:$0xff] }
 0x460   :  { %1803 = vmatpush.msrb.mxu0 %v6615_v40  ;;  %1823 = vmatpush.msra.mxu1 %v9363_v45  ;;  %v9391_v45 = vld [vmem:[#allocation17_spill] sm:$0xff] }
 0x461   :  { %1843 = vmatpush.msra.mxu2 %v9364_v39  ;;  %1863 = vmatpush.msra.mxu3 %v9365_v55  ;;  %v1376_v39 = vadd.f32 %v6553_v51, %v9391_v45 }
 0x462   :  { %1804 = vmatpush.msrb.mxu0 %v6621_v8  ;;  %1824 = vmatpush.msra.mxu1 %v9366_v24 }
 0x463   :  { %1844 = vmatpush.msra.mxu2 %v9367_v47  ;;  %1864 = vmatpush.msra.mxu3 %v9368_v26 }
 0x464   :  { %1805 = vmatpush.msrb.mxu0 %v6627_v42  ;;  %1825 = vmatpush.msra.mxu1 %v9369_v19 }
 0x465   :  { %1845 = vmatpush.msra.mxu2 %v9370_v3  ;;  %1865 = vmatpush.msra.mxu3 %v9371_v41  ;;  %v9392_v41 = vld [vmem:[#allocation19_spill] sm:$0xff] }
 0x466   :  { %1806 = vmatpush.msrb.mxu0 %v6633_v21  ;;  %1826 = vmatpush.msra.mxu1 %v9372_v12  ;;  %v1396_v12 = vadd.f32 %v6555_v20, %v9392_v41 }
 0x467   :  { %1846 = vmatpush.msra.mxu2 %v9373_v14  ;;  %1866 = vmatpush.msra.mxu3 %v9374_v53 }
 0x468   :  { %1807 = vmatpush.msrb.mxu0 %v6639_v17  ;;  %1827 = vmatpush.msra.mxu1 %v9375_v25 }
 0x469   :  { %1847 = vmatpush.msra.mxu2 %v9376_v6  ;;  %1867 = vmatpush.msra.mxu3 %v9377_v44 }
 0x46a   :  { %1808 = vmatpush.msrb.mxu0 %v6645_v0  ;;  %1828 = vmatpush.msra.mxu1 %v9378_v30 }
 0x46b   :  { %1848 = vmatpush.msra.mxu2 %v9379_v11  ;;  %1868 = vmatpush.msra.mxu3 %v9380_v13  ;;  %v9393_v13 = vld [vmem:[#allocation14_spill] sm:$0xff] }
 0x46c   :  { %1809 = vmatpush.msrb.mxu0 %v6651_v16  ;;  %1829 = vmatpush.msra.mxu1 %v9381_v2  ;;  %v1416_v2 = vadd.f32 %v6559_v18, %v9393_v13 }
 0x46d   :  { %1849 = vmatpush.msra.mxu2 %v9382_v36  ;;  %1869 = vmatpush.msra.mxu3 %v9383_v52 }
 0x46e   :  { %1810 = vmatpush.msrb.mxu0 %v6657_v61  ;;  %1830 = vmatpush.msra.mxu1 %v9384_v58 }
 0x46f   :  { %1850 = vmatpush.msra.mxu2 %v9385_v57  ;;  %1870 = vmatpush.msra.mxu3 %v9386_v31 }
 0x470   :  { %1811 = vmatpush.msrb.mxu0 %v6663_v54  ;;  %1831 = vmatpush.msra.mxu1 %v9387_v60 }
 0x471   :  { %1851 = vmatpush.msra.mxu2 %v9388_v1  ;;  %1871 = vmatpush.msra.mxu3 %v9389_v5 }
 0x4cd   :  { %v1586_v55 = vpop.f32.mrf.mxu0  ;;  %v1606_v24 = vpop.f32.mrf.mxu1 }
 0x4ce   :  { %v1587_v47 = vadd.f32 %v1586_v55, %v1356_v9  ;;  %v1607_v26 = vadd.f32 %v1606_v24, %v1376_v39 }
 0x4d0   :  { %v3721_v19 = vmul.f32 -1.442695, %v1587_v47  ;;  %v3722_v3 = vmul.f32 -1.442695, %v1607_v26 }
 0x4d2   :  { %3858 = vpow2.f32 %v3721_v19 }
 0x4d3   :  { %3860 = vpow2.f32 %v3722_v3 }
 0x4d4   :  { %v1626_v14 = vpop.f32.mrf.mxu2  ;;  %v1646_v51 = vpop.f32.mrf.mxu3 }
 0x4d5   :  { %v1627_v53 = vadd.f32 %v1626_v14, %v1396_v12  ;;  %v1647_v58 = vadd.f32 %v1646_v51, %v1416_v2 }
 0x4d7   :  { %v3723_v25 = vmul.f32 -1.442695, %v1627_v53 }
 0x4d8   :  { %v3859_v6 = vpop.eup %3858 }
 0x4d9   :  { %v3861_v44 = vpop.eup %3860  ;;  %v1658_v50 = vadd.f32 1.0, %v3859_v6  ;;  %3862 = vpow2.f32 %v3723_v25 }
 0x4da   :  { %v1659_v30 = vadd.f32 1.0, %v3861_v44 }
 0x4db   :  { %3864 = vrcp.f32 %v1658_v50  ;;  %v1672_v5 = vand.u32 2147483648, %v1658_v50  ;;  %v1670_v55 = vand.u32 2147483647, %v1658_v50  ;;  %vm1666_vm7 = vweird.f32 %v1658_v50 }
 0x4dc   :  { %3866 = vrcp.f32 %v1659_v30  ;;  %v1687_v9 = vand.u32 2147483648, %v1659_v30  ;;  %v1685_v47 = vand.u32 2147483647, %v1659_v30  ;;  %vm1681_vm8 = vweird.f32 %v1659_v30 }
 0x4dd   :  { %v1673_v3 = vor.u32 1.1754944e-38, %v1672_v5  ;;  %vm1671_vm11 = vcmp.eq.f32.partialorder %v1670_v55, 8.507059e+37  ;;  %v9410_v55 = vld [vmem:[#allocation118_spill] sm:$0xff] }
 0x4de   :  { %v1688_v14 = vor.u32 1.1754944e-38, %v1687_v9  ;;  %vm1686_vm12 = vcmp.eq.f32.partialorder %v1685_v47, 8.507059e+37  ;;  %v9412_v47 = vld [vmem:[#allocation120_spill] sm:$0xff] }
 0x4df   :  { %v3863_v11 = vpop.eup %3862 }
 0x4e0   :  { %v1660_v36 = vadd.f32 1.0, %v3863_v11 }
 0x4e1   :  { %v3865_v52 = vpop.eup %3864 }
 0x4e2   :  { %v3867_v20 = vpop.eup %3866  ;;  %v1662_v57 = vmul.f32 %v3865_v52, %v1658_v50  ;;  %3868 = vrcp.f32 %v1660_v36  ;;  %vm1667_vm5 = vweird.f32 %v3865_v52  ;;  %vm1696_vm14 = vweird.f32 %v1660_v36 }
 0x4e3   :  { %v1677_v31 = vmul.f32 %v3867_v20, %v1659_v30  ;;  %3870 = vtanh.f32 %v1647_v58  ;;  %vm1682_vm6 = vweird.f32 %v3867_v20  ;;  %vm1668_vm9 = vmor %vm1666_vm7, %vm1667_vm5 }
 0x4e4   :  { %v1663_v60 = vsub.f32 1.0, %v1662_v57  ;;  %vm1683_vm10 = vmor %vm1681_vm8, %vm1682_vm6 }
 0x4e5   :  { %v1678_v1 = vsub.f32 1.0, %v1677_v31  ;;  %v1702_v31 = vand.u32 2147483648, %v1660_v36 }
 0x4e6   :  { %v1664_v39 = vmul.f32 %v3865_v52, %v1663_v60 }
 0x4e7   :  { %v1679_v24 = vmul.f32 %v3867_v20, %v1678_v1  ;;  %v1703_v1 = vor.u32 1.1754944e-38, %v1702_v31  ;;  %v9429_v31 = vld [vmem:[#allocation140_spill] sm:$0xff] }
 0x4e8   :  { %v3869_v26 = vpop.eup %3868  ;;  %v1665_v18 = vadd.f32 %v3865_v52, %v1664_v39  ;;  %v9409_v39 = vld [vmem:[#allocation116_spill] sm:$0xff] }
 0x4e9   :  { %v1692_v19 = vmul.f32 %v3869_v26, %v1660_v36  ;;  %v1680_v12 = vadd.f32 %v3867_v20, %v1679_v24  ;;  %v3871_v25 = vpop.eup %3870  ;;  %vm1697_vm13 = vweird.f32 %v3869_v26  ;;  %v9411_v24 = vld [vmem:[#allocation119_spill] sm:$0xff] }
 0x4ea   :  { %v1669_v53 = vsel %vm1668_vm9, %v3865_v52, %v1665_v18  ;;  %v1700_v52 = vand.u32 2147483647, %v1660_v36  ;;  %vm1698_vm15 = vmor %vm1696_vm14, %vm1697_vm13  ;;  %v9408_v36 = vld [vmem:[#allocation115_spill] sm:$0xff] }
 0x4eb   :  { %v1693_v6 = vsub.f32 1.0, %v1692_v19  ;;  %v1674_v44 = vsel %vm1671_vm11, %v1673_v3, %v1669_v53  ;;  %v1684_v51 = vsel %vm1683_vm10, %v3867_v20, %v1680_v12  ;;  %v9414_v18 = vld [vmem:[#allocation123_spill] sm:$0xff]  ;;  %v9415_v19 = vld [vmem:[#allocation124_spill] sm:$0xff]  ;;  %v9416_v3 = vld [vmem:[#allocation125_spill] sm:$0xff] }
 0x4ec   :  { %v1689_v11 = vsel %vm1686_vm12, %v1688_v14, %v1684_v51  ;;  %v1708_v2 = vmul.f32 %v3871_v25, %v1674_v44  ;;  %vm1701_vm0 = vcmp.eq.f32.partialorder %v1700_v52, 8.507059e+37  ;;  %v9417_v12 = vld [vmem:[#allocation126_spill] sm:$0xff]  ;;  %v9418_v14 = vld [vmem:[#allocation127_spill] sm:$0xff]  ;;  %v9419_v53 = vld [vmem:[#allocation128_spill] sm:$0xff] }
 0x4ed   :  { %v1707_v58 = vmul.f32 %v1689_v11, %v6256_v32  ;;  %v1694_v57 = vmul.f32 %v3869_v26, %v1693_v6  ;;  %v9394_v32 = vld [vmem:[#allocation99_spill] sm:$0xff]  ;;  %v9420_v25 = vld [vmem:[#allocation129_spill] sm:$0xff]  ;;  %v9421_v6 = vld [vmem:[#allocation130_spill] sm:$0xff] }
 0x4ee   :  { %v9422_v44 = vld [vmem:[#allocation131_spill] sm:$0xff]  ;;  %v9423_v51 = vld [vmem:[#allocation132_spill] sm:$0xff]  ;;  %v9424_v11 = vld [vmem:[#allocation133_spill] sm:$0xff] }
 0x4ef   :  { %v6678_v50 = vadd.f32 %v1708_v2, %v1707_v58  ;;  %v1695_v30 = vadd.f32 %v3869_v26, %v1694_v57  ;;  %v9425_v2 = vld [vmem:[#allocation134_spill] sm:$0xff]  ;;  %v9426_v58 = vld [vmem:[#allocation136_spill] sm:$0xff]  ;;  %v9427_v57 = vld [vmem:[#allocation137_spill] sm:$0xff] }
 0x4f0   :  { %v9430_v52 = vld [vmem:[#allocation141_spill] sm:$0xff] }
 0x4f1   :  { %3872 = vtanh.f32 %v6678_v50  ;;  %v1699_v60 = vsel %vm1698_vm15, %v3869_v26, %v1695_v30  ;;  %v9413_v26 = vld [vmem:[#allocation122_spill] sm:$0xff] }
 0x4f2   :  { %v1704_v5 = vsel %vm1701_vm0, %v1703_v1, %v1699_v60  ;;  %v9428_v30 = vld [vmem:[#allocation138_spill] sm:$0xff]  ;;  %v9432_v1 = vld [vmem:[#allocation143_spill] sm:$0xff] }
 0x4f3   :  { %v9431_v60 = vld [vmem:[#allocation142_spill] sm:$0xff] }
 0x4f7   :  { %v3873_v20 = vpop.eup %3872 }
 0x4f8   :  { %v1711_v9 = vmul.f32 %v3873_v20, %v1704_v5  ;;  %v9433_v20 = vld [vmem:[#allocation144_spill] sm:$0xff]  ;;  %v9434_v5 = vld [vmem:[#allocation145_spill] sm:$0xff] }
 0x4fa   :  { %1728 = vmatmul.f32.vlgmr.msra.gmra.mxu0 %v1711_v9  ;;  %1748 = vmatmul.f32.vlgmr.msrb.gmra.mxu1 %v1711_v9 }
 0x4fb   :  { %1768 = vmatmul.f32.vlgmr.msrb.gmra.mxu2 %v1711_v9  ;;  %1788 = vmatmul.f32.vlgmr.msrb.gmra.mxu3 %v1711_v9  ;;  %v9435_v9 = vld [vmem:[#allocation146_spill] sm:$0xff] }
 0x4fc   :  { %1943 = vmatpush.msra.mxu0 %v6259_v62  ;;  %1963 = vmatpush.msrb.mxu1 %v6262_v34  ;;  %v9395_v62 = vld [vmem:[#allocation100_spill] sm:$0xff]  ;;  %v9396_v34 = vld [vmem:[#allocation102_spill] sm:$0xff] }
 0x4fd   :  { %1983 = vmatpush.msrb.mxu2 %v6265_v22  ;;  %2003 = vmatpush.msrb.mxu3 %v6268_v15  ;;  %v9397_v22 = vld [vmem:[#allocation103_spill] sm:$0xff]  ;;  %v9398_v15 = vld [vmem:[#allocation104_spill] sm:$0xff] }
 0x4fe   :  { %1944 = vmatpush.msra.mxu0 %v6271_v4  ;;  %1964 = vmatpush.msrb.mxu1 %v6274_v59  ;;  %v9399_v4 = vld [vmem:[#allocation105_spill] sm:$0xff]  ;;  %v9400_v59 = vld [vmem:[#allocation106_spill] sm:$0xff] }
 0x4ff   :  { %1984 = vmatpush.msrb.mxu2 %v6277_v35  ;;  %2004 = vmatpush.msrb.mxu3 %v6280_v27  ;;  %v9401_v35 = vld [vmem:[#allocation108_spill] sm:$0xff]  ;;  %v9402_v27 = vld [vmem:[#allocation109_spill] sm:$0xff] }
 0x500   :  { %1945 = vmatpush.msra.mxu0 %v6283_v23  ;;  %1965 = vmatpush.msrb.mxu1 %v6286_v38  ;;  %v9403_v23 = vld [vmem:[#allocation110_spill] sm:$0xff]  ;;  %v9404_v38 = vld [vmem:[#allocation111_spill] sm:$0xff] }
 0x501   :  { %1985 = vmatpush.msrb.mxu2 %v6289_v28  ;;  %2005 = vmatpush.msrb.mxu3 %v6292_v48  ;;  %v9405_v28 = vld [vmem:[#allocation112_spill] sm:$0xff]  ;;  %v9406_v48 = vld [vmem:[#allocation113_spill] sm:$0xff] }
 0x502   :  { %1812 = vmatmul.f32.vlgmr.msrb.gmra.mxu0 %v6567_v33  ;;  %1832 = vmatmul.f32.vlgmr.msra.gmra.mxu1 %v6567_v33 }
 0x503   :  { %1852 = vmatmul.f32.vlgmr.msra.gmra.mxu2 %v6567_v33  ;;  %1872 = vmatmul.f32.vlgmr.msra.gmra.mxu3 %v6567_v33  ;;  %v9407_v33 = vld [vmem:[#allocation114_spill] sm:$0xff] }
 0x504   :  { %1946 = vmatpush.msra.mxu0 %v9394_v32  ;;  %1966 = vmatpush.msrb.mxu1 %v9395_v62  ;;  %v9436_v32 = vld [vmem:[#allocation147_spill] sm:$0xff]  ;;  %v9437_v62 = vld [vmem:[#allocation148_spill] sm:$0xff] }
 0x505   :  { %1986 = vmatpush.msrb.mxu2 %v9396_v34  ;;  %2006 = vmatpush.msrb.mxu3 %v9397_v22  ;;  %v9438_v34 = vld [vmem:[#allocation149_spill] sm:$0xff]  ;;  %v9439_v22 = vld [vmem:[#allocation150_spill] sm:$0xff] }
 0x506   :  { %1947 = vmatpush.msra.mxu0 %v9398_v15  ;;  %1967 = vmatpush.msrb.mxu1 %v9399_v4  ;;  %v9440_v15 = vld [vmem:[#allocation151_spill] sm:$0xff]  ;;  %v9441_v4 = vld [vmem:[#allocation152_spill] sm:$0xff] }
 0x507   :  { %1987 = vmatpush.msrb.mxu2 %v9400_v59  ;;  %2007 = vmatpush.msrb.mxu3 %v9401_v35  ;;  %v9442_v59 = vld [vmem:[#allocation153_spill] sm:$0xff]  ;;  %v9443_v35 = vld [vmem:[#allocation62_spill] sm:$0xff] }
 0x508   :  { %1948 = vmatpush.msra.mxu0 %v9402_v27  ;;  %1968 = vmatpush.msrb.mxu1 %v9403_v23  ;;  %v9444_v27 = vld [vmem:[#allocation65_spill] sm:$0xff] }
 0x509   :  { %1988 = vmatpush.msrb.mxu2 %v9404_v38  ;;  %2008 = vmatpush.msrb.mxu3 %v9405_v28  ;;  %v9445_v23 = vld [vmem:[#allocation69_spill] sm:$0xff]  ;;  %v9446_v38 = vld [vmem:[#allocation70_spill] sm:$0xff] }
 0x50a   :  { %1949 = vmatpush.msra.mxu0 %v9406_v48  ;;  %1969 = vmatpush.msrb.mxu1 %v9407_v33  ;;  %v6750_v28 = vld [vmem:[#allocation8 + $0x1e8] sm:$0xff]  ;;  %v6753_v48 = vld [vmem:[#allocation8 + $0x1f0] sm:$0xff]  ;;  %v6756_v33 = vld [vmem:[#allocation8 + $0x1f8] sm:$0xff] }
 0x50b   :  { %1989 = vmatpush.msrb.mxu2 %v9408_v36  ;;  %2009 = vmatpush.msrb.mxu3 %v9409_v39  ;;  %v9447_v36 = vld [vmem:[#allocation154_spill] sm:$0xff]  ;;  %v6760_v39 = vld [vmem:[#allocation8 + $0x1c8] sm:$0xff] }
 0x50c   :  { %1950 = vmatpush.msra.mxu0 %v9410_v55  ;;  %1970 = vmatpush.msrb.mxu1 %v9411_v24  ;;  %v6763_v55 = vld [vmem:[#allocation8 + $0x1d0] sm:$0xff]  ;;  %v6766_v24 = vld [vmem:[#allocation8 + $0x1d8] sm:$0xff] }
 0x50d   :  { %1990 = vmatpush.msrb.mxu2 %v9412_v47  ;;  %2010 = vmatpush.msrb.mxu3 %v9413_v26  ;;  %v9448_v47 = vld [vmem:[#allocation155_spill] sm:$0xff]  ;;  %v6770_v26 = vld [vmem:[#allocation8 + $0x1a8] sm:$0xff] }
 0x50e   :  { %1951 = vmatpush.msra.mxu0 %v9414_v18  ;;  %1971 = vmatpush.msrb.mxu1 %v9415_v19  ;;  %v6773_v18 = vld [vmem:[#allocation8 + $0x1b0] sm:$0xff]  ;;  %v6776_v19 = vld [vmem:[#allocation8 + $0x1b8] sm:$0xff] }
 0x50f   :  { %1991 = vmatpush.msrb.mxu2 %v9416_v3  ;;  %2011 = vmatpush.msrb.mxu3 %v9417_v12  ;;  %v9449_v3 = vld [vmem:[#allocation156_spill] sm:$0xff]  ;;  %v6780_v12 = vld [vmem:[#allocation8 + $0x188] sm:$0xff] }
 0x510   :  { %1952 = vmatpush.msra.mxu0 %v9418_v14  ;;  %1972 = vmatpush.msrb.mxu1 %v9419_v53  ;;  %v6783_v14 = vld [vmem:[#allocation8 + $0x190] sm:$0xff]  ;;  %v6786_v53 = vld [vmem:[#allocation8 + $0x198] sm:$0xff] }
 0x511   :  { %1992 = vmatpush.msrb.mxu2 %v9420_v25  ;;  %2012 = vmatpush.msrb.mxu3 %v9421_v6  ;;  %v9450_v25 = vld [vmem:[#allocation157_spill] sm:$0xff] }
 0x512   :  { %1953 = vmatpush.msra.mxu0 %v9422_v44  ;;  %1973 = vmatpush.msrb.mxu1 %v9423_v51  ;;  %v6790_v6 = vld [vmem:[#allocation8 + $0x168] sm:$0xff]  ;;  %v6793_v44 = vld [vmem:[#allocation8 + $0x170] sm:$0xff]  ;;  %v6796_v51 = vld [vmem:[#allocation8 + $0x178] sm:$0xff] }
 0x513   :  { %1993 = vmatpush.msrb.mxu2 %v9424_v11  ;;  %2013 = vmatpush.msrb.mxu3 %v9425_v2  ;;  %9451 = vst [vmem:[#allocation31_spill] sm:$0xff] %v6793_v44  ;;  %v9453_v11 = vld [vmem:[#allocation158_spill] sm:$0xff]  ;;  %v6800_v2 = vld [vmem:[#allocation8 + $0x148] sm:$0xff] }
 0x514   :  { %1954 = vmatpush.msra.mxu0 %v9426_v58  ;;  %1974 = vmatpush.msrb.mxu1 %v9427_v57  ;;  %9452 = vst [vmem:[#allocation21_spill] sm:$0xff] %v6796_v51  ;;  %v6803_v58 = vld [vmem:[#allocation8 + $0x150] sm:$0xff]  ;;  %v6806_v57 = vld [vmem:[#allocation8 + $0x158] sm:$0xff] }
 0x515   :  { %1994 = vmatpush.msrb.mxu2 %v9428_v30  ;;  %2014 = vmatpush.msrb.mxu3 %v9429_v31  ;;  %9454 = vst [vmem:[#allocation33_spill] sm:$0xff] %v6800_v2  ;;  %v9457_v30 = vld [vmem:[#allocation20_spill] sm:$0xff]  ;;  %v6810_v31 = vld [vmem:[#allocation8 + $0x128] sm:$0xff] }
 0x516   :  { %1955 = vmatpush.msra.mxu0 %v9430_v52  ;;  %1975 = vmatpush.msrb.mxu1 %v9431_v60  ;;  %9455 = vst [vmem:[#allocation34_spill] sm:$0xff] %v6803_v58  ;;  %v6813_v52 = vld [vmem:[#allocation8 + $0x130] sm:$0xff]  ;;  %v6816_v60 = vld [vmem:[#allocation8 + $0x138] sm:$0xff] }
 0x517   :  { %1995 = vmatpush.msrb.mxu2 %v9432_v1  ;;  %2015 = vmatpush.msrb.mxu3 %v9433_v20  ;;  %9456 = vst [vmem:[#allocation24_spill] sm:$0xff] %v6806_v57  ;;  %v9461_v1 = vld [vmem:[#allocation22_spill] sm:$0xff]  ;;  %v6820_v20 = vld [vmem:[#allocation8 + $0x108] sm:$0xff] }
 0x518   :  { %1956 = vmatpush.msra.mxu0 %v9434_v5  ;;  %1976 = vmatpush.msrb.mxu1 %v9435_v9  ;;  %9458 = vst [vmem:[#allocation36_spill] sm:$0xff] %v6810_v31  ;;  %v6823_v5 = vld [vmem:[#allocation8 + $0x110] sm:$0xff]  ;;  %v6826_v9 = vld [vmem:[#allocation8 + $0x118] sm:$0xff] }
 0x519   :  { %1996 = vmatpush.msrb.mxu2 %v9436_v32  ;;  %2016 = vmatpush.msrb.mxu3 %v9437_v62  ;;  %9459 = vst [vmem:[#allocation37_spill] sm:$0xff] %v6813_v52  ;;  %v9465_v32 = vld [vmem:[#allocation15_spill] sm:$0xff]  ;;  %v6830_v62 = vld [vmem:[#allocation8 + $0xe8] sm:$0xff] }
 0x51a   :  { %1957 = vmatpush.msra.mxu0 %v9438_v34  ;;  %1977 = vmatpush.msrb.mxu1 %v9439_v22  ;;  %9460 = vst [vmem:[#allocation26_spill] sm:$0xff] %v6816_v60  ;;  %v6833_v34 = vld [vmem:[#allocation8 + $0xf0] sm:$0xff]  ;;  %v6836_v22 = vld [vmem:[#allocation8 + $0xf8] sm:$0xff] }
 0x51b   :  { %1997 = vmatpush.msrb.mxu2 %v9440_v15  ;;  %2017 = vmatpush.msrb.mxu3 %v9441_v4  ;;  %9462 = vst [vmem:[#allocation39_spill] sm:$0xff] %v6820_v20  ;;  %v9469_v15 = vld [vmem:[#allocation23_spill] sm:$0xff]  ;;  %v6840_v4 = vld [vmem:[#allocation8 + $0xc8] sm:$0xff] }
 0x51c   :  { %1958 = vmatpush.msra.mxu0 %v9442_v59  ;;  %1978 = vmatpush.msrb.mxu1 %v9443_v35  ;;  %9463 = vst [vmem:[#allocation40_spill] sm:$0xff] %v6823_v5  ;;  %v6843_v59 = vld [vmem:[#allocation8 + $0xd0] sm:$0xff]  ;;  %v6846_v35 = vld [vmem:[#allocation8 + $0xd8] sm:$0xff] }
 0x51d   :  { %1998 = vmatpush.msrb.mxu2 %v9444_v27  ;;  %2018 = vmatpush.msrb.mxu3 %v9445_v23  ;;  %9464 = vst [vmem:[#allocation29_spill] sm:$0xff] %v6826_v9  ;;  %v9473_v27 = vld [vmem:[#allocation25_spill] sm:$0xff] }
 0x51e   :  { %2086 = vmatpush.msrb.mxu0 %v9446_v38  ;;  %2106 = vmatpush.msra.mxu1 %v6750_v28  ;;  %9466 = vst [vmem:[#allocation42_spill] sm:$0xff] %v6830_v62  ;;  %v6850_v23 = vld [vmem:[#allocation8 + $0xa8] sm:$0xff]  ;;  %v6853_v38 = vld [vmem:[#allocation8 + $0xb0] sm:$0xff] }
 0x51f   :  { %2126 = vmatpush.msra.mxu2 %v6753_v48  ;;  %2146 = vmatpush.msra.mxu3 %v6756_v33  ;;  %9467 = vst [vmem:[#allocation43_spill] sm:$0xff] %v6833_v34 }
 0x520   :  { %2087 = vmatpush.msrb.mxu0 %v9447_v36  ;;  %2107 = vmatpush.msra.mxu1 %v6760_v39  ;;  %9468 = vst [vmem:[#allocation32_spill] sm:$0xff] %v6836_v22  ;;  %v6856_v36 = vld [vmem:[#allocation8 + $0xb8] sm:$0xff] }
 0x521   :  { %2127 = vmatpush.msra.mxu2 %v6763_v55  ;;  %2147 = vmatpush.msra.mxu3 %v6766_v24  ;;  %9470 = vst [vmem:[#allocation45_spill] sm:$0xff] %v6840_v4 }
 0x522   :  { %2088 = vmatpush.msrb.mxu0 %v9448_v47  ;;  %2108 = vmatpush.msra.mxu1 %v6770_v26  ;;  %9471 = vst [vmem:[#allocation46_spill] sm:$0xff] %v6843_v59  ;;  %v9477_v47 = vld [vmem:[#allocation16_spill] sm:$0xff] }
 0x523   :  { %2128 = vmatpush.msra.mxu2 %v6773_v18  ;;  %2148 = vmatpush.msra.mxu3 %v6776_v19  ;;  %9472 = vst [vmem:[#allocation35_spill] sm:$0xff] %v6846_v35 }
 0x524   :  { %2089 = vmatpush.msrb.mxu0 %v9449_v3  ;;  %2109 = vmatpush.msra.mxu1 %v6780_v12  ;;  %9474 = vst [vmem:[#allocation48_spill] sm:$0xff] %v6850_v23  ;;  %v6860_v3 = vld [vmem:[#allocation8 + $0x88] sm:$0xff] }
 0x525   :  { %2129 = vmatpush.msra.mxu2 %v6783_v14  ;;  %2149 = vmatpush.msra.mxu3 %v6786_v53  ;;  %9475 = vst [vmem:[#allocation49_spill] sm:$0xff] %v6853_v38 }
 0x526   :  { %2090 = vmatpush.msrb.mxu0 %v9450_v25  ;;  %2110 = vmatpush.msra.mxu1 %v6790_v6  ;;  %9476 = vst [vmem:[#allocation38_spill] sm:$0xff] %v6856_v36  ;;  %v6863_v25 = vld [vmem:[#allocation8 + $0x90] sm:$0xff] }
 0x527   :  { %2130 = vmatpush.msra.mxu2 %v6793_v44  ;;  %2150 = vmatpush.msra.mxu3 %v6796_v51  ;;  %9478 = vst [vmem:[#allocation51_spill] sm:$0xff] %v6860_v3 }
 0x528   :  { %2091 = vmatpush.msrb.mxu0 %v9453_v11  ;;  %2111 = vmatpush.msra.mxu1 %v6800_v2  ;;  %9479 = vst [vmem:[#allocation52_spill] sm:$0xff] %v6863_v25  ;;  %v6866_v11 = vld [vmem:[#allocation8 + $0x98] sm:$0xff] }
 0x529   :  { %2131 = vmatpush.msra.mxu2 %v6803_v58  ;;  %2151 = vmatpush.msra.mxu3 %v6806_v57  ;;  %9480 = vst [vmem:[#allocation41_spill] sm:$0xff] %v6866_v11 }
 0x52a   :  { %2092 = vmatpush.msrb.mxu0 %v9457_v30  ;;  %2112 = vmatpush.msra.mxu1 %v6810_v31  ;;  %v9481_v30 = vld [vmem:[#allocation27_spill] sm:$0xff] }
 0x52b   :  { %2132 = vmatpush.msra.mxu2 %v6813_v52  ;;  %2152 = vmatpush.msra.mxu3 %v6816_v60 }
 0x52c   :  { %2093 = vmatpush.msrb.mxu0 %v9461_v1  ;;  %2113 = vmatpush.msra.mxu1 %v6820_v20  ;;  %v6870_v1 = vld [vmem:[#allocation8 + $0x68] sm:$0xff] }
 0x52d   :  { %2133 = vmatpush.msra.mxu2 %v6823_v5  ;;  %2153 = vmatpush.msra.mxu3 %v6826_v9  ;;  %9482 = vst [vmem:[#allocation66_spill] sm:$0xff] %v6870_v1 }
 0x52e   :  { %2094 = vmatpush.msrb.mxu0 %v9465_v32  ;;  %2114 = vmatpush.msra.mxu1 %v6830_v62  ;;  %v6873_v32 = vld [vmem:[#allocation8 + $0x70] sm:$0xff] }
 0x52f   :  { %2134 = vmatpush.msra.mxu2 %v6833_v34  ;;  %2154 = vmatpush.msra.mxu3 %v6836_v22  ;;  %9483 = vst [vmem:[#allocation67_spill] sm:$0xff] %v6873_v32 }
 0x530   :  { %2095 = vmatpush.msrb.mxu0 %v9469_v15  ;;  %2115 = vmatpush.msra.mxu1 %v6840_v4  ;;  %v6876_v15 = vld [vmem:[#allocation8 + $0x78] sm:$0xff] }
 0x531   :  { %2135 = vmatpush.msra.mxu2 %v6843_v59  ;;  %2155 = vmatpush.msra.mxu3 %v6846_v35  ;;  %9484 = vst [vmem:[#allocation72_spill] sm:$0xff] %v6876_v15 }
 0x532   :  { %2096 = vmatpush.msrb.mxu0 %v9473_v27  ;;  %2116 = vmatpush.msra.mxu1 %v6850_v23  ;;  %v9485_v27 = vld [vmem:[#allocation28_spill] sm:$0xff] }
 0x533   :  { %2136 = vmatpush.msra.mxu2 %v6853_v38  ;;  %2156 = vmatpush.msra.mxu3 %v6856_v36  ;;  %v9498_v38 = vld [vmem:[#allocation71_spill] sm:$0xff] }
 0x534   :  { %2097 = vmatpush.msrb.mxu0 %v9477_v47  ;;  %2117 = vmatpush.msra.mxu1 %v6860_v3  ;;  %v6880_v47 = vld [vmem:[#allocation8 + $0x48] sm:$0xff]  ;;  %v9497_v3 = vld [vmem:[#allocation68_spill] sm:$0xff] }
 0x535   :  { %2137 = vmatpush.msra.mxu2 %v6863_v25  ;;  %2157 = vmatpush.msra.mxu3 %v6866_v11  ;;  %9486 = vst [vmem:[#allocation73_spill] sm:$0xff] %v6880_v47  ;;  %v6883_v11 = vld [vmem:[#allocation8 + $0x50] sm:$0xff] }
 0x536   :  { %2098 = vmatpush.msrb.mxu0 %v9481_v30  ;;  %2118 = vmatpush.msra.mxu1 %v6870_v1  ;;  %9487 = vst [vmem:[#allocation54_spill] sm:$0xff] %v6883_v11  ;;  %v6886_v30 = vld [vmem:[#allocation8 + $0x58] sm:$0xff]  ;;  %v9489_v1 = vld [vmem:[#allocation18_spill] sm:$0xff] }
 0x537   :  { %2138 = vmatpush.msra.mxu2 %v6873_v32  ;;  %2158 = vmatpush.msra.mxu3 %v6876_v15  ;;  %9488 = vst [vmem:[#allocation53_spill] sm:$0xff] %v6886_v30  ;;  %v6890_v32 = vld [vmem:[#allocation8 + $0x28] sm:$0xff]  ;;  %v6893_v15 = vld [vmem:[#allocation8 + $0x30] sm:$0xff] }
 0x538   :  { %2099 = vmatpush.msrb.mxu0 %v9485_v27  ;;  %2119 = vmatpush.msra.mxu1 %v6880_v47  ;;  %9490 = vst [vmem:[#allocation44_spill] sm:$0xff] %v6890_v32  ;;  %v6896_v27 = vld [vmem:[#allocation8 + $0x38] sm:$0xff]  ;;  %v9493_v47 = vld [vmem:[#allocation30_spill] sm:$0xff] }
 0x539   :  { %2139 = vmatpush.msra.mxu2 %v6883_v11  ;;  %2159 = vmatpush.msra.mxu3 %v6886_v30  ;;  %9491 = vst [vmem:[#allocation56_spill] sm:$0xff] %v6893_v15  ;;  %v6900_v11 = vld [vmem:[#allocation8 + $0x8] sm:$0xff]  ;;  %v6903_v30 = vld [vmem:[#allocation8 + $0x10] sm:$0xff] }
 0x53a   :  { %2100 = vmatpush.msrb.mxu0 %v9489_v1  ;;  %2120 = vmatpush.msra.mxu1 %v6890_v32  ;;  %9492 = vst [vmem:[#allocation55_spill] sm:$0xff] %v6896_v27  ;;  %v6906_v1 = vld [vmem:[#allocation8 + $0x18] sm:$0xff] }
 0x53b   :  { %2140 = vmatpush.msra.mxu2 %v6893_v15  ;;  %2160 = vmatpush.msra.mxu3 %v6896_v27  ;;  %9494 = vst [vmem:[#allocation47_spill] sm:$0xff] %v6900_v11 }
 0x53c   :  { %2101 = vmatpush.msrb.mxu0 %v9493_v47  ;;  %2121 = vmatpush.msra.mxu1 %v6900_v11  ;;  %9495 = vst [vmem:[#allocation58_spill] sm:$0xff] %v6903_v30 }
 0x53d   :  { %2141 = vmatpush.msra.mxu2 %v6903_v30  ;;  %9496 = vst [vmem:[#allocation57_spill] sm:$0xff] %v6906_v1  ;;  %2161 = vmatpush.msra.mxu3 %v6906_v1  ;;  %v9499_v1 = vld [vmem:[#allocation76_spill] sm:$0xff] }
 0x577   :  { %v6909_v32 = vpop.f32.mrf.mxu0  ;;  %v6911_v15 = vpop.f32.mrf.mxu1 }
 0x57e   :  { %v6913_v25 = vpop.f32.mrf.mxu2  ;;  %v6917_v30 = vpop.f32.mrf.mxu3 }
 0x57f   :  { %v1813_v27 = vpop.f32.mrf.mxu0  ;;  %v1833_v47 = vpop.f32.mrf.mxu1 }
 0x580   :  { %v1876_v36 = vadd.f32 %v1813_v27, %v9497_v3  ;;  %v1877_v11 = vadd.f32 %v1833_v47, %v9498_v38 }
 0x582   :  { %v3724_v23 = vmul.f32 -1.442695, %v1876_v36  ;;  %v3725_v35 = vmul.f32 -1.442695, %v1877_v11  ;;  %v9500_v11 = vld [vmem:[#allocation77_spill] sm:$0xff] }
 0x584   :  { %3874 = vpow2.f32 %v3724_v23 }
 0x585   :  { %3876 = vpow2.f32 %v3725_v35 }
 0x586   :  { %v1853_v59 = vpop.f32.mrf.mxu2  ;;  %v1873_v3 = vpop.f32.mrf.mxu3 }
 0x587   :  { %v1878_v4 = vadd.f32 %v1853_v59, %v9499_v1  ;;  %v1879_v23 = vadd.f32 %v1873_v3, %v9500_v11 }
 0x589   :  { %v3726_v22 = vmul.f32 -1.442695, %v1878_v4 }
 0x58a   :  { %v3875_v34 = vpop.eup %3874 }
 0x58b   :  { %v3877_v62 = vpop.eup %3876  ;;  %v1889_v9 = vadd.f32 1.0, %v3875_v34  ;;  %3878 = vpow2.f32 %v3726_v22 }
 0x58c   :  { %v1890_v5 = vadd.f32 1.0, %v3877_v62 }
 0x58d   :  { %3880 = vrcp.f32 %v1889_v9  ;;  %v1903_v4 = vand.u32 2147483648, %v1889_v9  ;;  %v1901_v62 = vand.u32 2147483647, %v1889_v9  ;;  %vm1897_vm3 = vweird.f32 %v1889_v9 }
 0x58e   :  { %3882 = vrcp.f32 %v1890_v5  ;;  %v1918_v1 = vand.u32 2147483648, %v1890_v5  ;;  %v1916_v52 = vand.u32 2147483647, %v1890_v5  ;;  %vm1912_vm4 = vweird.f32 %v1890_v5 }
 0x58f   :  { %v1904_v11 = vor.u32 1.1754944e-38, %v1903_v4  ;;  %vm1902_vm7 = vcmp.eq.f32.partialorder %v1901_v62, 8.507059e+37 }
 0x590   :  { %vm1917_vm8 = vcmp.eq.f32.partialorder %v1916_v52, 8.507059e+37 }
 0x591   :  { %v3879_v27 = vpop.eup %3878 }
 0x592   :  { %v1891_v38 = vadd.f32 1.0, %v3879_v27 }
 0x593   :  { %v3881_v36 = vpop.eup %3880 }
 0x594   :  { %v3883_v35 = vpop.eup %3882  ;;  %v1893_v47 = vmul.f32 %v3881_v36, %v1889_v9  ;;  %3884 = vrcp.f32 %v1891_v38  ;;  %vm1898_vm1 = vweird.f32 %v3881_v36  ;;  %v1933_v4 = vand.u32 2147483648, %v1891_v38 }
 0x595   :  { %v1908_v20 = vmul.f32 %v3883_v35, %v1890_v5  ;;  %3886 = vtanh.f32 %v1879_v23  ;;  %vm1913_vm2 = vweird.f32 %v3883_v35  ;;  %vm1899_vm5 = vmor %vm1897_vm3, %vm1898_vm1  ;;  %vm1927_vm10 = vweird.f32 %v1891_v38 }
 0x596   :  { %v1894_v60 = vsub.f32 1.0, %v1893_v47  ;;  %vm1914_vm6 = vmor %vm1912_vm4, %vm1913_vm2  ;;  %v1919_v47 = vor.u32 1.1754944e-38, %v1918_v1  ;;  %v1934_v62 = vor.u32 1.1754944e-38, %v1933_v4  ;;  %v7015_v4 = vld [vmem:[#allocation3 + $0xf0] sm:$0xff] }
 0x597   :  { %v1909_v59 = vsub.f32 1.0, %v1908_v20  ;;  %9503 = vst [vmem:[#allocation59_spill] sm:$0xff] %v7015_v4 }
 0x598   :  { %v1895_v34 = vmul.f32 %v3881_v36, %v1894_v60 }
 0x599   :  { %v1910_v22 = vmul.f32 %v3883_v35, %v1909_v59 }
 0x59a   :  { %v3885_v31 = vpop.eup %3884  ;;  %v1896_v27 = vadd.f32 %v3881_v36, %v1895_v34 }
 0x59b   :  { %v1923_v3 = vmul.f32 %v3885_v31, %v1891_v38  ;;  %v1911_v57 = vadd.f32 %v3883_v35, %v1910_v22  ;;  %v3887_v23 = vpop.eup %3886  ;;  %vm1928_vm9 = vweird.f32 %v3885_v31  ;;  %v6962_v22 = vld [vmem:[#allocation3 + $0x188] sm:$0xff] }
 0x59c   :  { %v1900_v20 = vsel %vm1899_vm5, %v3881_v36, %v1896_v27  ;;  %v1931_v36 = vand.u32 2147483647, %v1891_v38  ;;  %vm1929_vm11 = vmor %vm1927_vm10, %vm1928_vm9  ;;  %v6952_v38 = vld [vmem:[#allocation3 + $0x1a8] sm:$0xff]  ;;  %v6965_v27 = vld [vmem:[#allocation3 + $0x190] sm:$0xff] }
 0x59d   :  { %v1924_v58 = vsub.f32 1.0, %v1923_v3  ;;  %v1905_v60 = vsel %vm1902_vm7, %v1904_v11, %v1900_v20  ;;  %v1915_v2 = vsel %vm1914_vm6, %v3883_v35, %v1911_v57  ;;  %v6955_v35 = vld [vmem:[#allocation3 + $0x1b0] sm:$0xff]  ;;  %v6972_v3 = vld [vmem:[#allocation3 + $0x168] sm:$0xff] }
 0x59e   :  { %v1920_v59 = vsel %vm1917_vm8, %v1919_v47, %v1915_v2  ;;  %v1939_v51 = vmul.f32 %v3887_v23, %v1905_v60  ;;  %vm1932_vm12 = vcmp.eq.f32.partialorder %v1931_v36, 8.507059e+37  ;;  %v6975_v11 = vld [vmem:[#allocation3 + $0x170] sm:$0xff]  ;;  %v6982_v47 = vld [vmem:[#allocation3 + $0x148] sm:$0xff] }
 0x59f   :  { %v1925_v44 = vmul.f32 %v3885_v31, %v1924_v58  ;;  %v1938_v34 = vmul.f32 %v1920_v59, %v6564_v43  ;;  %v6932_v43 = vld [vmem:[#allocation3 + $0x1e8] sm:$0xff]  ;;  %v6985_v20 = vld [vmem:[#allocation3 + $0x150] sm:$0xff] }
 0x5a0   :  { %v6942_v58 = vld [vmem:[#allocation3 + $0x1c8] sm:$0xff]  ;;  %v6995_v60 = vld [vmem:[#allocation3 + $0x130] sm:$0xff] }
 0x5a1   :  { %v6922_v9 = vadd.f32 %v1939_v51, %v1938_v34  ;;  %v1926_v5 = vadd.f32 %v3885_v31, %v1925_v44  ;;  %v6935_v44 = vld [vmem:[#allocation3 + $0x1f0] sm:$0xff]  ;;  %v6938_v51 = vld [vmem:[#allocation3 + $0x1f8] sm:$0xff]  ;;  %v6992_v23 = vld [vmem:[#allocation3 + $0x128] sm:$0xff] }
 0x5a2   :  { %v7002_v59 = vld [vmem:[#allocation3 + $0x108] sm:$0xff]  ;;  %v7005_v34 = vld [vmem:[#allocation3 + $0x110] sm:$0xff] }
 0x5a3   :  { %3888 = vtanh.f32 %v6922_v9  ;;  %v1930_v1 = vsel %vm1929_vm11, %v3885_v31, %v1926_v5  ;;  %v6945_v31 = vld [vmem:[#allocation3 + $0x1d0] sm:$0xff]  ;;  %v7012_v5 = vld [vmem:[#allocation3 + $0xe8] sm:$0xff] }
 0x5a4   :  { %v1935_v52 = vsel %vm1932_vm12, %v1934_v62, %v1930_v1  ;;  %9502 = vst [vmem:[#allocation60_spill] sm:$0xff] %v7012_v5  ;;  %v7022_v36 = vld [vmem:[#allocation3 + $0xc8] sm:$0xff]  ;;  %v7025_v1 = vld [vmem:[#allocation3 + $0xd0] sm:$0xff] }
 0x5a5   :  { %9505 = vst [vmem:[#allocation107_spill] sm:$0xff] %v7022_v36  ;;  %v7032_v62 = vld [vmem:[#allocation3 + $0xa8] sm:$0xff] }
 0x5a6   :  { %9506 = vst [vmem:[#allocation135_spill] sm:$0xff] %v7025_v1 }
 0x5a7   :  { %9508 = vst [vmem:[#allocation85_spill] sm:$0xff] %v7032_v62 }
 0x5a9   :  { %v3889_v57 = vpop.eup %3888 }
 0x5aa   :  { %v6925_v2 = vmul.f32 %v3889_v57, %v1935_v52  ;;  %v7035_v57 = vld [vmem:[#allocation3 + $0xb0] sm:$0xff]  ;;  %v7042_v52 = vld [vmem:[#allocation3 + $0x88] sm:$0xff] }
 0x5ab   :  { %9509 = vst [vmem:[#allocation86_spill] sm:$0xff] %v7035_v57 }
 0x5ac   :  { %1959 = vmatmul.f32.vlgmr.msra.gmra.mxu0 %v6925_v2  ;;  %1979 = vmatmul.f32.vlgmr.msrb.gmra.mxu1 %v6925_v2  ;;  %9511 = vst [vmem:[#allocation89_spill] sm:$0xff] %v7042_v52 }
 0x5ad   :  { %1999 = vmatmul.f32.vlgmr.msrb.gmra.mxu2 %v6925_v2  ;;  %2019 = vmatmul.f32.vlgmr.msrb.gmra.mxu3 %v6925_v2 }
 0x5ae   :  { %2170 = vmatpush.msra.mxu0 %v6573_v49  ;;  %2190 = vmatpush.msrb.mxu1 %v6932_v43  ;;  %v6948_v49 = vld [vmem:[#allocation3 + $0x1d8] sm:$0xff] }
 0x5af   :  { %2210 = vmatpush.msrb.mxu2 %v6935_v44  ;;  %2230 = vmatpush.msrb.mxu3 %v6938_v51 }
 0x5b0   :  { %2171 = vmatpush.msra.mxu0 %v6579_v56  ;;  %2191 = vmatpush.msrb.mxu1 %v6942_v58  ;;  %v6958_v56 = vld [vmem:[#allocation3 + $0x1b8] sm:$0xff] }
 0x5b1   :  { %2211 = vmatpush.msrb.mxu2 %v6945_v31  ;;  %2231 = vmatpush.msrb.mxu3 %v6948_v49 }
 0x5b2   :  { %2172 = vmatpush.msra.mxu0 %v6585_v7  ;;  %2192 = vmatpush.msrb.mxu1 %v6952_v38  ;;  %v6968_v7 = vld [vmem:[#allocation3 + $0x198] sm:$0xff] }
 0x5b3   :  { %2212 = vmatpush.msrb.mxu2 %v6955_v35  ;;  %2232 = vmatpush.msrb.mxu3 %v6958_v56 }
 0x5b4   :  { %2173 = vmatpush.msra.mxu0 %v6591_v29  ;;  %2193 = vmatpush.msrb.mxu1 %v6962_v22  ;;  %v6978_v29 = vld [vmem:[#allocation3 + $0x178] sm:$0xff] }
 0x5b5   :  { %2213 = vmatpush.msrb.mxu2 %v6965_v27  ;;  %2233 = vmatpush.msrb.mxu3 %v6968_v7 }
 0x5b6   :  { %2174 = vmatpush.msra.mxu0 %v6597_v37  ;;  %2194 = vmatpush.msrb.mxu1 %v6972_v3  ;;  %v6988_v37 = vld [vmem:[#allocation3 + $0x158] sm:$0xff] }
 0x5b7   :  { %2214 = vmatpush.msrb.mxu2 %v6975_v11  ;;  %2234 = vmatpush.msrb.mxu3 %v6978_v29 }
 0x5b8   :  { %2175 = vmatpush.msra.mxu0 %v6603_v63  ;;  %2195 = vmatpush.msrb.mxu1 %v6982_v47  ;;  %v6998_v63 = vld [vmem:[#allocation3 + $0x138] sm:$0xff] }
 0x5b9   :  { %2215 = vmatpush.msrb.mxu2 %v6985_v20  ;;  %2235 = vmatpush.msrb.mxu3 %v6988_v37 }
 0x5ba   :  { %2176 = vmatpush.msra.mxu0 %v6609_v10  ;;  %2196 = vmatpush.msrb.mxu1 %v6992_v23  ;;  %v7008_v10 = vld [vmem:[#allocation3 + $0x118] sm:$0xff] }
 0x5bb   :  { %2216 = vmatpush.msrb.mxu2 %v6995_v60  ;;  %2236 = vmatpush.msrb.mxu3 %v6998_v63  ;;  %9501 = vst [vmem:[#allocation50_spill] sm:$0xff] %v7008_v10 }
 0x5bc   :  { %2177 = vmatpush.msra.mxu0 %v6615_v40  ;;  %2197 = vmatpush.msrb.mxu1 %v7002_v59  ;;  %v7018_v40 = vld [vmem:[#allocation3 + $0xf8] sm:$0xff] }
 0x5bd   :  { %2217 = vmatpush.msrb.mxu2 %v7005_v34  ;;  %2237 = vmatpush.msrb.mxu3 %v7008_v10  ;;  %9504 = vst [vmem:[#allocation79_spill] sm:$0xff] %v7018_v40 }
 0x5be   :  { %2178 = vmatpush.msra.mxu0 %v6621_v8  ;;  %2198 = vmatpush.msrb.mxu1 %v7012_v5  ;;  %v7028_v8 = vld [vmem:[#allocation3 + $0xd8] sm:$0xff] }
 0x5bf   :  { %2218 = vmatpush.msrb.mxu2 %v7015_v4  ;;  %2238 = vmatpush.msrb.mxu3 %v7018_v40  ;;  %9507 = vst [vmem:[#allocation139_spill] sm:$0xff] %v7028_v8 }
 0x5c0   :  { %2179 = vmatpush.msra.mxu0 %v6627_v42  ;;  %2199 = vmatpush.msrb.mxu1 %v7022_v36  ;;  %v7038_v42 = vld [vmem:[#allocation3 + $0xb8] sm:$0xff] }
 0x5c1   :  { %2219 = vmatpush.msrb.mxu2 %v7025_v1  ;;  %2239 = vmatpush.msrb.mxu3 %v7028_v8  ;;  %9510 = vst [vmem:[#allocation87_spill] sm:$0xff] %v7038_v42  ;;  %v7045_v8 = vld [vmem:[#allocation3 + $0x90] sm:$0xff] }
 0x5c2   :  { %2180 = vmatpush.msra.mxu0 %v6633_v21  ;;  %2200 = vmatpush.msrb.mxu1 %v7032_v62  ;;  %9512 = vst [vmem:[#allocation90_spill] sm:$0xff] %v7045_v8  ;;  %v7048_v21 = vld [vmem:[#allocation3 + $0x98] sm:$0xff] }
 0x5c3   :  { %2220 = vmatpush.msrb.mxu2 %v7035_v57  ;;  %2240 = vmatpush.msrb.mxu3 %v7038_v42  ;;  %9513 = vst [vmem:[#allocation91_spill] sm:$0xff] %v7048_v21  ;;  %v7052_v57 = vld [vmem:[#allocation3 + $0x68] sm:$0xff]  ;;  %v7055_v42 = vld [vmem:[#allocation3 + $0x70] sm:$0xff] }
 0x5c4   :  { %2181 = vmatpush.msra.mxu0 %v6639_v17  ;;  %2201 = vmatpush.msrb.mxu1 %v7042_v52  ;;  %9514 = vst [vmem:[#allocation92_spill] sm:$0xff] %v7052_v57  ;;  %v7058_v17 = vld [vmem:[#allocation3 + $0x78] sm:$0xff] }
 0x5c5   :  { %2221 = vmatpush.msrb.mxu2 %v7045_v8  ;;  %2241 = vmatpush.msrb.mxu3 %v7048_v21  ;;  %9515 = vst [vmem:[#allocation93_spill] sm:$0xff] %v7055_v42  ;;  %v7062_v8 = vld [vmem:[#allocation3 + $0x48] sm:$0xff]  ;;  %v7065_v21 = vld [vmem:[#allocation3 + $0x50] sm:$0xff] }
 0x5c6   :  { %2182 = vmatpush.msra.mxu0 %v6645_v0  ;;  %2202 = vmatpush.msrb.mxu1 %v7052_v57  ;;  %9516 = vst [vmem:[#allocation94_spill] sm:$0xff] %v7058_v17  ;;  %v7068_v0 = vld [vmem:[#allocation3 + $0x58] sm:$0xff] }
 0x5c7   :  { %2222 = vmatpush.msrb.mxu2 %v7055_v42  ;;  %2242 = vmatpush.msrb.mxu3 %v7058_v17  ;;  %9517 = vst [vmem:[#allocation95_spill] sm:$0xff] %v7062_v8  ;;  %v7072_v42 = vld [vmem:[#allocation3 + $0x28] sm:$0xff]  ;;  %v7075_v17 = vld [vmem:[#allocation3 + $0x30] sm:$0xff] }
 0x5c8   :  { %2183 = vmatpush.msra.mxu0 %v6651_v16  ;;  %2203 = vmatpush.msrb.mxu1 %v7062_v8  ;;  %9518 = vst [vmem:[#allocation96_spill] sm:$0xff] %v7065_v21  ;;  %v7078_v16 = vld [vmem:[#allocation3 + $0x38] sm:$0xff] }
 0x5c9   :  { %2223 = vmatpush.msrb.mxu2 %v7065_v21  ;;  %9519 = vst [vmem:[#allocation97_spill] sm:$0xff] %v7068_v0  ;;  %2243 = vmatpush.msrb.mxu3 %v7068_v0  ;;  %v7082_v21 = vld [vmem:[#allocation3 + $0x8] sm:$0xff]  ;;  %v7085_v0 = vld [vmem:[#allocation3 + $0x10] sm:$0xff] }
 0x5ca   :  { %2184 = vmatpush.msra.mxu0 %v6657_v61  ;;  %9520 = vst [vmem:[#allocation99_spill] sm:$0xff] %v7072_v42  ;;  %2204 = vmatpush.msrb.mxu1 %v7072_v42  ;;  %v7088_v61 = vld [vmem:[#allocation3 + $0x18] sm:$0xff] }
 0x5cb   :  { %9521 = vst [vmem:[#allocation100_spill] sm:$0xff] %v7075_v17  ;;  %2224 = vmatpush.msrb.mxu2 %v7075_v17  ;;  %2244 = vmatpush.msrb.mxu3 %v7078_v16  ;;  %v1730_v17 = vadd.f32 %v6909_v32, %v9390_v46 }
 0x5cc   :  { %9522 = vst [vmem:[#allocation102_spill] sm:$0xff] %v7078_v16  ;;  %2185 = vmatpush.msra.mxu0 %v6663_v54  ;;  %2205 = vmatpush.msrb.mxu1 %v7082_v21  ;;  %v1750_v16 = vadd.f32 %v6911_v15, %v9391_v45 }
 0x5cd   :  { %9523 = vst [vmem:[#allocation103_spill] sm:$0xff] %v7082_v21  ;;  %2225 = vmatpush.msrb.mxu2 %v7085_v0  ;;  %2245 = vmatpush.msrb.mxu3 %v7088_v61 }
 0x5ce   :  { %9524 = vst [vmem:[#allocation104_spill] sm:$0xff] %v7085_v0  ;;  %v1770_v0 = vadd.f32 %v6913_v25, %v9392_v41 }
 0x5cf   :  { %9525 = vst [vmem:[#allocation105_spill] sm:$0xff] %v7088_v61 }
 0x629   :  { %v1960_v42 = vpop.f32.mrf.mxu0  ;;  %v1980_v54 = vpop.f32.mrf.mxu1 }
 0x62a   :  { %v1961_v8 = vadd.f32 %v1960_v42, %v1730_v17  ;;  %v1981_v57 = vadd.f32 %v1980_v54, %v1750_v16 }
 0x62c   :  { %v3727_v52 = vmul.f32 -1.442695, %v1961_v8  ;;  %v3728_v21 = vmul.f32 -1.442695, %v1981_v57  ;;  %v1790_v8 = vadd.f32 %v6917_v30, %v9393_v13 }
 0x62e   :  { %3890 = vpow2.f32 %v3727_v52 }
 0x62f   :  { %3892 = vpow2.f32 %v3728_v21 }
 0x630   :  { %v2000_v62 = vpop.f32.mrf.mxu2  ;;  %v2020_v15 = vpop.f32.mrf.mxu3 }
 0x631   :  { %v2001_v1 = vadd.f32 %v2000_v62, %v1770_v0  ;;  %v2021_v17 = vadd.f32 %v2020_v15, %v1790_v8 }
 0x633   :  { %v3729_v61 = vmul.f32 -1.442695, %v2001_v1 }
 0x634   :  { %v3891_v36 = vpop.eup %3890 }
 0x635   :  { %v3893_v40 = vpop.eup %3892  ;;  %v2032_v32 = vadd.f32 1.0, %v3891_v36  ;;  %3894 = vpow2.f32 %v3729_v61 }
 0x636   :  { %v2033_v46 = vadd.f32 1.0, %v3893_v40 }
 0x637   :  { %3896 = vrcp.f32 %v2032_v32  ;;  %v2046_v16 = vand.u32 2147483648, %v2032_v32  ;;  %v2044_v61 = vand.u32 2147483647, %v2032_v32  ;;  %vm2040_vm15 = vweird.f32 %v2032_v32 }
 0x638   :  { %3898 = vrcp.f32 %v2033_v46  ;;  %v2061_v36 = vand.u32 2147483648, %v2033_v46  ;;  %v2059_v41 = vand.u32 2147483647, %v2033_v46  ;;  %vm2055_vm0 = vweird.f32 %v2033_v46 }
 0x639   :  { %vm2045_vm3 = vcmp.eq.f32.partialorder %v2044_v61, 8.507059e+37 }
 0x63a   :  { %vm2060_vm4 = vcmp.eq.f32.partialorder %v2059_v41, 8.507059e+37 }
 0x63b   :  { %v3895_v42 = vpop.eup %3894 }
 0x63c   :  { %v2034_v57 = vadd.f32 1.0, %v3895_v42  ;;  %v2047_v42 = vor.u32 1.1754944e-38, %v2046_v16 }
 0x63d   :  { %v3897_v52 = vpop.eup %3896 }
 0x63e   :  { %v3899_v25 = vpop.eup %3898  ;;  %v2036_v21 = vmul.f32 %v3897_v52, %v2032_v32  ;;  %3900 = vrcp.f32 %v2034_v57  ;;  %vm2041_vm13 = vweird.f32 %v3897_v52  ;;  %v2076_v16 = vand.u32 2147483648, %v2034_v57 }
 0x63f   :  { %v2051_v62 = vmul.f32 %v3899_v25, %v2033_v46  ;;  %3902 = vtanh.f32 %v2021_v17  ;;  %vm2056_vm14 = vweird.f32 %v3899_v25  ;;  %vm2042_vm1 = vmor %vm2040_vm15, %vm2041_vm13  ;;  %vm2070_vm6 = vweird.f32 %v2034_v57 }
 0x640   :  { %v2037_v1 = vsub.f32 1.0, %v2036_v21  ;;  %vm2057_vm2 = vmor %vm2055_vm0, %vm2056_vm14  ;;  %v2062_v21 = vor.u32 1.1754944e-38, %v2061_v36  ;;  %v2077_v61 = vor.u32 1.1754944e-38, %v2076_v16  ;;  %v7164_v16 = vld [vmem:[#allocation6 + $0x178] sm:$0xff] }
 0x641   :  { %v2052_v0 = vsub.f32 1.0, %v2051_v62  ;;  %9535 = vst [vmem:[#allocation116_spill] sm:$0xff] %v7164_v16 }
 0x642   :  { %v2038_v40 = vmul.f32 %v3897_v52, %v2037_v1 }
 0x643   :  { %v2053_v54 = vmul.f32 %v3899_v25, %v2052_v0 }
 0x644   :  { %v3901_v45 = vpop.eup %3900  ;;  %v2039_v30 = vadd.f32 %v3897_v52, %v2038_v40 }
 0x645   :  { %v2066_v15 = vmul.f32 %v3901_v45, %v2034_v57  ;;  %v2054_v8 = vadd.f32 %v3899_v25, %v2053_v54  ;;  %v3903_v17 = vpop.eup %3902  ;;  %vm2071_vm5 = vweird.f32 %v3901_v45  ;;  %v7121_v54 = vld [vmem:[#allocation6 + $0x1d0] sm:$0xff] }
 0x646   :  { %v2043_v62 = vsel %vm2042_vm1, %v3897_v52, %v2039_v30  ;;  %v2074_v52 = vand.u32 2147483647, %v2034_v57  ;;  %vm2072_vm7 = vmor %vm2070_vm6, %vm2071_vm5  ;;  %v7118_v57 = vld [vmem:[#allocation6 + $0x1c8] sm:$0xff]  ;;  %v7124_v30 = vld [vmem:[#allocation6 + $0x1d8] sm:$0xff] }
 0x647   :  { %v2067_v13 = vsub.f32 1.0, %v2066_v15  ;;  %v2048_v1 = vsel %vm2045_vm3, %v2047_v42, %v2043_v62  ;;  %v2058_v4 = vsel %vm2057_vm2, %v3899_v25, %v2054_v8  ;;  %v7127_v15 = vld [vmem:[#allocation6 + $0x1a0] sm:$0xff]  ;;  %v7130_v42 = vld [vmem:[#allocation6 + $0x1a8] sm:$0xff]  ;;  %v7133_v8 = vld [vmem:[#allocation6 + $0x1b0] sm:$0xff] }
 0x648   :  { %v2063_v0 = vsel %vm2060_vm4, %v2062_v21, %v2058_v4  ;;  %v2082_v5 = vmul.f32 %v3903_v17, %v2048_v1  ;;  %vm2075_vm8 = vcmp.eq.f32.partialorder %v2074_v52, 8.507059e+37  ;;  %9526 = vst [vmem:[#allocation106_spill] sm:$0xff] %v7133_v8  ;;  %v7136_v21 = vld [vmem:[#allocation6 + $0x1b8] sm:$0xff]  ;;  %v7143_v62 = vld [vmem:[#allocation6 + $0x180] sm:$0xff]  ;;  %v7146_v17 = vld [vmem:[#allocation6 + $0x188] sm:$0xff] }
 0x649   :  { %v2081_v10 = vmul.f32 %v2063_v0, %v6678_v50  ;;  %v2068_v40 = vmul.f32 %v3901_v45, %v2067_v13  ;;  %v7103_v13 = vld [vmem:[#allocation6 + $0x1e0] sm:$0xff]  ;;  %v7106_v50 = vld [vmem:[#allocation6 + $0x1e8] sm:$0xff]  ;;  %9527 = vst [vmem:[#allocation108_spill] sm:$0xff] %v7136_v21  ;;  %v7149_v1 = vld [vmem:[#allocation6 + $0x190] sm:$0xff] }
 0x64a   :  { %9528 = vst [vmem:[#allocation109_spill] sm:$0xff] %v7143_v62  ;;  %v7152_v0 = vld [vmem:[#allocation6 + $0x198] sm:$0xff]  ;;  %v7167_v52 = vld [vmem:[#allocation6 + $0x140] sm:$0xff] }
 0x64b   :  { %v7100_v32 = vadd.f32 %v2082_v5, %v2081_v10  ;;  %v2069_v46 = vadd.f32 %v3901_v45, %v2068_v40  ;;  %v7109_v10 = vld [vmem:[#allocation6 + $0x1f0] sm:$0xff]  ;;  %v7115_v5 = vld [vmem:[#allocation6 + $0x1c0] sm:$0xff]  ;;  %9529 = vst [vmem:[#allocation110_spill] sm:$0xff] %v7146_v17 }
 0x64c   :  { %9530 = vst [vmem:[#allocation111_spill] sm:$0xff] %v7149_v1  ;;  %v7155_v40 = vld [vmem:[#allocation6 + $0x160] sm:$0xff] }
 0x64d   :  { %3904 = vtanh.f32 %v7100_v32  ;;  %v2073_v36 = vsel %vm2072_vm7, %v3901_v45, %v2069_v46  ;;  %v7112_v45 = vld [vmem:[#allocation6 + $0x1f8] sm:$0xff]  ;;  %9531 = vst [vmem:[#allocation112_spill] sm:$0xff] %v7152_v0  ;;  %v7161_v46 = vld [vmem:[#allocation6 + $0x170] sm:$0xff] }
 0x64e   :  { %v2078_v41 = vsel %vm2075_vm8, %v2077_v61, %v2073_v36  ;;  %9532 = vst [vmem:[#allocation113_spill] sm:$0xff] %v7155_v40  ;;  %v7170_v36 = vld [vmem:[#allocation6 + $0x148] sm:$0xff]  ;;  %v7173_v61 = vld [vmem:[#allocation6 + $0x150] sm:$0xff] }
 0x64f   :  { %9534 = vst [vmem:[#allocation115_spill] sm:$0xff] %v7161_v46 }
 0x650   :  { %9536 = vst [vmem:[#allocation118_spill] sm:$0xff] %v7167_v52 }
 0x651   :  { %9537 = vst [vmem:[#allocation119_spill] sm:$0xff] %v7170_v36 }
 0x652   :  { %9538 = vst [vmem:[#allocation120_spill] sm:$0xff] %v7173_v61 }
 0x653   :  { %v3905_v25 = vpop.eup %3904 }
 0x654   :  { %v2085_v4 = vmul.f32 %v3905_v25, %v2078_v41  ;;  %v7176_v25 = vld [vmem:[#allocation6 + $0x158] sm:$0xff]  ;;  %v7179_v41 = vld [vmem:[#allocation6 + $0x120] sm:$0xff] }
 0x655   :  { %9539 = vst [vmem:[#allocation122_spill] sm:$0xff] %v7176_v25 }
 0x656   :  { %2102 = vmatmul.f32.vlgmr.msrb.gmra.mxu0 %v2085_v4  ;;  %2122 = vmatmul.f32.vlgmr.msra.gmra.mxu1 %v2085_v4  ;;  %9540 = vst [vmem:[#allocation123_spill] sm:$0xff] %v7179_v41 }
 0x657   :  { %2142 = vmatmul.f32.vlgmr.msra.gmra.mxu2 %v2085_v4  ;;  %2162 = vmatmul.f32.vlgmr.msra.gmra.mxu3 %v2085_v4  ;;  %v7182_v4 = vld [vmem:[#allocation6 + $0x128] sm:$0xff] }
 0x658   :  { %2317 = vmatpush.msrb.mxu0 %v7103_v13  ;;  %2337 = vmatpush.msra.mxu1 %v7106_v50  ;;  %9541 = vst [vmem:[#allocation124_spill] sm:$0xff] %v7182_v4 }
 0x659   :  { %2357 = vmatpush.msra.mxu2 %v7109_v10  ;;  %2377 = vmatpush.msra.mxu3 %v7112_v45 }
 0x65a   :  { %2318 = vmatpush.msrb.mxu0 %v7115_v5  ;;  %2338 = vmatpush.msra.mxu1 %v7118_v57 }
 0x65b   :  { %2358 = vmatpush.msra.mxu2 %v7121_v54  ;;  %2378 = vmatpush.msra.mxu3 %v7124_v30 }
 0x65c   :  { %2319 = vmatpush.msrb.mxu0 %v7127_v15  ;;  %2339 = vmatpush.msra.mxu1 %v7130_v42 }
 0x65d   :  { %2359 = vmatpush.msra.mxu2 %v7133_v8  ;;  %2379 = vmatpush.msra.mxu3 %v7136_v21 }
 0x65e   :  { %2186 = vmatmul.f32.vlgmr.msra.gmra.mxu0 %v6925_v2  ;;  %2206 = vmatmul.f32.vlgmr.msrb.gmra.mxu1 %v6925_v2 }
 0x65f   :  { %2226 = vmatmul.f32.vlgmr.msrb.gmra.mxu2 %v6925_v2  ;;  %2246 = vmatmul.f32.vlgmr.msrb.gmra.mxu3 %v6925_v2  ;;  %v7158_v2 = vld [vmem:[#allocation6 + $0x168] sm:$0xff] }
 0x660   :  { %2320 = vmatpush.msrb.mxu0 %v7143_v62  ;;  %2340 = vmatpush.msra.mxu1 %v7146_v17  ;;  %9533 = vst [vmem:[#allocation114_spill] sm:$0xff] %v7158_v2 }
 0x661   :  { %2360 = vmatpush.msra.mxu2 %v7149_v1  ;;  %2380 = vmatpush.msra.mxu3 %v7152_v0 }
 0x662   :  { %2321 = vmatpush.msrb.mxu0 %v7155_v40  ;;  %2341 = vmatpush.msra.mxu1 %v7158_v2 }
 0x663   :  { %2361 = vmatpush.msra.mxu2 %v7161_v46  ;;  %2381 = vmatpush.msra.mxu3 %v7164_v16 }
 0x664   :  { %2322 = vmatpush.msrb.mxu0 %v7167_v52  ;;  %2342 = vmatpush.msra.mxu1 %v7170_v36  ;;  %v7185_v52 = vld [vmem:[#allocation6 + $0x130] sm:$0xff]  ;;  %v7188_v36 = vld [vmem:[#allocation6 + $0x138] sm:$0xff] }
 0x665   :  { %2362 = vmatpush.msra.mxu2 %v7173_v61  ;;  %2382 = vmatpush.msra.mxu3 %v7176_v25  ;;  %9542 = vst [vmem:[#allocation125_spill] sm:$0xff] %v7185_v52  ;;  %v7191_v61 = vld [vmem:[#allocation6 + $0x100] sm:$0xff]  ;;  %v7194_v25 = vld [vmem:[#allocation6 + $0x108] sm:$0xff] }
 0x666   :  { %2323 = vmatpush.msrb.mxu0 %v7179_v41  ;;  %2343 = vmatpush.msra.mxu1 %v7182_v4  ;;  %9543 = vst [vmem:[#allocation126_spill] sm:$0xff] %v7188_v36  ;;  %v7197_v41 = vld [vmem:[#allocation6 + $0x110] sm:$0xff]  ;;  %v7200_v4 = vld [vmem:[#allocation6 + $0x118] sm:$0xff] }
 0x667   :  { %2363 = vmatpush.msra.mxu2 %v7185_v52  ;;  %2383 = vmatpush.msra.mxu3 %v7188_v36  ;;  %9544 = vst [vmem:[#allocation127_spill] sm:$0xff] %v7191_v61  ;;  %v7203_v52 = vld [vmem:[#allocation6 + $0xe0] sm:$0xff]  ;;  %v7206_v36 = vld [vmem:[#allocation6 + $0xe8] sm:$0xff] }
 0x668   :  { %2324 = vmatpush.msrb.mxu0 %v7191_v61  ;;  %9545 = vst [vmem:[#allocation128_spill] sm:$0xff] %v7194_v25  ;;  %2344 = vmatpush.msra.mxu1 %v7194_v25  ;;  %v7209_v61 = vld [vmem:[#allocation6 + $0xf0] sm:$0xff]  ;;  %v7212_v25 = vld [vmem:[#allocation6 + $0xf8] sm:$0xff] }
 0x669   :  { %9546 = vst [vmem:[#allocation129_spill] sm:$0xff] %v7197_v41  ;;  %2364 = vmatpush.msra.mxu2 %v7197_v41  ;;  %2384 = vmatpush.msra.mxu3 %v7200_v4  ;;  %v7215_v41 = vld [vmem:[#allocation6 + $0xc0] sm:$0xff] }
 0x66a   :  { %9547 = vst [vmem:[#allocation130_spill] sm:$0xff] %v7200_v4  ;;  %2325 = vmatpush.msrb.mxu0 %v7203_v52  ;;  %2345 = vmatpush.msra.mxu1 %v7206_v36  ;;  %v7218_v4 = vld [vmem:[#allocation6 + $0xc8] sm:$0xff] }
 0x66b   :  { %9548 = vst [vmem:[#allocation131_spill] sm:$0xff] %v7203_v52  ;;  %2365 = vmatpush.msra.mxu2 %v7209_v61  ;;  %2385 = vmatpush.msra.mxu3 %v7212_v25  ;;  %v7221_v52 = vld [vmem:[#allocation6 + $0xd0] sm:$0xff] }
 0x66c   :  { %9549 = vst [vmem:[#allocation132_spill] sm:$0xff] %v7206_v36  ;;  %2326 = vmatpush.msrb.mxu0 %v7215_v41  ;;  %2346 = vmatpush.msra.mxu1 %v7218_v4  ;;  %v7224_v36 = vld [vmem:[#allocation6 + $0xd8] sm:$0xff] }
 0x66d   :  { %9550 = vst [vmem:[#allocation133_spill] sm:$0xff] %v7209_v61  ;;  %2366 = vmatpush.msra.mxu2 %v7221_v52  ;;  %2386 = vmatpush.msra.mxu3 %v7224_v36  ;;  %v7227_v61 = vld [vmem:[#allocation6 + $0xa0] sm:$0xff] }
 0x66e   :  { %9551 = vst [vmem:[#allocation134_spill] sm:$0xff] %v7212_v25  ;;  %2327 = vmatpush.msrb.mxu0 %v7227_v61  ;;  %v7230_v25 = vld [vmem:[#allocation6 + $0xa8] sm:$0xff] }
 0x66f   :  { %9552 = vst [vmem:[#allocation136_spill] sm:$0xff] %v7215_v41  ;;  %2347 = vmatpush.msra.mxu1 %v7230_v25  ;;  %v7233_v41 = vld [vmem:[#allocation6 + $0xb0] sm:$0xff] }
 0x670   :  { %9553 = vst [vmem:[#allocation137_spill] sm:$0xff] %v7218_v4  ;;  %2367 = vmatpush.msra.mxu2 %v7233_v41  ;;  %v7236_v4 = vld [vmem:[#allocation6 + $0xb8] sm:$0xff] }
 0x671   :  { %9554 = vst [vmem:[#allocation138_spill] sm:$0xff] %v7221_v52  ;;  %2387 = vmatpush.msra.mxu3 %v7236_v4  ;;  %v7239_v52 = vld [vmem:[#allocation6 + $0x80] sm:$0xff] }
 0x672   :  { %9555 = vst [vmem:[#allocation140_spill] sm:$0xff] %v7224_v36  ;;  %2328 = vmatpush.msrb.mxu0 %v7239_v52  ;;  %v7242_v36 = vld [vmem:[#allocation6 + $0x88] sm:$0xff] }
 0x673   :  { %9556 = vst [vmem:[#allocation141_spill] sm:$0xff] %v7227_v61  ;;  %2348 = vmatpush.msra.mxu1 %v7242_v36  ;;  %v7245_v61 = vld [vmem:[#allocation6 + $0x90] sm:$0xff] }
 0x674   :  { %9557 = vst [vmem:[#allocation142_spill] sm:$0xff] %v7230_v25  ;;  %2368 = vmatpush.msra.mxu2 %v7245_v61  ;;  %v7248_v25 = vld [vmem:[#allocation6 + $0x98] sm:$0xff] }
 0x675   :  { %9558 = vst [vmem:[#allocation143_spill] sm:$0xff] %v7233_v41  ;;  %2388 = vmatpush.msra.mxu3 %v7248_v25  ;;  %v7251_v41 = vld [vmem:[#allocation6 + $0x60] sm:$0xff] }
 0x676   :  { %9559 = vst [vmem:[#allocation144_spill] sm:$0xff] %v7236_v4  ;;  %2329 = vmatpush.msrb.mxu0 %v7251_v41  ;;  %v7254_v4 = vld [vmem:[#allocation6 + $0x68] sm:$0xff] }
 0x677   :  { %9560 = vst [vmem:[#allocation145_spill] sm:$0xff] %v7239_v52  ;;  %2349 = vmatpush.msra.mxu1 %v7254_v4  ;;  %v7257_v52 = vld [vmem:[#allocation6 + $0x70] sm:$0xff] }
 0x678   :  { %9561 = vst [vmem:[#allocation146_spill] sm:$0xff] %v7242_v36  ;;  %2369 = vmatpush.msra.mxu2 %v7257_v52  ;;  %v7260_v36 = vld [vmem:[#allocation6 + $0x78] sm:$0xff] }
 0x679   :  { %9562 = vst [vmem:[#allocation147_spill] sm:$0xff] %v7245_v61  ;;  %2389 = vmatpush.msra.mxu3 %v7260_v36  ;;  %v7263_v61 = vld [vmem:[#allocation6 + $0x40] sm:$0xff] }
 0x67a   :  { %9563 = vst [vmem:[#allocation148_spill] sm:$0xff] %v7248_v25  ;;  %2330 = vmatpush.msrb.mxu0 %v7263_v61  ;;  %v7266_v25 = vld [vmem:[#allocation6 + $0x48] sm:$0xff] }
 0x67b   :  { %9564 = vst [vmem:[#allocation149_spill] sm:$0xff] %v7251_v41  ;;  %2350 = vmatpush.msra.mxu1 %v7266_v25  ;;  %v7269_v41 = vld [vmem:[#allocation6 + $0x50] sm:$0xff] }
 0x67c   :  { %9565 = vst [vmem:[#allocation150_spill] sm:$0xff] %v7254_v4  ;;  %2370 = vmatpush.msra.mxu2 %v7269_v41  ;;  %v7272_v4 = vld [vmem:[#allocation6 + $0x58] sm:$0xff] }
 0x67d   :  { %9566 = vst [vmem:[#allocation151_spill] sm:$0xff] %v7257_v52  ;;  %2390 = vmatpush.msra.mxu3 %v7272_v4  ;;  %v7275_v52 = vld [vmem:[#allocation6 + $0x20] sm:$0xff] }
 0x67e   :  { %9567 = vst [vmem:[#allocation152_spill] sm:$0xff] %v7260_v36  ;;  %2331 = vmatpush.msrb.mxu0 %v7275_v52  ;;  %v7278_v36 = vld [vmem:[#allocation6 + $0x28] sm:$0xff] }
 0x67f   :  { %9568 = vst [vmem:[#allocation153_spill] sm:$0xff] %v7263_v61  ;;  %2351 = vmatpush.msra.mxu1 %v7278_v36  ;;  %v7281_v61 = vld [vmem:[#allocation6 + $0x30] sm:$0xff] }
 0x680   :  { %9569 = vst [vmem:[#allocation62_spill] sm:$0xff] %v7266_v25  ;;  %2371 = vmatpush.msra.mxu2 %v7281_v61  ;;  %v7284_v25 = vld [vmem:[#allocation6 + $0x38] sm:$0xff] }
 0x681   :  { %9570 = vst [vmem:[#allocation65_spill] sm:$0xff] %v7269_v41  ;;  %2391 = vmatpush.msra.mxu3 %v7284_v25  ;;  %v7287_v41 = vld [vmem:[#allocation6] sm:$0xff] }
 0x682   :  { %9571 = vst [vmem:[#allocation69_spill] sm:$0xff] %v7272_v4  ;;  %2332 = vmatpush.msrb.mxu0 %v7287_v41  ;;  %v7290_v4 = vld [vmem:[#allocation6 + $0x8] sm:$0xff] }
 0x683   :  { %9572 = vst [vmem:[#allocation70_spill] sm:$0xff] %v7275_v52  ;;  %2352 = vmatpush.msra.mxu1 %v7290_v4  ;;  %v7293_v52 = vld [vmem:[#allocation6 + $0x10] sm:$0xff] }
 0x684   :  { %9573 = vst [vmem:[#allocation154_spill] sm:$0xff] %v7278_v36  ;;  %2372 = vmatpush.msra.mxu2 %v7293_v52  ;;  %v7296_v36 = vld [vmem:[#allocation6 + $0x18] sm:$0xff] }
 0x685   :  { %9574 = vst [vmem:[#allocation155_spill] sm:$0xff] %v7281_v61  ;;  %2392 = vmatpush.msra.mxu3 %v7296_v36  ;;  %v7299_v61 = vld [vmem:[#allocation8 + $0x1e0] sm:$0xff]  ;;  %2480 = vmatpush.msrb.mxu1 %v6750_v28 }
 0x686   :  { %9575 = vst [vmem:[#allocation156_spill] sm:$0xff] %v7284_v25  ;;  %2460 = vmatpush.msra.mxu0 %v7299_v61  ;;  %2500 = vmatpush.msrb.mxu2 %v6753_v48  ;;  %v7317_v28 = vld [vmem:[#allocation8 + $0x180] sm:$0xff] }
 0x687   :  { %9576 = vst [vmem:[#allocation157_spill] sm:$0xff] %v7287_v41  ;;  %2520 = vmatpush.msrb.mxu3 %v6756_v33  ;;  %v7305_v41 = vld [vmem:[#allocation8 + $0x1c0] sm:$0xff]  ;;  %2481 = vmatpush.msrb.mxu1 %v6760_v39  ;;  %v9585_v33 = vld [vmem:[#allocation31_spill] sm:$0xff]  ;;  %v9586_v39 = vld [vmem:[#allocation21_spill] sm:$0xff] }
 0x688   :  { %9577 = vst [vmem:[#allocation158_spill] sm:$0xff] %v7290_v4  ;;  %2461 = vmatpush.msra.mxu0 %v7305_v41  ;;  %2501 = vmatpush.msrb.mxu2 %v6763_v55  ;;  %v7323_v48 = vld [vmem:[#allocation8 + $0x160] sm:$0xff] }
 0x689   :  { %9578 = vst [vmem:[#allocation20_spill] sm:$0xff] %v7293_v52  ;;  %2521 = vmatpush.msrb.mxu3 %v6766_v24  ;;  %2482 = vmatpush.msrb.mxu1 %v6770_v26  ;;  %v7329_v55 = vld [vmem:[#allocation8 + $0x140] sm:$0xff]  ;;  %v9588_v24 = vld [vmem:[#allocation33_spill] sm:$0xff]  ;;  %v9589_v26 = vld [vmem:[#allocation34_spill] sm:$0xff] }
 0x68a   :  { %9579 = vst [vmem:[#allocation22_spill] sm:$0xff] %v7296_v36  ;;  %v7311_v36 = vld [vmem:[#allocation8 + $0x1a0] sm:$0xff]  ;;  %2502 = vmatpush.msrb.mxu2 %v6773_v18 }
 0x68b   :  { %9580 = vst [vmem:[#allocation15_spill] sm:$0xff] %v7299_v61  ;;  %2462 = vmatpush.msra.mxu0 %v7311_v36  ;;  %2522 = vmatpush.msrb.mxu3 %v6776_v19  ;;  %v9590_v18 = vld [vmem:[#allocation24_spill] sm:$0xff] }
 0x68c   :  { %9581 = vst [vmem:[#allocation23_spill] sm:$0xff] %v7305_v41  ;;  %2483 = vmatpush.msrb.mxu1 %v6780_v12  ;;  %2503 = vmatpush.msrb.mxu2 %v6783_v14  ;;  %v7335_v19 = vld [vmem:[#allocation8 + $0x120] sm:$0xff]  ;;  %v9593_v14 = vld [vmem:[#allocation37_spill] sm:$0xff] }
 0x68d   :  { %9582 = vst [vmem:[#allocation25_spill] sm:$0xff] %v7311_v36  ;;  %2463 = vmatpush.msra.mxu0 %v7317_v28  ;;  %2523 = vmatpush.msrb.mxu3 %v6786_v53  ;;  %v9592_v12 = vld [vmem:[#allocation36_spill] sm:$0xff]  ;;  %v9594_v53 = vld [vmem:[#allocation26_spill] sm:$0xff] }
 0x68e   :  { %9583 = vst [vmem:[#allocation16_spill] sm:$0xff] %v7317_v28  ;;  %2484 = vmatpush.msrb.mxu1 %v6790_v6  ;;  %2504 = vmatpush.msrb.mxu2 %v9585_v33  ;;  %v7341_v6 = vld [vmem:[#allocation8 + $0x100] sm:$0xff]  ;;  %v9596_v33 = vld [vmem:[#allocation39_spill] sm:$0xff] }
 0x68f   :  { %9584 = vst [vmem:[#allocation27_spill] sm:$0xff] %v7323_v48  ;;  %2464 = vmatpush.msra.mxu0 %v7323_v48  ;;  %2524 = vmatpush.msrb.mxu3 %v9586_v39  ;;  %v9597_v39 = vld [vmem:[#allocation40_spill] sm:$0xff]  ;;  %v9632_v48 = vld [vmem:[#allocation75_spill] sm:$0xff] }
 0x690   :  { %9587 = vst [vmem:[#allocation28_spill] sm:$0xff] %v7329_v55  ;;  %2485 = vmatpush.msrb.mxu1 %v9588_v24  ;;  %2505 = vmatpush.msrb.mxu2 %v9589_v26  ;;  %v9598_v24 = vld [vmem:[#allocation29_spill] sm:$0xff]  ;;  %v7347_v26 = vld [vmem:[#allocation8 + $0xe0] sm:$0xff] }
 0x691   :  { %2465 = vmatpush.msra.mxu0 %v7329_v55  ;;  %2525 = vmatpush.msrb.mxu3 %v9590_v18  ;;  %9591 = vst [vmem:[#allocation18_spill] sm:$0xff] %v7335_v19  ;;  %v9600_v18 = vld [vmem:[#allocation42_spill] sm:$0xff] }
 0x692   :  { %2486 = vmatpush.msrb.mxu1 %v9592_v12  ;;  %2506 = vmatpush.msrb.mxu2 %v9593_v14  ;;  %9595 = vst [vmem:[#allocation30_spill] sm:$0xff] %v7341_v6  ;;  %v9601_v12 = vld [vmem:[#allocation43_spill] sm:$0xff]  ;;  %v9602_v14 = vld [vmem:[#allocation32_spill] sm:$0xff]  ;;  %v9631_v55 = vld [vmem:[#allocation74_spill] sm:$0xff] }
 0x693   :  { %2466 = vmatpush.msra.mxu0 %v7335_v19  ;;  %2526 = vmatpush.msrb.mxu3 %v9594_v53  ;;  %9599 = vst [vmem:[#allocation68_spill] sm:$0xff] %v7347_v26  ;;  %v7353_v53 = vld [vmem:[#allocation8 + $0xc0] sm:$0xff] }
 0x694   :  { %2487 = vmatpush.msrb.mxu1 %v9596_v33  ;;  %2507 = vmatpush.msrb.mxu2 %v9597_v39  ;;  %9603 = vst [vmem:[#allocation71_spill] sm:$0xff] %v7353_v53  ;;  %v9605_v33 = vld [vmem:[#allocation46_spill] sm:$0xff]  ;;  %v9606_v39 = vld [vmem:[#allocation35_spill] sm:$0xff] }
 0x695   :  { %2467 = vmatpush.msra.mxu0 %v7341_v6  ;;  %2527 = vmatpush.msrb.mxu3 %v9598_v24  ;;  %v9604_v6 = vld [vmem:[#allocation45_spill] sm:$0xff]  ;;  %v7359_v24 = vld [vmem:[#allocation8 + $0xa0] sm:$0xff] }
 0x696   :  { %2488 = vmatpush.msrb.mxu1 %v9600_v18  ;;  %2508 = vmatpush.msrb.mxu2 %v9601_v12  ;;  %9607 = vst [vmem:[#allocation76_spill] sm:$0xff] %v7359_v24  ;;  %v9609_v18 = vld [vmem:[#allocation49_spill] sm:$0xff]  ;;  %v9610_v12 = vld [vmem:[#allocation38_spill] sm:$0xff] }
 0x697   :  { %2468 = vmatpush.msra.mxu0 %v7347_v26  ;;  %2528 = vmatpush.msrb.mxu3 %v9602_v14  ;;  %v9608_v26 = vld [vmem:[#allocation48_spill] sm:$0xff] }
 0x698   :  { %2489 = vmatpush.msrb.mxu1 %v9604_v6  ;;  %2509 = vmatpush.msrb.mxu2 %v9605_v33  ;;  %v7365_v14 = vld [vmem:[#allocation8 + $0x80] sm:$0xff]  ;;  %v9614_v33 = vld [vmem:[#allocation41_spill] sm:$0xff] }
 0x699   :  { %2469 = vmatpush.msra.mxu0 %v7353_v53  ;;  %2529 = vmatpush.msrb.mxu3 %v9606_v39  ;;  %9611 = vst [vmem:[#allocation77_spill] sm:$0xff] %v7365_v14  ;;  %v9612_v53 = vld [vmem:[#allocation51_spill] sm:$0xff]  ;;  %v9613_v6 = vld [vmem:[#allocation52_spill] sm:$0xff] }
 0x69a   :  { %2490 = vmatpush.msrb.mxu1 %v9608_v26  ;;  %2510 = vmatpush.msrb.mxu2 %v9609_v18  ;;  %v7371_v39 = vld [vmem:[#allocation8 + $0x60] sm:$0xff]  ;;  %v9617_v26 = vld [vmem:[#allocation67_spill] sm:$0xff] }
 0x69b   :  { %2470 = vmatpush.msra.mxu0 %v7359_v24  ;;  %2530 = vmatpush.msrb.mxu3 %v9610_v12  ;;  %9615 = vst [vmem:[#allocation31_spill] sm:$0xff] %v7371_v39  ;;  %v9616_v24 = vld [vmem:[#allocation66_spill] sm:$0xff]  ;;  %v9618_v18 = vld [vmem:[#allocation72_spill] sm:$0xff] }
 0x69c   :  { %2491 = vmatpush.msrb.mxu1 %v9612_v53  ;;  %2511 = vmatpush.msrb.mxu2 %v9613_v6  ;;  %v7377_v12 = vld [vmem:[#allocation8 + $0x40] sm:$0xff]  ;;  %v9621_v53 = vld [vmem:[#allocation54_spill] sm:$0xff]  ;;  %v9622_v6 = vld [vmem:[#allocation53_spill] sm:$0xff] }
 0x69d   :  { %2471 = vmatpush.msra.mxu0 %v7365_v14  ;;  %2531 = vmatpush.msrb.mxu3 %v9614_v33  ;;  %9619 = vst [vmem:[#allocation21_spill] sm:$0xff] %v7377_v12  ;;  %v9620_v14 = vld [vmem:[#allocation73_spill] sm:$0xff]  ;;  %v7383_v33 = vld [vmem:[#allocation8 + $0x20] sm:$0xff] }
 0x69e   :  { %2492 = vmatpush.msrb.mxu1 %v9616_v24  ;;  %2512 = vmatpush.msrb.mxu2 %v9617_v26  ;;  %9623 = vst [vmem:[#allocation33_spill] sm:$0xff] %v7383_v33  ;;  %v9625_v24 = vld [vmem:[#allocation56_spill] sm:$0xff]  ;;  %v9626_v26 = vld [vmem:[#allocation55_spill] sm:$0xff] }
 0x69f   :  { %2472 = vmatpush.msra.mxu0 %v7371_v39  ;;  %2532 = vmatpush.msrb.mxu3 %v9618_v18  ;;  %v9624_v39 = vld [vmem:[#allocation44_spill] sm:$0xff] }
 0x6a0   :  { %2493 = vmatpush.msrb.mxu1 %v9620_v14  ;;  %2513 = vmatpush.msrb.mxu2 %v9621_v53  ;;  %v7389_v18 = vld [vmem:[#allocation8] sm:$0xff]  ;;  %v9629_v14 = vld [vmem:[#allocation58_spill] sm:$0xff]  ;;  %v9630_v53 = vld [vmem:[#allocation57_spill] sm:$0xff] }
 0x6a1   :  { %2473 = vmatpush.msra.mxu0 %v7377_v12  ;;  %2533 = vmatpush.msrb.mxu3 %v9622_v6  ;;  %9627 = vst [vmem:[#allocation34_spill] sm:$0xff] %v7389_v18  ;;  %v9628_v12 = vld [vmem:[#allocation47_spill] sm:$0xff] }
 0x6a2   :  { %2494 = vmatpush.msrb.mxu1 %v9624_v39  ;;  %2514 = vmatpush.msrb.mxu2 %v9625_v24 }
 0x6a3   :  { %2474 = vmatpush.msra.mxu0 %v7383_v33  ;;  %2534 = vmatpush.msrb.mxu3 %v9626_v26 }
 0x6a4   :  { %2495 = vmatpush.msrb.mxu1 %v9628_v12  ;;  %2515 = vmatpush.msrb.mxu2 %v9629_v14 }
 0x6a5   :  { %2475 = vmatpush.msra.mxu0 %v7389_v18  ;;  %2535 = vmatpush.msrb.mxu3 %v9630_v53  ;;  %v9633_v53 = vld [vmem:[#allocation80_spill] sm:$0xff] }
 0x6d3   :  { %v7395_v6 = vpop.f32.mrf.mxu0  ;;  %v7397_v19 = vpop.f32.mrf.mxu1 }
 0x6da   :  { %v7399_v33 = vpop.f32.mrf.mxu2  ;;  %v7403_v12 = vpop.f32.mrf.mxu3 }
 0x6db   :  { %v2187_v39 = vpop.f32.mrf.mxu0  ;;  %v2207_v24 = vpop.f32.mrf.mxu1 }
 0x6dc   :  { %v2250_v26 = vadd.f32 %v2187_v39, %v9631_v55  ;;  %v2251_v28 = vadd.f32 %v2207_v24, %v9632_v48 }
 0x6de   :  { %v3730_v36 = vmul.f32 -1.442695, %v2250_v26  ;;  %v3731_v18 = vmul.f32 -1.442695, %v2251_v28  ;;  %v9634_v28 = vld [vmem:[#allocation81_spill] sm:$0xff] }
 0x6e0   :  { %3906 = vpow2.f32 %v3730_v36 }
 0x6e1   :  { %3908 = vpow2.f32 %v3731_v18 }
 0x6e2   :  { %v2227_v14 = vpop.f32.mrf.mxu2  ;;  %v2247_v55 = vpop.f32.mrf.mxu3 }
 0x6e3   :  { %v2252_v41 = vadd.f32 %v2227_v14, %v9633_v53  ;;  %v2253_v36 = vadd.f32 %v2247_v55, %v9634_v28 }
 0x6e5   :  { %v3732_v61 = vmul.f32 -1.442695, %v2252_v41 }
 0x6e6   :  { %v3907_v52 = vpop.eup %3906 }
 0x6e7   :  { %v3909_v4 = vpop.eup %3908  ;;  %v2263_v25 = vadd.f32 1.0, %v3907_v52  ;;  %3910 = vpow2.f32 %v3732_v61 }
 0x6e8   :  { %v2264_v16 = vadd.f32 1.0, %v3909_v4 }
 0x6e9   :  { %3912 = vrcp.f32 %v2263_v25  ;;  %v2277_v41 = vand.u32 2147483648, %v2263_v25  ;;  %v2275_v61 = vand.u32 2147483647, %v2263_v25  ;;  %vm2271_vm11 = vweird.f32 %v2263_v25 }
 0x6ea   :  { %3914 = vrcp.f32 %v2264_v16  ;;  %v2292_v53 = vand.u32 2147483648, %v2264_v16  ;;  %v2290_v40 = vand.u32 2147483647, %v2264_v16  ;;  %vm2286_vm12 = vweird.f32 %v2264_v16 }
 0x6eb   :  { %v2278_v28 = vor.u32 1.1754944e-38, %v2277_v41  ;;  %vm2276_vm15 = vcmp.eq.f32.partialorder %v2275_v61, 8.507059e+37 }
 0x6ec   :  { %vm2291_vm0 = vcmp.eq.f32.partialorder %v2290_v40, 8.507059e+37 }
 0x6ed   :  { %v3911_v39 = vpop.eup %3910 }
 0x6ee   :  { %v2265_v48 = vadd.f32 1.0, %v3911_v39 }
 0x6ef   :  { %v3913_v24 = vpop.eup %3912 }
 0x6f0   :  { %v3915_v18 = vpop.eup %3914  ;;  %v2267_v26 = vmul.f32 %v3913_v24, %v2263_v25  ;;  %3916 = vrcp.f32 %v2265_v48  ;;  %vm2272_vm9 = vweird.f32 %v3913_v24  ;;  %v2307_v41 = vand.u32 2147483648, %v2265_v48 }
 0x6f1   :  { %v2282_v46 = vmul.f32 %v3915_v18, %v2264_v16  ;;  %3918 = vtanh.f32 %v2253_v36  ;;  %vm2287_vm10 = vweird.f32 %v3915_v18  ;;  %vm2273_vm13 = vmor %vm2271_vm11, %vm2272_vm9  ;;  %vm2301_vm2 = vweird.f32 %v2265_v48 }
 0x6f2   :  { %v2268_v2 = vsub.f32 1.0, %v2267_v26  ;;  %vm2288_vm14 = vmor %vm2286_vm12, %vm2287_vm10  ;;  %v2293_v26 = vor.u32 1.1754944e-38, %v2292_v53  ;;  %v2308_v61 = vor.u32 1.1754944e-38, %v2307_v41  ;;  %v9660_v41 = vld [vmem:[#allocation13_spill] sm:$0xff] }
 0x6f3   :  { %v2283_v14 = vsub.f32 1.0, %v2282_v46 }
 0x6f4   :  { %v2269_v52 = vmul.f32 %v3913_v24, %v2268_v2 }
 0x6f5   :  { %v2284_v4 = vmul.f32 %v3915_v18, %v2283_v14 }
 0x6f6   :  { %v3917_v0 = vpop.eup %3916  ;;  %v2270_v39 = vadd.f32 %v3913_v24, %v2269_v52 }
 0x6f7   :  { %v2297_v55 = vmul.f32 %v3917_v0, %v2265_v48  ;;  %v2285_v1 = vadd.f32 %v3915_v18, %v2284_v4  ;;  %v3919_v36 = vpop.eup %3918  ;;  %vm2302_vm1 = vweird.f32 %v3917_v0  ;;  %v9651_v4 = vld [vmem:[#allocation95_spill] sm:$0xff] }
 0x6f8   :  { %v2274_v46 = vsel %vm2273_vm13, %v3913_v24, %v2270_v39  ;;  %v2305_v24 = vand.u32 2147483647, %v2265_v48  ;;  %vm2303_vm3 = vmor %vm2301_vm2, %vm2302_vm1  ;;  %v9650_v48 = vld [vmem:[#allocation94_spill] sm:$0xff]  ;;  %v9652_v39 = vld [vmem:[#allocation96_spill] sm:$0xff] }
 0x6f9   :  { %v2298_v17 = vsub.f32 1.0, %v2297_v55  ;;  %v2279_v2 = vsel %vm2276_vm15, %v2278_v28, %v2274_v46  ;;  %v2289_v62 = vsel %vm2288_vm14, %v3915_v18, %v2285_v1  ;;  %v7495_v18 = vld [vmem:[#allocation3 + $0x40] sm:$0xff]  ;;  %v9653_v55 = vld [vmem:[#allocation97_spill] sm:$0xff] }
 0x6fa   :  { %v2294_v14 = vsel %vm2291_vm0, %v2293_v26, %v2289_v62  ;;  %v2313_v21 = vmul.f32 %v3919_v36, %v2279_v2  ;;  %vm2306_vm4 = vcmp.eq.f32.partialorder %v2305_v24, 8.507059e+37  ;;  %v7501_v28 = vld [vmem:[#allocation3 + $0x20] sm:$0xff]  ;;  %v9654_v26 = vld [vmem:[#allocation99_spill] sm:$0xff]  ;;  %v9656_v36 = vld [vmem:[#allocation102_spill] sm:$0xff]  ;;  %v2104_v24 = vadd.f32 %v7395_v6, %v9660_v41 }
 0x6fb   :  { %v2299_v8 = vmul.f32 %v3917_v0, %v2298_v17  ;;  %v2312_v52 = vmul.f32 %v2294_v14, %v6922_v9  ;;  %v7417_v9 = vld [vmem:[#allocation3 + $0x1e0] sm:$0xff]  ;;  %v9657_v14 = vld [vmem:[#allocation103_spill] sm:$0xff] }
 0x6fc   :  { %v9648_v17 = vld [vmem:[#allocation92_spill] sm:$0xff] }
 0x6fd   :  { %v7408_v25 = vadd.f32 %v2313_v21, %v2312_v52  ;;  %v2300_v16 = vadd.f32 %v3917_v0, %v2299_v8  ;;  %v7423_v8 = vld [vmem:[#allocation3 + $0x1c0] sm:$0xff] }
 0x6fe   :  { %v7429_v21 = vld [vmem:[#allocation3 + $0x1a0] sm:$0xff] }
 0x6ff   :  { %3920 = vtanh.f32 %v7408_v25  ;;  %v2304_v53 = vsel %vm2303_vm3, %v3917_v0, %v2300_v16  ;;  %v9649_v0 = vld [vmem:[#allocation93_spill] sm:$0xff]  ;;  %v9655_v46 = vld [vmem:[#allocation100_spill] sm:$0xff] }
 0x700   :  { %v2309_v40 = vsel %vm2306_vm4, %v2308_v61, %v2304_v53  ;;  %v7507_v2 = vld [vmem:[#allocation3] sm:$0xff]  ;;  %v9659_v16 = vld [vmem:[#allocation105_spill] sm:$0xff] }
 0x701   :  { %v9658_v52 = vld [vmem:[#allocation104_spill] sm:$0xff]  ;;  %v9661_v53 = vld [vmem:[#allocation17_spill] sm:$0xff] }
 0x702   :  { %v2124_v61 = vadd.f32 %v7397_v19, %v9661_v53 }
 0x705   :  { %v3921_v1 = vpop.eup %3920 }
 0x706   :  { %v7411_v62 = vmul.f32 %v3921_v1, %v2309_v40 }
 0x708   :  { %2333 = vmatmul.f32.vlgmr.msrb.gmra.mxu0 %v7411_v62  ;;  %2353 = vmatmul.f32.vlgmr.msra.gmra.mxu1 %v7411_v62 }
 0x709   :  { %2373 = vmatmul.f32.vlgmr.msra.gmra.mxu2 %v7411_v62  ;;  %2393 = vmatmul.f32.vlgmr.msra.gmra.mxu3 %v7411_v62 }
 0x70a   :  { %2544 = vmatpush.msrb.mxu0 %v7417_v9  ;;  %2564 = vmatpush.msra.mxu1 %v6932_v43  ;;  %v7435_v43 = vld [vmem:[#allocation3 + $0x180] sm:$0xff] }
 0x70b   :  { %2584 = vmatpush.msra.mxu2 %v6935_v44  ;;  %2604 = vmatpush.msra.mxu3 %v6938_v51  ;;  %v7441_v44 = vld [vmem:[#allocation3 + $0x160] sm:$0xff] }
 0x70c   :  { %2545 = vmatpush.msrb.mxu0 %v7423_v8  ;;  %2565 = vmatpush.msra.mxu1 %v6942_v58  ;;  %v7447_v51 = vld [vmem:[#allocation3 + $0x140] sm:$0xff] }
 0x70d   :  { %2585 = vmatpush.msra.mxu2 %v6945_v31  ;;  %2605 = vmatpush.msra.mxu3 %v6948_v49  ;;  %v7453_v58 = vld [vmem:[#allocation3 + $0x120] sm:$0xff]  ;;  %v9635_v49 = vld [vmem:[#allocation50_spill] sm:$0xff] }
 0x70e   :  { %2546 = vmatpush.msrb.mxu0 %v7429_v21  ;;  %2566 = vmatpush.msra.mxu1 %v6952_v38  ;;  %v7459_v31 = vld [vmem:[#allocation3 + $0x100] sm:$0xff] }
 0x70f   :  { %2586 = vmatpush.msra.mxu2 %v6955_v35  ;;  %2606 = vmatpush.msra.mxu3 %v6958_v56  ;;  %v7465_v38 = vld [vmem:[#allocation3 + $0xe0] sm:$0xff]  ;;  %v9637_v56 = vld [vmem:[#allocation59_spill] sm:$0xff] }
 0x710   :  { %2547 = vmatpush.msrb.mxu0 %v7435_v43  ;;  %2567 = vmatpush.msra.mxu1 %v6962_v22  ;;  %v9636_v35 = vld [vmem:[#allocation60_spill] sm:$0xff]  ;;  %v9638_v22 = vld [vmem:[#allocation79_spill] sm:$0xff] }
 0x711   :  { %2587 = vmatpush.msra.mxu2 %v6965_v27  ;;  %2607 = vmatpush.msra.mxu3 %v6968_v7  ;;  %v7471_v27 = vld [vmem:[#allocation3 + $0xc0] sm:$0xff]  ;;  %v9639_v7 = vld [vmem:[#allocation107_spill] sm:$0xff] }
 0x712   :  { %2548 = vmatpush.msrb.mxu0 %v7441_v44  ;;  %2568 = vmatpush.msra.mxu1 %v6972_v3  ;;  %v9640_v3 = vld [vmem:[#allocation135_spill] sm:$0xff] }
 0x713   :  { %2588 = vmatpush.msra.mxu2 %v6975_v11  ;;  %2608 = vmatpush.msra.mxu3 %v6978_v29  ;;  %v9641_v11 = vld [vmem:[#allocation139_spill] sm:$0xff]  ;;  %v7477_v29 = vld [vmem:[#allocation3 + $0xa0] sm:$0xff] }
 0x714   :  { %2549 = vmatpush.msrb.mxu0 %v7447_v51  ;;  %2569 = vmatpush.msra.mxu1 %v6982_v47  ;;  %v9642_v47 = vld [vmem:[#allocation85_spill] sm:$0xff] }
 0x715   :  { %2589 = vmatpush.msra.mxu2 %v6985_v20  ;;  %2609 = vmatpush.msra.mxu3 %v6988_v37  ;;  %v9643_v20 = vld [vmem:[#allocation86_spill] sm:$0xff]  ;;  %v9644_v37 = vld [vmem:[#allocation87_spill] sm:$0xff] }
 0x716   :  { %2550 = vmatpush.msrb.mxu0 %v7453_v58  ;;  %2570 = vmatpush.msra.mxu1 %v6992_v23  ;;  %v7483_v23 = vld [vmem:[#allocation3 + $0x80] sm:$0xff] }
 0x717   :  { %2590 = vmatpush.msra.mxu2 %v6995_v60  ;;  %2610 = vmatpush.msra.mxu3 %v6998_v63  ;;  %v9645_v60 = vld [vmem:[#allocation89_spill] sm:$0xff]  ;;  %v9646_v63 = vld [vmem:[#allocation90_spill] sm:$0xff] }
 0x718   :  { %2551 = vmatpush.msrb.mxu0 %v7459_v31  ;;  %2571 = vmatpush.msra.mxu1 %v7002_v59  ;;  %v9647_v59 = vld [vmem:[#allocation91_spill] sm:$0xff] }
 0x719   :  { %2591 = vmatpush.msra.mxu2 %v7005_v34  ;;  %2611 = vmatpush.msra.mxu3 %v9635_v49  ;;  %v7489_v34 = vld [vmem:[#allocation3 + $0x60] sm:$0xff] }
 0x71a   :  { %2552 = vmatpush.msrb.mxu0 %v7465_v38  ;;  %2572 = vmatpush.msra.mxu1 %v9636_v35 }
 0x71b   :  { %2592 = vmatpush.msra.mxu2 %v9637_v56  ;;  %2612 = vmatpush.msra.mxu3 %v9638_v22 }
 0x71c   :  { %2553 = vmatpush.msrb.mxu0 %v7471_v27  ;;  %2573 = vmatpush.msra.mxu1 %v9639_v7  ;;  %v9662_v7 = vld [vmem:[#allocation19_spill] sm:$0xff] }
 0x71d   :  { %2593 = vmatpush.msra.mxu2 %v9640_v3  ;;  %2613 = vmatpush.msra.mxu3 %v9641_v11  ;;  %v2144_v3 = vadd.f32 %v7399_v33, %v9662_v7 }
 0x71e   :  { %2554 = vmatpush.msrb.mxu0 %v7477_v29  ;;  %2574 = vmatpush.msra.mxu1 %v9642_v47 }
 0x71f   :  { %2594 = vmatpush.msra.mxu2 %v9643_v20  ;;  %2614 = vmatpush.msra.mxu3 %v9644_v37 }
 0x720   :  { %2555 = vmatpush.msrb.mxu0 %v7483_v23  ;;  %2575 = vmatpush.msra.mxu1 %v9645_v60 }
 0x721   :  { %2595 = vmatpush.msra.mxu2 %v9646_v63  ;;  %2615 = vmatpush.msra.mxu3 %v9647_v59 }
 0x722   :  { %2556 = vmatpush.msrb.mxu0 %v7489_v34  ;;  %2576 = vmatpush.msra.mxu1 %v9648_v17  ;;  %v9663_v17 = vld [vmem:[#allocation14_spill] sm:$0xff] }
 0x723   :  { %2596 = vmatpush.msra.mxu2 %v9649_v0  ;;  %2616 = vmatpush.msra.mxu3 %v9650_v48  ;;  %v2164_v0 = vadd.f32 %v7403_v12, %v9663_v17 }
 0x724   :  { %2557 = vmatpush.msrb.mxu0 %v7495_v18  ;;  %2577 = vmatpush.msra.mxu1 %v9651_v4 }
 0x725   :  { %2597 = vmatpush.msra.mxu2 %v9652_v39  ;;  %2617 = vmatpush.msra.mxu3 %v9653_v55 }
 0x726   :  { %2558 = vmatpush.msrb.mxu0 %v7501_v28  ;;  %2578 = vmatpush.msra.mxu1 %v9654_v26 }
 0x727   :  { %2598 = vmatpush.msra.mxu2 %v9655_v46  ;;  %2618 = vmatpush.msra.mxu3 %v9656_v36 }
 0x728   :  { %2559 = vmatpush.msrb.mxu0 %v7507_v2  ;;  %2579 = vmatpush.msra.mxu1 %v9657_v14 }
 0x729   :  { %2599 = vmatpush.msra.mxu2 %v9658_v52  ;;  %2619 = vmatpush.msra.mxu3 %v9659_v16 }
 0x785   :  { %v2334_v1 = vpop.f32.mrf.mxu0  ;;  %v2354_v40 = vpop.f32.mrf.mxu1 }
 0x786   :  { %v2335_v49 = vadd.f32 %v2334_v1, %v2104_v24  ;;  %v2355_v35 = vadd.f32 %v2354_v40, %v2124_v61 }
 0x788   :  { %v3733_v56 = vmul.f32 -1.442695, %v2335_v49  ;;  %v3734_v22 = vmul.f32 -1.442695, %v2355_v35 }
 0x78a   :  { %3922 = vpow2.f32 %v3733_v56 }
 0x78b   :  { %3924 = vpow2.f32 %v3734_v22 }
 0x78c   :  { %v2374_v11 = vpop.f32.mrf.mxu2  ;;  %v2394_v19 = vpop.f32.mrf.mxu3 }
 0x78d   :  { %v2375_v47 = vadd.f32 %v2374_v11, %v2144_v3  ;;  %v2395_v39 = vadd.f32 %v2394_v19, %v2164_v0 }
 0x78f   :  { %v3735_v20 = vmul.f32 -1.442695, %v2375_v47 }
 0x790   :  { %v3923_v37 = vpop.eup %3922 }
 0x791   :  { %v3925_v60 = vpop.eup %3924  ;;  %v2406_v6 = vadd.f32 1.0, %v3923_v37  ;;  %3926 = vpow2.f32 %v3735_v20 }
 0x792   :  { %v2407_v63 = vadd.f32 1.0, %v3925_v60 }
 0x793   :  { %3928 = vrcp.f32 %v2406_v6  ;;  %v2420_v14 = vand.u32 2147483648, %v2406_v6  ;;  %v2418_v24 = vand.u32 2147483647, %v2406_v6  ;;  %vm2414_vm7 = vweird.f32 %v2406_v6 }
 0x794   :  { %3930 = vrcp.f32 %v2407_v63  ;;  %v2435_v52 = vand.u32 2147483648, %v2407_v63  ;;  %v2433_v1 = vand.u32 2147483647, %v2407_v63  ;;  %vm2429_vm8 = vweird.f32 %v2407_v63 }
 0x795   :  { %v2421_v35 = vor.u32 1.1754944e-38, %v2420_v14  ;;  %vm2419_vm11 = vcmp.eq.f32.partialorder %v2418_v24, 8.507059e+37  ;;  %v9677_v14 = vld [vmem:[#allocation122_spill] sm:$0xff]  ;;  %v9680_v24 = vld [vmem:[#allocation125_spill] sm:$0xff] }
 0x796   :  { %v2436_v22 = vor.u32 1.1754944e-38, %v2435_v52  ;;  %vm2434_vm12 = vcmp.eq.f32.partialorder %v2433_v1, 8.507059e+37  ;;  %v9678_v52 = vld [vmem:[#allocation123_spill] sm:$0xff] }
 0x797   :  { %v3927_v59 = vpop.eup %3926  ;;  %v9682_v1 = vld [vmem:[#allocation127_spill] sm:$0xff] }
 0x798   :  { %v2408_v48 = vadd.f32 1.0, %v3927_v59 }
 0x799   :  { %v3929_v4 = vpop.eup %3928 }
 0x79a   :  { %v3931_v33 = vpop.eup %3930  ;;  %v2410_v55 = vmul.f32 %v3929_v4, %v2406_v6  ;;  %3932 = vrcp.f32 %v2408_v48  ;;  %vm2415_vm5 = vweird.f32 %v3929_v4  ;;  %vm2444_vm14 = vweird.f32 %v2408_v48 }
 0x79b   :  { %v2425_v26 = vmul.f32 %v3931_v33, %v2407_v63  ;;  %3934 = vtanh.f32 %v2395_v39  ;;  %vm2430_vm6 = vweird.f32 %v3931_v33  ;;  %vm2416_vm9 = vmor %vm2414_vm7, %vm2415_vm5  ;;  %v2450_v39 = vand.u32 2147483648, %v2408_v48 }
 0x79c   :  { %v2411_v46 = vsub.f32 1.0, %v2410_v55  ;;  %vm2431_vm10 = vmor %vm2429_vm8, %vm2430_vm6 }
 0x79d   :  { %v2426_v36 = vsub.f32 1.0, %v2425_v26  ;;  %v2451_v26 = vor.u32 1.1754944e-38, %v2450_v39  ;;  %v9699_v39 = vld [vmem:[#allocation146_spill] sm:$0xff] }
 0x79e   :  { %v2412_v16 = vmul.f32 %v3929_v4, %v2411_v46 }
 0x79f   :  { %v2427_v61 = vmul.f32 %v3931_v33, %v2426_v36 }
 0x7a0   :  { %v3933_v40 = vpop.eup %3932  ;;  %v2413_v12 = vadd.f32 %v3929_v4, %v2412_v16  ;;  %v9679_v16 = vld [vmem:[#allocation124_spill] sm:$0xff] }
 0x7a1   :  { %v2440_v49 = vmul.f32 %v3933_v40, %v2408_v48  ;;  %v2428_v56 = vadd.f32 %v3931_v33, %v2427_v61  ;;  %v3935_v11 = vpop.eup %3934  ;;  %vm2445_vm13 = vweird.f32 %v3933_v40  ;;  %v9681_v61 = vld [vmem:[#allocation126_spill] sm:$0xff] }
 0x7a2   :  { %v2417_v3 = vsel %vm2416_vm9, %v3929_v4, %v2413_v12  ;;  %v2448_v4 = vand.u32 2147483647, %v2408_v48  ;;  %vm2446_vm15 = vmor %vm2444_vm14, %vm2445_vm13  ;;  %v9675_v48 = vld [vmem:[#allocation119_spill] sm:$0xff]  ;;  %v9684_v12 = vld [vmem:[#allocation129_spill] sm:$0xff] }
 0x7a3   :  { %v2441_v47 = vsub.f32 1.0, %v2440_v49  ;;  %v2422_v20 = vsel %vm2419_vm11, %v2421_v35, %v2417_v3  ;;  %v2432_v37 = vsel %vm2431_vm10, %v3931_v33, %v2428_v56  ;;  %v9685_v49 = vld [vmem:[#allocation130_spill] sm:$0xff]  ;;  %v9686_v35 = vld [vmem:[#allocation131_spill] sm:$0xff]  ;;  %v9687_v56 = vld [vmem:[#allocation132_spill] sm:$0xff] }
 0x7a4   :  { %v2437_v60 = vsel %vm2434_vm12, %v2436_v22, %v2432_v37  ;;  %v2456_v19 = vmul.f32 %v3935_v11, %v2422_v20  ;;  %vm2449_vm0 = vcmp.eq.f32.partialorder %v2448_v4, 8.507059e+37  ;;  %v9688_v22 = vld [vmem:[#allocation133_spill] sm:$0xff]  ;;  %v9689_v3 = vld [vmem:[#allocation134_spill] sm:$0xff]  ;;  %v9690_v11 = vld [vmem:[#allocation136_spill] sm:$0xff] }
 0x7a5   :  { %v2455_v59 = vmul.f32 %v2437_v60, %v7100_v32  ;;  %v2442_v0 = vmul.f32 %v3933_v40, %v2441_v47  ;;  %v9664_v32 = vld [vmem:[#allocation106_spill] sm:$0xff]  ;;  %v9691_v47 = vld [vmem:[#allocation137_spill] sm:$0xff]  ;;  %v9693_v37 = vld [vmem:[#allocation140_spill] sm:$0xff] }
 0x7a6   :  { %v9692_v20 = vld [vmem:[#allocation138_spill] sm:$0xff]  ;;  %v9694_v60 = vld [vmem:[#allocation141_spill] sm:$0xff]  ;;  %v9700_v4 = vld [vmem:[#allocation147_spill] sm:$0xff] }
 0x7a7   :  { %v7522_v6 = vadd.f32 %v2456_v19, %v2455_v59  ;;  %v2443_v63 = vadd.f32 %v3933_v40, %v2442_v0  ;;  %v9695_v19 = vld [vmem:[#allocation142_spill] sm:$0xff]  ;;  %v9696_v59 = vld [vmem:[#allocation143_spill] sm:$0xff]  ;;  %v9697_v0 = vld [vmem:[#allocation144_spill] sm:$0xff] }
 0x7a9   :  { %3936 = vtanh.f32 %v7522_v6  ;;  %v2447_v55 = vsel %vm2446_vm15, %v3933_v40, %v2443_v63  ;;  %v9683_v40 = vld [vmem:[#allocation128_spill] sm:$0xff]  ;;  %v9698_v63 = vld [vmem:[#allocation145_spill] sm:$0xff] }
 0x7aa   :  { %v2452_v46 = vsel %vm2449_vm0, %v2451_v26, %v2447_v55  ;;  %v9701_v55 = vld [vmem:[#allocation148_spill] sm:$0xff]  ;;  %v9702_v26 = vld [vmem:[#allocation149_spill] sm:$0xff] }
 0x7af   :  { %v3937_v33 = vpop.eup %3936 }
 0x7b0   :  { %v2459_v36 = vmul.f32 %v3937_v33, %v2452_v46  ;;  %v9703_v33 = vld [vmem:[#allocation150_spill] sm:$0xff]  ;;  %v9704_v46 = vld [vmem:[#allocation151_spill] sm:$0xff] }
 0x7b2   :  { %2476 = vmatmul.f32.vlgmr.msra.gmra.mxu0 %v2459_v36  ;;  %2496 = vmatmul.f32.vlgmr.msrb.gmra.mxu1 %v2459_v36 }
 0x7b3   :  { %2516 = vmatmul.f32.vlgmr.msrb.gmra.mxu2 %v2459_v36  ;;  %2536 = vmatmul.f32.vlgmr.msrb.gmra.mxu3 %v2459_v36  ;;  %v9705_v36 = vld [vmem:[#allocation152_spill] sm:$0xff] }
 0x7b4   :  { %2691 = vmatpush.msra.mxu0 %v7103_v13  ;;  %2711 = vmatpush.msrb.mxu1 %v7106_v50  ;;  %v9665_v13 = vld [vmem:[#allocation108_spill] sm:$0xff]  ;;  %v9666_v50 = vld [vmem:[#allocation109_spill] sm:$0xff] }
 0x7b5   :  { %2731 = vmatpush.msrb.mxu2 %v7109_v10  ;;  %2751 = vmatpush.msrb.mxu3 %v7112_v45  ;;  %v9667_v10 = vld [vmem:[#allocation110_spill] sm:$0xff]  ;;  %v9668_v45 = vld [vmem:[#allocation111_spill] sm:$0xff] }
 0x7b6   :  { %2692 = vmatpush.msra.mxu0 %v7115_v5  ;;  %2712 = vmatpush.msrb.mxu1 %v7118_v57  ;;  %v9669_v5 = vld [vmem:[#allocation112_spill] sm:$0xff]  ;;  %v9670_v57 = vld [vmem:[#allocation113_spill] sm:$0xff] }
 0x7b7   :  { %2732 = vmatpush.msrb.mxu2 %v7121_v54  ;;  %2752 = vmatpush.msrb.mxu3 %v7124_v30  ;;  %v9671_v54 = vld [vmem:[#allocation114_spill] sm:$0xff]  ;;  %v9672_v30 = vld [vmem:[#allocation115_spill] sm:$0xff] }
 0x7b8   :  { %2693 = vmatpush.msra.mxu0 %v7127_v15  ;;  %2713 = vmatpush.msrb.mxu1 %v7130_v42  ;;  %v9673_v15 = vld [vmem:[#allocation116_spill] sm:$0xff]  ;;  %v9674_v42 = vld [vmem:[#allocation118_spill] sm:$0xff] }
 0x7b9   :  { %2733 = vmatpush.msrb.mxu2 %v9664_v32  ;;  %2753 = vmatpush.msrb.mxu3 %v9665_v13  ;;  %v9706_v32 = vld [vmem:[#allocation153_spill] sm:$0xff]  ;;  %v9707_v13 = vld [vmem:[#allocation62_spill] sm:$0xff] }
 0x7ba   :  { %2560 = vmatmul.f32.vlgmr.msrb.gmra.mxu0 %v7411_v62  ;;  %2580 = vmatmul.f32.vlgmr.msra.gmra.mxu1 %v7411_v62 }
 0x7bb   :  { %2600 = vmatmul.f32.vlgmr.msra.gmra.mxu2 %v7411_v62  ;;  %2620 = vmatmul.f32.vlgmr.msra.gmra.mxu3 %v7411_v62  ;;  %v9676_v62 = vld [vmem:[#allocation120_spill] sm:$0xff] }
 0x7bc   :  { %2694 = vmatpush.msra.mxu0 %v9666_v50  ;;  %2714 = vmatpush.msrb.mxu1 %v9667_v10  ;;  %v9708_v50 = vld [vmem:[#allocation65_spill] sm:$0xff] }
 0x7bd   :  { %2734 = vmatpush.msrb.mxu2 %v9668_v45  ;;  %2754 = vmatpush.msrb.mxu3 %v9669_v5  ;;  %v9709_v10 = vld [vmem:[#allocation69_spill] sm:$0xff]  ;;  %v9710_v45 = vld [vmem:[#allocation70_spill] sm:$0xff] }
 0x7be   :  { %2695 = vmatpush.msra.mxu0 %v9670_v57  ;;  %2715 = vmatpush.msrb.mxu1 %v9671_v54  ;;  %v9711_v5 = vld [vmem:[#allocation154_spill] sm:$0xff]  ;;  %v9712_v57 = vld [vmem:[#allocation155_spill] sm:$0xff]  ;;  %v9713_v54 = vld [vmem:[#allocation156_spill] sm:$0xff] }
 0x7bf   :  { %2735 = vmatpush.msrb.mxu2 %v9672_v30  ;;  %2755 = vmatpush.msrb.mxu3 %v9673_v15  ;;  %v9714_v30 = vld [vmem:[#allocation157_spill] sm:$0xff]  ;;  %v9715_v15 = vld [vmem:[#allocation158_spill] sm:$0xff] }
 0x7c0   :  { %2696 = vmatpush.msra.mxu0 %v9674_v42  ;;  %2716 = vmatpush.msrb.mxu1 %v9675_v48  ;;  %v9716_v42 = vld [vmem:[#allocation20_spill] sm:$0xff]  ;;  %v9717_v48 = vld [vmem:[#allocation22_spill] sm:$0xff] }
 0x7c1   :  { %2736 = vmatpush.msrb.mxu2 %v9676_v62  ;;  %2756 = vmatpush.msrb.mxu3 %v9677_v14  ;;  %v9718_v62 = vld [vmem:[#allocation15_spill] sm:$0xff]  ;;  %v7594_v14 = vld [vmem:[#allocation8 + $0x1e8] sm:$0xff] }
 0x7c2   :  { %2697 = vmatpush.msra.mxu0 %v9678_v52  ;;  %2717 = vmatpush.msrb.mxu1 %v9679_v16  ;;  %v7597_v52 = vld [vmem:[#allocation8 + $0x1f0] sm:$0xff]  ;;  %v7600_v16 = vld [vmem:[#allocation8 + $0x1f8] sm:$0xff] }
 0x7c3   :  { %2737 = vmatpush.msrb.mxu2 %v9680_v24  ;;  %2757 = vmatpush.msrb.mxu3 %v9681_v61  ;;  %v9719_v24 = vld [vmem:[#allocation23_spill] sm:$0xff]  ;;  %v7604_v61 = vld [vmem:[#allocation8 + $0x1c8] sm:$0xff] }
 0x7c4   :  { %2698 = vmatpush.msra.mxu0 %v9682_v1  ;;  %2718 = vmatpush.msrb.mxu1 %v9683_v40  ;;  %v7607_v1 = vld [vmem:[#allocation8 + $0x1d0] sm:$0xff]  ;;  %v7610_v40 = vld [vmem:[#allocation8 + $0x1d8] sm:$0xff] }
 0x7c5   :  { %2738 = vmatpush.msrb.mxu2 %v9684_v12  ;;  %2758 = vmatpush.msrb.mxu3 %v9685_v49  ;;  %v9720_v12 = vld [vmem:[#allocation25_spill] sm:$0xff] }
 0x7c6   :  { %2699 = vmatpush.msra.mxu0 %v9686_v35  ;;  %2719 = vmatpush.msrb.mxu1 %v9687_v56  ;;  %v7614_v49 = vld [vmem:[#allocation8 + $0x1a8] sm:$0xff]  ;;  %v7617_v35 = vld [vmem:[#allocation8 + $0x1b0] sm:$0xff]  ;;  %v7620_v56 = vld [vmem:[#allocation8 + $0x1b8] sm:$0xff] }
 0x7c7   :  { %2739 = vmatpush.msrb.mxu2 %v9688_v22  ;;  %2759 = vmatpush.msrb.mxu3 %v9689_v3  ;;  %v9721_v22 = vld [vmem:[#allocation16_spill] sm:$0xff]  ;;  %v7624_v3 = vld [vmem:[#allocation8 + $0x188] sm:$0xff] }
 0x7c8   :  { %2700 = vmatpush.msra.mxu0 %v9690_v11  ;;  %2720 = vmatpush.msrb.mxu1 %v9691_v47  ;;  %v7627_v11 = vld [vmem:[#allocation8 + $0x190] sm:$0xff]  ;;  %v7630_v47 = vld [vmem:[#allocation8 + $0x198] sm:$0xff] }
 0x7c9   :  { %2740 = vmatpush.msrb.mxu2 %v9692_v20  ;;  %2760 = vmatpush.msrb.mxu3 %v9693_v37  ;;  %v9722_v20 = vld [vmem:[#allocation27_spill] sm:$0xff]  ;;  %v7634_v37 = vld [vmem:[#allocation8 + $0x168] sm:$0xff] }
 0x7ca   :  { %2701 = vmatpush.msra.mxu0 %v9694_v60  ;;  %2721 = vmatpush.msrb.mxu1 %v9695_v19  ;;  %v7637_v60 = vld [vmem:[#allocation8 + $0x170] sm:$0xff]  ;;  %v7640_v19 = vld [vmem:[#allocation8 + $0x178] sm:$0xff] }
 0x7cb   :  { %2741 = vmatpush.msrb.mxu2 %v9696_v59  ;;  %2761 = vmatpush.msrb.mxu3 %v9697_v0  ;;  %9723 = vst [vmem:[#allocation24_spill] sm:$0xff] %v7637_v60  ;;  %v9725_v59 = vld [vmem:[#allocation28_spill] sm:$0xff]  ;;  %v7644_v0 = vld [vmem:[#allocation8 + $0x148] sm:$0xff] }
 0x7cc   :  { %2702 = vmatpush.msra.mxu0 %v9698_v63  ;;  %2722 = vmatpush.msrb.mxu1 %v9699_v39  ;;  %9724 = vst [vmem:[#allocation36_spill] sm:$0xff] %v7640_v19  ;;  %v7647_v63 = vld [vmem:[#allocation8 + $0x150] sm:$0xff]  ;;  %v7650_v39 = vld [vmem:[#allocation8 + $0x158] sm:$0xff] }
 0x7cd   :  { %2742 = vmatpush.msrb.mxu2 %v9700_v4  ;;  %2762 = vmatpush.msrb.mxu3 %v9701_v55  ;;  %9726 = vst [vmem:[#allocation37_spill] sm:$0xff] %v7644_v0  ;;  %v9729_v4 = vld [vmem:[#allocation18_spill] sm:$0xff]  ;;  %v7654_v55 = vld [vmem:[#allocation8 + $0x128] sm:$0xff] }
 0x7ce   :  { %2703 = vmatpush.msra.mxu0 %v9702_v26  ;;  %2723 = vmatpush.msrb.mxu1 %v9703_v33  ;;  %9727 = vst [vmem:[#allocation26_spill] sm:$0xff] %v7647_v63  ;;  %v7657_v26 = vld [vmem:[#allocation8 + $0x130] sm:$0xff]  ;;  %v7660_v33 = vld [vmem:[#allocation8 + $0x138] sm:$0xff] }
 0x7cf   :  { %2743 = vmatpush.msrb.mxu2 %v9704_v46  ;;  %2763 = vmatpush.msrb.mxu3 %v9705_v36  ;;  %9728 = vst [vmem:[#allocation39_spill] sm:$0xff] %v7650_v39  ;;  %v9733_v46 = vld [vmem:[#allocation30_spill] sm:$0xff]  ;;  %v7664_v36 = vld [vmem:[#allocation8 + $0x108] sm:$0xff] }
 0x7d0   :  { %2704 = vmatpush.msra.mxu0 %v9706_v32  ;;  %2724 = vmatpush.msrb.mxu1 %v9707_v13  ;;  %9730 = vst [vmem:[#allocation40_spill] sm:$0xff] %v7654_v55  ;;  %v7667_v32 = vld [vmem:[#allocation8 + $0x110] sm:$0xff]  ;;  %v7670_v13 = vld [vmem:[#allocation8 + $0x118] sm:$0xff] }
 0x7d1   :  { %2744 = vmatpush.msrb.mxu2 %v9708_v50  ;;  %2764 = vmatpush.msrb.mxu3 %v9709_v10  ;;  %9731 = vst [vmem:[#allocation29_spill] sm:$0xff] %v7657_v26  ;;  %v9737_v50 = vld [vmem:[#allocation68_spill] sm:$0xff]  ;;  %v7674_v10 = vld [vmem:[#allocation8 + $0xe8] sm:$0xff] }
 0x7d2   :  { %2705 = vmatpush.msra.mxu0 %v9710_v45  ;;  %2725 = vmatpush.msrb.mxu1 %v9711_v5  ;;  %9732 = vst [vmem:[#allocation42_spill] sm:$0xff] %v7660_v33  ;;  %v7677_v45 = vld [vmem:[#allocation8 + $0xf0] sm:$0xff]  ;;  %v7680_v5 = vld [vmem:[#allocation8 + $0xf8] sm:$0xff] }
 0x7d3   :  { %2745 = vmatpush.msrb.mxu2 %v9712_v57  ;;  %2765 = vmatpush.msrb.mxu3 %v9713_v54  ;;  %9734 = vst [vmem:[#allocation43_spill] sm:$0xff] %v7664_v36  ;;  %v9741_v57 = vld [vmem:[#allocation71_spill] sm:$0xff]  ;;  %v7684_v54 = vld [vmem:[#allocation8 + $0xc8] sm:$0xff] }
 0x7d4   :  { %2706 = vmatpush.msra.mxu0 %v9714_v30  ;;  %2726 = vmatpush.msrb.mxu1 %v9715_v15  ;;  %9735 = vst [vmem:[#allocation32_spill] sm:$0xff] %v7667_v32  ;;  %v7687_v30 = vld [vmem:[#allocation8 + $0xd0] sm:$0xff]  ;;  %v7690_v15 = vld [vmem:[#allocation8 + $0xd8] sm:$0xff] }
 0x7d5   :  { %2746 = vmatpush.msrb.mxu2 %v9716_v42  ;;  %2766 = vmatpush.msrb.mxu3 %v9717_v48  ;;  %9736 = vst [vmem:[#allocation45_spill] sm:$0xff] %v7670_v13  ;;  %v9745_v42 = vld [vmem:[#allocation76_spill] sm:$0xff]  ;;  %v7694_v48 = vld [vmem:[#allocation8 + $0xa8] sm:$0xff] }
 0x7d6   :  { %2834 = vmatpush.msrb.mxu0 %v9718_v62  ;;  %2854 = vmatpush.msra.mxu1 %v7594_v14  ;;  %9738 = vst [vmem:[#allocation46_spill] sm:$0xff] %v7674_v10  ;;  %v7697_v62 = vld [vmem:[#allocation8 + $0xb0] sm:$0xff] }
 0x7d7   :  { %2874 = vmatpush.msra.mxu2 %v7597_v52  ;;  %2894 = vmatpush.msra.mxu3 %v7600_v16  ;;  %9739 = vst [vmem:[#allocation35_spill] sm:$0xff] %v7677_v45 }
 0x7d8   :  { %2835 = vmatpush.msrb.mxu0 %v9719_v24  ;;  %2855 = vmatpush.msra.mxu1 %v7604_v61  ;;  %9740 = vst [vmem:[#allocation48_spill] sm:$0xff] %v7680_v5  ;;  %v7700_v24 = vld [vmem:[#allocation8 + $0xb8] sm:$0xff] }
 0x7d9   :  { %2875 = vmatpush.msra.mxu2 %v7607_v1  ;;  %2895 = vmatpush.msra.mxu3 %v7610_v40  ;;  %9742 = vst [vmem:[#allocation49_spill] sm:$0xff] %v7684_v54 }
 0x7da   :  { %2836 = vmatpush.msrb.mxu0 %v9720_v12  ;;  %2856 = vmatpush.msra.mxu1 %v7614_v49  ;;  %9743 = vst [vmem:[#allocation38_spill] sm:$0xff] %v7687_v30  ;;  %v9749_v12 = vld [vmem:[#allocation77_spill] sm:$0xff] }
 0x7db   :  { %2876 = vmatpush.msra.mxu2 %v7617_v35  ;;  %2896 = vmatpush.msra.mxu3 %v7620_v56  ;;  %9744 = vst [vmem:[#allocation51_spill] sm:$0xff] %v7690_v15 }
 0x7dc   :  { %2837 = vmatpush.msrb.mxu0 %v9721_v22  ;;  %2857 = vmatpush.msra.mxu1 %v7624_v3  ;;  %9746 = vst [vmem:[#allocation52_spill] sm:$0xff] %v7694_v48  ;;  %v7704_v22 = vld [vmem:[#allocation8 + $0x88] sm:$0xff] }
 0x7dd   :  { %2877 = vmatpush.msra.mxu2 %v7627_v11  ;;  %2897 = vmatpush.msra.mxu3 %v7630_v47  ;;  %9747 = vst [vmem:[#allocation41_spill] sm:$0xff] %v7697_v62 }
 0x7de   :  { %2838 = vmatpush.msrb.mxu0 %v9722_v20  ;;  %2858 = vmatpush.msra.mxu1 %v7634_v37  ;;  %9748 = vst [vmem:[#allocation66_spill] sm:$0xff] %v7700_v24  ;;  %v7707_v20 = vld [vmem:[#allocation8 + $0x90] sm:$0xff] }
 0x7df   :  { %2878 = vmatpush.msra.mxu2 %v7637_v60  ;;  %2898 = vmatpush.msra.mxu3 %v7640_v19  ;;  %9750 = vst [vmem:[#allocation67_spill] sm:$0xff] %v7704_v22 }
 0x7e0   :  { %2839 = vmatpush.msrb.mxu0 %v9725_v59  ;;  %2859 = vmatpush.msra.mxu1 %v7644_v0  ;;  %9751 = vst [vmem:[#allocation72_spill] sm:$0xff] %v7707_v20  ;;  %v7710_v59 = vld [vmem:[#allocation8 + $0x98] sm:$0xff] }
 0x7e1   :  { %2879 = vmatpush.msra.mxu2 %v7647_v63  ;;  %2899 = vmatpush.msra.mxu3 %v7650_v39  ;;  %9752 = vst [vmem:[#allocation73_spill] sm:$0xff] %v7710_v59 }
 0x7e2   :  { %2840 = vmatpush.msrb.mxu0 %v9729_v4  ;;  %2860 = vmatpush.msra.mxu1 %v7654_v55  ;;  %v9753_v4 = vld [vmem:[#allocation31_spill] sm:$0xff] }
 0x7e3   :  { %2880 = vmatpush.msra.mxu2 %v7657_v26  ;;  %2900 = vmatpush.msra.mxu3 %v7660_v33 }
 0x7e4   :  { %2841 = vmatpush.msrb.mxu0 %v9733_v46  ;;  %2861 = vmatpush.msra.mxu1 %v7664_v36  ;;  %v7714_v46 = vld [vmem:[#allocation8 + $0x68] sm:$0xff] }
 0x7e5   :  { %2881 = vmatpush.msra.mxu2 %v7667_v32  ;;  %2901 = vmatpush.msra.mxu3 %v7670_v13  ;;  %9754 = vst [vmem:[#allocation54_spill] sm:$0xff] %v7714_v46 }
 0x7e6   :  { %2842 = vmatpush.msrb.mxu0 %v9737_v50  ;;  %2862 = vmatpush.msra.mxu1 %v7674_v10  ;;  %v7717_v50 = vld [vmem:[#allocation8 + $0x70] sm:$0xff] }
 0x7e7   :  { %2882 = vmatpush.msra.mxu2 %v7677_v45  ;;  %2902 = vmatpush.msra.mxu3 %v7680_v5  ;;  %9755 = vst [vmem:[#allocation53_spill] sm:$0xff] %v7717_v50 }
 0x7e8   :  { %2843 = vmatpush.msrb.mxu0 %v9741_v57  ;;  %2863 = vmatpush.msra.mxu1 %v7684_v54  ;;  %v7720_v57 = vld [vmem:[#allocation8 + $0x78] sm:$0xff] }
 0x7e9   :  { %2883 = vmatpush.msra.mxu2 %v7687_v30  ;;  %2903 = vmatpush.msra.mxu3 %v7690_v15  ;;  %9756 = vst [vmem:[#allocation44_spill] sm:$0xff] %v7720_v57 }
 0x7ea   :  { %2844 = vmatpush.msrb.mxu0 %v9745_v42  ;;  %2864 = vmatpush.msra.mxu1 %v7694_v48  ;;  %v9757_v42 = vld [vmem:[#allocation21_spill] sm:$0xff] }
 0x7eb   :  { %2884 = vmatpush.msra.mxu2 %v7697_v62  ;;  %2904 = vmatpush.msra.mxu3 %v7700_v24  ;;  %v9770_v62 = vld [vmem:[#allocation78_spill] sm:$0xff] }
 0x7ec   :  { %2845 = vmatpush.msrb.mxu0 %v9749_v12  ;;  %2865 = vmatpush.msra.mxu1 %v7704_v22  ;;  %v7724_v12 = vld [vmem:[#allocation8 + $0x48] sm:$0xff] }
 0x7ed   :  { %2885 = vmatpush.msra.mxu2 %v7707_v20  ;;  %2905 = vmatpush.msra.mxu3 %v7710_v59  ;;  %9758 = vst [vmem:[#allocation56_spill] sm:$0xff] %v7724_v12  ;;  %v7727_v59 = vld [vmem:[#allocation8 + $0x50] sm:$0xff]  ;;  %v9769_v22 = vld [vmem:[#allocation61_spill] sm:$0xff] }
 0x7ee   :  { %2846 = vmatpush.msrb.mxu0 %v9753_v4  ;;  %2866 = vmatpush.msra.mxu1 %v7714_v46  ;;  %9759 = vst [vmem:[#allocation55_spill] sm:$0xff] %v7727_v59  ;;  %v7730_v4 = vld [vmem:[#allocation8 + $0x58] sm:$0xff]  ;;  %v9761_v46 = vld [vmem:[#allocation33_spill] sm:$0xff] }
 0x7ef   :  { %2886 = vmatpush.msra.mxu2 %v7717_v50  ;;  %2906 = vmatpush.msra.mxu3 %v7720_v57  ;;  %9760 = vst [vmem:[#allocation47_spill] sm:$0xff] %v7730_v4  ;;  %v7734_v50 = vld [vmem:[#allocation8 + $0x28] sm:$0xff]  ;;  %v7737_v57 = vld [vmem:[#allocation8 + $0x30] sm:$0xff] }
 0x7f0   :  { %2847 = vmatpush.msrb.mxu0 %v9757_v42  ;;  %2867 = vmatpush.msra.mxu1 %v7724_v12  ;;  %9762 = vst [vmem:[#allocation58_spill] sm:$0xff] %v7734_v50  ;;  %v7740_v42 = vld [vmem:[#allocation8 + $0x38] sm:$0xff]  ;;  %v9765_v12 = vld [vmem:[#allocation34_spill] sm:$0xff] }
 0x7f1   :  { %2887 = vmatpush.msra.mxu2 %v7727_v59  ;;  %2907 = vmatpush.msra.mxu3 %v7730_v4  ;;  %9763 = vst [vmem:[#allocation57_spill] sm:$0xff] %v7737_v57  ;;  %v7744_v59 = vld [vmem:[#allocation8 + $0x8] sm:$0xff]  ;;  %v7747_v4 = vld [vmem:[#allocation8 + $0x10] sm:$0xff] }
 0x7f2   :  { %2848 = vmatpush.msrb.mxu0 %v9761_v46  ;;  %2868 = vmatpush.msra.mxu1 %v7734_v50  ;;  %9764 = vst [vmem:[#allocation74_spill] sm:$0xff] %v7740_v42  ;;  %v7750_v46 = vld [vmem:[#allocation8 + $0x18] sm:$0xff] }
 0x7f3   :  { %2888 = vmatpush.msra.mxu2 %v7737_v57  ;;  %2908 = vmatpush.msra.mxu3 %v7740_v42  ;;  %9766 = vst [vmem:[#allocation75_spill] sm:$0xff] %v7744_v59 }
 0x7f4   :  { %2849 = vmatpush.msrb.mxu0 %v9765_v12  ;;  %2869 = vmatpush.msra.mxu1 %v7744_v59  ;;  %9767 = vst [vmem:[#allocation80_spill] sm:$0xff] %v7747_v4 }
 0x7f5   :  { %2889 = vmatpush.msra.mxu2 %v7747_v4  ;;  %9768 = vst [vmem:[#allocation81_spill] sm:$0xff] %v7750_v46  ;;  %2909 = vmatpush.msra.mxu3 %v7750_v46  ;;  %v9771_v46 = vld [vmem:[#allocation83_spill] sm:$0xff] }
 0x82f   :  { %v7753_v50 = vpop.f32.mrf.mxu0  ;;  %v7755_v57 = vpop.f32.mrf.mxu1 }
 0x836   :  { %v7757_v20 = vpop.f32.mrf.mxu2  ;;  %v7761_v4 = vpop.f32.mrf.mxu3 }
 0x837   :  { %v2561_v42 = vpop.f32.mrf.mxu0  ;;  %v2581_v12 = vpop.f32.mrf.mxu1 }
 0x838   :  { %v2624_v24 = vadd.f32 %v2561_v42, %v9769_v22  ;;  %v2625_v59 = vadd.f32 %v2581_v12, %v9770_v62 }
 0x83a   :  { %v3736_v48 = vmul.f32 -1.442695, %v2624_v24  ;;  %v3737_v15 = vmul.f32 -1.442695, %v2625_v59  ;;  %v9772_v59 = vld [vmem:[#allocation84_spill] sm:$0xff] }
 0x83c   :  { %3938 = vpow2.f32 %v3736_v48 }
 0x83d   :  { %3940 = vpow2.f32 %v3737_v15 }
 0x83e   :  { %v2601_v30 = vpop.f32.mrf.mxu2  ;;  %v2621_v22 = vpop.f32.mrf.mxu3 }
 0x83f   :  { %v2626_v54 = vadd.f32 %v2601_v30, %v9771_v46  ;;  %v2627_v48 = vadd.f32 %v2621_v22, %v9772_v59 }
 0x841   :  { %v3738_v5 = vmul.f32 -1.442695, %v2626_v54 }
 0x842   :  { %v3939_v45 = vpop.eup %3938 }
 0x843   :  { %v3941_v10 = vpop.eup %3940  ;;  %v2637_v13 = vadd.f32 1.0, %v3939_v45  ;;  %3942 = vpow2.f32 %v3738_v5 }
 0x844   :  { %v2638_v32 = vadd.f32 1.0, %v3941_v10 }
 0x845   :  { %3944 = vrcp.f32 %v2637_v13  ;;  %v2651_v54 = vand.u32 2147483648, %v2637_v13  ;;  %v2649_v10 = vand.u32 2147483647, %v2637_v13  ;;  %vm2645_vm3 = vweird.f32 %v2637_v13 }
 0x846   :  { %3946 = vrcp.f32 %v2638_v32  ;;  %v2666_v46 = vand.u32 2147483648, %v2638_v32  ;;  %v2664_v26 = vand.u32 2147483647, %v2638_v32  ;;  %vm2660_vm4 = vweird.f32 %v2638_v32 }
 0x847   :  { %v2652_v59 = vor.u32 1.1754944e-38, %v2651_v54  ;;  %vm2650_vm7 = vcmp.eq.f32.partialorder %v2649_v10, 8.507059e+37 }
 0x848   :  { %vm2665_vm8 = vcmp.eq.f32.partialorder %v2664_v26, 8.507059e+37 }
 0x849   :  { %v3943_v42 = vpop.eup %3942 }
 0x84a   :  { %v2639_v62 = vadd.f32 1.0, %v3943_v42 }
 0x84b   :  { %v3945_v24 = vpop.eup %3944 }
 0x84c   :  { %v3947_v15 = vpop.eup %3946  ;;  %v2641_v12 = vmul.f32 %v3945_v24, %v2637_v13  ;;  %3948 = vrcp.f32 %v2639_v62  ;;  %vm2646_vm1 = vweird.f32 %v3945_v24  ;;  %v2681_v54 = vand.u32 2147483648, %v2639_v62 }
 0x84d   :  { %v2656_v36 = vmul.f32 %v3947_v15, %v2638_v32  ;;  %3950 = vtanh.f32 %v2627_v48  ;;  %vm2661_vm2 = vweird.f32 %v3947_v15  ;;  %vm2647_vm5 = vmor %vm2645_vm3, %vm2646_vm1  ;;  %vm2675_vm10 = vweird.f32 %v2639_v62 }
 0x84e   :  { %v2642_v33 = vsub.f32 1.0, %v2641_v12  ;;  %vm2662_vm6 = vmor %vm2660_vm4, %vm2661_vm2  ;;  %v2667_v12 = vor.u32 1.1754944e-38, %v2666_v46  ;;  %v2682_v10 = vor.u32 1.1754944e-38, %v2681_v54  ;;  %v7859_v54 = vld [vmem:[#allocation3 + $0xf0] sm:$0xff] }
 0x84f   :  { %v2657_v30 = vsub.f32 1.0, %v2656_v36  ;;  %9775 = vst [vmem:[#allocation59_spill] sm:$0xff] %v7859_v54 }
 0x850   :  { %v2643_v45 = vmul.f32 %v3945_v24, %v2642_v33 }
 0x851   :  { %v2658_v5 = vmul.f32 %v3947_v15, %v2657_v30 }
 0x852   :  { %v3949_v55 = vpop.eup %3948  ;;  %v2644_v42 = vadd.f32 %v3945_v24, %v2643_v45 }
 0x853   :  { %v2671_v22 = vmul.f32 %v3949_v55, %v2639_v62  ;;  %v2659_v39 = vadd.f32 %v3947_v15, %v2658_v5  ;;  %v3951_v48 = vpop.eup %3950  ;;  %vm2676_vm9 = vweird.f32 %v3949_v55  ;;  %v7806_v5 = vld [vmem:[#allocation3 + $0x188] sm:$0xff] }
 0x854   :  { %v2648_v36 = vsel %vm2647_vm5, %v3945_v24, %v2644_v42  ;;  %v2679_v24 = vand.u32 2147483647, %v2639_v62  ;;  %vm2677_vm11 = vmor %vm2675_vm10, %vm2676_vm9  ;;  %v7796_v62 = vld [vmem:[#allocation3 + $0x1a8] sm:$0xff]  ;;  %v7809_v42 = vld [vmem:[#allocation3 + $0x190] sm:$0xff] }
 0x855   :  { %v2672_v63 = vsub.f32 1.0, %v2671_v22  ;;  %v2653_v33 = vsel %vm2650_vm7, %v2652_v59, %v2648_v36  ;;  %v2663_v0 = vsel %vm2662_vm6, %v3947_v15, %v2659_v39  ;;  %v7799_v15 = vld [vmem:[#allocation3 + $0x1b0] sm:$0xff]  ;;  %v7816_v22 = vld [vmem:[#allocation3 + $0x168] sm:$0xff] }
 0x856   :  { %v2668_v30 = vsel %vm2665_vm8, %v2667_v12, %v2663_v0  ;;  %v2687_v19 = vmul.f32 %v3951_v48, %v2653_v33  ;;  %vm2680_vm12 = vcmp.eq.f32.partialorder %v2679_v24, 8.507059e+37  ;;  %v7819_v59 = vld [vmem:[#allocation3 + $0x170] sm:$0xff]  ;;  %v7826_v12 = vld [vmem:[#allocation3 + $0x148] sm:$0xff] }
 0x857   :  { %v2673_v60 = vmul.f32 %v3949_v55, %v2672_v63  ;;  %v2686_v45 = vmul.f32 %v2668_v30, %v7408_v25  ;;  %v7776_v25 = vld [vmem:[#allocation3 + $0x1e8] sm:$0xff]  ;;  %v7829_v36 = vld [vmem:[#allocation3 + $0x150] sm:$0xff] }
 0x858   :  { %v7786_v63 = vld [vmem:[#allocation3 + $0x1c8] sm:$0xff]  ;;  %v7839_v33 = vld [vmem:[#allocation3 + $0x130] sm:$0xff] }
 0x859   :  { %v7766_v13 = vadd.f32 %v2687_v19, %v2686_v45  ;;  %v2674_v32 = vadd.f32 %v3949_v55, %v2673_v60  ;;  %v7779_v60 = vld [vmem:[#allocation3 + $0x1f0] sm:$0xff]  ;;  %v7782_v19 = vld [vmem:[#allocation3 + $0x1f8] sm:$0xff]  ;;  %v7836_v48 = vld [vmem:[#allocation3 + $0x128] sm:$0xff] }
 0x85a   :  { %v7846_v30 = vld [vmem:[#allocation3 + $0x108] sm:$0xff]  ;;  %v7849_v45 = vld [vmem:[#allocation3 + $0x110] sm:$0xff] }
 0x85b   :  { %3952 = vtanh.f32 %v7766_v13  ;;  %v2678_v46 = vsel %vm2677_vm11, %v3949_v55, %v2674_v32  ;;  %v7789_v55 = vld [vmem:[#allocation3 + $0x1d0] sm:$0xff]  ;;  %v7856_v32 = vld [vmem:[#allocation3 + $0xe8] sm:$0xff] }
 0x85c   :  { %v2683_v26 = vsel %vm2680_vm12, %v2682_v10, %v2678_v46  ;;  %9774 = vst [vmem:[#allocation60_spill] sm:$0xff] %v7856_v32  ;;  %v7866_v24 = vld [vmem:[#allocation3 + $0xc8] sm:$0xff]  ;;  %v7869_v46 = vld [vmem:[#allocation3 + $0xd0] sm:$0xff] }
 0x85d   :  { %9777 = vst [vmem:[#allocation107_spill] sm:$0xff] %v7866_v24  ;;  %v7876_v10 = vld [vmem:[#allocation3 + $0xa8] sm:$0xff] }
 0x85e   :  { %9778 = vst [vmem:[#allocation135_spill] sm:$0xff] %v7869_v46 }
 0x85f   :  { %9780 = vst [vmem:[#allocation85_spill] sm:$0xff] %v7876_v10 }
 0x861   :  { %v3953_v39 = vpop.eup %3952 }
 0x862   :  { %v7769_v0 = vmul.f32 %v3953_v39, %v2683_v26  ;;  %v7879_v39 = vld [vmem:[#allocation3 + $0xb0] sm:$0xff]  ;;  %v7886_v26 = vld [vmem:[#allocation3 + $0x88] sm:$0xff] }
 0x863   :  { %9781 = vst [vmem:[#allocation86_spill] sm:$0xff] %v7879_v39 }
 0x864   :  { %2707 = vmatmul.f32.vlgmr.msra.gmra.mxu0 %v7769_v0  ;;  %2727 = vmatmul.f32.vlgmr.msrb.gmra.mxu1 %v7769_v0  ;;  %9783 = vst [vmem:[#allocation89_spill] sm:$0xff] %v7886_v26 }
 0x865   :  { %2747 = vmatmul.f32.vlgmr.msrb.gmra.mxu2 %v7769_v0  ;;  %2767 = vmatmul.f32.vlgmr.msrb.gmra.mxu3 %v7769_v0 }
 0x866   :  { %2918 = vmatpush.msra.mxu0 %v7417_v9  ;;  %2938 = vmatpush.msrb.mxu1 %v7776_v25  ;;  %v7792_v9 = vld [vmem:[#allocation3 + $0x1d8] sm:$0xff] }
 0x867   :  { %2958 = vmatpush.msrb.mxu2 %v7779_v60  ;;  %2978 = vmatpush.msrb.mxu3 %v7782_v19 }
 0x868   :  { %2919 = vmatpush.msra.mxu0 %v7423_v8  ;;  %2939 = vmatpush.msrb.mxu1 %v7786_v63  ;;  %v7802_v8 = vld [vmem:[#allocation3 + $0x1b8] sm:$0xff] }
 0x869   :  { %2959 = vmatpush.msrb.mxu2 %v7789_v55  ;;  %2979 = vmatpush.msrb.mxu3 %v7792_v9 }
 0x86a   :  { %2920 = vmatpush.msra.mxu0 %v7429_v21  ;;  %2940 = vmatpush.msrb.mxu1 %v7796_v62  ;;  %v7812_v21 = vld [vmem:[#allocation3 + $0x198] sm:$0xff] }
 0x86b   :  { %2960 = vmatpush.msrb.mxu2 %v7799_v15  ;;  %2980 = vmatpush.msrb.mxu3 %v7802_v8 }
 0x86c   :  { %2921 = vmatpush.msra.mxu0 %v7435_v43  ;;  %2941 = vmatpush.msrb.mxu1 %v7806_v5  ;;  %v7822_v43 = vld [vmem:[#allocation3 + $0x178] sm:$0xff] }
 0x86d   :  { %2961 = vmatpush.msrb.mxu2 %v7809_v42  ;;  %2981 = vmatpush.msrb.mxu3 %v7812_v21 }
 0x86e   :  { %2922 = vmatpush.msra.mxu0 %v7441_v44  ;;  %2942 = vmatpush.msrb.mxu1 %v7816_v22  ;;  %v7832_v44 = vld [vmem:[#allocation3 + $0x158] sm:$0xff] }
 0x86f   :  { %2962 = vmatpush.msrb.mxu2 %v7819_v59  ;;  %2982 = vmatpush.msrb.mxu3 %v7822_v43 }
 0x870   :  { %2923 = vmatpush.msra.mxu0 %v7447_v51  ;;  %2943 = vmatpush.msrb.mxu1 %v7826_v12  ;;  %v7842_v51 = vld [vmem:[#allocation3 + $0x138] sm:$0xff] }
 0x871   :  { %2963 = vmatpush.msrb.mxu2 %v7829_v36  ;;  %2983 = vmatpush.msrb.mxu3 %v7832_v44 }
 0x872   :  { %2924 = vmatpush.msra.mxu0 %v7453_v58  ;;  %2944 = vmatpush.msrb.mxu1 %v7836_v48  ;;  %v7852_v58 = vld [vmem:[#allocation3 + $0x118] sm:$0xff] }
 0x873   :  { %2964 = vmatpush.msrb.mxu2 %v7839_v33  ;;  %2984 = vmatpush.msrb.mxu3 %v7842_v51  ;;  %9773 = vst [vmem:[#allocation50_spill] sm:$0xff] %v7852_v58 }
 0x874   :  { %2925 = vmatpush.msra.mxu0 %v7459_v31  ;;  %2945 = vmatpush.msrb.mxu1 %v7846_v30  ;;  %v7862_v31 = vld [vmem:[#allocation3 + $0xf8] sm:$0xff] }
 0x875   :  { %2965 = vmatpush.msrb.mxu2 %v7849_v45  ;;  %2985 = vmatpush.msrb.mxu3 %v7852_v58  ;;  %9776 = vst [vmem:[#allocation79_spill] sm:$0xff] %v7862_v31 }
 0x876   :  { %2926 = vmatpush.msra.mxu0 %v7465_v38  ;;  %2946 = vmatpush.msrb.mxu1 %v7856_v32  ;;  %v7872_v38 = vld [vmem:[#allocation3 + $0xd8] sm:$0xff] }
 0x877   :  { %2966 = vmatpush.msrb.mxu2 %v7859_v54  ;;  %2986 = vmatpush.msrb.mxu3 %v7862_v31  ;;  %9779 = vst [vmem:[#allocation139_spill] sm:$0xff] %v7872_v38 }
 0x878   :  { %2927 = vmatpush.msra.mxu0 %v7471_v27  ;;  %2947 = vmatpush.msrb.mxu1 %v7866_v24  ;;  %v7882_v27 = vld [vmem:[#allocation3 + $0xb8] sm:$0xff] }
 0x879   :  { %2967 = vmatpush.msrb.mxu2 %v7869_v46  ;;  %2987 = vmatpush.msrb.mxu3 %v7872_v38  ;;  %9782 = vst [vmem:[#allocation87_spill] sm:$0xff] %v7882_v27  ;;  %v7889_v38 = vld [vmem:[#allocation3 + $0x90] sm:$0xff] }
 0x87a   :  { %2928 = vmatpush.msra.mxu0 %v7477_v29  ;;  %2948 = vmatpush.msrb.mxu1 %v7876_v10  ;;  %9784 = vst [vmem:[#allocation90_spill] sm:$0xff] %v7889_v38  ;;  %v7892_v29 = vld [vmem:[#allocation3 + $0x98] sm:$0xff] }
 0x87b   :  { %2968 = vmatpush.msrb.mxu2 %v7879_v39  ;;  %2988 = vmatpush.msrb.mxu3 %v7882_v27  ;;  %9785 = vst [vmem:[#allocation91_spill] sm:$0xff] %v7892_v29  ;;  %v7896_v39 = vld [vmem:[#allocation3 + $0x68] sm:$0xff]  ;;  %v7899_v27 = vld [vmem:[#allocation3 + $0x70] sm:$0xff] }
 0x87c   :  { %2929 = vmatpush.msra.mxu0 %v7483_v23  ;;  %2949 = vmatpush.msrb.mxu1 %v7886_v26  ;;  %9786 = vst [vmem:[#allocation92_spill] sm:$0xff] %v7896_v39  ;;  %v7902_v23 = vld [vmem:[#allocation3 + $0x78] sm:$0xff] }
 0x87d   :  { %2969 = vmatpush.msrb.mxu2 %v7889_v38  ;;  %2989 = vmatpush.msrb.mxu3 %v7892_v29  ;;  %9787 = vst [vmem:[#allocation93_spill] sm:$0xff] %v7899_v27  ;;  %v7906_v38 = vld [vmem:[#allocation3 + $0x48] sm:$0xff]  ;;  %v7909_v29 = vld [vmem:[#allocation3 + $0x50] sm:$0xff] }
 0x87e   :  { %2930 = vmatpush.msra.mxu0 %v7489_v34  ;;  %2950 = vmatpush.msrb.mxu1 %v7896_v39  ;;  %9788 = vst [vmem:[#allocation94_spill] sm:$0xff] %v7902_v23  ;;  %v7912_v34 = vld [vmem:[#allocation3 + $0x58] sm:$0xff] }
 0x87f   :  { %2970 = vmatpush.msrb.mxu2 %v7899_v27  ;;  %2990 = vmatpush.msrb.mxu3 %v7902_v23  ;;  %9789 = vst [vmem:[#allocation95_spill] sm:$0xff] %v7906_v38  ;;  %v7916_v27 = vld [vmem:[#allocation3 + $0x28] sm:$0xff]  ;;  %v7919_v23 = vld [vmem:[#allocation3 + $0x30] sm:$0xff] }
 0x880   :  { %2931 = vmatpush.msra.mxu0 %v7495_v18  ;;  %2951 = vmatpush.msrb.mxu1 %v7906_v38  ;;  %9790 = vst [vmem:[#allocation96_spill] sm:$0xff] %v7909_v29  ;;  %v7922_v18 = vld [vmem:[#allocation3 + $0x38] sm:$0xff] }
 0x881   :  { %2971 = vmatpush.msrb.mxu2 %v7909_v29  ;;  %9791 = vst [vmem:[#allocation97_spill] sm:$0xff] %v7912_v34  ;;  %2991 = vmatpush.msrb.mxu3 %v7912_v34  ;;  %v7926_v29 = vld [vmem:[#allocation3 + $0x8] sm:$0xff]  ;;  %v7929_v34 = vld [vmem:[#allocation3 + $0x10] sm:$0xff] }
 0x882   :  { %2932 = vmatpush.msra.mxu0 %v7501_v28  ;;  %9792 = vst [vmem:[#allocation99_spill] sm:$0xff] %v7916_v27  ;;  %2952 = vmatpush.msrb.mxu1 %v7916_v27  ;;  %v7932_v28 = vld [vmem:[#allocation3 + $0x18] sm:$0xff] }
 0x883   :  { %9793 = vst [vmem:[#allocation100_spill] sm:$0xff] %v7919_v23  ;;  %2972 = vmatpush.msrb.mxu2 %v7919_v23  ;;  %2992 = vmatpush.msrb.mxu3 %v7922_v18  ;;  %v2478_v23 = vadd.f32 %v7753_v50, %v9660_v41 }
 0x884   :  { %9794 = vst [vmem:[#allocation102_spill] sm:$0xff] %v7922_v18  ;;  %2933 = vmatpush.msra.mxu0 %v7507_v2  ;;  %2953 = vmatpush.msrb.mxu1 %v7926_v29  ;;  %v2498_v18 = vadd.f32 %v7755_v57, %v9661_v53 }
 0x885   :  { %9795 = vst [vmem:[#allocation103_spill] sm:$0xff] %v7926_v29  ;;  %2973 = vmatpush.msrb.mxu2 %v7929_v34  ;;  %2993 = vmatpush.msrb.mxu3 %v7932_v28 }
 0x886   :  { %9796 = vst [vmem:[#allocation104_spill] sm:$0xff] %v7929_v34  ;;  %v2518_v34 = vadd.f32 %v7757_v20, %v9662_v7 }
 0x887   :  { %9797 = vst [vmem:[#allocation105_spill] sm:$0xff] %v7932_v28 }
 0x8e1   :  { %v2708_v27 = vpop.f32.mrf.mxu0  ;;  %v2728_v2 = vpop.f32.mrf.mxu1 }
 0x8e2   :  { %v2709_v38 = vadd.f32 %v2708_v27, %v2478_v23  ;;  %v2729_v39 = vadd.f32 %v2728_v2, %v2498_v18 }
 0x8e4   :  { %v3739_v26 = vmul.f32 -1.442695, %v2709_v38  ;;  %v3740_v29 = vmul.f32 -1.442695, %v2729_v39  ;;  %v2538_v38 = vadd.f32 %v7761_v4, %v9663_v17 }
 0x8e6   :  { %3954 = vpow2.f32 %v3739_v26 }
 0x8e7   :  { %3956 = vpow2.f32 %v3740_v29 }
 0x8e8   :  { %v2748_v10 = vpop.f32.mrf.mxu2  ;;  %v2768_v57 = vpop.f32.mrf.mxu3 }
 0x8e9   :  { %v2749_v46 = vadd.f32 %v2748_v10, %v2518_v34  ;;  %v2769_v23 = vadd.f32 %v2768_v57, %v2538_v38 }
 0x8eb   :  { %v3741_v28 = vmul.f32 -1.442695, %v2749_v46 }
 0x8ec   :  { %v3955_v24 = vpop.eup %3954 }
 0x8ed   :  { %v3957_v31 = vpop.eup %3956  ;;  %v2780_v50 = vadd.f32 1.0, %v3955_v24  ;;  %3958 = vpow2.f32 %v3741_v28 }
 0x8ee   :  { %v2781_v41 = vadd.f32 1.0, %v3957_v31 }
 0x8ef   :  { %3960 = vrcp.f32 %v2780_v50  ;;  %v2794_v18 = vand.u32 2147483648, %v2780_v50  ;;  %v2792_v28 = vand.u32 2147483647, %v2780_v50  ;;  %vm2788_vm15 = vweird.f32 %v2780_v50 }
 0x8f0   :  { %3962 = vrcp.f32 %v2781_v41  ;;  %v2809_v24 = vand.u32 2147483648, %v2781_v41  ;;  %v2807_v7 = vand.u32 2147483647, %v2781_v41  ;;  %vm2803_vm0 = vweird.f32 %v2781_v41 }
 0x8f1   :  { %vm2793_vm3 = vcmp.eq.f32.partialorder %v2792_v28, 8.507059e+37 }
 0x8f2   :  { %vm2808_vm4 = vcmp.eq.f32.partialorder %v2807_v7, 8.507059e+37 }
 0x8f3   :  { %v3959_v27 = vpop.eup %3958 }
 0x8f4   :  { %v2782_v39 = vadd.f32 1.0, %v3959_v27  ;;  %v2795_v27 = vor.u32 1.1754944e-38, %v2794_v18 }
 0x8f5   :  { %v3961_v26 = vpop.eup %3960 }
 0x8f6   :  { %v3963_v20 = vpop.eup %3962  ;;  %v2784_v29 = vmul.f32 %v3961_v26, %v2780_v50  ;;  %3964 = vrcp.f32 %v2782_v39  ;;  %vm2789_vm13 = vweird.f32 %v3961_v26  ;;  %v2824_v18 = vand.u32 2147483648, %v2782_v39 }
 0x8f7   :  { %v2799_v10 = vmul.f32 %v3963_v20, %v2781_v41  ;;  %3966 = vtanh.f32 %v2769_v23  ;;  %vm2804_vm14 = vweird.f32 %v3963_v20  ;;  %vm2790_vm1 = vmor %vm2788_vm15, %vm2789_vm13  ;;  %vm2818_vm6 = vweird.f32 %v2782_v39 }
 0x8f8   :  { %v2785_v46 = vsub.f32 1.0, %v2784_v29  ;;  %vm2805_vm2 = vmor %vm2803_vm0, %vm2804_vm14  ;;  %v2810_v29 = vor.u32 1.1754944e-38, %v2809_v24  ;;  %v2825_v28 = vor.u32 1.1754944e-38, %v2824_v18  ;;  %v8008_v18 = vld [vmem:[#allocation6 + $0x178] sm:$0xff] }
 0x8f9   :  { %v2800_v34 = vsub.f32 1.0, %v2799_v10  ;;  %9807 = vst [vmem:[#allocation116_spill] sm:$0xff] %v8008_v18 }
 0x8fa   :  { %v2786_v31 = vmul.f32 %v3961_v26, %v2785_v46 }
 0x8fb   :  { %v2801_v2 = vmul.f32 %v3963_v20, %v2800_v34 }
 0x8fc   :  { %v3965_v53 = vpop.eup %3964  ;;  %v2787_v4 = vadd.f32 %v3961_v26, %v2786_v31 }
 0x8fd   :  { %v2814_v57 = vmul.f32 %v3965_v53, %v2782_v39  ;;  %v2802_v38 = vadd.f32 %v3963_v20, %v2801_v2  ;;  %v3967_v23 = vpop.eup %3966  ;;  %vm2819_vm5 = vweird.f32 %v3965_v53  ;;  %v7965_v2 = vld [vmem:[#allocation6 + $0x1d0] sm:$0xff] }
 0x8fe   :  { %v2791_v10 = vsel %vm2790_vm1, %v3961_v26, %v2787_v4  ;;  %v2822_v26 = vand.u32 2147483647, %v2782_v39  ;;  %vm2820_vm7 = vmor %vm2818_vm6, %vm2819_vm5  ;;  %v7962_v39 = vld [vmem:[#allocation6 + $0x1c8] sm:$0xff]  ;;  %v7968_v4 = vld [vmem:[#allocation6 + $0x1d8] sm:$0xff] }
 0x8ff   :  { %v2815_v17 = vsub.f32 1.0, %v2814_v57  ;;  %v2796_v46 = vsel %vm2793_vm3, %v2795_v27, %v2791_v10  ;;  %v2806_v54 = vsel %vm2805_vm2, %v3963_v20, %v2802_v38  ;;  %v7971_v57 = vld [vmem:[#allocation6 + $0x1a0] sm:$0xff]  ;;  %v7974_v27 = vld [vmem:[#allocation6 + $0x1a8] sm:$0xff]  ;;  %v7977_v38 = vld [vmem:[#allocation6 + $0x1b0] sm:$0xff] }
 0x900   :  { %v2811_v34 = vsel %vm2808_vm4, %v2810_v29, %v2806_v54  ;;  %v2830_v32 = vmul.f32 %v3967_v23, %v2796_v46  ;;  %vm2823_vm8 = vcmp.eq.f32.partialorder %v2822_v26, 8.507059e+37  ;;  %9798 = vst [vmem:[#allocation106_spill] sm:$0xff] %v7977_v38  ;;  %v7980_v29 = vld [vmem:[#allocation6 + $0x1b8] sm:$0xff]  ;;  %v7987_v10 = vld [vmem:[#allocation6 + $0x180] sm:$0xff]  ;;  %v7990_v23 = vld [vmem:[#allocation6 + $0x188] sm:$0xff] }
 0x901   :  { %v2829_v58 = vmul.f32 %v2811_v34, %v7522_v6  ;;  %v2816_v31 = vmul.f32 %v3965_v53, %v2815_v17  ;;  %v7947_v17 = vld [vmem:[#allocation6 + $0x1e0] sm:$0xff]  ;;  %v7950_v6 = vld [vmem:[#allocation6 + $0x1e8] sm:$0xff]  ;;  %9799 = vst [vmem:[#allocation108_spill] sm:$0xff] %v7980_v29  ;;  %v7993_v46 = vld [vmem:[#allocation6 + $0x190] sm:$0xff] }
 0x902   :  { %9800 = vst [vmem:[#allocation109_spill] sm:$0xff] %v7987_v10  ;;  %v7996_v34 = vld [vmem:[#allocation6 + $0x198] sm:$0xff]  ;;  %v8011_v26 = vld [vmem:[#allocation6 + $0x140] sm:$0xff] }
 0x903   :  { %v7944_v50 = vadd.f32 %v2830_v32, %v2829_v58  ;;  %v2817_v41 = vadd.f32 %v3965_v53, %v2816_v31  ;;  %v7953_v58 = vld [vmem:[#allocation6 + $0x1f0] sm:$0xff]  ;;  %v7959_v32 = vld [vmem:[#allocation6 + $0x1c0] sm:$0xff]  ;;  %9801 = vst [vmem:[#allocation110_spill] sm:$0xff] %v7990_v23 }
 0x904   :  { %9802 = vst [vmem:[#allocation111_spill] sm:$0xff] %v7993_v46  ;;  %v7999_v31 = vld [vmem:[#allocation6 + $0x160] sm:$0xff] }
 0x905   :  { %3968 = vtanh.f32 %v7944_v50  ;;  %v2821_v24 = vsel %vm2820_vm7, %v3965_v53, %v2817_v41  ;;  %v7956_v53 = vld [vmem:[#allocation6 + $0x1f8] sm:$0xff]  ;;  %9803 = vst [vmem:[#allocation112_spill] sm:$0xff] %v7996_v34  ;;  %v8005_v41 = vld [vmem:[#allocation6 + $0x170] sm:$0xff] }
 0x906   :  { %v2826_v7 = vsel %vm2823_vm8, %v2825_v28, %v2821_v24  ;;  %9804 = vst [vmem:[#allocation113_spill] sm:$0xff] %v7999_v31  ;;  %v8014_v24 = vld [vmem:[#allocation6 + $0x148] sm:$0xff]  ;;  %v8017_v28 = vld [vmem:[#allocation6 + $0x150] sm:$0xff] }
 0x907   :  { %9806 = vst [vmem:[#allocation115_spill] sm:$0xff] %v8005_v41 }
 0x908   :  { %9808 = vst [vmem:[#allocation118_spill] sm:$0xff] %v8011_v26 }
 0x909   :  { %9809 = vst [vmem:[#allocation119_spill] sm:$0xff] %v8014_v24 }
 0x90a   :  { %9810 = vst [vmem:[#allocation120_spill] sm:$0xff] %v8017_v28 }
 0x90b   :  { %v3969_v20 = vpop.eup %3968 }
 0x90c   :  { %v2833_v54 = vmul.f32 %v3969_v20, %v2826_v7  ;;  %v8020_v20 = vld [vmem:[#allocation6 + $0x158] sm:$0xff]  ;;  %v8023_v7 = vld [vmem:[#allocation6 + $0x120] sm:$0xff] }
 0x90d   :  { %9811 = vst [vmem:[#allocation122_spill] sm:$0xff] %v8020_v20 }
 0x90e   :  { %2850 = vmatmul.f32.vlgmr.msrb.gmra.mxu0 %v2833_v54  ;;  %2870 = vmatmul.f32.vlgmr.msra.gmra.mxu1 %v2833_v54  ;;  %9812 = vst [vmem:[#allocation123_spill] sm:$0xff] %v8023_v7 }
 0x90f   :  { %2890 = vmatmul.f32.vlgmr.msra.gmra.mxu2 %v2833_v54  ;;  %2910 = vmatmul.f32.vlgmr.msra.gmra.mxu3 %v2833_v54  ;;  %v8026_v54 = vld [vmem:[#allocation6 + $0x128] sm:$0xff] }
 0x910   :  { %3065 = vmatpush.msrb.mxu0 %v7947_v17  ;;  %3085 = vmatpush.msra.mxu1 %v7950_v6  ;;  %9813 = vst [vmem:[#allocation124_spill] sm:$0xff] %v8026_v54 }
 0x911   :  { %3105 = vmatpush.msra.mxu2 %v7953_v58  ;;  %3125 = vmatpush.msra.mxu3 %v7956_v53 }
 0x912   :  { %3066 = vmatpush.msrb.mxu0 %v7959_v32  ;;  %3086 = vmatpush.msra.mxu1 %v7962_v39 }
 0x913   :  { %3106 = vmatpush.msra.mxu2 %v7965_v2  ;;  %3126 = vmatpush.msra.mxu3 %v7968_v4 }
 0x914   :  { %3067 = vmatpush.msrb.mxu0 %v7971_v57  ;;  %3087 = vmatpush.msra.mxu1 %v7974_v27 }
 0x915   :  { %3107 = vmatpush.msra.mxu2 %v7977_v38  ;;  %3127 = vmatpush.msra.mxu3 %v7980_v29 }
 0x916   :  { %2934 = vmatmul.f32.vlgmr.msra.gmra.mxu0 %v7769_v0  ;;  %2954 = vmatmul.f32.vlgmr.msrb.gmra.mxu1 %v7769_v0 }
 0x917   :  { %2974 = vmatmul.f32.vlgmr.msrb.gmra.mxu2 %v7769_v0  ;;  %2994 = vmatmul.f32.vlgmr.msrb.gmra.mxu3 %v7769_v0  ;;  %v8002_v0 = vld [vmem:[#allocation6 + $0x168] sm:$0xff] }
 0x918   :  { %3068 = vmatpush.msrb.mxu0 %v7987_v10  ;;  %3088 = vmatpush.msra.mxu1 %v7990_v23  ;;  %9805 = vst [vmem:[#allocation114_spill] sm:$0xff] %v8002_v0 }
 0x919   :  { %3108 = vmatpush.msra.mxu2 %v7993_v46  ;;  %3128 = vmatpush.msra.mxu3 %v7996_v34 }
 0x91a   :  { %3069 = vmatpush.msrb.mxu0 %v7999_v31  ;;  %3089 = vmatpush.msra.mxu1 %v8002_v0 }
 0x91b   :  { %3109 = vmatpush.msra.mxu2 %v8005_v41  ;;  %3129 = vmatpush.msra.mxu3 %v8008_v18 }
 0x91c   :  { %3070 = vmatpush.msrb.mxu0 %v8011_v26  ;;  %3090 = vmatpush.msra.mxu1 %v8014_v24  ;;  %v8029_v26 = vld [vmem:[#allocation6 + $0x130] sm:$0xff]  ;;  %v8032_v24 = vld [vmem:[#allocation6 + $0x138] sm:$0xff] }
 0x91d   :  { %3110 = vmatpush.msra.mxu2 %v8017_v28  ;;  %3130 = vmatpush.msra.mxu3 %v8020_v20  ;;  %9814 = vst [vmem:[#allocation125_spill] sm:$0xff] %v8029_v26  ;;  %v8035_v28 = vld [vmem:[#allocation6 + $0x100] sm:$0xff]  ;;  %v8038_v20 = vld [vmem:[#allocation6 + $0x108] sm:$0xff] }
 0x91e   :  { %3071 = vmatpush.msrb.mxu0 %v8023_v7  ;;  %3091 = vmatpush.msra.mxu1 %v8026_v54  ;;  %9815 = vst [vmem:[#allocation126_spill] sm:$0xff] %v8032_v24  ;;  %v8041_v7 = vld [vmem:[#allocation6 + $0x110] sm:$0xff]  ;;  %v8044_v54 = vld [vmem:[#allocation6 + $0x118] sm:$0xff] }
 0x91f   :  { %3111 = vmatpush.msra.mxu2 %v8029_v26  ;;  %3131 = vmatpush.msra.mxu3 %v8032_v24  ;;  %9816 = vst [vmem:[#allocation127_spill] sm:$0xff] %v8035_v28  ;;  %v8047_v26 = vld [vmem:[#allocation6 + $0xe0] sm:$0xff]  ;;  %v8050_v24 = vld [vmem:[#allocation6 + $0xe8] sm:$0xff] }
 0x920   :  { %3072 = vmatpush.msrb.mxu0 %v8035_v28  ;;  %9817 = vst [vmem:[#allocation128_spill] sm:$0xff] %v8038_v20  ;;  %3092 = vmatpush.msra.mxu1 %v8038_v20  ;;  %v8053_v28 = vld [vmem:[#allocation6 + $0xf0] sm:$0xff]  ;;  %v8056_v20 = vld [vmem:[#allocation6 + $0xf8] sm:$0xff] }
 0x921   :  { %9818 = vst [vmem:[#allocation129_spill] sm:$0xff] %v8041_v7  ;;  %3112 = vmatpush.msra.mxu2 %v8041_v7  ;;  %3132 = vmatpush.msra.mxu3 %v8044_v54  ;;  %v8059_v7 = vld [vmem:[#allocation6 + $0xc0] sm:$0xff] }
 0x922   :  { %9819 = vst [vmem:[#allocation130_spill] sm:$0xff] %v8044_v54  ;;  %3073 = vmatpush.msrb.mxu0 %v8047_v26  ;;  %3093 = vmatpush.msra.mxu1 %v8050_v24  ;;  %v8062_v54 = vld [vmem:[#allocation6 + $0xc8] sm:$0xff] }
 0x923   :  { %9820 = vst [vmem:[#allocation131_spill] sm:$0xff] %v8047_v26  ;;  %3113 = vmatpush.msra.mxu2 %v8053_v28  ;;  %3133 = vmatpush.msra.mxu3 %v8056_v20  ;;  %v8065_v26 = vld [vmem:[#allocation6 + $0xd0] sm:$0xff] }
 0x924   :  { %9821 = vst [vmem:[#allocation132_spill] sm:$0xff] %v8050_v24  ;;  %3074 = vmatpush.msrb.mxu0 %v8059_v7  ;;  %3094 = vmatpush.msra.mxu1 %v8062_v54  ;;  %v8068_v24 = vld [vmem:[#allocation6 + $0xd8] sm:$0xff] }
 0x925   :  { %9822 = vst [vmem:[#allocation133_spill] sm:$0xff] %v8053_v28  ;;  %3114 = vmatpush.msra.mxu2 %v8065_v26  ;;  %3134 = vmatpush.msra.mxu3 %v8068_v24  ;;  %v8071_v28 = vld [vmem:[#allocation6 + $0xa0] sm:$0xff] }
 0x926   :  { %9823 = vst [vmem:[#allocation134_spill] sm:$0xff] %v8056_v20  ;;  %3075 = vmatpush.msrb.mxu0 %v8071_v28  ;;  %v8074_v20 = vld [vmem:[#allocation6 + $0xa8] sm:$0xff] }
 0x927   :  { %9824 = vst [vmem:[#allocation136_spill] sm:$0xff] %v8059_v7  ;;  %3095 = vmatpush.msra.mxu1 %v8074_v20  ;;  %v8077_v7 = vld [vmem:[#allocation6 + $0xb0] sm:$0xff] }
 0x928   :  { %9825 = vst [vmem:[#allocation137_spill] sm:$0xff] %v8062_v54  ;;  %3115 = vmatpush.msra.mxu2 %v8077_v7  ;;  %v8080_v54 = vld [vmem:[#allocation6 + $0xb8] sm:$0xff] }
 0x929   :  { %9826 = vst [vmem:[#allocation138_spill] sm:$0xff] %v8065_v26  ;;  %3135 = vmatpush.msra.mxu3 %v8080_v54  ;;  %v8083_v26 = vld [vmem:[#allocation6 + $0x80] sm:$0xff] }
 0x92a   :  { %9827 = vst [vmem:[#allocation140_spill] sm:$0xff] %v8068_v24  ;;  %3076 = vmatpush.msrb.mxu0 %v8083_v26  ;;  %v8086_v24 = vld [vmem:[#allocation6 + $0x88] sm:$0xff] }
 0x92b   :  { %9828 = vst [vmem:[#allocation141_spill] sm:$0xff] %v8071_v28  ;;  %3096 = vmatpush.msra.mxu1 %v8086_v24  ;;  %v8089_v28 = vld [vmem:[#allocation6 + $0x90] sm:$0xff] }
 0x92c   :  { %9829 = vst [vmem:[#allocation142_spill] sm:$0xff] %v8074_v20  ;;  %3116 = vmatpush.msra.mxu2 %v8089_v28  ;;  %v8092_v20 = vld [vmem:[#allocation6 + $0x98] sm:$0xff] }
 0x92d   :  { %9830 = vst [vmem:[#allocation143_spill] sm:$0xff] %v8077_v7  ;;  %3136 = vmatpush.msra.mxu3 %v8092_v20  ;;  %v8095_v7 = vld [vmem:[#allocation6 + $0x60] sm:$0xff] }
 0x92e   :  { %9831 = vst [vmem:[#allocation144_spill] sm:$0xff] %v8080_v54  ;;  %3077 = vmatpush.msrb.mxu0 %v8095_v7  ;;  %v8098_v54 = vld [vmem:[#allocation6 + $0x68] sm:$0xff] }
 0x92f   :  { %9832 = vst [vmem:[#allocation145_spill] sm:$0xff] %v8083_v26  ;;  %3097 = vmatpush.msra.mxu1 %v8098_v54  ;;  %v8101_v26 = vld [vmem:[#allocation6 + $0x70] sm:$0xff] }
 0x930   :  { %9833 = vst [vmem:[#allocation146_spill] sm:$0xff] %v8086_v24  ;;  %3117 = vmatpush.msra.mxu2 %v8101_v26  ;;  %v8104_v24 = vld [vmem:[#allocation6 + $0x78] sm:$0xff] }
 0x931   :  { %9834 = vst [vmem:[#allocation147_spill] sm:$0xff] %v8089_v28  ;;  %3137 = vmatpush.msra.mxu3 %v8104_v24  ;;  %v8107_v28 = vld [vmem:[#allocation6 + $0x40] sm:$0xff] }
 0x932   :  { %9835 = vst [vmem:[#allocation148_spill] sm:$0xff] %v8092_v20  ;;  %3078 = vmatpush.msrb.mxu0 %v8107_v28  ;;  %v8110_v20 = vld [vmem:[#allocation6 + $0x48] sm:$0xff] }
 0x933   :  { %9836 = vst [vmem:[#allocation149_spill] sm:$0xff] %v8095_v7  ;;  %3098 = vmatpush.msra.mxu1 %v8110_v20  ;;  %v8113_v7 = vld [vmem:[#allocation6 + $0x50] sm:$0xff] }
 0x934   :  { %9837 = vst [vmem:[#allocation150_spill] sm:$0xff] %v8098_v54  ;;  %3118 = vmatpush.msra.mxu2 %v8113_v7  ;;  %v8116_v54 = vld [vmem:[#allocation6 + $0x58] sm:$0xff] }
 0x935   :  { %9838 = vst [vmem:[#allocation151_spill] sm:$0xff] %v8101_v26  ;;  %3138 = vmatpush.msra.mxu3 %v8116_v54  ;;  %v8119_v26 = vld [vmem:[#allocation6 + $0x20] sm:$0xff] }
 0x936   :  { %9839 = vst [vmem:[#allocation152_spill] sm:$0xff] %v8104_v24  ;;  %3079 = vmatpush.msrb.mxu0 %v8119_v26  ;;  %v8122_v24 = vld [vmem:[#allocation6 + $0x28] sm:$0xff] }
 0x937   :  { %9840 = vst [vmem:[#allocation153_spill] sm:$0xff] %v8107_v28  ;;  %3099 = vmatpush.msra.mxu1 %v8122_v24  ;;  %v8125_v28 = vld [vmem:[#allocation6 + $0x30] sm:$0xff] }
 0x938   :  { %9841 = vst [vmem:[#allocation62_spill] sm:$0xff] %v8110_v20  ;;  %3119 = vmatpush.msra.mxu2 %v8125_v28  ;;  %v8128_v20 = vld [vmem:[#allocation6 + $0x38] sm:$0xff] }
 0x939   :  { %9842 = vst [vmem:[#allocation65_spill] sm:$0xff] %v8113_v7  ;;  %3139 = vmatpush.msra.mxu3 %v8128_v20  ;;  %v8131_v7 = vld [vmem:[#allocation6] sm:$0xff] }
 0x93a   :  { %9843 = vst [vmem:[#allocation69_spill] sm:$0xff] %v8116_v54  ;;  %3080 = vmatpush.msrb.mxu0 %v8131_v7  ;;  %v8134_v54 = vld [vmem:[#allocation6 + $0x8] sm:$0xff] }
 0x93b   :  { %9844 = vst [vmem:[#allocation70_spill] sm:$0xff] %v8119_v26  ;;  %3100 = vmatpush.msra.mxu1 %v8134_v54  ;;  %v8137_v26 = vld [vmem:[#allocation6 + $0x10] sm:$0xff] }
 0x93c   :  { %9845 = vst [vmem:[#allocation154_spill] sm:$0xff] %v8122_v24  ;;  %3120 = vmatpush.msra.mxu2 %v8137_v26  ;;  %v8140_v24 = vld [vmem:[#allocation6 + $0x18] sm:$0xff] }
 0x93d   :  { %9846 = vst [vmem:[#allocation155_spill] sm:$0xff] %v8125_v28  ;;  %3140 = vmatpush.msra.mxu3 %v8140_v24  ;;  %v4614_v28 = vld [vmem:[#allocation8 + $0x1e0] sm:$0xff]  ;;  %3228 = vmatpush.msrb.mxu1 %v7594_v14 }
 0x93e   :  { %9847 = vst [vmem:[#allocation156_spill] sm:$0xff] %v8128_v20  ;;  %3208 = vmatpush.msra.mxu0 %v4614_v28  ;;  %3248 = vmatpush.msrb.mxu2 %v7597_v52  ;;  %v4617_v14 = vld [vmem:[#allocation8 + $0x180] sm:$0xff] }
 0x93f   :  { %9848 = vst [vmem:[#allocation157_spill] sm:$0xff] %v8131_v7  ;;  %3268 = vmatpush.msrb.mxu3 %v7600_v16  ;;  %v4615_v7 = vld [vmem:[#allocation8 + $0x1c0] sm:$0xff]  ;;  %3229 = vmatpush.msrb.mxu1 %v7604_v61 }
 0x940   :  { %9849 = vst [vmem:[#allocation158_spill] sm:$0xff] %v8134_v54  ;;  %3209 = vmatpush.msra.mxu0 %v4615_v7  ;;  %3249 = vmatpush.msrb.mxu2 %v7607_v1  ;;  %v4618_v52 = vld [vmem:[#allocation8 + $0x160] sm:$0xff]  ;;  %v9862_v7 = vld [vmem:[#allocation45_spill] sm:$0xff] }
 0x941   :  { %9850 = vst [vmem:[#allocation20_spill] sm:$0xff] %v8137_v26  ;;  %3269 = vmatpush.msrb.mxu3 %v7610_v40  ;;  %v4616_v26 = vld [vmem:[#allocation8 + $0x1a0] sm:$0xff]  ;;  %3230 = vmatpush.msrb.mxu1 %v7614_v49  ;;  %v9854_v40 = vld [vmem:[#allocation37_spill] sm:$0xff]  ;;  %v9855_v49 = vld [vmem:[#allocation26_spill] sm:$0xff] }
 0x942   :  { %9851 = vst [vmem:[#allocation22_spill] sm:$0xff] %v8140_v24  ;;  %3210 = vmatpush.msra.mxu0 %v4616_v26  ;;  %3250 = vmatpush.msrb.mxu2 %v7617_v35  ;;  %v9852_v16 = vld [vmem:[#allocation24_spill] sm:$0xff]  ;;  %v9856_v35 = vld [vmem:[#allocation39_spill] sm:$0xff] }
 0x943   :  { %3270 = vmatpush.msrb.mxu3 %v7620_v56  ;;  %3231 = vmatpush.msrb.mxu1 %v7624_v3  ;;  %v9853_v61 = vld [vmem:[#allocation36_spill] sm:$0xff]  ;;  %v9860_v26 = vld [vmem:[#allocation43_spill] sm:$0xff] }
 0x944   :  { %3211 = vmatpush.msra.mxu0 %v4617_v14  ;;  %3251 = vmatpush.msrb.mxu2 %v7627_v11  ;;  %v4619_v1 = vld [vmem:[#allocation8 + $0x140] sm:$0xff]  ;;  %v9858_v11 = vld [vmem:[#allocation29_spill] sm:$0xff] }
 0x945   :  { %3271 = vmatpush.msrb.mxu3 %v7630_v47  ;;  %3232 = vmatpush.msrb.mxu1 %v7634_v37  ;;  %v4620_v56 = vld [vmem:[#allocation8 + $0x120] sm:$0xff]  ;;  %v9859_v47 = vld [vmem:[#allocation42_spill] sm:$0xff] }
 0x946   :  { %3212 = vmatpush.msra.mxu0 %v4618_v52  ;;  %3252 = vmatpush.msrb.mxu2 %v9852_v16  ;;  %v9857_v3 = vld [vmem:[#allocation40_spill] sm:$0xff]  ;;  %v9863_v52 = vld [vmem:[#allocation46_spill] sm:$0xff]  ;;  %v9864_v16 = vld [vmem:[#allocation35_spill] sm:$0xff] }
 0x947   :  { %3272 = vmatpush.msrb.mxu3 %v9853_v61  ;;  %3233 = vmatpush.msrb.mxu1 %v9854_v40  ;;  %v4621_v37 = vld [vmem:[#allocation8 + $0x100] sm:$0xff]  ;;  %v9866_v40 = vld [vmem:[#allocation49_spill] sm:$0xff] }
 0x948   :  { %3213 = vmatpush.msra.mxu0 %v4619_v1  ;;  %3253 = vmatpush.msrb.mxu2 %v9855_v49  ;;  %v9861_v28 = vld [vmem:[#allocation32_spill] sm:$0xff]  ;;  %v9867_v49 = vld [vmem:[#allocation38_spill] sm:$0xff] }
 0x949   :  { %3273 = vmatpush.msrb.mxu3 %v9856_v35  ;;  %3234 = vmatpush.msrb.mxu1 %v9857_v3  ;;  %v4622_v14 = vld [vmem:[#allocation8 + $0xe0] sm:$0xff]  ;;  %v9868_v35 = vld [vmem:[#allocation51_spill] sm:$0xff] }
 0x94a   :  { %3214 = vmatpush.msra.mxu0 %v4620_v56  ;;  %3254 = vmatpush.msrb.mxu2 %v9858_v11  ;;  %v9865_v61 = vld [vmem:[#allocation48_spill] sm:$0xff]  ;;  %v9870_v11 = vld [vmem:[#allocation41_spill] sm:$0xff] }
 0x94b   :  { %3274 = vmatpush.msrb.mxu3 %v9859_v47  ;;  %3235 = vmatpush.msrb.mxu1 %v9860_v26  ;;  %v4623_v1 = vld [vmem:[#allocation8 + $0xc0] sm:$0xff]  ;;  %v9871_v47 = vld [vmem:[#allocation66_spill] sm:$0xff]  ;;  %v9872_v26 = vld [vmem:[#allocation67_spill] sm:$0xff] }
 0x94c   :  { %3215 = vmatpush.msra.mxu0 %v4621_v37  ;;  %3255 = vmatpush.msrb.mxu2 %v9861_v28  ;;  %v4624_v56 = vld [vmem:[#allocation8 + $0xa0] sm:$0xff] }
 0x94d   :  { %3275 = vmatpush.msrb.mxu3 %v9862_v7  ;;  %3236 = vmatpush.msrb.mxu1 %v9863_v52  ;;  %v9869_v3 = vld [vmem:[#allocation52_spill] sm:$0xff]  ;;  %v9874_v7 = vld [vmem:[#allocation73_spill] sm:$0xff]  ;;  %v9875_v52 = vld [vmem:[#allocation54_spill] sm:$0xff] }
 0x94e   :  { %3216 = vmatpush.msra.mxu0 %v4622_v14  ;;  %3256 = vmatpush.msrb.mxu2 %v9864_v16  ;;  %v4625_v37 = vld [vmem:[#allocation8 + $0x80] sm:$0xff]  ;;  %v9876_v16 = vld [vmem:[#allocation53_spill] sm:$0xff] }
 0x94f   :  { %3276 = vmatpush.msrb.mxu3 %v9865_v61  ;;  %3237 = vmatpush.msrb.mxu1 %v9866_v40  ;;  %v9873_v28 = vld [vmem:[#allocation72_spill] sm:$0xff] }
 0x950   :  { %3217 = vmatpush.msra.mxu0 %v4623_v1  ;;  %3257 = vmatpush.msrb.mxu2 %v9867_v49  ;;  %v4626_v14 = vld [vmem:[#allocation8 + $0x60] sm:$0xff]  ;;  %v9879_v49 = vld [vmem:[#allocation55_spill] sm:$0xff] }
 0x951   :  { %3277 = vmatpush.msrb.mxu3 %v9868_v35  ;;  %3238 = vmatpush.msrb.mxu1 %v9869_v3  ;;  %v9877_v61 = vld [vmem:[#allocation44_spill] sm:$0xff]  ;;  %v9880_v35 = vld [vmem:[#allocation47_spill] sm:$0xff]  ;;  %v9881_v3 = vld [vmem:[#allocation58_spill] sm:$0xff] }
 0x952   :  { %3218 = vmatpush.msra.mxu0 %v4624_v56  ;;  %3258 = vmatpush.msrb.mxu2 %v9870_v11  ;;  %v4627_v1 = vld [vmem:[#allocation8 + $0x40] sm:$0xff]  ;;  %v9882_v11 = vld [vmem:[#allocation57_spill] sm:$0xff] }
 0x953   :  { %3278 = vmatpush.msrb.mxu3 %v9871_v47  ;;  %3239 = vmatpush.msrb.mxu1 %v9872_v26  ;;  %v9878_v40 = vld [vmem:[#allocation56_spill] sm:$0xff]  ;;  %v9883_v47 = vld [vmem:[#allocation74_spill] sm:$0xff]  ;;  %v9884_v26 = vld [vmem:[#allocation75_spill] sm:$0xff] }
 0x954   :  { %3219 = vmatpush.msra.mxu0 %v4625_v37  ;;  %3259 = vmatpush.msrb.mxu2 %v9873_v28  ;;  %v4628_v56 = vld [vmem:[#allocation8 + $0x20] sm:$0xff] }
 0x955   :  { %3279 = vmatpush.msrb.mxu3 %v9874_v7  ;;  %3240 = vmatpush.msrb.mxu1 %v9875_v52  ;;  %v4629_v37 = vld [vmem:[#allocation8] sm:$0xff]  ;;  %v9886_v7 = vld [vmem:[#allocation81_spill] sm:$0xff] }
 0x956   :  { %3220 = vmatpush.msra.mxu0 %v4626_v14  ;;  %3260 = vmatpush.msrb.mxu2 %v9876_v16  ;;  %v9885_v28 = vld [vmem:[#allocation80_spill] sm:$0xff] }
 0x957   :  { %3280 = vmatpush.msrb.mxu3 %v9877_v61  ;;  %3241 = vmatpush.msrb.mxu1 %v9878_v40  ;;  %v9887_v40 = vld [vmem:[#allocation63_spill] sm:$0xff] }
 0x958   :  { %3221 = vmatpush.msra.mxu0 %v4627_v1  ;;  %3261 = vmatpush.msrb.mxu2 %v9879_v49 }
 0x959   :  { %3281 = vmatpush.msrb.mxu3 %v9880_v35  ;;  %3242 = vmatpush.msrb.mxu1 %v9881_v3  ;;  %v9888_v35 = vld [vmem:[#allocation82_spill] sm:$0xff] }
 0x95a   :  { %3222 = vmatpush.msra.mxu0 %v4628_v56  ;;  %3262 = vmatpush.msrb.mxu2 %v9882_v11 }
 0x95b   :  { %3282 = vmatpush.msrb.mxu3 %v9883_v47  ;;  %3243 = vmatpush.msrb.mxu1 %v9884_v26  ;;  %v9889_v26 = vld [vmem:[#allocation98_spill] sm:$0xff] }
 0x95c   :  { %3223 = vmatpush.msra.mxu0 %v4629_v37  ;;  %3263 = vmatpush.msrb.mxu2 %v9885_v28 }
 0x95d   :  { %3283 = vmatpush.msrb.mxu3 %v9886_v7 }
 0x98b   :  { %v8191_v14 = vpop.f32.mrf.mxu0  ;;  %v8193_v52 = vpop.f32.mrf.mxu1 }
 0x992   :  { %v8195_v16 = vpop.f32.mrf.mxu2  ;;  %v8199_v47 = vpop.f32.mrf.mxu3 }
 0x993   :  { %v2935_v61 = vpop.f32.mrf.mxu0  ;;  %v2955_v1 = vpop.f32.mrf.mxu1 }
 0x994   :  { %v2998_v49 = vadd.f32 %v2935_v61, %v9887_v40  ;;  %v2999_v56 = vadd.f32 %v2955_v1, %v9888_v35  ;;  %v9890_v35 = vld [vmem:[#allocation101_spill] sm:$0xff] }
 0x996   :  { %v3742_v3 = vmul.f32 -1.442695, %v2998_v49  ;;  %v3743_v11 = vmul.f32 -1.442695, %v2999_v56 }
 0x998   :  { %3970 = vpow2.f32 %v3742_v3 }
 0x999   :  { %3972 = vpow2.f32 %v3743_v11 }
 0x99a   :  { %v2975_v37 = vpop.f32.mrf.mxu2  ;;  %v2995_v61 = vpop.f32.mrf.mxu3 }
 0x99b   :  { %v3000_v28 = vadd.f32 %v2975_v37, %v9889_v26  ;;  %v3001_v56 = vadd.f32 %v2995_v61, %v9890_v35 }
 0x99d   :  { %v3744_v7 = vmul.f32 -1.442695, %v3000_v28 }
 0x99e   :  { %v3971_v24 = vpop.eup %3970 }
 0x99f   :  { %v3973_v54 = vpop.eup %3972  ;;  %v3011_v20 = vadd.f32 1.0, %v3971_v24  ;;  %3974 = vpow2.f32 %v3744_v7 }
 0x9a0   :  { %v3012_v18 = vadd.f32 1.0, %v3973_v54 }
 0x9a1   :  { %3976 = vrcp.f32 %v3011_v20  ;;  %v3025_v26 = vand.u32 2147483648, %v3011_v20  ;;  %v3023_v54 = vand.u32 2147483647, %v3011_v20  ;;  %vm3019_vm11 = vweird.f32 %v3011_v20 }
 0x9a2   :  { %3978 = vrcp.f32 %v3012_v18  ;;  %v3040_v28 = vand.u32 2147483648, %v3012_v18  ;;  %v3038_v31 = vand.u32 2147483647, %v3012_v18  ;;  %vm3034_vm12 = vweird.f32 %v3012_v18 }
 0x9a3   :  { %v3026_v35 = vor.u32 1.1754944e-38, %v3025_v26  ;;  %vm3024_vm15 = vcmp.eq.f32.partialorder %v3023_v54, 8.507059e+37 }
 0x9a4   :  { %vm3039_vm0 = vcmp.eq.f32.partialorder %v3038_v31, 8.507059e+37 }
 0x9a5   :  { %v3975_v40 = vpop.eup %3974 }
 0x9a6   :  { %v3013_v1 = vadd.f32 1.0, %v3975_v40 }
 0x9a7   :  { %v3977_v49 = vpop.eup %3976 }
 0x9a8   :  { %v3979_v3 = vpop.eup %3978  ;;  %v3015_v11 = vmul.f32 %v3977_v49, %v3011_v20  ;;  %3980 = vrcp.f32 %v3013_v1  ;;  %vm3020_vm9 = vweird.f32 %v3977_v49  ;;  %v3055_v26 = vand.u32 2147483648, %v3013_v1 }
 0x9a9   :  { %v3030_v41 = vmul.f32 %v3979_v3, %v3012_v18  ;;  %3982 = vtanh.f32 %v3001_v56  ;;  %vm3035_vm10 = vweird.f32 %v3979_v3  ;;  %vm3021_vm13 = vmor %vm3019_vm11, %vm3020_vm9  ;;  %vm3049_vm2 = vweird.f32 %v3013_v1 }
 0x9aa   :  { %v3016_v0 = vsub.f32 1.0, %v3015_v11  ;;  %vm3036_vm14 = vmor %vm3034_vm12, %vm3035_vm10  ;;  %v3041_v11 = vor.u32 1.1754944e-38, %v3040_v28  ;;  %v3056_v54 = vor.u32 1.1754944e-38, %v3055_v26  ;;  %v9916_v26 = vld [vmem:[#allocation13_spill] sm:$0xff] }
 0x9ab   :  { %v3031_v37 = vsub.f32 1.0, %v3030_v41 }
 0x9ac   :  { %v3017_v24 = vmul.f32 %v3977_v49, %v3016_v0 }
 0x9ad   :  { %v3032_v7 = vmul.f32 %v3979_v3, %v3031_v37 }
 0x9ae   :  { %v3981_v34 = vpop.eup %3980  ;;  %v3018_v40 = vadd.f32 %v3977_v49, %v3017_v24 }
 0x9af   :  { %v3045_v61 = vmul.f32 %v3981_v34, %v3013_v1  ;;  %v3033_v46 = vadd.f32 %v3979_v3, %v3032_v7  ;;  %v3983_v56 = vpop.eup %3982  ;;  %vm3050_vm1 = vweird.f32 %v3981_v34  ;;  %v9907_v7 = vld [vmem:[#allocation95_spill] sm:$0xff] }
 0x9b0   :  { %v3022_v41 = vsel %vm3021_vm13, %v3977_v49, %v3018_v40  ;;  %v3053_v49 = vand.u32 2147483647, %v3013_v1  ;;  %vm3051_vm3 = vmor %vm3049_vm2, %vm3050_vm1  ;;  %v9906_v1 = vld [vmem:[#allocation94_spill] sm:$0xff]  ;;  %v9908_v40 = vld [vmem:[#allocation96_spill] sm:$0xff] }
 0x9b1   :  { %v3046_v23 = vsub.f32 1.0, %v3045_v61  ;;  %v3027_v0 = vsel %vm3024_vm15, %v3026_v35, %v3022_v41  ;;  %v3037_v10 = vsel %vm3036_vm14, %v3979_v3, %v3033_v46  ;;  %v4643_v3 = vld [vmem:[#allocation3 + $0x40] sm:$0xff]  ;;  %v9909_v61 = vld [vmem:[#allocation97_spill] sm:$0xff] }
 0x9b2   :  { %v3042_v37 = vsel %vm3039_vm0, %v3041_v11, %v3037_v10  ;;  %v3061_v29 = vmul.f32 %v3983_v56, %v3027_v0  ;;  %vm3054_vm4 = vcmp.eq.f32.partialorder %v3053_v49, 8.507059e+37  ;;  %v4644_v35 = vld [vmem:[#allocation3 + $0x20] sm:$0xff]  ;;  %v9910_v11 = vld [vmem:[#allocation99_spill] sm:$0xff]  ;;  %v9912_v56 = vld [vmem:[#allocation102_spill] sm:$0xff]  ;;  %v2852_v49 = vadd.f32 %v8191_v14, %v9916_v26 }
 0x9b3   :  { %v3047_v38 = vmul.f32 %v3981_v34, %v3046_v23  ;;  %v3060_v24 = vmul.f32 %v3042_v37, %v7766_v13  ;;  %v4630_v13 = vld [vmem:[#allocation3 + $0x1e0] sm:$0xff]  ;;  %v9913_v37 = vld [vmem:[#allocation103_spill] sm:$0xff] }
 0x9b4   :  { %v9904_v23 = vld [vmem:[#allocation92_spill] sm:$0xff] }
 0x9b5   :  { %v8204_v20 = vadd.f32 %v3061_v29, %v3060_v24  ;;  %v3048_v18 = vadd.f32 %v3981_v34, %v3047_v38  ;;  %v4631_v38 = vld [vmem:[#allocation3 + $0x1c0] sm:$0xff] }
 0x9b6   :  { %v4632_v29 = vld [vmem:[#allocation3 + $0x1a0] sm:$0xff] }
 0x9b7   :  { %3984 = vtanh.f32 %v8204_v20  ;;  %v3052_v28 = vsel %vm3051_vm3, %v3981_v34, %v3048_v18  ;;  %v9905_v34 = vld [vmem:[#allocation93_spill] sm:$0xff]  ;;  %v9911_v41 = vld [vmem:[#allocation100_spill] sm:$0xff] }
 0x9b8   :  { %v3057_v31 = vsel %vm3054_vm4, %v3056_v54, %v3052_v28  ;;  %v4645_v0 = vld [vmem:[#allocation3] sm:$0xff]  ;;  %v9915_v18 = vld [vmem:[#allocation105_spill] sm:$0xff] }
 0x9b9   :  { %v9914_v24 = vld [vmem:[#allocation104_spill] sm:$0xff]  ;;  %v9917_v28 = vld [vmem:[#allocation17_spill] sm:$0xff] }
 0x9ba   :  { %v2872_v54 = vadd.f32 %v8193_v52, %v9917_v28 }
 0x9bd   :  { %v3985_v46 = vpop.eup %3984 }
 0x9be   :  { %v8207_v10 = vmul.f32 %v3985_v46, %v3057_v31 }
 0x9c0   :  { %3081 = vmatmul.f32.vlgmr.msrb.gmra.mxu0 %v8207_v10  ;;  %3101 = vmatmul.f32.vlgmr.msra.gmra.mxu1 %v8207_v10 }
 0x9c1   :  { %3121 = vmatmul.f32.vlgmr.msra.gmra.mxu2 %v8207_v10  ;;  %3141 = vmatmul.f32.vlgmr.msra.gmra.mxu3 %v8207_v10 }
 0x9c2   :  { %3292 = vmatpush.msrb.mxu0 %v4630_v13  ;;  %3312 = vmatpush.msra.mxu1 %v7776_v25  ;;  %v4633_v25 = vld [vmem:[#allocation3 + $0x180] sm:$0xff] }
 0x9c3   :  { %3332 = vmatpush.msra.mxu2 %v7779_v60  ;;  %3352 = vmatpush.msra.mxu3 %v7782_v19  ;;  %v4634_v60 = vld [vmem:[#allocation3 + $0x160] sm:$0xff] }
 0x9c4   :  { %3293 = vmatpush.msrb.mxu0 %v4631_v38  ;;  %3313 = vmatpush.msra.mxu1 %v7786_v63  ;;  %v4635_v19 = vld [vmem:[#allocation3 + $0x140] sm:$0xff] }
 0x9c5   :  { %3333 = vmatpush.msra.mxu2 %v7789_v55  ;;  %3353 = vmatpush.msra.mxu3 %v7792_v9  ;;  %v4636_v63 = vld [vmem:[#allocation3 + $0x120] sm:$0xff]  ;;  %v9891_v9 = vld [vmem:[#allocation50_spill] sm:$0xff] }
 0x9c6   :  { %3294 = vmatpush.msrb.mxu0 %v4632_v29  ;;  %3314 = vmatpush.msra.mxu1 %v7796_v62  ;;  %v4637_v55 = vld [vmem:[#allocation3 + $0x100] sm:$0xff] }
 0x9c7   :  { %3334 = vmatpush.msra.mxu2 %v7799_v15  ;;  %3354 = vmatpush.msra.mxu3 %v7802_v8  ;;  %v4638_v62 = vld [vmem:[#allocation3 + $0xe0] sm:$0xff]  ;;  %v9893_v8 = vld [vmem:[#allocation59_spill] sm:$0xff] }
 0x9c8   :  { %3295 = vmatpush.msrb.mxu0 %v4633_v25  ;;  %3315 = vmatpush.msra.mxu1 %v7806_v5  ;;  %v9892_v15 = vld [vmem:[#allocation60_spill] sm:$0xff]  ;;  %v9894_v5 = vld [vmem:[#allocation79_spill] sm:$0xff] }
 0x9c9   :  { %3335 = vmatpush.msra.mxu2 %v7809_v42  ;;  %3355 = vmatpush.msra.mxu3 %v7812_v21  ;;  %v4639_v42 = vld [vmem:[#allocation3 + $0xc0] sm:$0xff]  ;;  %v9895_v21 = vld [vmem:[#allocation107_spill] sm:$0xff] }
 0x9ca   :  { %3296 = vmatpush.msrb.mxu0 %v4634_v60  ;;  %3316 = vmatpush.msra.mxu1 %v7816_v22  ;;  %v9896_v22 = vld [vmem:[#allocation135_spill] sm:$0xff] }
 0x9cb   :  { %3336 = vmatpush.msra.mxu2 %v7819_v59  ;;  %3356 = vmatpush.msra.mxu3 %v7822_v43  ;;  %v9897_v59 = vld [vmem:[#allocation139_spill] sm:$0xff]  ;;  %v4640_v43 = vld [vmem:[#allocation3 + $0xa0] sm:$0xff] }
 0x9cc   :  { %3297 = vmatpush.msrb.mxu0 %v4635_v19  ;;  %3317 = vmatpush.msra.mxu1 %v7826_v12  ;;  %v9898_v12 = vld [vmem:[#allocation85_spill] sm:$0xff]  ;;  %v9918_v60 = vld [vmem:[#allocation19_spill] sm:$0xff] }
 0x9cd   :  { %3337 = vmatpush.msra.mxu2 %v7829_v36  ;;  %3357 = vmatpush.msra.mxu3 %v7832_v44  ;;  %v9899_v36 = vld [vmem:[#allocation86_spill] sm:$0xff]  ;;  %v9900_v44 = vld [vmem:[#allocation87_spill] sm:$0xff]  ;;  %v2892_v19 = vadd.f32 %v8195_v16, %v9918_v60 }
 0x9ce   :  { %3298 = vmatpush.msrb.mxu0 %v4636_v63  ;;  %3318 = vmatpush.msra.mxu1 %v7836_v48  ;;  %v4641_v48 = vld [vmem:[#allocation3 + $0x80] sm:$0xff] }
 0x9cf   :  { %3338 = vmatpush.msra.mxu2 %v7839_v33  ;;  %3358 = vmatpush.msra.mxu3 %v7842_v51  ;;  %v9901_v33 = vld [vmem:[#allocation89_spill] sm:$0xff]  ;;  %v9902_v51 = vld [vmem:[#allocation90_spill] sm:$0xff] }
 0x9d0   :  { %3299 = vmatpush.msrb.mxu0 %v4637_v55  ;;  %3319 = vmatpush.msra.mxu1 %v7846_v30  ;;  %v9903_v30 = vld [vmem:[#allocation91_spill] sm:$0xff] }
 0x9d1   :  { %3339 = vmatpush.msra.mxu2 %v7849_v45  ;;  %3359 = vmatpush.msra.mxu3 %v9891_v9  ;;  %v4642_v45 = vld [vmem:[#allocation3 + $0x60] sm:$0xff] }
 0x9d2   :  { %3300 = vmatpush.msrb.mxu0 %v4638_v62  ;;  %3320 = vmatpush.msra.mxu1 %v9892_v15 }
 0x9d3   :  { %3340 = vmatpush.msra.mxu2 %v9893_v8  ;;  %3360 = vmatpush.msra.mxu3 %v9894_v5 }
 0x9d4   :  { %3301 = vmatpush.msrb.mxu0 %v4639_v42  ;;  %3321 = vmatpush.msra.mxu1 %v9895_v21  ;;  %v9919_v42 = vld [vmem:[#allocation14_spill] sm:$0xff] }
 0x9d5   :  { %3341 = vmatpush.msra.mxu2 %v9896_v22  ;;  %3361 = vmatpush.msra.mxu3 %v9897_v59  ;;  %v2912_v21 = vadd.f32 %v8199_v47, %v9919_v42 }
 0x9d6   :  { %3302 = vmatpush.msrb.mxu0 %v4640_v43  ;;  %3322 = vmatpush.msra.mxu1 %v9898_v12 }
 0x9d7   :  { %3342 = vmatpush.msra.mxu2 %v9899_v36  ;;  %3362 = vmatpush.msra.mxu3 %v9900_v44 }
 0x9d8   :  { %3303 = vmatpush.msrb.mxu0 %v4641_v48  ;;  %3323 = vmatpush.msra.mxu1 %v9901_v33 }
 0x9d9   :  { %3343 = vmatpush.msra.mxu2 %v9902_v51  ;;  %3363 = vmatpush.msra.mxu3 %v9903_v30 }
 0x9da   :  { %3304 = vmatpush.msrb.mxu0 %v4642_v45  ;;  %3324 = vmatpush.msra.mxu1 %v9904_v23 }
 0x9db   :  { %3344 = vmatpush.msra.mxu2 %v9905_v34  ;;  %3364 = vmatpush.msra.mxu3 %v9906_v1 }
 0x9dc   :  { %3305 = vmatpush.msrb.mxu0 %v4643_v3  ;;  %3325 = vmatpush.msra.mxu1 %v9907_v7 }
 0x9dd   :  { %3345 = vmatpush.msra.mxu2 %v9908_v40  ;;  %3365 = vmatpush.msra.mxu3 %v9909_v61 }
 0x9de   :  { %3306 = vmatpush.msrb.mxu0 %v4644_v35  ;;  %3326 = vmatpush.msra.mxu1 %v9910_v11 }
 0x9df   :  { %3346 = vmatpush.msra.mxu2 %v9911_v41  ;;  %3366 = vmatpush.msra.mxu3 %v9912_v56 }
 0x9e0   :  { %3307 = vmatpush.msrb.mxu0 %v4645_v0  ;;  %3327 = vmatpush.msra.mxu1 %v9913_v37 }
 0x9e1   :  { %3347 = vmatpush.msra.mxu2 %v9914_v24  ;;  %3367 = vmatpush.msra.mxu3 %v9915_v18 }
 0xa3d   :  { %v3082_v46 = vpop.f32.mrf.mxu0  ;;  %v3102_v31 = vpop.f32.mrf.mxu1 }
 0xa3e   :  { %v3083_v13 = vadd.f32 %v3082_v46, %v2852_v49  ;;  %v3103_v38 = vadd.f32 %v3102_v31, %v2872_v54 }
 0xa40   :  { %v3745_v29 = vmul.f32 -1.442695, %v3083_v13  ;;  %v3746_v25 = vmul.f32 -1.442695, %v3103_v38 }
 0xa42   :  { %3986 = vpow2.f32 %v3745_v29 }
 0xa43   :  { %3988 = vpow2.f32 %v3746_v25 }
 0xa44   :  { %v3122_v63 = vpop.f32.mrf.mxu2  ;;  %v3142_v52 = vpop.f32.mrf.mxu3 }
 0xa45   :  { %v3123_v55 = vadd.f32 %v3122_v63, %v2892_v19  ;;  %v3143_v43 = vadd.f32 %v3142_v52, %v2912_v21  ;;  %v9938_v52 = vld [vmem:[#allocation127_spill] sm:$0xff]  ;;  %v9940_v21 = vld [vmem:[#allocation129_spill] sm:$0xff] }
 0xa47   :  { %v3747_v9 = vmul.f32 -1.442695, %v3123_v55  ;;  %v9931_v55 = vld [vmem:[#allocation119_spill] sm:$0xff] }
 0xa48   :  { %v3987_v62 = vpop.eup %3986 }
 0xa49   :  { %v3989_v15 = vpop.eup %3988  ;;  %v3154_v14 = vadd.f32 1.0, %v3987_v62  ;;  %3990 = vpow2.f32 %v3747_v9  ;;  %v9933_v9 = vld [vmem:[#allocation122_spill] sm:$0xff]  ;;  %v9934_v62 = vld [vmem:[#allocation123_spill] sm:$0xff] }
 0xa4a   :  { %v3155_v8 = vadd.f32 1.0, %v3989_v15  ;;  %v9935_v15 = vld [vmem:[#allocation124_spill] sm:$0xff] }
 0xa4b   :  { %3992 = vrcp.f32 %v3154_v14  ;;  %v3168_v33 = vand.u32 2147483648, %v3154_v14  ;;  %v3166_v45 = vand.u32 2147483647, %v3154_v14  ;;  %vm3162_vm7 = vweird.f32 %v3154_v14 }
 0xa4c   :  { %3994 = vrcp.f32 %v3155_v8  ;;  %v3183_v51 = vand.u32 2147483648, %v3155_v8  ;;  %v3181_v34 = vand.u32 2147483647, %v3155_v8  ;;  %vm3177_vm8 = vweird.f32 %v3155_v8 }
 0xa4d   :  { %v3169_v7 = vor.u32 1.1754944e-38, %v3168_v33  ;;  %vm3167_vm11 = vcmp.eq.f32.partialorder %v3166_v45, 8.507059e+37  ;;  %v9949_v33 = vld [vmem:[#allocation140_spill] sm:$0xff]  ;;  %v9952_v45 = vld [vmem:[#allocation143_spill] sm:$0xff] }
 0xa4e   :  { %v3184_v61 = vor.u32 1.1754944e-38, %v3183_v51  ;;  %vm3182_vm12 = vcmp.eq.f32.partialorder %v3181_v34, 8.507059e+37  ;;  %v9950_v51 = vld [vmem:[#allocation141_spill] sm:$0xff] }
 0xa4f   :  { %v3991_v5 = vpop.eup %3990  ;;  %v9954_v34 = vld [vmem:[#allocation145_spill] sm:$0xff] }
 0xa50   :  { %v3156_v22 = vadd.f32 1.0, %v3991_v5  ;;  %v9939_v5 = vld [vmem:[#allocation128_spill] sm:$0xff] }
 0xa51   :  { %v3993_v59 = vpop.eup %3992 }
 0xa52   :  { %v3995_v16 = vpop.eup %3994  ;;  %v3158_v12 = vmul.f32 %v3993_v59, %v3154_v14  ;;  %3996 = vrcp.f32 %v3156_v22  ;;  %vm3163_vm5 = vweird.f32 %v3993_v59  ;;  %v3198_v31 = vand.u32 2147483648, %v3156_v22  ;;  %v9936_v14 = vld [vmem:[#allocation125_spill] sm:$0xff] }
 0xa53   :  { %v3173_v36 = vmul.f32 %v3995_v16, %v3155_v8  ;;  %3998 = vtanh.f32 %v3143_v43  ;;  %vm3178_vm6 = vweird.f32 %v3995_v16  ;;  %vm3164_vm9 = vmor %vm3162_vm7, %vm3163_vm5  ;;  %vm3192_vm14 = vweird.f32 %v3156_v22  ;;  %v9937_v8 = vld [vmem:[#allocation126_spill] sm:$0xff]  ;;  %v9943_v43 = vld [vmem:[#allocation132_spill] sm:$0xff] }
 0xa54   :  { %v3159_v44 = vsub.f32 1.0, %v3158_v12  ;;  %vm3179_vm10 = vmor %vm3177_vm8, %vm3178_vm6  ;;  %v3196_v13 = vand.u32 2147483647, %v3156_v22  ;;  %v3199_v29 = vor.u32 1.1754944e-38, %v3198_v31  ;;  %v9945_v12 = vld [vmem:[#allocation134_spill] sm:$0xff] }
 0xa55   :  { %v3174_v48 = vsub.f32 1.0, %v3173_v36  ;;  %v9946_v36 = vld [vmem:[#allocation136_spill] sm:$0xff]  ;;  %v9971_v31 = vld [vmem:[#allocation158_spill] sm:$0xff] }
 0xa56   :  { %v3160_v30 = vmul.f32 %v3993_v59, %v3159_v44  ;;  %vm3197_vm0 = vcmp.eq.f32.partialorder %v3196_v13, 8.507059e+37  ;;  %v9947_v44 = vld [vmem:[#allocation137_spill] sm:$0xff]  ;;  %v9972_v13 = vld [vmem:[#allocation20_spill] sm:$0xff] }
 0xa57   :  { %v3175_v23 = vmul.f32 %v3995_v16, %v3174_v48  ;;  %v9948_v48 = vld [vmem:[#allocation138_spill] sm:$0xff] }
 0xa58   :  { %v3997_v1 = vpop.eup %3996  ;;  %v3161_v47 = vadd.f32 %v3993_v59, %v3160_v30  ;;  %v9951_v30 = vld [vmem:[#allocation142_spill] sm:$0xff] }
 0xa59   :  { %v3188_v3 = vmul.f32 %v3997_v1, %v3156_v22  ;;  %v3176_v40 = vadd.f32 %v3995_v16, %v3175_v23  ;;  %v3999_v11 = vpop.eup %3998  ;;  %vm3193_vm13 = vweird.f32 %v3997_v1  ;;  %v9941_v22 = vld [vmem:[#allocation130_spill] sm:$0xff]  ;;  %v9953_v23 = vld [vmem:[#allocation144_spill] sm:$0xff] }
 0xa5a   :  { %v3165_v35 = vsel %vm3164_vm9, %v3993_v59, %v3161_v47  ;;  %vm3194_vm15 = vmor %vm3192_vm14, %vm3193_vm13  ;;  %v9942_v59 = vld [vmem:[#allocation131_spill] sm:$0xff] }
 0xa5b   :  { %v3189_v41 = vsub.f32 1.0, %v3188_v3  ;;  %v3170_v56 = vsel %vm3167_vm11, %v3169_v7, %v3165_v35  ;;  %v3180_v0 = vsel %vm3179_vm10, %v3995_v16, %v3176_v40  ;;  %v9944_v16 = vld [vmem:[#allocation133_spill] sm:$0xff]  ;;  %v9956_v47 = vld [vmem:[#allocation147_spill] sm:$0xff]  ;;  %v9957_v3 = vld [vmem:[#allocation148_spill] sm:$0xff] }
 0xa5c   :  { %v3185_v37 = vsel %vm3182_vm12, %v3184_v61, %v3180_v0  ;;  %v3204_v24 = vmul.f32 %v3999_v11, %v3170_v56  ;;  %v9958_v7 = vld [vmem:[#allocation149_spill] sm:$0xff]  ;;  %v9959_v40 = vld [vmem:[#allocation150_spill] sm:$0xff]  ;;  %v9960_v61 = vld [vmem:[#allocation151_spill] sm:$0xff] }
 0xa5d   :  { %v3190_v18 = vmul.f32 %v3997_v1, %v3189_v41  ;;  %v3203_v49 = vmul.f32 %v3185_v37, %v7944_v50  ;;  %v9920_v50 = vld [vmem:[#allocation106_spill] sm:$0xff]  ;;  %v9961_v35 = vld [vmem:[#allocation152_spill] sm:$0xff]  ;;  %v9962_v11 = vld [vmem:[#allocation153_spill] sm:$0xff] }
 0xa5e   :  { %v9963_v41 = vld [vmem:[#allocation62_spill] sm:$0xff]  ;;  %v9964_v56 = vld [vmem:[#allocation65_spill] sm:$0xff] }
 0xa5f   :  { %v8270_v54 = vadd.f32 %v3204_v24, %v3203_v49  ;;  %v3191_v46 = vadd.f32 %v3997_v1, %v3190_v18  ;;  %v9965_v0 = vld [vmem:[#allocation69_spill] sm:$0xff]  ;;  %v9966_v37 = vld [vmem:[#allocation70_spill] sm:$0xff]  ;;  %v9968_v18 = vld [vmem:[#allocation155_spill] sm:$0xff] }
 0xa60   :  { %v9967_v24 = vld [vmem:[#allocation154_spill] sm:$0xff]  ;;  %v9969_v49 = vld [vmem:[#allocation156_spill] sm:$0xff] }
 0xa61   :  { %4000 = vtanh.f32 %v8270_v54  ;;  %v3195_v38 = vsel %vm3194_vm15, %v3997_v1, %v3191_v46  ;;  %v9955_v1 = vld [vmem:[#allocation146_spill] sm:$0xff]  ;;  %v9970_v46 = vld [vmem:[#allocation157_spill] sm:$0xff] }
 0xa62   :  { %v3200_v19 = vsel %vm3197_vm0, %v3199_v29, %v3195_v38  ;;  %v9973_v38 = vld [vmem:[#allocation22_spill] sm:$0xff] }
 0xa67   :  { %v4001_v25 = vpop.eup %4000 }
 0xa68   :  { %v3207_v63 = vmul.f32 %v4001_v25, %v3200_v19 }
 0xa6a   :  { %3224 = vmatmul.f32.vlgmr.msra.gmra.mxu0 %v3207_v63  ;;  %3244 = vmatmul.f32.vlgmr.msrb.gmra.mxu1 %v3207_v63 }
 0xa6b   :  { %3264 = vmatmul.f32.vlgmr.msrb.gmra.mxu2 %v3207_v63  ;;  %3284 = vmatmul.f32.vlgmr.msrb.gmra.mxu3 %v3207_v63 }
 0xa6c   :  { %3439 = vmatpush.msra.mxu0 %v7947_v17  ;;  %3459 = vmatpush.msrb.mxu1 %v7950_v6  ;;  %v9921_v17 = vld [vmem:[#allocation108_spill] sm:$0xff]  ;;  %v9922_v6 = vld [vmem:[#allocation109_spill] sm:$0xff] }
 0xa6d   :  { %3479 = vmatpush.msrb.mxu2 %v7953_v58  ;;  %3499 = vmatpush.msrb.mxu3 %v7956_v53  ;;  %v9923_v58 = vld [vmem:[#allocation110_spill] sm:$0xff]  ;;  %v9924_v53 = vld [vmem:[#allocation111_spill] sm:$0xff] }
 0xa6e   :  { %3440 = vmatpush.msra.mxu0 %v7959_v32  ;;  %3460 = vmatpush.msrb.mxu1 %v7962_v39  ;;  %v9925_v32 = vld [vmem:[#allocation112_spill] sm:$0xff]  ;;  %v9926_v39 = vld [vmem:[#allocation113_spill] sm:$0xff] }
 0xa6f   :  { %3480 = vmatpush.msrb.mxu2 %v7965_v2  ;;  %3500 = vmatpush.msrb.mxu3 %v7968_v4  ;;  %v9927_v2 = vld [vmem:[#allocation114_spill] sm:$0xff]  ;;  %v9928_v4 = vld [vmem:[#allocation115_spill] sm:$0xff] }
 0xa70   :  { %3441 = vmatpush.msra.mxu0 %v7971_v57  ;;  %3461 = vmatpush.msrb.mxu1 %v7974_v27  ;;  %v9929_v57 = vld [vmem:[#allocation116_spill] sm:$0xff]  ;;  %v9930_v27 = vld [vmem:[#allocation118_spill] sm:$0xff] }
 0xa71   :  { %3481 = vmatpush.msrb.mxu2 %v9920_v50  ;;  %3501 = vmatpush.msrb.mxu3 %v9921_v17  ;;  %v9974_v17 = vld [vmem:[#allocation64_spill] sm:$0xff] }
 0xa72   :  { %3308 = vmatmul.f32.vlgmr.msrb.gmra.mxu0 %v8207_v10  ;;  %3328 = vmatmul.f32.vlgmr.msra.gmra.mxu1 %v8207_v10 }
 0xa73   :  { %3348 = vmatmul.f32.vlgmr.msra.gmra.mxu2 %v8207_v10  ;;  %3368 = vmatmul.f32.vlgmr.msra.gmra.mxu3 %v8207_v10  ;;  %v9932_v10 = vld [vmem:[#allocation120_spill] sm:$0xff] }
 0xa74   :  { %3442 = vmatpush.msra.mxu0 %v9922_v6  ;;  %3462 = vmatpush.msrb.mxu1 %v9923_v58  ;;  %v9975_v58 = vld [vmem:[#allocation88_spill] sm:$0xff] }
 0xa75   :  { %3482 = vmatpush.msrb.mxu2 %v9924_v53  ;;  %3502 = vmatpush.msrb.mxu3 %v9925_v32 }
 0xa76   :  { %3443 = vmatpush.msra.mxu0 %v9926_v39  ;;  %3463 = vmatpush.msrb.mxu1 %v9927_v2 }
 0xa77   :  { %3483 = vmatpush.msrb.mxu2 %v9928_v4  ;;  %3503 = vmatpush.msrb.mxu3 %v9929_v57  ;;  %v9976_v57 = vld [vmem:[#allocation117_spill] sm:$0xff] }
 0xa78   :  { %3444 = vmatpush.msra.mxu0 %v9930_v27  ;;  %3464 = vmatpush.msrb.mxu1 %v9931_v55 }
 0xa79   :  { %3484 = vmatpush.msrb.mxu2 %v9932_v10  ;;  %3504 = vmatpush.msrb.mxu3 %v9933_v9 }
 0xa7a   :  { %3445 = vmatpush.msra.mxu0 %v9934_v62  ;;  %3465 = vmatpush.msrb.mxu1 %v9935_v15 }
 0xa7b   :  { %3485 = vmatpush.msrb.mxu2 %v9936_v14  ;;  %3505 = vmatpush.msrb.mxu3 %v9937_v8 }
 0xa7c   :  { %3446 = vmatpush.msra.mxu0 %v9938_v52  ;;  %3466 = vmatpush.msrb.mxu1 %v9939_v5 }
 0xa7d   :  { %3486 = vmatpush.msrb.mxu2 %v9940_v21  ;;  %3506 = vmatpush.msrb.mxu3 %v9941_v22  ;;  %v9977_v21 = vld [vmem:[#allocation121_spill] sm:$0xff] }
 0xa7e   :  { %3447 = vmatpush.msra.mxu0 %v9942_v59  ;;  %3467 = vmatpush.msrb.mxu1 %v9943_v43 }
 0xa7f   :  { %3487 = vmatpush.msrb.mxu2 %v9944_v16  ;;  %3507 = vmatpush.msrb.mxu3 %v9945_v12 }
 0xa80   :  { %3448 = vmatpush.msra.mxu0 %v9946_v36  ;;  %3468 = vmatpush.msrb.mxu1 %v9947_v44 }
 0xa81   :  { %3488 = vmatpush.msrb.mxu2 %v9948_v48  ;;  %3508 = vmatpush.msrb.mxu3 %v9949_v33 }
 0xa82   :  { %3449 = vmatpush.msra.mxu0 %v9950_v51  ;;  %3469 = vmatpush.msrb.mxu1 %v9951_v30 }
 0xa83   :  { %3489 = vmatpush.msrb.mxu2 %v9952_v45  ;;  %3509 = vmatpush.msrb.mxu3 %v9953_v23 }
 0xa84   :  { %3450 = vmatpush.msra.mxu0 %v9954_v34  ;;  %3470 = vmatpush.msrb.mxu1 %v9955_v1 }
 0xa85   :  { %3490 = vmatpush.msrb.mxu2 %v9956_v47  ;;  %3510 = vmatpush.msrb.mxu3 %v9957_v3 }
 0xa86   :  { %3451 = vmatpush.msra.mxu0 %v9958_v7  ;;  %3471 = vmatpush.msrb.mxu1 %v9959_v40 }
 0xa87   :  { %3491 = vmatpush.msrb.mxu2 %v9960_v61  ;;  %3511 = vmatpush.msrb.mxu3 %v9961_v35 }
 0xa88   :  { %3452 = vmatpush.msra.mxu0 %v9962_v11  ;;  %3472 = vmatpush.msrb.mxu1 %v9963_v41 }
 0xa89   :  { %3492 = vmatpush.msrb.mxu2 %v9964_v56  ;;  %3512 = vmatpush.msrb.mxu3 %v9965_v0 }
 0xa8a   :  { %3453 = vmatpush.msra.mxu0 %v9966_v37  ;;  %3473 = vmatpush.msrb.mxu1 %v9967_v24 }
 0xa8b   :  { %3493 = vmatpush.msrb.mxu2 %v9968_v18  ;;  %3513 = vmatpush.msrb.mxu3 %v9969_v49 }
 0xa8c   :  { %3454 = vmatpush.msra.mxu0 %v9970_v46  ;;  %3474 = vmatpush.msrb.mxu1 %v9971_v31 }
 0xa8d   :  { %3494 = vmatpush.msrb.mxu2 %v9972_v13  ;;  %3514 = vmatpush.msrb.mxu3 %v9973_v38 }
 0xae7   :  { %v8341_v29 = vpop.f32.mrf.mxu0  ;;  %v8343_v25 = vpop.f32.mrf.mxu1 }
 0xaee   :  { %v8345_v19 = vpop.f32.mrf.mxu2  ;;  %v8349_v2 = vpop.f32.mrf.mxu3 }
 0xaef   :  { %v3309_v63 = vpop.f32.mrf.mxu0  ;;  %v3329_v50 = vpop.f32.mrf.mxu1 }
 0xaf0   :  { %v3372_v6 = vadd.f32 %v3309_v63, %v9974_v17  ;;  %v3373_v53 = vadd.f32 %v3329_v50, %v9975_v58  ;;  %v3595_v58 = vld [vmem:[%s8426_s6 + $0x68] sm:$0xff] }
 0xaf2   :  { %v3748_v32 = vmul.f32 -1.442695, %v3372_v6  ;;  %v3749_v39 = vmul.f32 -1.442695, %v3373_v53  ;;  %v3596_v6 = vld [vmem:[%s8426_s6 + $0x70] sm:$0xff]  ;;  %v3594_v53 = vld [vmem:[%s8426_s6 + $0x60] sm:$0xff] }
 0xaf4   :  { %4002 = vpow2.f32 %v3748_v32  ;;  %v3593_v32 = vld [vmem:[%s8426_s6 + $0x58] sm:$0xff] }
 0xaf5   :  { %4004 = vpow2.f32 %v3749_v39  ;;  %v3592_v39 = vld [vmem:[%s8426_s6 + $0x50] sm:$0xff] }
 0xaf6   :  { %v3349_v4 = vpop.f32.mrf.mxu2  ;;  %v3369_v14 = vpop.f32.mrf.mxu3 }
 0xaf7   :  { %v3374_v27 = vadd.f32 %v3349_v4, %v9976_v57  ;;  %v3375_v22 = vadd.f32 %v3369_v14, %v9977_v21  ;;  %v3591_v4 = vld [vmem:[%s8426_s6 + $0x48] sm:$0xff]  ;;  %v3590_v57 = vld [vmem:[%s8426_s6 + $0x40] sm:$0xff] }
 0xaf9   :  { %v3750_v55 = vmul.f32 -1.442695, %v3374_v27  ;;  %v3589_v27 = vld [vmem:[%s8426_s6 + $0x38] sm:$0xff] }
 0xafa   :  { %v4003_v10 = vpop.eup %4002 }
 0xafb   :  { %v4005_v9 = vpop.eup %4004  ;;  %v3385_v62 = vadd.f32 1.0, %v4003_v10  ;;  %4006 = vpow2.f32 %v3750_v55  ;;  %v3226_v55 = vadd.f32 %v8341_v29, %v9916_v26  ;;  %v3246_v10 = vadd.f32 %v8343_v25, %v9917_v28  ;;  %v3586_v26 = vld [vmem:[%s8426_s6 + $0x20] sm:$0xff]  ;;  %v3585_v28 = vld [vmem:[%s8426_s6 + $0x18] sm:$0xff]  ;;  %v3584_v25 = vld [vmem:[%s8426_s6 + $0x10] sm:$0xff] }
 0xafc   :  { %v3386_v15 = vadd.f32 1.0, %v4005_v9  ;;  %v3266_v29 = vadd.f32 %v8345_v19, %v9918_v60 }
 0xafd   :  { %4008 = vrcp.f32 %v3385_v62  ;;  %v3399_v44 = vand.u32 2147483648, %v3385_v62  ;;  %v3397_v51 = vand.u32 2147483647, %v3385_v62  ;;  %vm3393_vm3 = vweird.f32 %v3385_v62 }
 0xafe   :  { %4010 = vrcp.f32 %v3386_v15  ;;  %v3414_v48 = vand.u32 2147483648, %v3386_v15  ;;  %v3412_v45 = vand.u32 2147483647, %v3386_v15  ;;  %vm3408_vm4 = vweird.f32 %v3386_v15 }
 0xaff   :  { %v3400_v47 = vor.u32 1.1754944e-38, %v3399_v44  ;;  %vm3398_vm7 = vcmp.eq.f32.partialorder %v3397_v51, 8.507059e+37  ;;  %v3286_v51 = vadd.f32 %v8349_v2, %v9919_v42 }
 0xb00   :  { %v3415_v7 = vor.u32 1.1754944e-38, %v3414_v48  ;;  %vm3413_vm8 = vcmp.eq.f32.partialorder %v3412_v45, 8.507059e+37 }
 0xb01   :  { %v4007_v8 = vpop.eup %4006 }
 0xb02   :  { %v3387_v52 = vadd.f32 1.0, %v4007_v8 }
 0xb03   :  { %v4009_v5 = vpop.eup %4008 }
 0xb04   :  { %v4011_v59 = vpop.eup %4010  ;;  %v3389_v43 = vmul.f32 %v4009_v5, %v3385_v62  ;;  %4012 = vrcp.f32 %v3387_v52  ;;  %vm3394_vm1 = vweird.f32 %v4009_v5  ;;  %v3429_v46 = vand.u32 2147483648, %v3387_v52 }
 0xb05   :  { %v3404_v16 = vmul.f32 %v4011_v59, %v3386_v15  ;;  %4014 = vtanh.f32 %v3375_v22  ;;  %vm3409_vm2 = vweird.f32 %v4011_v59  ;;  %vm3395_vm5 = vmor %vm3393_vm3, %vm3394_vm1  ;;  %vm3423_vm10 = vweird.f32 %v3387_v52  ;;  %v3588_v15 = vld [vmem:[%s8426_s6 + $0x30] sm:$0xff] }
 0xb06   :  { %v3390_v12 = vsub.f32 1.0, %v3389_v43  ;;  %vm3410_vm6 = vmor %vm3408_vm4, %vm3409_vm2  ;;  %v3427_v31 = vand.u32 2147483647, %v3387_v52  ;;  %v3430_v38 = vor.u32 1.1754944e-38, %v3429_v46  ;;  %v3583_v43 = vld [vmem:[%s8426_s6 + $0x8] sm:$0xff] }
 0xb07   :  { %v3405_v36 = vsub.f32 1.0, %v3404_v16 }
 0xb08   :  { %v3391_v33 = vmul.f32 %v4009_v5, %v3390_v12  ;;  %vm3428_vm12 = vcmp.eq.f32.partialorder %v3427_v31, 8.507059e+37  ;;  %v3582_v12 = vld [vmem:[%s8426_s6] sm:$0xff] }
 0xb09   :  { %v3406_v30 = vmul.f32 %v4011_v59, %v3405_v36 }
 0xb0a   :  { %v4013_v23 = vpop.eup %4012  ;;  %v3392_v34 = vadd.f32 %v4009_v5, %v3391_v33 }
 0xb0b   :  { %v3419_v1 = vmul.f32 %v4013_v23, %v3387_v52  ;;  %v3407_v3 = vadd.f32 %v4011_v59, %v3406_v30  ;;  %v4015_v61 = vpop.eup %4014  ;;  %vm3424_vm9 = vweird.f32 %v4013_v23  ;;  %v3587_v52 = vld [vmem:[%s8426_s6 + $0x28] sm:$0xff] }
 0xb0c   :  { %v3396_v40 = vsel %vm3395_vm5, %v4009_v5, %v3392_v34  ;;  %vm3425_vm11 = vmor %vm3423_vm10, %vm3424_vm9  ;;  %vm3622_vm9 = vcmask 64512  }
 0xb0d   :  { %v3420_v35 = vsub.f32 1.0, %v3419_v1  ;;  %v3401_v11 = vsel %vm3398_vm7, %v3400_v47, %v3396_v40  ;;  %v3411_v41 = vsel %vm3410_vm6, %v4011_v59, %v3407_v3 }
 0xb0e   :  { %v3416_v56 = vsel %vm3413_vm8, %v3415_v7, %v3411_v41  ;;  %v3435_v0 = vmul.f32 %v4015_v61, %v3401_v11 }
 0xb0f   :  { %v3421_v37 = vmul.f32 %v4013_v23, %v3420_v35  ;;  %v3434_v24 = vmul.f32 %v3416_v56, %v8204_v20  ;;  %v3597_v20 = vld [vmem:[%s8426_s6 + $0x78] sm:$0xff] }
 0xb10   :  { %3602 = vmatpush.msrb.mxu0 %v3597_v20 }
 0xb11   :  { %v3436_v18 = vadd.f32 %v3435_v0, %v3434_v24  ;;  %v3422_v49 = vadd.f32 %v4013_v23, %v3421_v37 }
 0xb12   :  { %3603 = vmatpush.msrb.mxu0 %v3596_v6 }
 0xb13   :  { %4016 = vtanh.f32 %v3436_v18  ;;  %v3426_v13 = vsel %vm3425_vm11, %v4013_v23, %v3422_v49 }
 0xb14   :  { %v3431_v50 = vsel %vm3428_vm12, %v3430_v38, %v3426_v13  ;;  %3604 = vmatpush.msrb.mxu0 %v3595_v58 }
 0xb16   :  { %3605 = vmatpush.msrb.mxu0 %v3594_v53 }
 0xb18   :  { %3606 = vmatpush.msrb.mxu0 %v3593_v32 }
 0xb19   :  { %v4017_v63 = vpop.eup %4016 }
 0xb1a   :  { %v3438_v17 = vmul.f32 %v4017_v63, %v3431_v50  ;;  %3607 = vmatpush.msrb.mxu0 %v3592_v39 }
 0xb1c   :  { %3455 = vmatmul.f32.vlgmr.msra.gmra.mxu0 %v3438_v17  ;;  %3475 = vmatmul.f32.vlgmr.msrb.gmra.mxu1 %v3438_v17 }
 0xb1d   :  { %3495 = vmatmul.f32.vlgmr.msrb.gmra.mxu2 %v3438_v17  ;;  %3515 = vmatmul.f32.vlgmr.msrb.gmra.mxu3 %v3438_v17 }
 0xb1e   :  { %3608 = vmatpush.msrb.mxu0 %v3591_v4 }
 0xb20   :  { %3609 = vmatpush.msrb.mxu0 %v3590_v57 }
 0xb22   :  { %3610 = vmatpush.msrb.mxu0 %v3589_v27 }
 0xb24   :  { %3611 = vmatpush.msrb.mxu0 %v3588_v15 }
 0xb26   :  { %3612 = vmatpush.msrb.mxu0 %v3587_v52 }
 0xb28   :  { %3613 = vmatpush.msrb.mxu0 %v3586_v26 }
 0xb2a   :  { %3614 = vmatpush.msrb.mxu0 %v3585_v28 }
 0xb2c   :  { %3615 = vmatpush.msrb.mxu0 %v3584_v25 }
 0xb2e   :  { %3616 = vmatpush.msrb.mxu0 %v3583_v43 }
 0xb30   :  { %3617 = vmatpush.msrb.mxu0 %v3582_v12 }
 0xb99   :  { %v3456_v9 = vpop.f32.mrf.mxu0  ;;  %v3476_v62 = vpop.f32.mrf.mxu1 }
 0xb9a   :  { %v3457_v14 = vadd.f32 %v3456_v9, %v3226_v55  ;;  %v3477_v8 = vadd.f32 %v3476_v62, %v3246_v10  ;;  %v3777_v10 = vld [vmem:[%s8427_s7] ss:$0 sm:$0xff]  ;;  %s4755_s7 = smov [#allocation9]  }
 0xb9b   :  { %s3653_s30 = sshll.u32 %s4755_s7, 4  ;;  %s3654_s30 = int_to_ptr.vmem [resolvable:$true] %s3653_s30 }
 0xb9c   :  { %v3751_v5 = vmul.f32 -1.442695, %v3457_v14  ;;  %v3752_v21 = vmul.f32 -1.442695, %v3477_v8 }
 0xb9e   :  { %4018 = vpow2.f32 %v3751_v5 }
 0xb9f   :  { %4020 = vpow2.f32 %v3752_v21 }
 0xba0   :  { %v3496_v22 = vpop.f32.mrf.mxu2  ;;  %v3516_v48 = vpop.f32.mrf.mxu3 }
 0xba1   :  { %v3497_v59 = vadd.f32 %v3496_v22, %v3266_v29  ;;  %v3517_v23 = vadd.f32 %v3516_v48, %v3286_v51 }
 0xba3   :  { %v3753_v16 = vmul.f32 -1.442695, %v3497_v59 }
 0xba4   :  { %v4019_v36 = vpop.eup %4018 }
 0xba5   :  { %v4021_v60 = vpop.eup %4020  ;;  %v3528_v19 = vadd.f32 1.0, %v4019_v36  ;;  %4022 = vpow2.f32 %v3753_v16 }
 0xba6   :  { %v3529_v44 = vadd.f32 1.0, %v4021_v60 }
 0xba7   :  { %4024 = vrcp.f32 %v3528_v19  ;;  %v3542_v40 = vand.u32 2147483648, %v3528_v19  ;;  %v3540_v11 = vand.u32 2147483647, %v3528_v19  ;;  %vm3536_vm15 = vweird.f32 %v3528_v19 }
 0xba8   :  { %4026 = vrcp.f32 %v3529_v44  ;;  %v3557_v61 = vand.u32 2147483648, %v3529_v44  ;;  %v3555_v56 = vand.u32 2147483647, %v3529_v44  ;;  %vm3551_vm0 = vweird.f32 %v3529_v44 }
 0xba9   :  { %v3543_v37 = vor.u32 1.1754944e-38, %v3542_v40  ;;  %vm3541_vm3 = vcmp.eq.f32.partialorder %v3540_v11, 8.507059e+37 }
 0xbaa   :  { %v3558_v18 = vor.u32 1.1754944e-38, %v3557_v61  ;;  %vm3556_vm4 = vcmp.eq.f32.partialorder %v3555_v56, 8.507059e+37 }
 0xbab   :  { %v4023_v33 = vpop.eup %4022 }
 0xbac   :  { %v3530_v30 = vadd.f32 1.0, %v4023_v33 }
 0xbad   :  { %v4025_v45 = vpop.eup %4024 }
 0xbae   :  { %v4027_v34 = vpop.eup %4026  ;;  %v3532_v1 = vmul.f32 %v4025_v45, %v3528_v19  ;;  %4028 = vrcp.f32 %v3530_v30  ;;  %vm3537_vm13 = vweird.f32 %v4025_v45  ;;  %v3572_v53 = vand.u32 2147483648, %v3530_v30 }
 0xbaf   :  { %v3547_v47 = vmul.f32 %v4027_v34, %v3529_v44  ;;  %4030 = vtanh.f32 %v3517_v23  ;;  %vm3552_vm14 = vweird.f32 %v4027_v34  ;;  %vm3538_vm1 = vmor %vm3536_vm15, %vm3537_vm13  ;;  %vm3566_vm6 = vweird.f32 %v3530_v30 }
 0xbb0   :  { %v3533_v3 = vsub.f32 1.0, %v3532_v1  ;;  %vm3553_vm2 = vmor %vm3551_vm0, %vm3552_vm14  ;;  %v3570_v32 = vand.u32 2147483647, %v3530_v30  ;;  %v3573_v4 = vor.u32 1.1754944e-38, %v3572_v53 }
 0xbb1   :  { %v3548_v7 = vsub.f32 1.0, %v3547_v47 }
 0xbb2   :  { %v3534_v35 = vmul.f32 %v4025_v45, %v3533_v3  ;;  %vm3571_vm8 = vcmp.eq.f32.partialorder %v3570_v32, 8.507059e+37 }
 0xbb3   :  { %v3549_v41 = vmul.f32 %v4027_v34, %v3548_v7 }
 0xbb4   :  { %v4029_v0 = vpop.eup %4028  ;;  %v3535_v42 = vadd.f32 %v4025_v45, %v3534_v35 }
 0xbb5   :  { %v3562_v2 = vmul.f32 %v4029_v0, %v3530_v30  ;;  %v3550_v24 = vadd.f32 %v4027_v34, %v3549_v41  ;;  %v4031_v46 = vpop.eup %4030  ;;  %vm3567_vm5 = vweird.f32 %v4029_v0 }
 0xbb6   :  { %v3539_v49 = vsel %vm3538_vm1, %v4025_v45, %v3535_v42  ;;  %vm3568_vm7 = vmor %vm3566_vm6, %vm3567_vm5 }
 0xbb7   :  { %v3563_v31 = vsub.f32 1.0, %v3562_v2  ;;  %v3544_v13 = vsel %vm3541_vm3, %v3543_v37, %v3539_v49  ;;  %v3554_v38 = vsel %vm3553_vm2, %v4027_v34, %v3550_v24 }
 0xbb8   :  { %v3559_v63 = vsel %vm3556_vm4, %v3558_v18, %v3554_v38  ;;  %v3578_v50 = vmul.f32 %v4031_v46, %v3544_v13 }
 0xbb9   :  { %v3564_v17 = vmul.f32 %v4029_v0, %v3563_v31  ;;  %v3577_v20 = vmul.f32 %v3559_v63, %v8270_v54 }
 0xbbb   :  { %v3579_v6 = vadd.f32 %v3578_v50, %v3577_v20  ;;  %v3565_v58 = vadd.f32 %v4029_v0, %v3564_v17 }
 0xbbd   :  { %4032 = vtanh.f32 %v3579_v6  ;;  %v3569_v39 = vsel %vm3568_vm7, %v4029_v0, %v3565_v58 }
 0xbbe   :  { %v3574_v27 = vsel %vm3571_vm8, %v3573_v4, %v3569_v39 }
 0xbc3   :  { %v4033_v57 = vpop.eup %4032 }
 0xbc4   :  { %v3581_v55 = vmul.f32 %v4033_v57, %v3574_v27 }
 0xbc6   :  { %3618 = vmatmul.f32.vlgmr.msrb.gmra.mxu0 %v3581_v55 }
 0xc43   :  { %v3619_v54 = vpop.f32.mrf.mxu0 }
 0xc44   :  { %v3620_v9 = vadd.f32 %v3777_v10, %v3619_v54 }
 0xc46   :  { %v3623_v62 = vsel %vm3622_vm9, %v3620_v9, -inf }
 0xc47   :  { %3624 = vmax.xlane.f32.xlu2 %v3623_v62 }
 0xcba   :  { %v3625_v15 = vpop.xlane.xlu2 %3624 }
 0xcbb   :  { %v3626_v14 = vsub.f32 %v3620_v9, %v3625_v15 }
 0xcbd   :  { %v3627_v8 = vmul.f32 1.442695, %v3626_v14 }
 0xcbf   :  { %4034 = vpow2.f32 %v3627_v8 }
 0xcc5   :  { %v4035_v52 = vpop.eup %4034 }
 0xcc6   :  { %v3629_v5 = vsel %vm3622_vm9, %v4035_v52, 0.0 }
 0xcc7   :  { %3630 = vadd.xlane.f32.xlu0 %v3629_v5 }
 0xd3a   :  { %v3631_v21 = vpop.xlane.xlu0 %3630 }
 0xd3b   :  { %4036 = vrcp.f32 %v3631_v21  ;;  %v3643_v25 = vand.u32 2147483648, %v3631_v21  ;;  %v3641_v59 = vand.u32 2147483647, %v3631_v21  ;;  %vm3637_vm11 = vweird.f32 %v3631_v21 }
 0xd3d   :  { %v3644_v16 = vor.u32 1.1754944e-38, %v3643_v25  ;;  %vm3642_vm13 = vcmp.eq.f32.partialorder %v3641_v59, 8.507059e+37 }
 0xd41   :  { %v4037_v26 = vpop.eup %4036 }
 0xd42   :  { %v3633_v28 = vmul.f32 %v4037_v26, %v3631_v21  ;;  %vm3638_vm10 = vweird.f32 %v4037_v26 }
 0xd43   :  { %vm3639_vm12 = vmor %vm3637_vm11, %vm3638_vm10 }
 0xd44   :  { %v3634_v29 = vsub.f32 1.0, %v3633_v28 }
 0xd46   :  { %v3635_v22 = vmul.f32 %v4037_v26, %v3634_v29 }
 0xd48   :  { %v3636_v43 = vadd.f32 %v4037_v26, %v3635_v22 }
 0xd4a   :  { %v3640_v12 = vsel %vm3639_vm12, %v4037_v26, %v3636_v43 }
 0xd4b   :  { %v3645_v36 = vsel %vm3642_vm13, %v3644_v16, %v3640_v12 }
 0xd4c   :  { %v3646_v60 = vmul.f32 %v4035_v52, %v3645_v36 }
 0xd4e   :  { %3647 = vst.msk [vmem:[#allocation9] sm:$0xff] %vm3622_vm9, %v3646_v60 }
 0xd4f   :  { %3658 = dma.vmem_to_hbm [thread:$0]  %s3654_s30, 128, %s3656_s15, [#allocation5]  }
 0xd50   :  { %4746 = dma.done.wait [#allocation5], 128  }
 0xd51   :  { %4747 = vsyncadd [#allocation5], 4294967168 }
 0xd52   :  { %3663 = vsyncpa [#allocation4], 1 }
 0xd53   :  { %3664 = vsyncpa [#allocation7], 1 }
 0xd54   :  { %3665 = vsyncpa [#allocation5], 1 }

</bundles_post_ra>
